<compile_context>
chip_gen: v7x
topology: tpu7x:2x2x1
jax: 0.10.0
libtpu: 0.0.40
codegen_flags: <defaults>
</compile_context>

<pallas_src>
import math
from functools import partial

import jax
import jax.numpy as jnp
from jax.experimental import pallas as pl
from jax.experimental.pallas import tpu as pltpu


# ------------------------------ Fused kernel --------------------------------

def fused_net_kernel(x_ref, w1_ref, w2_ref, w3_ref, shift_ref,
                     a_ref, fo_ref, o_ref,
                     xp1, xp2, xp3):
    """Forward pass for one batch block of BB samples.

    x_ref   : (BB, H, W, 3)   f32 NHWC input block
    w1/2/3  : (9, Cin, Cout)  f32 conv weights (BN scale folded in), tap-major
    shift   : (3, Cout)       f32 folded BN shifts (conv bias folded in)
    a_ref   : (RO, Hp*Wp, C)  f32 partial Tucker tensor A[d, hw, c]
    fo_ref  : (RO, O)         f32 transposed output factor Fo^T
    o_ref   : (1, BB, O)      f32 log_softmax output block
    xp1/2/3 : zero-haloed padded activation scratches (VMEM, f32)
    """
    f32 = jnp.float32

    BB, H, W, _ = x_ref.shape
    C = w2_ref.shape[2]
    Hp, Wp = H // 2, W // 2
    HW = Hp * Wp
    RO = a_ref.shape[0]
    O = o_ref.shape[2]

    def zero_halo(xp):
        bb, hh, ww, cc = xp.shape
        xp[:, 0:1, :, :] = jnp.zeros((bb, 1, ww, cc), f32)
        xp[:, hh - 1:hh, :, :] = jnp.zeros((bb, 1, ww, cc), f32)
        xp[:, :, 0:1, :] = jnp.zeros((bb, hh, 1, cc), f32)
        xp[:, :, ww - 1:ww, :] = jnp.zeros((bb, hh, 1, cc), f32)

    def conv3x3_relu(xp, w_ref, shift):
        """'same' 3x3 conv as 9 shifted-accumulate MXU matmuls + shift + ReLU."""
        bb, hh, ww, cin = xp.shape
        h, w = hh - 2, ww - 2
        cout = w_ref.shape[2]
        acc = jnp.zeros((bb * h * w, cout), f32)
        for dy in range(3):
            for dx in range(3):
                lhs = xp[:, dy:dy + h, dx:dx + w, :].reshape(bb * h * w, cin)
                acc = acc + jnp.dot(lhs, w_ref[dy * 3 + dx],
                                    preferred_element_type=f32)
        return jnp.maximum(acc + shift, 0.0)                 # (bb*h*w, cout)

    # Only the 1-px halo needs zeroing; interiors are fully overwritten below.
    zero_halo(xp1)
    zero_halo(xp2)
    zero_halo(xp3)

    # ---- conv1 + bn1 + relu -------------------------------------------------
    xp1[:, 1:H + 1, 1:W + 1, :] = x_ref[...]
    y1 = conv3x3_relu(xp1, w1_ref, shift_ref[0:1, :])        # (BB*H*W, C)
    # drop1: nn.Dropout(p=0.3) is the identity at inference.
    # TODO(synk): training-mode stochastic dropout not implemented.

    # ---- conv2 + bn2 + relu -------------------------------------------------
    xp2[:, 1:H + 1, 1:W + 1, :] = y1.reshape(BB, H, W, C)
    y2 = conv3x3_relu(xp2, w2_ref, shift_ref[1:2, :])        # (BB*H*W, C)

    # ---- maxpool 2x2 stride 2 (on values, no scratch) -----------------------
    y2r = y2.reshape(BB * Hp, 2, W, C)                       # rows: h = 2i + p
    hmax = jnp.maximum(y2r[:, 0, :, :], y2r[:, 1, :, :])     # (BB*Hp, W, C)
    wsp = hmax.reshape(BB * Hp, Wp, 2, C)                    # cols: w = 2j + q
    pooled = jnp.maximum(wsp[:, :, 0, :], wsp[:, :, 1, :])   # (BB*Hp, Wp, C)

    # ---- conv3 + bn3 + relu -------------------------------------------------
    xp3[:, 1:Hp + 1, 1:Wp + 1, :] = pooled.reshape(BB, Hp, Wp, C)
    y3 = conv3x3_relu(xp3, w3_ref, shift_ref[2:3, :])        # (BB*HW, C)

    # ---- TRL head (Tucker-factored) + log_softmax ---------------------------
    # logits[b,o] = sum_d Fo[o,d] * sum_{hw,c} y3[b,hw,c] * A[d,hw,c]
    # (the scalar TRL bias is a no-op under log_softmax and is dropped)
    y3r = y3.reshape(BB, HW, C)
    logits = jnp.zeros((BB, O), f32)
    for d in range(RO):
        prod = y3r * a_ref[d]                                # (BB, HW, C)
        td = jnp.sum(jnp.sum(prod, axis=-1), axis=-1, keepdims=True)  # (BB, 1)
        logits = logits + td * fo_ref[d:d + 1, :]            # (BB, O)

    m = jnp.max(logits, axis=-1, keepdims=True)
    lse = jnp.log(jnp.sum(jnp.exp(logits - m), axis=-1, keepdims=True)) + m
    o_ref[0] = logits - lse


# ------------------------------- Wrappers ------------------------------------

def prepare_params(p):
    """One-time folding, hoisted out of the jitted forward:
    - conv weights -> (9, Cin, Cout) with BN scale folded in,
    - BN shifts stacked (conv bias already folded in),
    - Tucker core/factors partially contracted into A[d, hw, c] and Fo^T."""
    q = {}
    for i, name in ((1, 'w1'), (2, 'w2'), (3, 'w3')):
        w = p[name] * p[f'scale{i}']                       # fold BN scale per Cout
        q[name] = w.reshape(9, w.shape[2], w.shape[3]).astype(jnp.float32)
    q['shift'] = jnp.stack([p['shift1'], p['shift2'],
                            p['shift3']]).astype(jnp.float32)      # (3, C)
    core = p['core']
    Fc, Fh, Fw, Fo = p['factors']
    # A[d,h,w,c] = sum_{a,b,g} core[a,b,g,d] Fc[c,a] Fh[h,b] Fw[w,g]
    A = jnp.einsum('abgd,ca,hb,wg->dhwc', core, Fc, Fh, Fw,
                   precision=jax.lax.Precision.HIGHEST)
    RO = core.shape[3]
    q['A'] = A.reshape(RO, -1, Fc.shape[0]).astype(jnp.float32)    # (RO, Hp*Wp, C)
    q['FoT'] = jnp.transpose(Fo).astype(jnp.float32)               # (RO, O)
    # scalar TRL bias dropped: constant shift of all logits cancels in log_softmax
    return q


@partial(jax.jit, static_argnames=('block_b',))
def net_forward(x_nchw, q, block_b=8):
    x = jnp.transpose(x_nchw, (0, 2, 3, 1)).astype(jnp.float32)    # NCHW -> NHWC
    B, H, W, Cin = x.shape
    C = q['w2'].shape[2]
    RO, O = q['FoT'].shape
    Hp, Wp = H // 2, W // 2

    BB = math.gcd(B, block_b)          # samples per grid step (divides B)

    full = lambda a: pl.BlockSpec(a.shape, lambda b: (0,) * a.ndim)

    grid_spec = pltpu.PrefetchScalarGridSpec(
        num_scalar_prefetch=0,
        grid=(B // BB,),
        in_specs=[
            pl.BlockSpec((BB, H, W, Cin), lambda b: (b, 0, 0, 0)),  # input block
            full(q['w1']), full(q['w2']), full(q['w3']),
            full(q['shift']), full(q['A']), full(q['FoT']),
        ],
        out_specs=pl.BlockSpec((1, BB, O), lambda b: (b, 0, 0)),
        scratch_shapes=[
            pltpu.VMEM((BB, H + 2, W + 2, Cin), jnp.float32),   # xp1 padded input
            pltpu.VMEM((BB, H + 2, W + 2, C), jnp.float32),     # xp2 padded act1
            pltpu.VMEM((BB, Hp + 2, Wp + 2, C), jnp.float32),   # xp3 padded pooled
        ],
    )

    out = pl.pallas_call(
        fused_net_kernel,
        out_shape=jax.ShapeDtypeStruct((B // BB, BB, O), jnp.float32),
        grid_spec=grid_spec,
        compiler_params=pltpu.CompilerParams(
            dimension_semantics=("parallel",)),   # batch blocks across TensorCores
    )(x, q['w1'], q['w2'], q['w3'], q['shift'], q['A'], q['FoT'])
    return out.reshape(B, O)


# --------------------------- Params & reference ------------------------------

def init_params(key, pooled_hw):
    ks = jax.random.split(key, 11)
    u = lambda k, shape, s: jax.random.uniform(k, shape, jnp.float32, -s, s)
    eps = 1e-5
    p = {}
    p['w1'] = u(ks[0], (3, 3, 3, 64), 0.30)      # HWIO
    p['w2'] = u(ks[1], (3, 3, 64, 64), 0.08)
    p['w3'] = u(ks[2], (3, 3, 64, 64), 0.08)
    conv_biases = [u(ks[3], (64,), 0.05), u(ks[4], (64,), 0.05),
                   u(ks[5], (64,), 0.05)]
    gamma = jnp.ones((64,), jnp.float32)
    beta = jnp.zeros((64,), jnp.float32)
    mean = jnp.zeros((64,), jnp.float32)
    var = jnp.ones((64,), jnp.float32)
    for i, b in enumerate(conv_biases, start=1):
        scale = gamma / jnp.sqrt(var + eps)
        p[f'scale{i}'] = scale                      # BN scale
        p[f'shift{i}'] = beta + (b - mean) * scale  # BN shift w/ conv bias folded
    Hp, Wp = pooled_hw
    ranks = (30, 10, 10, 10)
    n_out = 130
    p['core'] = u(ks[6], ranks, 0.2)
    p['factors'] = [u(ks[7], (64, ranks[0]), 0.2),
                    u(ks[8], (Hp, ranks[1]), 0.2),
                    u(ks[9], (Wp, ranks[2]), 0.2),
                    u(ks[10], (n_out, ranks[3]), 0.2)]
    p['trl_bias'] = jnp.zeros((1,), jnp.float32)
    return p


def reference_forward(x_nchw, p):
    """Pure-JAX f32 reference of the same forward pass (correctness check)."""
    x = jnp.transpose(x_nchw, (0, 2, 3, 1))

    def conv_block(x, w, scale, shift):
        y = jax.lax.conv_general_dilated(
            x, w, window_strides=(1, 1), padding='SAME',
            dimension_numbers=('NHWC', 'HWIO', 'NHWC'),
            precision=jax.lax.Precision.HIGHEST)
        return jnp.maximum(y * scale + shift, 0.0)

    x = conv_block(x, p['w1'], p['scale1'], p['shift1'])
    x = conv_block(x, p['w2'], p['scale2'], p['shift2'])
    N, H, W, C = x.shape
    x = x.reshape(N, H // 2, 2, W // 2, 2, C).max(axis=(2, 4))
    x = conv_block(x, p['w3'], p['scale3'], p['shift3'])
    wt = jnp.einsum('abcd,ia,jb,kc,ld->ijkl', p['core'], *p['factors'],
                    precision=jax.lax.Precision.HIGHEST)
    logits = jnp.einsum('nhwc,chwo->no', x, wt,
                        precision=jax.lax.Precision.HIGHEST) + p['trl_bias'][0]
    return jax.nn.log_softmax(logits, axis=1)


# ---------------------------------- Main --------------------------------------

if __name__ == "__main__":
    key = jax.random.PRNGKey(0)
    k_x, k_p = jax.random.split(key)

    # small NCHW input consistent with the module (3 input channels, 3x3 convs)
    B, Cin, Himg, Wimg = 2, 3, 16, 16
    x = jax.random.uniform(k_x, (B, Cin, Himg, Wimg), jnp.float32)
    params = init_params(k_p, pooled_hw=(Himg // 2, Wimg // 2))
    q = prepare_params(params)   # one-time weight folding (BN + Tucker partials)

    out = jax.block_until_ready(net_forward(x, q))

    assert out.shape == (B, 130), out.shape
    assert bool(jnp.all(jnp.isfinite(out)))
    # rows of log_softmax must logsumexp to ~0
    row_lse = jax.scipy.special.logsumexp(out, axis=1)
    assert bool(jnp.max(jnp.abs(row_lse)) < 1e-3)
    # compare against pure-JAX f32 reference (tolerance covers MXU precision)
    ref = reference_forward(x, params)
    err = float(jnp.max(jnp.abs(out - ref)))
    assert err < 1e-1, err

    print("KERNEL_OK")
</pallas_src>

<mosaic_0001>
module attributes {stable_mosaic.version = 11 : i64} {
  func.func @fused_net_kernel(%arg0: i32, %arg1: memref<2x16x16x3xf32, #tpu.memory_space<vmem>>, %arg2: memref<9x3x64xf32, #tpu.memory_space<vmem>>, %arg3: memref<9x64x64xf32, #tpu.memory_space<vmem>>, %arg4: memref<9x64x64xf32, #tpu.memory_space<vmem>>, %arg5: memref<3x64xf32, #tpu.memory_space<vmem>>, %arg6: memref<10x64x64xf32, #tpu.memory_space<vmem>>, %arg7: memref<10x130xf32, #tpu.memory_space<vmem>>, %arg8: memref<1x2x130xf32, #tpu.memory_space<vmem>>, %arg9: memref<2x18x18x3xf32, #tpu.memory_space<vmem>>, %arg10: memref<2x18x18x64xf32, #tpu.memory_space<vmem>>, %arg11: memref<2x10x10x64xf32, #tpu.memory_space<vmem>>) attributes {dimension_semantics = [#tpu.dimension_semantics<parallel>], iteration_bounds = array<i64: 1>, scalar_prefetch = 0 : i64, scratch_operands = 3 : i64, tpu.core_type = #tpu.core_type<tc>, window_params = [{transform_indices = @transform_0, window_bounds = array<i64: 2, 16, 16, 3>}, {pipeline_mode = #tpu.pipeline_mode<synchronous>, transform_indices = @transform_1, window_bounds = array<i64: 9, 3, 64>}, {pipeline_mode = #tpu.pipeline_mode<synchronous>, transform_indices = @transform_2, window_bounds = array<i64: 9, 64, 64>}, {pipeline_mode = #tpu.pipeline_mode<synchronous>, transform_indices = @transform_3, window_bounds = array<i64: 9, 64, 64>}, {pipeline_mode = #tpu.pipeline_mode<synchronous>, transform_indices = @transform_4, window_bounds = array<i64: 3, 64>}, {pipeline_mode = #tpu.pipeline_mode<synchronous>, transform_indices = @transform_5, window_bounds = array<i64: 10, 64, 64>}, {pipeline_mode = #tpu.pipeline_mode<synchronous>, transform_indices = @transform_6, window_bounds = array<i64: 10, 130>}, {transform_indices = @transform_7, window_bounds = array<i64: 1, 2, 130>}]} {
    %cst = arith.constant 0.000000e+00 : f32
    %0 = vector.broadcast %cst : f32 to vector<2x1x18x3xf32>
    %c0 = arith.constant 0 : index
    %c0_0 = arith.constant 0 : index
    %c0_1 = arith.constant 0 : index
    %c0_2 = arith.constant 0 : index
    %1 = vector.load %arg9[%c0, %c0_0, %c0_1, %c0_2] : memref<2x18x18x3xf32, #tpu.memory_space<vmem>>, vector<2x1x18x3xf32>
    tpu.vector_store %arg9[%c0, %c0_0, %c0_1, %c0_2], %0 {strides = array<i32>} : memref<2x18x18x3xf32, #tpu.memory_space<vmem>>, vector<2x1x18x3xf32>,
    %cst_3 = arith.constant 0.000000e+00 : f32
    %2 = vector.broadcast %cst_3 : f32 to vector<2x1x18x3xf32>
    %c0_4 = arith.constant 0 : index
    %c17 = arith.constant 17 : index
    %c0_5 = arith.constant 0 : index
    %c0_6 = arith.constant 0 : index
    %3 = vector.load %arg9[%c0_4, %c17, %c0_5, %c0_6] : memref<2x18x18x3xf32, #tpu.memory_space<vmem>>, vector<2x1x18x3xf32>
    tpu.vector_store %arg9[%c0_4, %c17, %c0_5, %c0_6], %2 {strides = array<i32>} : memref<2x18x18x3xf32, #tpu.memory_space<vmem>>, vector<2x1x18x3xf32>,
    %cst_7 = arith.constant 0.000000e+00 : f32
    %4 = vector.broadcast %cst_7 : f32 to vector<2x18x1x3xf32>
    %c0_8 = arith.constant 0 : index
    %c0_9 = arith.constant 0 : index
    %c0_10 = arith.constant 0 : index
    %c0_11 = arith.constant 0 : index
    %5 = vector.load %arg9[%c0_8, %c0_9, %c0_10, %c0_11] : memref<2x18x18x3xf32, #tpu.memory_space<vmem>>, vector<2x18x1x3xf32>
    tpu.vector_store %arg9[%c0_8, %c0_9, %c0_10, %c0_11], %4 {strides = array<i32>} : memref<2x18x18x3xf32, #tpu.memory_space<vmem>>, vector<2x18x1x3xf32>,
    %cst_12 = arith.constant 0.000000e+00 : f32
    %6 = vector.broadcast %cst_12 : f32 to vector<2x18x1x3xf32>
    %c0_13 = arith.constant 0 : index
    %c0_14 = arith.constant 0 : index
    %c17_15 = arith.constant 17 : index
    %c0_16 = arith.constant 0 : index
    %7 = vector.load %arg9[%c0_13, %c0_14, %c17_15, %c0_16] : memref<2x18x18x3xf32, #tpu.memory_space<vmem>>, vector<2x18x1x3xf32>
    tpu.vector_store %arg9[%c0_13, %c0_14, %c17_15, %c0_16], %6 {strides = array<i32>} : memref<2x18x18x3xf32, #tpu.memory_space<vmem>>, vector<2x18x1x3xf32>,
    %cst_17 = arith.constant 0.000000e+00 : f32
    %8 = vector.broadcast %cst_17 : f32 to vector<2x1x18x64xf32>
    %c0_18 = arith.constant 0 : index
    %c0_19 = arith.constant 0 : index
    %c0_20 = arith.constant 0 : index
    %c0_21 = arith.constant 0 : index
    %9 = vector.load %arg10[%c0_18, %c0_19, %c0_20, %c0_21] : memref<2x18x18x64xf32, #tpu.memory_space<vmem>>, vector<2x1x18x64xf32>
    tpu.vector_store %arg10[%c0_18, %c0_19, %c0_20, %c0_21], %8 {strides = array<i32>} : memref<2x18x18x64xf32, #tpu.memory_space<vmem>>, vector<2x1x18x64xf32>,
    %cst_22 = arith.constant 0.000000e+00 : f32
    %10 = vector.broadcast %cst_22 : f32 to vector<2x1x18x64xf32>
    %c0_23 = arith.constant 0 : index
    %c17_24 = arith.constant 17 : index
    %c0_25 = arith.constant 0 : index
    %c0_26 = arith.constant 0 : index
    %11 = vector.load %arg10[%c0_23, %c17_24, %c0_25, %c0_26] : memref<2x18x18x64xf32, #tpu.memory_space<vmem>>, vector<2x1x18x64xf32>
    tpu.vector_store %arg10[%c0_23, %c17_24, %c0_25, %c0_26], %10 {strides = array<i32>} : memref<2x18x18x64xf32, #tpu.memory_space<vmem>>, vector<2x1x18x64xf32>,
    %cst_27 = arith.constant 0.000000e+00 : f32
    %12 = vector.broadcast %cst_27 : f32 to vector<2x18x1x64xf32>
    %c0_28 = arith.constant 0 : index
    %c0_29 = arith.constant 0 : index
    %c0_30 = arith.constant 0 : index
    %c0_31 = arith.constant 0 : index
    %13 = vector.load %arg10[%c0_28, %c0_29, %c0_30, %c0_31] : memref<2x18x18x64xf32, #tpu.memory_space<vmem>>, vector<2x18x1x64xf32>
    tpu.vector_store %arg10[%c0_28, %c0_29, %c0_30, %c0_31], %12 {strides = array<i32>} : memref<2x18x18x64xf32, #tpu.memory_space<vmem>>, vector<2x18x1x64xf32>,
    %cst_32 = arith.constant 0.000000e+00 : f32
    %14 = vector.broadcast %cst_32 : f32 to vector<2x18x1x64xf32>
    %c0_33 = arith.constant 0 : index
    %c0_34 = arith.constant 0 : index
    %c17_35 = arith.constant 17 : index
    %c0_36 = arith.constant 0 : index
    %15 = vector.load %arg10[%c0_33, %c0_34, %c17_35, %c0_36] : memref<2x18x18x64xf32, #tpu.memory_space<vmem>>, vector<2x18x1x64xf32>
    tpu.vector_store %arg10[%c0_33, %c0_34, %c17_35, %c0_36], %14 {strides = array<i32>} : memref<2x18x18x64xf32, #tpu.memory_space<vmem>>, vector<2x18x1x64xf32>,
    %cst_37 = arith.constant 0.000000e+00 : f32
    %16 = vector.broadcast %cst_37 : f32 to vector<2x1x10x64xf32>
    %c0_38 = arith.constant 0 : index
    %c0_39 = arith.constant 0 : index
    %c0_40 = arith.constant 0 : index
    %c0_41 = arith.constant 0 : index
    %17 = vector.load %arg11[%c0_38, %c0_39, %c0_40, %c0_41] : memref<2x10x10x64xf32, #tpu.memory_space<vmem>>, vector<2x1x10x64xf32>
    tpu.vector_store %arg11[%c0_38, %c0_39, %c0_40, %c0_41], %16 {strides = array<i32>} : memref<2x10x10x64xf32, #tpu.memory_space<vmem>>, vector<2x1x10x64xf32>,
    %cst_42 = arith.constant 0.000000e+00 : f32
    %18 = vector.broadcast %cst_42 : f32 to vector<2x1x10x64xf32>
    %c0_43 = arith.constant 0 : index
    %c9 = arith.constant 9 : index
    %c0_44 = arith.constant 0 : index
    %c0_45 = arith.constant 0 : index
    %19 = vector.load %arg11[%c0_43, %c9, %c0_44, %c0_45] : memref<2x10x10x64xf32, #tpu.memory_space<vmem>>, vector<2x1x10x64xf32>
    tpu.vector_store %arg11[%c0_43, %c9, %c0_44, %c0_45], %18 {strides = array<i32>} : memref<2x10x10x64xf32, #tpu.memory_space<vmem>>, vector<2x1x10x64xf32>,
    %cst_46 = arith.constant 0.000000e+00 : f32
    %20 = vector.broadcast %cst_46 : f32 to vector<2x10x1x64xf32>
    %c0_47 = arith.constant 0 : index
    %c0_48 = arith.constant 0 : index
    %c0_49 = arith.constant 0 : index
    %c0_50 = arith.constant 0 : index
    %21 = vector.load %arg11[%c0_47, %c0_48, %c0_49, %c0_50] : memref<2x10x10x64xf32, #tpu.memory_space<vmem>>, vector<2x10x1x64xf32>
    tpu.vector_store %arg11[%c0_47, %c0_48, %c0_49, %c0_50], %20 {strides = array<i32>} : memref<2x10x10x64xf32, #tpu.memory_space<vmem>>, vector<2x10x1x64xf32>,
    %cst_51 = arith.constant 0.000000e+00 : f32
    %22 = vector.broadcast %cst_51 : f32 to vector<2x10x1x64xf32>
    %c0_52 = arith.constant 0 : index
    %c0_53 = arith.constant 0 : index
    %c9_54 = arith.constant 9 : index
    %c0_55 = arith.constant 0 : index
    %23 = vector.load %arg11[%c0_52, %c0_53, %c9_54, %c0_55] : memref<2x10x10x64xf32, #tpu.memory_space<vmem>>, vector<2x10x1x64xf32>
    tpu.vector_store %arg11[%c0_52, %c0_53, %c9_54, %c0_55], %22 {strides = array<i32>} : memref<2x10x10x64xf32, #tpu.memory_space<vmem>>, vector<2x10x1x64xf32>,
    %c0_56 = arith.constant 0 : index
    %c0_57 = arith.constant 0 : index
    %c0_58 = arith.constant 0 : index
    %c0_59 = arith.constant 0 : index
    %24 = vector.load %arg1[%c0_56, %c0_57, %c0_58, %c0_59] : memref<2x16x16x3xf32, #tpu.memory_space<vmem>>, vector<2x16x16x3xf32>
    %c0_60 = arith.constant 0 : index
    %c1 = arith.constant 1 : index
    %c1_61 = arith.constant 1 : index
    %c0_62 = arith.constant 0 : index
    %25 = vector.load %arg9[%c0_60, %c1, %c1_61, %c0_62] : memref<2x18x18x3xf32, #tpu.memory_space<vmem>>, vector<2x16x16x3xf32>
    tpu.vector_store %arg9[%c0_60, %c1, %c1_61, %c0_62], %24 {strides = array<i32>} : memref<2x18x18x3xf32, #tpu.memory_space<vmem>>, vector<2x16x16x3xf32>,
    %c0_63 = arith.constant 0 : index
    %c0_64 = arith.constant 0 : index
    %26 = vector.load %arg5[%c0_63, %c0_64] : memref<3x64xf32, #tpu.memory_space<vmem>>, vector<1x64xf32>
    %cst_65 = arith.constant 0.000000e+00 : f32
    %27 = vector.broadcast %cst_65 : f32 to vector<512x64xf32>
    %c0_66 = arith.constant 0 : index
    %c0_67 = arith.constant 0 : index
    %c0_68 = arith.constant 0 : index
    %c0_69 = arith.constant 0 : index
    %28 = vector.load %arg9[%c0_66, %c0_67, %c0_68, %c0_69] : memref<2x18x18x3xf32, #tpu.memory_space<vmem>>, vector<2x16x16x3xf32>
    %29 = vector.shape_cast %28 : vector<2x16x16x3xf32> to vector<512x3xf32>
    %c0_70 = arith.constant 0 : index
    %c0_71 = arith.constant 0 : index
    %c0_72 = arith.constant 0 : index
    %30 = vector.load %arg2[%c0_70, %c0_71, %c0_72] : memref<9x3x64xf32, #tpu.memory_space<vmem>>, vector<1x3x64xf32>
    %31 = vector.shape_cast %30 : vector<1x3x64xf32> to vector<3x64xf32>
    %cst_73 = arith.constant dense<0.000000e+00> : vector<512x64xf32>
    %32 = tpu.matmul %29, %31, %cst_73 {dimension_numbers = #tpu.dot_dimension_numbers<[1], [0], [0], [1], [0, 0, 1, 1], [], []>} : vector<512x3xf32>, vector<3x64xf32>, vector<512x64xf32> -> vector<512x64xf32>
    %33 = arith.addf %27, %32 : vector<512x64xf32>
    %c0_74 = arith.constant 0 : index
    %c0_75 = arith.constant 0 : index
    %c1_76 = arith.constant 1 : index
    %c0_77 = arith.constant 0 : index
    %34 = vector.load %arg9[%c0_74, %c0_75, %c1_76, %c0_77] : memref<2x18x18x3xf32, #tpu.memory_space<vmem>>, vector<2x16x16x3xf32>
    %35 = vector.shape_cast %34 : vector<2x16x16x3xf32> to vector<512x3xf32>
    %c1_78 = arith.constant 1 : index
    %c0_79 = arith.constant 0 : index
    %c0_80 = arith.constant 0 : index
    %36 = vector.load %arg2[%c1_78, %c0_79, %c0_80] : memref<9x3x64xf32, #tpu.memory_space<vmem>>, vector<1x3x64xf32>
    %37 = vector.shape_cast %36 : vector<1x3x64xf32> to vector<3x64xf32>
    %cst_81 = arith.constant dense<0.000000e+00> : vector<512x64xf32>
    %38 = tpu.matmul %35, %37, %cst_81 {dimension_numbers = #tpu.dot_dimension_numbers<[1], [0], [0], [1], [0, 0, 1, 1], [], []>} : vector<512x3xf32>, vector<3x64xf32>, vector<512x64xf32> -> vector<512x64xf32>
    %39 = arith.addf %33, %38 : vector<512x64xf32>
    %c0_82 = arith.constant 0 : index
    %c0_83 = arith.constant 0 : index
    %c2 = arith.constant 2 : index
    %c0_84 = arith.constant 0 : index
    %40 = vector.load %arg9[%c0_82, %c0_83, %c2, %c0_84] : memref<2x18x18x3xf32, #tpu.memory_space<vmem>>, vector<2x16x16x3xf32>
    %41 = vector.shape_cast %40 : vector<2x16x16x3xf32> to vector<512x3xf32>
    %c2_85 = arith.constant 2 : index
    %c0_86 = arith.constant 0 : index
    %c0_87 = arith.constant 0 : index
    %42 = vector.load %arg2[%c2_85, %c0_86, %c0_87] : memref<9x3x64xf32, #tpu.memory_space<vmem>>, vector<1x3x64xf32>
    %43 = vector.shape_cast %42 : vector<1x3x64xf32> to vector<3x64xf32>
    %cst_88 = arith.constant dense<0.000000e+00> : vector<512x64xf32>
    %44 = tpu.matmul %41, %43, %cst_88 {dimension_numbers = #tpu.dot_dimension_numbers<[1], [0], [0], [1], [0, 0, 1, 1], [], []>} : vector<512x3xf32>, vector<3x64xf32>, vector<512x64xf32> -> vector<512x64xf32>
    %45 = arith.addf %39, %44 : vector<512x64xf32>
    %c0_89 = arith.constant 0 : index
    %c1_90 = arith.constant 1 : index
    %c0_91 = arith.constant 0 : index
    %c0_92 = arith.constant 0 : index
    %46 = vector.load %arg9[%c0_89, %c1_90, %c0_91, %c0_92] : memref<2x18x18x3xf32, #tpu.memory_space<vmem>>, vector<2x16x16x3xf32>
    %47 = vector.shape_cast %46 : vector<2x16x16x3xf32> to vector<512x3xf32>
    %c3 = arith.constant 3 : index
    %c0_93 = arith.constant 0 : index
    %c0_94 = arith.constant 0 : index
    %48 = vector.load %arg2[%c3, %c0_93, %c0_94] : memref<9x3x64xf32, #tpu.memory_space<vmem>>, vector<1x3x64xf32>
    %49 = vector.shape_cast %48 : vector<1x3x64xf32> to vector<3x64xf32>
    %cst_95 = arith.constant dense<0.000000e+00> : vector<512x64xf32>
    %50 = tpu.matmul %47, %49, %cst_95 {dimension_numbers = #tpu.dot_dimension_numbers<[1], [0], [0], [1], [0, 0, 1, 1], [], []>} : vector<512x3xf32>, vector<3x64xf32>, vector<512x64xf32> -> vector<512x64xf32>
    %51 = arith.addf %45, %50 : vector<512x64xf32>
    %c0_96 = arith.constant 0 : index
    %c1_97 = arith.constant 1 : index
    %c1_98 = arith.constant 1 : index
    %c0_99 = arith.constant 0 : index
    %52 = vector.load %arg9[%c0_96, %c1_97, %c1_98, %c0_99] : memref<2x18x18x3xf32, #tpu.memory_space<vmem>>, vector<2x16x16x3xf32>
    %53 = vector.shape_cast %52 : vector<2x16x16x3xf32> to vector<512x3xf32>
    %c4 = arith.constant 4 : index
    %c0_100 = arith.constant 0 : index
    %c0_101 = arith.constant 0 : index
    %54 = vector.load %arg2[%c4, %c0_100, %c0_101] : memref<9x3x64xf32, #tpu.memory_space<vmem>>, vector<1x3x64xf32>
    %55 = vector.shape_cast %54 : vector<1x3x64xf32> to vector<3x64xf32>
    %cst_102 = arith.constant dense<0.000000e+00> : vector<512x64xf32>
    %56 = tpu.matmul %53, %55, %cst_102 {dimension_numbers = #tpu.dot_dimension_numbers<[1], [0], [0], [1], [0, 0, 1, 1], [], []>} : vector<512x3xf32>, vector<3x64xf32>, vector<512x64xf32> -> vector<512x64xf32>
    %57 = arith.addf %51, %56 : vector<512x64xf32>
    %c0_103 = arith.constant 0 : index
    %c1_104 = arith.constant 1 : index
    %c2_105 = arith.constant 2 : index
    %c0_106 = arith.constant 0 : index
    %58 = vector.load %arg9[%c0_103, %c1_104, %c2_105, %c0_106] : memref<2x18x18x3xf32, #tpu.memory_space<vmem>>, vector<2x16x16x3xf32>
    %59 = vector.shape_cast %58 : vector<2x16x16x3xf32> to vector<512x3xf32>
    %c5 = arith.constant 5 : index
    %c0_107 = arith.constant 0 : index
    %c0_108 = arith.constant 0 : index
    %60 = vector.load %arg2[%c5, %c0_107, %c0_108] : memref<9x3x64xf32, #tpu.memory_space<vmem>>, vector<1x3x64xf32>
    %61 = vector.shape_cast %60 : vector<1x3x64xf32> to vector<3x64xf32>
    %cst_109 = arith.constant dense<0.000000e+00> : vector<512x64xf32>
    %62 = tpu.matmul %59, %61, %cst_109 {dimension_numbers = #tpu.dot_dimension_numbers<[1], [0], [0], [1], [0, 0, 1, 1], [], []>} : vector<512x3xf32>, vector<3x64xf32>, vector<512x64xf32> -> vector<512x64xf32>
    %63 = arith.addf %57, %62 : vector<512x64xf32>
    %c0_110 = arith.constant 0 : index
    %c2_111 = arith.constant 2 : index
    %c0_112 = arith.constant 0 : index
    %c0_113 = arith.constant 0 : index
    %64 = vector.load %arg9[%c0_110, %c2_111, %c0_112, %c0_113] : memref<2x18x18x3xf32, #tpu.memory_space<vmem>>, vector<2x16x16x3xf32>
    %65 = vector.shape_cast %64 : vector<2x16x16x3xf32> to vector<512x3xf32>
    %c6 = arith.constant 6 : index
    %c0_114 = arith.constant 0 : index
    %c0_115 = arith.constant 0 : index
    %66 = vector.load %arg2[%c6, %c0_114, %c0_115] : memref<9x3x64xf32, #tpu.memory_space<vmem>>, vector<1x3x64xf32>
    %67 = vector.shape_cast %66 : vector<1x3x64xf32> to vector<3x64xf32>
    %cst_116 = arith.constant dense<0.000000e+00> : vector<512x64xf32>
    %68 = tpu.matmul %65, %67, %cst_116 {dimension_numbers = #tpu.dot_dimension_numbers<[1], [0], [0], [1], [0, 0, 1, 1], [], []>} : vector<512x3xf32>, vector<3x64xf32>, vector<512x64xf32> -> vector<512x64xf32>
    %69 = arith.addf %63, %68 : vector<512x64xf32>
    %c0_117 = arith.constant 0 : index
    %c2_118 = arith.constant 2 : index
    %c1_119 = arith.constant 1 : index
    %c0_120 = arith.constant 0 : index
    %70 = vector.load %arg9[%c0_117, %c2_118, %c1_119, %c0_120] : memref<2x18x18x3xf32, #tpu.memory_space<vmem>>, vector<2x16x16x3xf32>
    %71 = vector.shape_cast %70 : vector<2x16x16x3xf32> to vector<512x3xf32>
    %c7 = arith.constant 7 : index
    %c0_121 = arith.constant 0 : index
    %c0_122 = arith.constant 0 : index
    %72 = vector.load %arg2[%c7, %c0_121, %c0_122] : memref<9x3x64xf32, #tpu.memory_space<vmem>>, vector<1x3x64xf32>
    %73 = vector.shape_cast %72 : vector<1x3x64xf32> to vector<3x64xf32>
    %cst_123 = arith.constant dense<0.000000e+00> : vector<512x64xf32>
    %74 = tpu.matmul %71, %73, %cst_123 {dimension_numbers = #tpu.dot_dimension_numbers<[1], [0], [0], [1], [0, 0, 1, 1], [], []>} : vector<512x3xf32>, vector<3x64xf32>, vector<512x64xf32> -> vector<512x64xf32>
    %75 = arith.addf %69, %74 : vector<512x64xf32>
    %c0_124 = arith.constant 0 : index
    %c2_125 = arith.constant 2 : index
    %c2_126 = arith.constant 2 : index
    %c0_127 = arith.constant 0 : index
    %76 = vector.load %arg9[%c0_124, %c2_125, %c2_126, %c0_127] : memref<2x18x18x3xf32, #tpu.memory_space<vmem>>, vector<2x16x16x3xf32>
    %77 = vector.shape_cast %76 : vector<2x16x16x3xf32> to vector<512x3xf32>
    %c8 = arith.constant 8 : index
    %c0_128 = arith.constant 0 : index
    %c0_129 = arith.constant 0 : index
    %78 = vector.load %arg2[%c8, %c0_128, %c0_129] : memref<9x3x64xf32, #tpu.memory_space<vmem>>, vector<1x3x64xf32>
    %79 = vector.shape_cast %78 : vector<1x3x64xf32> to vector<3x64xf32>
    %cst_130 = arith.constant dense<0.000000e+00> : vector<512x64xf32>
    %80 = tpu.matmul %77, %79, %cst_130 {dimension_numbers = #tpu.dot_dimension_numbers<[1], [0], [0], [1], [0, 0, 1, 1], [], []>} : vector<512x3xf32>, vector<3x64xf32>, vector<512x64xf32> -> vector<512x64xf32>
    %81 = arith.addf %75, %80 : vector<512x64xf32>
    %82 = vector.broadcast %26 : vector<1x64xf32> to vector<512x64xf32>
    %83 = arith.addf %81, %82 : vector<512x64xf32>
    %cst_131 = arith.constant 0.000000e+00 : f32
    %84 = vector.broadcast %cst_131 : f32 to vector<512x64xf32>
    %85 = arith.maximumf %83, %84 : vector<512x64xf32>
    %86 = vector.shape_cast %85 : vector<512x64xf32> to vector<2x16x16x64xf32>
    %c0_132 = arith.constant 0 : index
    %c1_133 = arith.constant 1 : index
    %c1_134 = arith.constant 1 : index
    %c0_135 = arith.constant 0 : index
    %87 = vector.load %arg10[%c0_132, %c1_133, %c1_134, %c0_135] : memref<2x18x18x64xf32, #tpu.memory_space<vmem>>, vector<2x16x16x64xf32>
    tpu.vector_store %arg10[%c0_132, %c1_133, %c1_134, %c0_135], %86 {strides = array<i32>} : memref<2x18x18x64xf32, #tpu.memory_space<vmem>>, vector<2x16x16x64xf32>,
    %c1_136 = arith.constant 1 : index
    %c0_137 = arith.constant 0 : index
    %88 = vector.load %arg5[%c1_136, %c0_137] : memref<3x64xf32, #tpu.memory_space<vmem>>, vector<1x64xf32>
    %cst_138 = arith.constant 0.000000e+00 : f32
    %89 = vector.broadcast %cst_138 : f32 to vector<512x64xf32>
    %c0_139 = arith.constant 0 : index
    %c0_140 = arith.constant 0 : index
    %c0_141 = arith.constant 0 : index
    %c0_142 = arith.constant 0 : index
    %90 = vector.load %arg10[%c0_139, %c0_140, %c0_141, %c0_142] : memref<2x18x18x64xf32, #tpu.memory_space<vmem>>, vector<2x16x16x64xf32>
    %91 = vector.shape_cast %90 : vector<2x16x16x64xf32> to vector<512x64xf32>
    %c0_143 = arith.constant 0 : index
    %c0_144 = arith.constant 0 : index
    %c0_145 = arith.constant 0 : index
    %92 = vector.load %arg3[%c0_143, %c0_144, %c0_145] : memref<9x64x64xf32, #tpu.memory_space<vmem>>, vector<1x64x64xf32>
    %93 = vector.shape_cast %92 : vector<1x64x64xf32> to vector<64x64xf32>
    %cst_146 = arith.constant dense<0.000000e+00> : vector<512x64xf32>
    %94 = tpu.matmul %91, %93, %cst_146 {dimension_numbers = #tpu.dot_dimension_numbers<[1], [0], [0], [1], [0, 0, 1, 1], [], []>} : vector<512x64xf32>, vector<64x64xf32>, vector<512x64xf32> -> vector<512x64xf32>
    %95 = arith.addf %89, %94 : vector<512x64xf32>
    %c0_147 = arith.constant 0 : index
    %c0_148 = arith.constant 0 : index
    %c1_149 = arith.constant 1 : index
    %c0_150 = arith.constant 0 : index
    %96 = vector.load %arg10[%c0_147, %c0_148, %c1_149, %c0_150] : memref<2x18x18x64xf32, #tpu.memory_space<vmem>>, vector<2x16x16x64xf32>
    %97 = vector.shape_cast %96 : vector<2x16x16x64xf32> to vector<512x64xf32>
    %c1_151 = arith.constant 1 : index
    %c0_152 = arith.constant 0 : index
    %c0_153 = arith.constant 0 : index
    %98 = vector.load %arg3[%c1_151, %c0_152, %c0_153] : memref<9x64x64xf32, #tpu.memory_space<vmem>>, vector<1x64x64xf32>
    %99 = vector.shape_cast %98 : vector<1x64x64xf32> to vector<64x64xf32>
    %cst_154 = arith.constant dense<0.000000e+00> : vector<512x64xf32>
    %100 = tpu.matmul %97, %99, %cst_154 {dimension_numbers = #tpu.dot_dimension_numbers<[1], [0], [0], [1], [0, 0, 1, 1], [], []>} : vector<512x64xf32>, vector<64x64xf32>, vector<512x64xf32> -> vector<512x64xf32>
    %101 = arith.addf %95, %100 : vector<512x64xf32>
    %c0_155 = arith.constant 0 : index
    %c0_156 = arith.constant 0 : index
    %c2_157 = arith.constant 2 : index
    %c0_158 = arith.constant 0 : index
    %102 = vector.load %arg10[%c0_155, %c0_156, %c2_157, %c0_158] : memref<2x18x18x64xf32, #tpu.memory_space<vmem>>, vector<2x16x16x64xf32>
    %103 = vector.shape_cast %102 : vector<2x16x16x64xf32> to vector<512x64xf32>
    %c2_159 = arith.constant 2 : index
    %c0_160 = arith.constant 0 : index
    %c0_161 = arith.constant 0 : index
    %104 = vector.load %arg3[%c2_159, %c0_160, %c0_161] : memref<9x64x64xf32, #tpu.memory_space<vmem>>, vector<1x64x64xf32>
    %105 = vector.shape_cast %104 : vector<1x64x64xf32> to vector<64x64xf32>
    %cst_162 = arith.constant dense<0.000000e+00> : vector<512x64xf32>
    %106 = tpu.matmul %103, %105, %cst_162 {dimension_numbers = #tpu.dot_dimension_numbers<[1], [0], [0], [1], [0, 0, 1, 1], [], []>} : vector<512x64xf32>, vector<64x64xf32>, vector<512x64xf32> -> vector<512x64xf32>
    %107 = arith.addf %101, %106 : vector<512x64xf32>
    %c0_163 = arith.constant 0 : index
    %c1_164 = arith.constant 1 : index
    %c0_165 = arith.constant 0 : index
    %c0_166 = arith.constant 0 : index
    %108 = vector.load %arg10[%c0_163, %c1_164, %c0_165, %c0_166] : memref<2x18x18x64xf32, #tpu.memory_space<vmem>>, vector<2x16x16x64xf32>
    %109 = vector.shape_cast %108 : vector<2x16x16x64xf32> to vector<512x64xf32>
    %c3_167 = arith.constant 3 : index
    %c0_168 = arith.constant 0 : index
    %c0_169 = arith.constant 0 : index
    %110 = vector.load %arg3[%c3_167, %c0_168, %c0_169] : memref<9x64x64xf32, #tpu.memory_space<vmem>>, vector<1x64x64xf32>
    %111 = vector.shape_cast %110 : vector<1x64x64xf32> to vector<64x64xf32>
    %cst_170 = arith.constant dense<0.000000e+00> : vector<512x64xf32>
    %112 = tpu.matmul %109, %111, %cst_170 {dimension_numbers = #tpu.dot_dimension_numbers<[1], [0], [0], [1], [0, 0, 1, 1], [], []>} : vector<512x64xf32>, vector<64x64xf32>, vector<512x64xf32> -> vector<512x64xf32>
    %113 = arith.addf %107, %112 : vector<512x64xf32>
    %c0_171 = arith.constant 0 : index
    %c1_172 = arith.constant 1 : index
    %c1_173 = arith.constant 1 : index
    %c0_174 = arith.constant 0 : index
    %114 = vector.load %arg10[%c0_171, %c1_172, %c1_173, %c0_174] : memref<2x18x18x64xf32, #tpu.memory_space<vmem>>, vector<2x16x16x64xf32>
    %115 = vector.shape_cast %114 : vector<2x16x16x64xf32> to vector<512x64xf32>
    %c4_175 = arith.constant 4 : index
    %c0_176 = arith.constant 0 : index
    %c0_177 = arith.constant 0 : index
    %116 = vector.load %arg3[%c4_175, %c0_176, %c0_177] : memref<9x64x64xf32, #tpu.memory_space<vmem>>, vector<1x64x64xf32>
    %117 = vector.shape_cast %116 : vector<1x64x64xf32> to vector<64x64xf32>
    %cst_178 = arith.constant dense<0.000000e+00> : vector<512x64xf32>
    %118 = tpu.matmul %115, %117, %cst_178 {dimension_numbers = #tpu.dot_dimension_numbers<[1], [0], [0], [1], [0, 0, 1, 1], [], []>} : vector<512x64xf32>, vector<64x64xf32>, vector<512x64xf32> -> vector<512x64xf32>
    %119 = arith.addf %113, %118 : vector<512x64xf32>
    %c0_179 = arith.constant 0 : index
    %c1_180 = arith.constant 1 : index
    %c2_181 = arith.constant 2 : index
    %c0_182 = arith.constant 0 : index
    %120 = vector.load %arg10[%c0_179, %c1_180, %c2_181, %c0_182] : memref<2x18x18x64xf32, #tpu.memory_space<vmem>>, vector<2x16x16x64xf32>
    %121 = vector.shape_cast %120 : vector<2x16x16x64xf32> to vector<512x64xf32>
    %c5_183 = arith.constant 5 : index
    %c0_184 = arith.constant 0 : index
    %c0_185 = arith.constant 0 : index
    %122 = vector.load %arg3[%c5_183, %c0_184, %c0_185] : memref<9x64x64xf32, #tpu.memory_space<vmem>>, vector<1x64x64xf32>
    %123 = vector.shape_cast %122 : vector<1x64x64xf32> to vector<64x64xf32>
    %cst_186 = arith.constant dense<0.000000e+00> : vector<512x64xf32>
    %124 = tpu.matmul %121, %123, %cst_186 {dimension_numbers = #tpu.dot_dimension_numbers<[1], [0], [0], [1], [0, 0, 1, 1], [], []>} : vector<512x64xf32>, vector<64x64xf32>, vector<512x64xf32> -> vector<512x64xf32>
    %125 = arith.addf %119, %124 : vector<512x64xf32>
    %c0_187 = arith.constant 0 : index
    %c2_188 = arith.constant 2 : index
    %c0_189 = arith.constant 0 : index
    %c0_190 = arith.constant 0 : index
    %126 = vector.load %arg10[%c0_187, %c2_188, %c0_189, %c0_190] : memref<2x18x18x64xf32, #tpu.memory_space<vmem>>, vector<2x16x16x64xf32>
    %127 = vector.shape_cast %126 : vector<2x16x16x64xf32> to vector<512x64xf32>
    %c6_191 = arith.constant 6 : index
    %c0_192 = arith.constant 0 : index
    %c0_193 = arith.constant 0 : index
    %128 = vector.load %arg3[%c6_191, %c0_192, %c0_193] : memref<9x64x64xf32, #tpu.memory_space<vmem>>, vector<1x64x64xf32>
    %129 = vector.shape_cast %128 : vector<1x64x64xf32> to vector<64x64xf32>
    %cst_194 = arith.constant dense<0.000000e+00> : vector<512x64xf32>
    %130 = tpu.matmul %127, %129, %cst_194 {dimension_numbers = #tpu.dot_dimension_numbers<[1], [0], [0], [1], [0, 0, 1, 1], [], []>} : vector<512x64xf32>, vector<64x64xf32>, vector<512x64xf32> -> vector<512x64xf32>
    %131 = arith.addf %125, %130 : vector<512x64xf32>
    %c0_195 = arith.constant 0 : index
    %c2_196 = arith.constant 2 : index
    %c1_197 = arith.constant 1 : index
    %c0_198 = arith.constant 0 : index
    %132 = vector.load %arg10[%c0_195, %c2_196, %c1_197, %c0_198] : memref<2x18x18x64xf32, #tpu.memory_space<vmem>>, vector<2x16x16x64xf32>
    %133 = vector.shape_cast %132 : vector<2x16x16x64xf32> to vector<512x64xf32>
    %c7_199 = arith.constant 7 : index
    %c0_200 = arith.constant 0 : index
    %c0_201 = arith.constant 0 : index
    %134 = vector.load %arg3[%c7_199, %c0_200, %c0_201] : memref<9x64x64xf32, #tpu.memory_space<vmem>>, vector<1x64x64xf32>
    %135 = vector.shape_cast %134 : vector<1x64x64xf32> to vector<64x64xf32>
    %cst_202 = arith.constant dense<0.000000e+00> : vector<512x64xf32>
    %136 = tpu.matmul %133, %135, %cst_202 {dimension_numbers = #tpu.dot_dimension_numbers<[1], [0], [0], [1], [0, 0, 1, 1], [], []>} : vector<512x64xf32>, vector<64x64xf32>, vector<512x64xf32> -> vector<512x64xf32>
    %137 = arith.addf %131, %136 : vector<512x64xf32>
    %c0_203 = arith.constant 0 : index
    %c2_204 = arith.constant 2 : index
    %c2_205 = arith.constant 2 : index
    %c0_206 = arith.constant 0 : index
    %138 = vector.load %arg10[%c0_203, %c2_204, %c2_205, %c0_206] : memref<2x18x18x64xf32, #tpu.memory_space<vmem>>, vector<2x16x16x64xf32>
    %139 = vector.shape_cast %138 : vector<2x16x16x64xf32> to vector<512x64xf32>
    %c8_207 = arith.constant 8 : index
    %c0_208 = arith.constant 0 : index
    %c0_209 = arith.constant 0 : index
    %140 = vector.load %arg3[%c8_207, %c0_208, %c0_209] : memref<9x64x64xf32, #tpu.memory_space<vmem>>, vector<1x64x64xf32>
    %141 = vector.shape_cast %140 : vector<1x64x64xf32> to vector<64x64xf32>
    %cst_210 = arith.constant dense<0.000000e+00> : vector<512x64xf32>
    %142 = tpu.matmul %139, %141, %cst_210 {dimension_numbers = #tpu.dot_dimension_numbers<[1], [0], [0], [1], [0, 0, 1, 1], [], []>} : vector<512x64xf32>, vector<64x64xf32>, vector<512x64xf32> -> vector<512x64xf32>
    %143 = arith.addf %137, %142 : vector<512x64xf32>
    %144 = vector.broadcast %88 : vector<1x64xf32> to vector<512x64xf32>
    %145 = arith.addf %143, %144 : vector<512x64xf32>
    %cst_211 = arith.constant 0.000000e+00 : f32
    %146 = vector.broadcast %cst_211 : f32 to vector<512x64xf32>
    %147 = arith.maximumf %145, %146 : vector<512x64xf32>
    %148 = vector.shape_cast %147 : vector<512x64xf32> to vector<16x2x16x64xf32>
    %149 = vector.extract_strided_slice %148 {offsets = [0, 0, 0, 0], sizes = [16, 1, 16, 64], strides = [1, 1, 1, 1]} : vector<16x2x16x64xf32> to vector<16x1x16x64xf32>
    %150 = vector.shape_cast %149 : vector<16x1x16x64xf32> to vector<16x16x64xf32>
    %151 = vector.extract_strided_slice %148 {offsets = [0, 1, 0, 0], sizes = [16, 1, 16, 64], strides = [1, 1, 1, 1]} : vector<16x2x16x64xf32> to vector<16x1x16x64xf32>
    %152 = vector.shape_cast %151 : vector<16x1x16x64xf32> to vector<16x16x64xf32>
    %153 = arith.maximumf %150, %152 : vector<16x16x64xf32>
    %154 = vector.shape_cast %153 : vector<16x16x64xf32> to vector<16x8x2x64xf32>
    %155 = vector.extract_strided_slice %154 {offsets = [0, 0, 0, 0], sizes = [16, 8, 1, 64], strides = [1, 1, 1, 1]} : vector<16x8x2x64xf32> to vector<16x8x1x64xf32>
    %156 = vector.shape_cast %155 : vector<16x8x1x64xf32> to vector<16x8x64xf32>
    %157 = vector.extract_strided_slice %154 {offsets = [0, 0, 1, 0], sizes = [16, 8, 1, 64], strides = [1, 1, 1, 1]} : vector<16x8x2x64xf32> to vector<16x8x1x64xf32>
    %158 = vector.shape_cast %157 : vector<16x8x1x64xf32> to vector<16x8x64xf32>
    %159 = arith.maximumf %156, %158 : vector<16x8x64xf32>
    %160 = vector.shape_cast %159 : vector<16x8x64xf32> to vector<2x8x8x64xf32>
    %c0_212 = arith.constant 0 : index
    %c1_213 = arith.constant 1 : index
    %c1_214 = arith.constant 1 : index
    %c0_215 = arith.constant 0 : index
    %161 = vector.load %arg11[%c0_212, %c1_213, %c1_214, %c0_215] : memref<2x10x10x64xf32, #tpu.memory_space<vmem>>, vector<2x8x8x64xf32>
    tpu.vector_store %arg11[%c0_212, %c1_213, %c1_214, %c0_215], %160 {strides = array<i32>} : memref<2x10x10x64xf32, #tpu.memory_space<vmem>>, vector<2x8x8x64xf32>,
    %c2_216 = arith.constant 2 : index
    %c0_217 = arith.constant 0 : index
    %162 = vector.load %arg5[%c2_216, %c0_217] : memref<3x64xf32, #tpu.memory_space<vmem>>, vector<1x64xf32>
    %cst_218 = arith.constant 0.000000e+00 : f32
    %163 = vector.broadcast %cst_218 : f32 to vector<128x64xf32>
    %c0_219 = arith.constant 0 : index
    %c0_220 = arith.constant 0 : index
    %c0_221 = arith.constant 0 : index
    %c0_222 = arith.constant 0 : index
    %164 = vector.load %arg11[%c0_219, %c0_220, %c0_221, %c0_222] : memref<2x10x10x64xf32, #tpu.memory_space<vmem>>, vector<2x8x8x64xf32>
    %165 = vector.shape_cast %164 : vector<2x8x8x64xf32> to vector<128x64xf32>
    %c0_223 = arith.constant 0 : index
    %c0_224 = arith.constant 0 : index
    %c0_225 = arith.constant 0 : index
    %166 = vector.load %arg4[%c0_223, %c0_224, %c0_225] : memref<9x64x64xf32, #tpu.memory_space<vmem>>, vector<1x64x64xf32>
    %167 = vector.shape_cast %166 : vector<1x64x64xf32> to vector<64x64xf32>
    %cst_226 = arith.constant dense<0.000000e+00> : vector<128x64xf32>
    %168 = tpu.matmul %165, %167, %cst_226 {dimension_numbers = #tpu.dot_dimension_numbers<[1], [0], [0], [1], [0, 0, 1, 1], [], []>} : vector<128x64xf32>, vector<64x64xf32>, vector<128x64xf32> -> vector<128x64xf32>
    %169 = arith.addf %163, %168 : vector<128x64xf32>
    %c0_227 = arith.constant 0 : index
    %c0_228 = arith.constant 0 : index
    %c1_229 = arith.constant 1 : index
    %c0_230 = arith.constant 0 : index
    %170 = vector.load %arg11[%c0_227, %c0_228, %c1_229, %c0_230] : memref<2x10x10x64xf32, #tpu.memory_space<vmem>>, vector<2x8x8x64xf32>
    %171 = vector.shape_cast %170 : vector<2x8x8x64xf32> to vector<128x64xf32>
    %c1_231 = arith.constant 1 : index
    %c0_232 = arith.constant 0 : index
    %c0_233 = arith.constant 0 : index
    %172 = vector.load %arg4[%c1_231, %c0_232, %c0_233] : memref<9x64x64xf32, #tpu.memory_space<vmem>>, vector<1x64x64xf32>
    %173 = vector.shape_cast %172 : vector<1x64x64xf32> to vector<64x64xf32>
    %cst_234 = arith.constant dense<0.000000e+00> : vector<128x64xf32>
    %174 = tpu.matmul %171, %173, %cst_234 {dimension_numbers = #tpu.dot_dimension_numbers<[1], [0], [0], [1], [0, 0, 1, 1], [], []>} : vector<128x64xf32>, vector<64x64xf32>, vector<128x64xf32> -> vector<128x64xf32>
    %175 = arith.addf %169, %174 : vector<128x64xf32>
    %c0_235 = arith.constant 0 : index
    %c0_236 = arith.constant 0 : index
    %c2_237 = arith.constant 2 : index
    %c0_238 = arith.constant 0 : index
    %176 = vector.load %arg11[%c0_235, %c0_236, %c2_237, %c0_238] : memref<2x10x10x64xf32, #tpu.memory_space<vmem>>, vector<2x8x8x64xf32>
    %177 = vector.shape_cast %176 : vector<2x8x8x64xf32> to vector<128x64xf32>
    %c2_239 = arith.constant 2 : index
    %c0_240 = arith.constant 0 : index
    %c0_241 = arith.constant 0 : index
    %178 = vector.load %arg4[%c2_239, %c0_240, %c0_241] : memref<9x64x64xf32, #tpu.memory_space<vmem>>, vector<1x64x64xf32>
    %179 = vector.shape_cast %178 : vector<1x64x64xf32> to vector<64x64xf32>
    %cst_242 = arith.constant dense<0.000000e+00> : vector<128x64xf32>
    %180 = tpu.matmul %177, %179, %cst_242 {dimension_numbers = #tpu.dot_dimension_numbers<[1], [0], [0], [1], [0, 0, 1, 1], [], []>} : vector<128x64xf32>, vector<64x64xf32>, vector<128x64xf32> -> vector<128x64xf32>
    %181 = arith.addf %175, %180 : vector<128x64xf32>
    %c0_243 = arith.constant 0 : index
    %c1_244 = arith.constant 1 : index
    %c0_245 = arith.constant 0 : index
    %c0_246 = arith.constant 0 : index
    %182 = vector.load %arg11[%c0_243, %c1_244, %c0_245, %c0_246] : memref<2x10x10x64xf32, #tpu.memory_space<vmem>>, vector<2x8x8x64xf32>
    %183 = vector.shape_cast %182 : vector<2x8x8x64xf32> to vector<128x64xf32>
    %c3_247 = arith.constant 3 : index
    %c0_248 = arith.constant 0 : index
    %c0_249 = arith.constant 0 : index
    %184 = vector.load %arg4[%c3_247, %c0_248, %c0_249] : memref<9x64x64xf32, #tpu.memory_space<vmem>>, vector<1x64x64xf32>
    %185 = vector.shape_cast %184 : vector<1x64x64xf32> to vector<64x64xf32>
    %cst_250 = arith.constant dense<0.000000e+00> : vector<128x64xf32>
    %186 = tpu.matmul %183, %185, %cst_250 {dimension_numbers = #tpu.dot_dimension_numbers<[1], [0], [0], [1], [0, 0, 1, 1], [], []>} : vector<128x64xf32>, vector<64x64xf32>, vector<128x64xf32> -> vector<128x64xf32>
    %187 = arith.addf %181, %186 : vector<128x64xf32>
    %c0_251 = arith.constant 0 : index
    %c1_252 = arith.constant 1 : index
    %c1_253 = arith.constant 1 : index
    %c0_254 = arith.constant 0 : index
    %188 = vector.load %arg11[%c0_251, %c1_252, %c1_253, %c0_254] : memref<2x10x10x64xf32, #tpu.memory_space<vmem>>, vector<2x8x8x64xf32>
    %189 = vector.shape_cast %188 : vector<2x8x8x64xf32> to vector<128x64xf32>
    %c4_255 = arith.constant 4 : index
    %c0_256 = arith.constant 0 : index
    %c0_257 = arith.constant 0 : index
    %190 = vector.load %arg4[%c4_255, %c0_256, %c0_257] : memref<9x64x64xf32, #tpu.memory_space<vmem>>, vector<1x64x64xf32>
    %191 = vector.shape_cast %190 : vector<1x64x64xf32> to vector<64x64xf32>
    %cst_258 = arith.constant dense<0.000000e+00> : vector<128x64xf32>
    %192 = tpu.matmul %189, %191, %cst_258 {dimension_numbers = #tpu.dot_dimension_numbers<[1], [0], [0], [1], [0, 0, 1, 1], [], []>} : vector<128x64xf32>, vector<64x64xf32>, vector<128x64xf32> -> vector<128x64xf32>
    %193 = arith.addf %187, %192 : vector<128x64xf32>
    %c0_259 = arith.constant 0 : index
    %c1_260 = arith.constant 1 : index
    %c2_261 = arith.constant 2 : index
    %c0_262 = arith.constant 0 : index
    %194 = vector.load %arg11[%c0_259, %c1_260, %c2_261, %c0_262] : memref<2x10x10x64xf32, #tpu.memory_space<vmem>>, vector<2x8x8x64xf32>
    %195 = vector.shape_cast %194 : vector<2x8x8x64xf32> to vector<128x64xf32>
    %c5_263 = arith.constant 5 : index
    %c0_264 = arith.constant 0 : index
    %c0_265 = arith.constant 0 : index
    %196 = vector.load %arg4[%c5_263, %c0_264, %c0_265] : memref<9x64x64xf32, #tpu.memory_space<vmem>>, vector<1x64x64xf32>
    %197 = vector.shape_cast %196 : vector<1x64x64xf32> to vector<64x64xf32>
    %cst_266 = arith.constant dense<0.000000e+00> : vector<128x64xf32>
    %198 = tpu.matmul %195, %197, %cst_266 {dimension_numbers = #tpu.dot_dimension_numbers<[1], [0], [0], [1], [0, 0, 1, 1], [], []>} : vector<128x64xf32>, vector<64x64xf32>, vector<128x64xf32> -> vector<128x64xf32>
    %199 = arith.addf %193, %198 : vector<128x64xf32>
    %c0_267 = arith.constant 0 : index
    %c2_268 = arith.constant 2 : index
    %c0_269 = arith.constant 0 : index
    %c0_270 = arith.constant 0 : index
    %200 = vector.load %arg11[%c0_267, %c2_268, %c0_269, %c0_270] : memref<2x10x10x64xf32, #tpu.memory_space<vmem>>, vector<2x8x8x64xf32>
    %201 = vector.shape_cast %200 : vector<2x8x8x64xf32> to vector<128x64xf32>
    %c6_271 = arith.constant 6 : index
    %c0_272 = arith.constant 0 : index
    %c0_273 = arith.constant 0 : index
    %202 = vector.load %arg4[%c6_271, %c0_272, %c0_273] : memref<9x64x64xf32, #tpu.memory_space<vmem>>, vector<1x64x64xf32>
    %203 = vector.shape_cast %202 : vector<1x64x64xf32> to vector<64x64xf32>
    %cst_274 = arith.constant dense<0.000000e+00> : vector<128x64xf32>
    %204 = tpu.matmul %201, %203, %cst_274 {dimension_numbers = #tpu.dot_dimension_numbers<[1], [0], [0], [1], [0, 0, 1, 1], [], []>} : vector<128x64xf32>, vector<64x64xf32>, vector<128x64xf32> -> vector<128x64xf32>
    %205 = arith.addf %199, %204 : vector<128x64xf32>
    %c0_275 = arith.constant 0 : index
    %c2_276 = arith.constant 2 : index
    %c1_277 = arith.constant 1 : index
    %c0_278 = arith.constant 0 : index
    %206 = vector.load %arg11[%c0_275, %c2_276, %c1_277, %c0_278] : memref<2x10x10x64xf32, #tpu.memory_space<vmem>>, vector<2x8x8x64xf32>
    %207 = vector.shape_cast %206 : vector<2x8x8x64xf32> to vector<128x64xf32>
    %c7_279 = arith.constant 7 : index
    %c0_280 = arith.constant 0 : index
    %c0_281 = arith.constant 0 : index
    %208 = vector.load %arg4[%c7_279, %c0_280, %c0_281] : memref<9x64x64xf32, #tpu.memory_space<vmem>>, vector<1x64x64xf32>
    %209 = vector.shape_cast %208 : vector<1x64x64xf32> to vector<64x64xf32>
    %cst_282 = arith.constant dense<0.000000e+00> : vector<128x64xf32>
    %210 = tpu.matmul %207, %209, %cst_282 {dimension_numbers = #tpu.dot_dimension_numbers<[1], [0], [0], [1], [0, 0, 1, 1], [], []>} : vector<128x64xf32>, vector<64x64xf32>, vector<128x64xf32> -> vector<128x64xf32>
    %211 = arith.addf %205, %210 : vector<128x64xf32>
    %c0_283 = arith.constant 0 : index
    %c2_284 = arith.constant 2 : index
    %c2_285 = arith.constant 2 : index
    %c0_286 = arith.constant 0 : index
    %212 = vector.load %arg11[%c0_283, %c2_284, %c2_285, %c0_286] : memref<2x10x10x64xf32, #tpu.memory_space<vmem>>, vector<2x8x8x64xf32>
    %213 = vector.shape_cast %212 : vector<2x8x8x64xf32> to vector<128x64xf32>
    %c8_287 = arith.constant 8 : index
    %c0_288 = arith.constant 0 : index
    %c0_289 = arith.constant 0 : index
    %214 = vector.load %arg4[%c8_287, %c0_288, %c0_289] : memref<9x64x64xf32, #tpu.memory_space<vmem>>, vector<1x64x64xf32>
    %215 = vector.shape_cast %214 : vector<1x64x64xf32> to vector<64x64xf32>
    %cst_290 = arith.constant dense<0.000000e+00> : vector<128x64xf32>
    %216 = tpu.matmul %213, %215, %cst_290 {dimension_numbers = #tpu.dot_dimension_numbers<[1], [0], [0], [1], [0, 0, 1, 1], [], []>} : vector<128x64xf32>, vector<64x64xf32>, vector<128x64xf32> -> vector<128x64xf32>
    %217 = arith.addf %211, %216 : vector<128x64xf32>
    %218 = vector.broadcast %162 : vector<1x64xf32> to vector<128x64xf32>
    %219 = arith.addf %217, %218 : vector<128x64xf32>
    %cst_291 = arith.constant 0.000000e+00 : f32
    %220 = vector.broadcast %cst_291 : f32 to vector<128x64xf32>
    %221 = arith.maximumf %219, %220 : vector<128x64xf32>
    %222 = vector.shape_cast %221 : vector<128x64xf32> to vector<2x64x64xf32>
    %cst_292 = arith.constant 0.000000e+00 : f32
    %223 = vector.broadcast %cst_292 : f32 to vector<2x130xf32>
    %c0_293 = arith.constant 0 : index
    %c0_294 = arith.constant 0 : index
    %c0_295 = arith.constant 0 : index
    %224 = vector.load %arg6[%c0_293, %c0_294, %c0_295] : memref<10x64x64xf32, #tpu.memory_space<vmem>>, vector<1x64x64xf32>
    %225 = vector.shape_cast %224 : vector<1x64x64xf32> to vector<64x64xf32>
    %226 = vector.shape_cast %225 : vector<64x64xf32> to vector<1x64x64xf32>
    %227 = vector.broadcast %226 : vector<1x64x64xf32> to vector<2x64x64xf32>
    %228 = arith.mulf %222, %227 : vector<2x64x64xf32>
    %cst_296 = arith.constant dense<0.000000e+00> : vector<2x64xf32>
    %229 = vector.multi_reduction <add>, %228, %cst_296 [2] : vector<2x64x64xf32> to vector<2x64xf32>
    %cst_297 = arith.constant dense<0.000000e+00> : vector<2xf32>
    %230 = vector.multi_reduction <add>, %229, %cst_297 [1] : vector<2x64xf32> to vector<2xf32>
    %231 = vector.shape_cast %230 : vector<2xf32> to vector<2x1xf32>
    %c0_298 = arith.constant 0 : index
    %c0_299 = arith.constant 0 : index
    %232 = vector.load %arg7[%c0_298, %c0_299] : memref<10x130xf32, #tpu.memory_space<vmem>>, vector<1x130xf32>
    %233 = vector.broadcast %231 : vector<2x1xf32> to vector<2x130xf32>
    %234 = vector.broadcast %232 : vector<1x130xf32> to vector<2x130xf32>
    %235 = arith.mulf %233, %234 : vector<2x130xf32>
    %236 = arith.addf %223, %235 : vector<2x130xf32>
    %c1_300 = arith.constant 1 : index
    %c0_301 = arith.constant 0 : index
    %c0_302 = arith.constant 0 : index
    %237 = vector.load %arg6[%c1_300, %c0_301, %c0_302] : memref<10x64x64xf32, #tpu.memory_space<vmem>>, vector<1x64x64xf32>
    %238 = vector.shape_cast %237 : vector<1x64x64xf32> to vector<64x64xf32>
    %239 = vector.shape_cast %238 : vector<64x64xf32> to vector<1x64x64xf32>
    %240 = vector.broadcast %239 : vector<1x64x64xf32> to vector<2x64x64xf32>
    %241 = arith.mulf %222, %240 : vector<2x64x64xf32>
    %cst_303 = arith.constant dense<0.000000e+00> : vector<2x64xf32>
    %242 = vector.multi_reduction <add>, %241, %cst_303 [2] : vector<2x64x64xf32> to vector<2x64xf32>
    %cst_304 = arith.constant dense<0.000000e+00> : vector<2xf32>
    %243 = vector.multi_reduction <add>, %242, %cst_304 [1] : vector<2x64xf32> to vector<2xf32>
    %244 = vector.shape_cast %243 : vector<2xf32> to vector<2x1xf32>
    %c1_305 = arith.constant 1 : index
    %c0_306 = arith.constant 0 : index
    %245 = vector.load %arg7[%c1_305, %c0_306] : memref<10x130xf32, #tpu.memory_space<vmem>>, vector<1x130xf32>
    %246 = vector.broadcast %244 : vector<2x1xf32> to vector<2x130xf32>
    %247 = vector.broadcast %245 : vector<1x130xf32> to vector<2x130xf32>
    %248 = arith.mulf %246, %247 : vector<2x130xf32>
    %249 = arith.addf %236, %248 : vector<2x130xf32>
    %c2_307 = arith.constant 2 : index
    %c0_308 = arith.constant 0 : index
    %c0_309 = arith.constant 0 : index
    %250 = vector.load %arg6[%c2_307, %c0_308, %c0_309] : memref<10x64x64xf32, #tpu.memory_space<vmem>>, vector<1x64x64xf32>
    %251 = vector.shape_cast %250 : vector<1x64x64xf32> to vector<64x64xf32>
    %252 = vector.shape_cast %251 : vector<64x64xf32> to vector<1x64x64xf32>
    %253 = vector.broadcast %252 : vector<1x64x64xf32> to vector<2x64x64xf32>
    %254 = arith.mulf %222, %253 : vector<2x64x64xf32>
    %cst_310 = arith.constant dense<0.000000e+00> : vector<2x64xf32>
    %255 = vector.multi_reduction <add>, %254, %cst_310 [2] : vector<2x64x64xf32> to vector<2x64xf32>
    %cst_311 = arith.constant dense<0.000000e+00> : vector<2xf32>
    %256 = vector.multi_reduction <add>, %255, %cst_311 [1] : vector<2x64xf32> to vector<2xf32>
    %257 = vector.shape_cast %256 : vector<2xf32> to vector<2x1xf32>
    %c2_312 = arith.constant 2 : index
    %c0_313 = arith.constant 0 : index
    %258 = vector.load %arg7[%c2_312, %c0_313] : memref<10x130xf32, #tpu.memory_space<vmem>>, vector<1x130xf32>
    %259 = vector.broadcast %257 : vector<2x1xf32> to vector<2x130xf32>
    %260 = vector.broadcast %258 : vector<1x130xf32> to vector<2x130xf32>
    %261 = arith.mulf %259, %260 : vector<2x130xf32>
    %262 = arith.addf %249, %261 : vector<2x130xf32>
    %c3_314 = arith.constant 3 : index
    %c0_315 = arith.constant 0 : index
    %c0_316 = arith.constant 0 : index
    %263 = vector.load %arg6[%c3_314, %c0_315, %c0_316] : memref<10x64x64xf32, #tpu.memory_space<vmem>>, vector<1x64x64xf32>
    %264 = vector.shape_cast %263 : vector<1x64x64xf32> to vector<64x64xf32>
    %265 = vector.shape_cast %264 : vector<64x64xf32> to vector<1x64x64xf32>
    %266 = vector.broadcast %265 : vector<1x64x64xf32> to vector<2x64x64xf32>
    %267 = arith.mulf %222, %266 : vector<2x64x64xf32>
    %cst_317 = arith.constant dense<0.000000e+00> : vector<2x64xf32>
    %268 = vector.multi_reduction <add>, %267, %cst_317 [2] : vector<2x64x64xf32> to vector<2x64xf32>
    %cst_318 = arith.constant dense<0.000000e+00> : vector<2xf32>
    %269 = vector.multi_reduction <add>, %268, %cst_318 [1] : vector<2x64xf32> to vector<2xf32>
    %270 = vector.shape_cast %269 : vector<2xf32> to vector<2x1xf32>
    %c3_319 = arith.constant 3 : index
    %c0_320 = arith.constant 0 : index
    %271 = vector.load %arg7[%c3_319, %c0_320] : memref<10x130xf32, #tpu.memory_space<vmem>>, vector<1x130xf32>
    %272 = vector.broadcast %270 : vector<2x1xf32> to vector<2x130xf32>
    %273 = vector.broadcast %271 : vector<1x130xf32> to vector<2x130xf32>
    %274 = arith.mulf %272, %273 : vector<2x130xf32>
    %275 = arith.addf %262, %274 : vector<2x130xf32>
    %c4_321 = arith.constant 4 : index
    %c0_322 = arith.constant 0 : index
    %c0_323 = arith.constant 0 : index
    %276 = vector.load %arg6[%c4_321, %c0_322, %c0_323] : memref<10x64x64xf32, #tpu.memory_space<vmem>>, vector<1x64x64xf32>
    %277 = vector.shape_cast %276 : vector<1x64x64xf32> to vector<64x64xf32>
    %278 = vector.shape_cast %277 : vector<64x64xf32> to vector<1x64x64xf32>
    %279 = vector.broadcast %278 : vector<1x64x64xf32> to vector<2x64x64xf32>
    %280 = arith.mulf %222, %279 : vector<2x64x64xf32>
    %cst_324 = arith.constant dense<0.000000e+00> : vector<2x64xf32>
    %281 = vector.multi_reduction <add>, %280, %cst_324 [2] : vector<2x64x64xf32> to vector<2x64xf32>
    %cst_325 = arith.constant dense<0.000000e+00> : vector<2xf32>
    %282 = vector.multi_reduction <add>, %281, %cst_325 [1] : vector<2x64xf32> to vector<2xf32>
    %283 = vector.shape_cast %282 : vector<2xf32> to vector<2x1xf32>
    %c4_326 = arith.constant 4 : index
    %c0_327 = arith.constant 0 : index
    %284 = vector.load %arg7[%c4_326, %c0_327] : memref<10x130xf32, #tpu.memory_space<vmem>>, vector<1x130xf32>
    %285 = vector.broadcast %283 : vector<2x1xf32> to vector<2x130xf32>
    %286 = vector.broadcast %284 : vector<1x130xf32> to vector<2x130xf32>
    %287 = arith.mulf %285, %286 : vector<2x130xf32>
    %288 = arith.addf %275, %287 : vector<2x130xf32>
    %c5_328 = arith.constant 5 : index
    %c0_329 = arith.constant 0 : index
    %c0_330 = arith.constant 0 : index
    %289 = vector.load %arg6[%c5_328, %c0_329, %c0_330] : memref<10x64x64xf32, #tpu.memory_space<vmem>>, vector<1x64x64xf32>
    %290 = vector.shape_cast %289 : vector<1x64x64xf32> to vector<64x64xf32>
    %291 = vector.shape_cast %290 : vector<64x64xf32> to vector<1x64x64xf32>
    %292 = vector.broadcast %291 : vector<1x64x64xf32> to vector<2x64x64xf32>
    %293 = arith.mulf %222, %292 : vector<2x64x64xf32>
    %cst_331 = arith.constant dense<0.000000e+00> : vector<2x64xf32>
    %294 = vector.multi_reduction <add>, %293, %cst_331 [2] : vector<2x64x64xf32> to vector<2x64xf32>
    %cst_332 = arith.constant dense<0.000000e+00> : vector<2xf32>
    %295 = vector.multi_reduction <add>, %294, %cst_332 [1] : vector<2x64xf32> to vector<2xf32>
    %296 = vector.shape_cast %295 : vector<2xf32> to vector<2x1xf32>
    %c5_333 = arith.constant 5 : index
    %c0_334 = arith.constant 0 : index
    %297 = vector.load %arg7[%c5_333, %c0_334] : memref<10x130xf32, #tpu.memory_space<vmem>>, vector<1x130xf32>
    %298 = vector.broadcast %296 : vector<2x1xf32> to vector<2x130xf32>
    %299 = vector.broadcast %297 : vector<1x130xf32> to vector<2x130xf32>
    %300 = arith.mulf %298, %299 : vector<2x130xf32>
    %301 = arith.addf %288, %300 : vector<2x130xf32>
    %c6_335 = arith.constant 6 : index
    %c0_336 = arith.constant 0 : index
    %c0_337 = arith.constant 0 : index
    %302 = vector.load %arg6[%c6_335, %c0_336, %c0_337] : memref<10x64x64xf32, #tpu.memory_space<vmem>>, vector<1x64x64xf32>
    %303 = vector.shape_cast %302 : vector<1x64x64xf32> to vector<64x64xf32>
    %304 = vector.shape_cast %303 : vector<64x64xf32> to vector<1x64x64xf32>
    %305 = vector.broadcast %304 : vector<1x64x64xf32> to vector<2x64x64xf32>
    %306 = arith.mulf %222, %305 : vector<2x64x64xf32>
    %cst_338 = arith.constant dense<0.000000e+00> : vector<2x64xf32>
    %307 = vector.multi_reduction <add>, %306, %cst_338 [2] : vector<2x64x64xf32> to vector<2x64xf32>
    %cst_339 = arith.constant dense<0.000000e+00> : vector<2xf32>
    %308 = vector.multi_reduction <add>, %307, %cst_339 [1] : vector<2x64xf32> to vector<2xf32>
    %309 = vector.shape_cast %308 : vector<2xf32> to vector<2x1xf32>
    %c6_340 = arith.constant 6 : index
    %c0_341 = arith.constant 0 : index
    %310 = vector.load %arg7[%c6_340, %c0_341] : memref<10x130xf32, #tpu.memory_space<vmem>>, vector<1x130xf32>
    %311 = vector.broadcast %309 : vector<2x1xf32> to vector<2x130xf32>
    %312 = vector.broadcast %310 : vector<1x130xf32> to vector<2x130xf32>
    %313 = arith.mulf %311, %312 : vector<2x130xf32>
    %314 = arith.addf %301, %313 : vector<2x130xf32>
    %c7_342 = arith.constant 7 : index
    %c0_343 = arith.constant 0 : index
    %c0_344 = arith.constant 0 : index
    %315 = vector.load %arg6[%c7_342, %c0_343, %c0_344] : memref<10x64x64xf32, #tpu.memory_space<vmem>>, vector<1x64x64xf32>
    %316 = vector.shape_cast %315 : vector<1x64x64xf32> to vector<64x64xf32>
    %317 = vector.shape_cast %316 : vector<64x64xf32> to vector<1x64x64xf32>
    %318 = vector.broadcast %317 : vector<1x64x64xf32> to vector<2x64x64xf32>
    %319 = arith.mulf %222, %318 : vector<2x64x64xf32>
    %cst_345 = arith.constant dense<0.000000e+00> : vector<2x64xf32>
    %320 = vector.multi_reduction <add>, %319, %cst_345 [2] : vector<2x64x64xf32> to vector<2x64xf32>
    %cst_346 = arith.constant dense<0.000000e+00> : vector<2xf32>
    %321 = vector.multi_reduction <add>, %320, %cst_346 [1] : vector<2x64xf32> to vector<2xf32>
    %322 = vector.shape_cast %321 : vector<2xf32> to vector<2x1xf32>
    %c7_347 = arith.constant 7 : index
    %c0_348 = arith.constant 0 : index
    %323 = vector.load %arg7[%c7_347, %c0_348] : memref<10x130xf32, #tpu.memory_space<vmem>>, vector<1x130xf32>
    %324 = vector.broadcast %322 : vector<2x1xf32> to vector<2x130xf32>
    %325 = vector.broadcast %323 : vector<1x130xf32> to vector<2x130xf32>
    %326 = arith.mulf %324, %325 : vector<2x130xf32>
    %327 = arith.addf %314, %326 : vector<2x130xf32>
    %c8_349 = arith.constant 8 : index
    %c0_350 = arith.constant 0 : index
    %c0_351 = arith.constant 0 : index
    %328 = vector.load %arg6[%c8_349, %c0_350, %c0_351] : memref<10x64x64xf32, #tpu.memory_space<vmem>>, vector<1x64x64xf32>
    %329 = vector.shape_cast %328 : vector<1x64x64xf32> to vector<64x64xf32>
    %330 = vector.shape_cast %329 : vector<64x64xf32> to vector<1x64x64xf32>
    %331 = vector.broadcast %330 : vector<1x64x64xf32> to vector<2x64x64xf32>
    %332 = arith.mulf %222, %331 : vector<2x64x64xf32>
    %cst_352 = arith.constant dense<0.000000e+00> : vector<2x64xf32>
    %333 = vector.multi_reduction <add>, %332, %cst_352 [2] : vector<2x64x64xf32> to vector<2x64xf32>
    %cst_353 = arith.constant dense<0.000000e+00> : vector<2xf32>
    %334 = vector.multi_reduction <add>, %333, %cst_353 [1] : vector<2x64xf32> to vector<2xf32>
    %335 = vector.shape_cast %334 : vector<2xf32> to vector<2x1xf32>
    %c8_354 = arith.constant 8 : index
    %c0_355 = arith.constant 0 : index
    %336 = vector.load %arg7[%c8_354, %c0_355] : memref<10x130xf32, #tpu.memory_space<vmem>>, vector<1x130xf32>
    %337 = vector.broadcast %335 : vector<2x1xf32> to vector<2x130xf32>
    %338 = vector.broadcast %336 : vector<1x130xf32> to vector<2x130xf32>
    %339 = arith.mulf %337, %338 : vector<2x130xf32>
    %340 = arith.addf %327, %339 : vector<2x130xf32>
    %c9_356 = arith.constant 9 : index
    %c0_357 = arith.constant 0 : index
    %c0_358 = arith.constant 0 : index
    %341 = vector.load %arg6[%c9_356, %c0_357, %c0_358] : memref<10x64x64xf32, #tpu.memory_space<vmem>>, vector<1x64x64xf32>
    %342 = vector.shape_cast %341 : vector<1x64x64xf32> to vector<64x64xf32>
    %343 = vector.shape_cast %342 : vector<64x64xf32> to vector<1x64x64xf32>
    %344 = vector.broadcast %343 : vector<1x64x64xf32> to vector<2x64x64xf32>
    %345 = arith.mulf %222, %344 : vector<2x64x64xf32>
    %cst_359 = arith.constant dense<0.000000e+00> : vector<2x64xf32>
    %346 = vector.multi_reduction <add>, %345, %cst_359 [2] : vector<2x64x64xf32> to vector<2x64xf32>
    %cst_360 = arith.constant dense<0.000000e+00> : vector<2xf32>
    %347 = vector.multi_reduction <add>, %346, %cst_360 [1] : vector<2x64xf32> to vector<2xf32>
    %348 = vector.shape_cast %347 : vector<2xf32> to vector<2x1xf32>
    %c9_361 = arith.constant 9 : index
    %c0_362 = arith.constant 0 : index
    %349 = vector.load %arg7[%c9_361, %c0_362] : memref<10x130xf32, #tpu.memory_space<vmem>>, vector<1x130xf32>
    %350 = vector.broadcast %348 : vector<2x1xf32> to vector<2x130xf32>
    %351 = vector.broadcast %349 : vector<1x130xf32> to vector<2x130xf32>
    %352 = arith.mulf %350, %351 : vector<2x130xf32>
    %353 = arith.addf %340, %352 : vector<2x130xf32>
    %cst_363 = arith.constant dense<0xFF800000> : vector<2xf32>
    %354 = vector.multi_reduction <maximumf>, %353, %cst_363 [1] : vector<2x130xf32> to vector<2xf32>
    %355 = vector.shape_cast %354 : vector<2xf32> to vector<2x1xf32>
    %356 = vector.broadcast %355 : vector<2x1xf32> to vector<2x130xf32>
    %357 = arith.subf %353, %356 : vector<2x130xf32>
    %358 = math.exp %357 : vector<2x130xf32>
    %cst_364 = arith.constant dense<0.000000e+00> : vector<2xf32>
    %359 = vector.multi_reduction <add>, %358, %cst_364 [1] : vector<2x130xf32> to vector<2xf32>
    %360 = vector.shape_cast %359 : vector<2xf32> to vector<2x1xf32>
    %361 = math.log %360 : vector<2x1xf32>
    %362 = arith.addf %361, %355 : vector<2x1xf32>
    %363 = vector.broadcast %362 : vector<2x1xf32> to vector<2x130xf32>
    %364 = arith.subf %353, %363 : vector<2x130xf32>
    %c0_365 = arith.constant 0 : index
    %c0_366 = arith.constant 0 : index
    %c0_367 = arith.constant 0 : index
    %365 = vector.load %arg8[%c0_365, %c0_366, %c0_367] : memref<1x2x130xf32, #tpu.memory_space<vmem>>, vector<1x2x130xf32>
    %366 = vector.shape_cast %365 : vector<1x2x130xf32> to vector<2x130xf32>
    %367 = vector.shape_cast %364 : vector<2x130xf32> to vector<1x2x130xf32>
    tpu.vector_store %arg8[%c0_365, %c0_366, %c0_367], %367 {strides = array<i32>} : memref<1x2x130xf32, #tpu.memory_space<vmem>>, vector<1x2x130xf32>,
    return
  }
  func.func @transform_0(%arg0: i32) -> (i32, i32, i32, i32) {
    %c0_i32 = arith.constant 0 : i32
    %c0_i32_0 = arith.constant 0 : i32
    %c0_i32_1 = arith.constant 0 : i32
    %c0_i32_2 = arith.constant 0 : i32
    return %arg0, %c0_i32, %c0_i32_0, %c0_i32_1 : i32, i32, i32, i32
  }
  func.func @transform_1(%arg0: i32) -> (i32, i32, i32) {
    %c0_i32 = arith.constant 0 : i32
    %c0_i32_0 = arith.constant 0 : i32
    %c0_i32_1 = arith.constant 0 : i32
    %c0_i32_2 = arith.constant 0 : i32
    return %c0_i32, %c0_i32_0, %c0_i32_1 : i32, i32, i32
  }
  func.func @transform_2(%arg0: i32) -> (i32, i32, i32) {
    %c0_i32 = arith.constant 0 : i32
    %c0_i32_0 = arith.constant 0 : i32
    %c0_i32_1 = arith.constant 0 : i32
    %c0_i32_2 = arith.constant 0 : i32
    return %c0_i32, %c0_i32_0, %c0_i32_1 : i32, i32, i32
  }
  func.func @transform_3(%arg0: i32) -> (i32, i32, i32) {
    %c0_i32 = arith.constant 0 : i32
    %c0_i32_0 = arith.constant 0 : i32
    %c0_i32_1 = arith.constant 0 : i32
    %c0_i32_2 = arith.constant 0 : i32
    return %c0_i32, %c0_i32_0, %c0_i32_1 : i32, i32, i32
  }
  func.func @transform_4(%arg0: i32) -> (i32, i32) {
    %c0_i32 = arith.constant 0 : i32
    %c0_i32_0 = arith.constant 0 : i32
    %c0_i32_1 = arith.constant 0 : i32
    return %c0_i32, %c0_i32_0 : i32, i32
  }
  func.func @transform_5(%arg0: i32) -> (i32, i32, i32) {
    %c0_i32 = arith.constant 0 : i32
    %c0_i32_0 = arith.constant 0 : i32
    %c0_i32_1 = arith.constant 0 : i32
    %c0_i32_2 = arith.constant 0 : i32
    return %c0_i32, %c0_i32_0, %c0_i32_1 : i32, i32, i32
  }
  func.func @transform_6(%arg0: i32) -> (i32, i32) {
    %c0_i32 = arith.constant 0 : i32
    %c0_i32_0 = arith.constant 0 : i32
    %c0_i32_1 = arith.constant 0 : i32
    return %c0_i32, %c0_i32_0 : i32, i32
  }
  func.func @transform_7(%arg0: i32) -> (i32, i32, i32) {
    %c0_i32 = arith.constant 0 : i32
    %c0_i32_0 = arith.constant 0 : i32
    %c0_i32_1 = arith.constant 0 : i32
    return %arg0, %c0_i32, %c0_i32_0 : i32, i32, i32
  }
}

</mosaic_0001>

<bundles_post_ra>
// kernel: net_forward.1
= control target key start
LH: loop header
LB: loop body
LE: loop exit
PB: predicated region body
PF: predicated region fallthrough
CT: control target
= control target key end

     0   :  { %12 = vsyncpa [#allocation6], 0  ;;  %s32706_s0 = inlined_call_operand.vmem [shape: f32[2,16,16,3], index: 0, kind: input, shape index: {}]   ;;  %s32707_s1 = inlined_call_operand.vmem [shape: f32[9,3,64], index: 1, kind: input, shape index: {}]   ;;  %s32708_s2 = inlined_call_operand.vmem [shape: f32[9,64,64], index: 2, kind: input, shape index: {}]   ;;  %s32709_s3 = inlined_call_operand.hbm [shape: f32[9,64,64], index: 3, kind: input, shape index: {}]   ;;  %s32710_s4 = inlined_call_operand.vmem [shape: f32[3,64], index: 4, kind: input, shape index: {}]   ;;  %s32711_s5 = inlined_call_operand.hbm [shape: f32[10,64,64], index: 5, kind: input, shape index: {}]   ;;  %s32712_s6 = inlined_call_operand.hbm [shape: f32[10,130], index: 6, kind: input, shape index: {}]   ;;  %s32713_s7 = inlined_call_operand.hbm [shape: f32[1,2,130], index: 7, kind: output, shape index: {}]  }
   0x1   :  { %13 = vsyncpa [#allocation9], 0 }
   0x2   :  { %14 = vsyncpa [#allocation7], 0  ;;  %s26196_s24 = smov [#allocation8]   ;;  %s26197_s26 = smov [#allocation5]  }
   0x3   :  { %s40_s25 = sshll.u32 %s26196_s24, 4  ;;  %s26_s27 = sshll.u32 %s26197_s26, 4  ;;  %s41_s25 = int_to_ptr.vmem [resolvable:$true] %s40_s25  ;;  %s26246_s27 = int_to_ptr.vmem [resolvable:$true] %s26_s27 }
   0x4   :  { %s26102_s30 = scalar_lea.hbm %s32711_s5, 10240 }
   0x5   :  { %p26103_p0 = scmp.ne.s32.totalorder %s32711_s5, %s26102_s30  ;;  %p26106_p1 = scmp.lt.u32.totalorder %s26102_s30, %s32711_s5 }
   0x7   :  { %p26108_p2 = pnand %p26106_p1, %p26103_p0 }
   0x9   :  { %26111 = shalt.err (!%p26108_p2)
}
   0xa   :  { %s26112_s12 = scalar_lea.vmem %s41_s25, 10240  ;;  %p26117_p4 = scmp.lt.s32.totalorder %s41_s25, %s41_s25 }
   0xb   :  { %p26113_p3 = scmp.ne.s32.totalorder %s41_s25, %s26112_s12  ;;  %p26118_p5 = scmp.lt.s32.totalorder %s26112_s12, %s26112_s12 }
   0xd   :  { %p26119_p6 = por %p26118_p5, %p26117_p4 }
   0xf   :  { %p26120_p7 = pnand %p26119_p6, %p26113_p3 }
  0x11   :  { %26123 = shalt.err (!%p26120_p7)
}
  0x12   :  { %s26198_s13 = smov 128   ;;  %s26199_s14 = smov 8  }
  0x13   :  { %46 = dma.hbm_to_vmem [thread:$0]  %s32711_s5, 10240, %s41_s25, [#allocation9], %s26198_s13, %s26198_s13, %s26199_s14  }
  0x14   :  { %s26124_s19 = scalar_lea.hbm %s32709_s3, 9216 }
  0x15   :  { %p26125_p8 = scmp.ne.s32.totalorder %s32709_s3, %s26124_s19  ;;  %p26128_p9 = scmp.lt.u32.totalorder %s26124_s19, %s32709_s3 }
  0x17   :  { %p26130_p10 = pnand %p26128_p9, %p26125_p8 }
  0x19   :  { %26133 = shalt.err (!%p26130_p10)
}
  0x1a   :  { %s26134_s24 = scalar_lea.vmem %s26246_s27, 9216  ;;  %p26139_p12 = scmp.lt.s32.totalorder %s26246_s27, %s26246_s27 }
  0x1b   :  { %p26135_p11 = scmp.ne.s32.totalorder %s26246_s27, %s26134_s24  ;;  %p26140_p13 = scmp.lt.s32.totalorder %s26134_s24, %s26134_s24 }
  0x1d   :  { %p26141_p0 = por %p26140_p13, %p26139_p12 }
  0x1f   :  { %p26142_p1 = pnand %p26141_p0, %p26135_p11 }
  0x21   :  { %26145 = shalt.err (!%p26142_p1)
}
  0x22   :  { %32 = dma.hbm_to_vmem [thread:$0]  %s32709_s3, 9216, %s26246_s27, [#allocation6], %s26198_s13, %s26198_s13, %s26199_s14  }
  0x23   :  { %s26200_s26 = smov [#allocation10]   ;;  %s26146_s8 = scalar_lea.hbm %s32712_s6, 512 }
  0x24   :  { %s52_s28 = sshll.u32 %s26200_s26, 4  ;;  %p26147_p2 = scmp.ne.s32.totalorder %s32712_s6, %s26146_s8  ;;  %s53_s28 = int_to_ptr.vmem [resolvable:$true] %s52_s28 }
  0x25   :  { %p26150_p3 = scmp.lt.u32.totalorder %s26146_s8, %s32712_s6 }
  0x27   :  { %p26152_p4 = pnand %p26150_p3, %p26147_p2 }
  0x29   :  { %26155 = shalt.err (!%p26152_p4)
}
  0x2a   :  { %s26156_s15 = scalar_lea.vmem %s53_s28, 512  ;;  %p26161_p6 = scmp.lt.s32.totalorder %s53_s28, %s53_s28 }
  0x2b   :  { %p26157_p5 = scmp.ne.s32.totalorder %s53_s28, %s26156_s15  ;;  %p26162_p7 = scmp.lt.s32.totalorder %s26156_s15, %s26156_s15 }
  0x2d   :  { %p26163_p8 = por %p26162_p7, %p26161_p6 }
  0x2f   :  { %p26164_p9 = pnand %p26163_p8, %p26157_p5 }
  0x31   :  { %26167 = shalt.err (!%p26164_p9)
}
  0x32   :  { %s26201_s3 = smov 256   ;;  %s26202_s27 = smov 16  }
  0x33   :  { %58 = dma.hbm_to_vmem [thread:$0]  %s32712_s6, 512, %s53_s28, [#allocation9], %s26201_s3, %s26201_s3, %s26202_s27  }
  0x34   :  { %26190 = dma.done.wait [#allocation6], 9216  }
  0x35   :  { %26191 = vsyncadd [#allocation6], 4294958080 }
  0x36   :  { %26192 = dma.done.wait [#allocation9], 10752  }
  0x37   :  { %26193 = vsyncadd [#allocation9], 4294956544  ;;  %vm68_vm0 = vcmask 23552   ;;  %vm83_vm1 = vcmask 16384   ;;  %v32714_v0 = vmov 0.0   ;;  %vm71_vm2 = vcmask 17408  }
  0x38   :  { %69 = vst.msk [vmem:[#allocation2] sm:$0xff] %vm68_vm0, %v32714_v0  ;;  %70 = vst.msk [vmem:[#allocation2 + $0x8] sm:$0xff] %vm68_vm0, %v32714_v0  ;;  %vm746_vm3 = vcmask 1042432   ;;  %v487_v1 = vld [vmem:[%s32707_s1] sm:$0x7]  ;;  %v294_v5 = vld [vmem:[%s32706_s0 + $0x8] sm:$0xff] }
  0x39   :  { %73 = vst.msk [vmem:[#allocation2 + $0x1b0] sm:$0xff] %vm68_vm0, %v32714_v0  ;;  %74 = vst.msk [vmem:[#allocation2 + $0x1b8] sm:$0xff] %vm68_vm0, %v32714_v0  ;;  %v19553_v2 = vld [vmem:[%s32707_s1 + $0x8] sm:$0x7]  ;;  %v293_v3 = vld [vmem:[%s32706_s0] sm:$0xff]  ;;  %22477 = vmatprep.subr.msk.mxu0 %vm746_vm3, %v487_v1  ;;  %vm156_vm4 = vcmask 523264  }
  0x3a   :  { %77 = vst.msk [vmem:[#allocation2 + $0x198] sm:$0xff] %vm68_vm0, %v32714_v0  ;;  %78 = vst.msk [vmem:[#allocation2 + $0x1a0] sm:$0xff] %vm68_vm0, %v32714_v0  ;;  %v295_v6 = vld [vmem:[%s32706_s0 + $0x10] sm:$0xff]  ;;  %22478 = vmatpush3.msk.msra.mxu0 %vm746_vm3, %v487_v1  ;;  %v296_v8 = vld [vmem:[%s32706_s0 + $0x18] sm:$0xff]  ;;  %vm159_vm5 = vcmask 517120   ;;  %vm171_vm6 = vcmask 516096  }
  0x3b   :  { %80 = vst.msk [vmem:[#allocation2 + $0x348] sm:$0xff] %vm68_vm0, %v32714_v0  ;;  %81 = vst.msk [vmem:[#allocation2 + $0x350] sm:$0xff] %vm68_vm0, %v32714_v0  ;;  %v297_v9 = vld [vmem:[%s32706_s0 + $0x20] sm:$0xff]  ;;  %22575 = vmatprep.subr.msk.mxu0 %vm746_vm3, %v19553_v2  ;;  %v298_v10 = vld [vmem:[%s32706_s0 + $0x28] sm:$0xff]  ;;  %vm15202_vm7 = vcmask 1041409   ;;  %vm15204_vm8 = vcmask 1042434  }
  0x3c   :  { %85 = vst.msk [vmem:[#allocation2 + $0x18] sm:$0x1] %vm83_vm1, %v32714_v0  ;;  %86 = vst.msk [vmem:[#allocation2 + $0x30] sm:$0x1] %vm83_vm1, %v32714_v0  ;;  %v299_v11 = vld [vmem:[%s32706_s0 + $0x30] sm:$0xff]  ;;  %v300_v12 = vld [vmem:[%s32706_s0 + $0x38] sm:$0xff] }
  0x3d   :  { %87 = vst.msk [vmem:[#allocation2 + $0x48] sm:$0x1] %vm83_vm1, %v32714_v0  ;;  %88 = vst.msk [vmem:[#allocation2 + $0x60] sm:$0x1] %vm83_vm1, %v32714_v0  ;;  %v301_v13 = vld [vmem:[%s32706_s0 + $0x40] sm:$0xff]  ;;  %v302_v14 = vld [vmem:[%s32706_s0 + $0x48] sm:$0xff] }
  0x3e   :  { %89 = vst.msk [vmem:[#allocation2 + $0x78] sm:$0x1] %vm83_vm1, %v32714_v0  ;;  %90 = vst.msk [vmem:[#allocation2 + $0x90] sm:$0x1] %vm83_vm1, %v32714_v0  ;;  %v303_v15 = vld [vmem:[%s32706_s0 + $0x50] sm:$0xff]  ;;  %v304_v16 = vld [vmem:[%s32706_s0 + $0x58] sm:$0xff] }
  0x3f   :  { %91 = vst.msk [vmem:[#allocation2 + $0xa8] sm:$0x1] %vm83_vm1, %v32714_v0  ;;  %92 = vst.msk [vmem:[#allocation2 + $0xc0] sm:$0x1] %vm83_vm1, %v32714_v0  ;;  %v424_v4 = vld [vmem:[#allocation2 + $0x8] sm:$0xff]  ;;  %v305_v17 = vld [vmem:[%s32706_s0 + $0x60] sm:$0xff] }
  0x40   :  { %93 = vst.msk [vmem:[#allocation2 + $0xd8] sm:$0x1] %vm83_vm1, %v32714_v0  ;;  %94 = vst.msk [vmem:[#allocation2 + $0xf0] sm:$0x1] %vm83_vm1, %v32714_v0  ;;  %v306_v18 = vld [vmem:[%s32706_s0 + $0x68] sm:$0xff]  ;;  %v307_v19 = vld [vmem:[%s32706_s0 + $0x70] sm:$0xff] }
  0x41   :  { %95 = vst.msk [vmem:[#allocation2 + $0x108] sm:$0x1] %vm83_vm1, %v32714_v0  ;;  %96 = vst.msk [vmem:[#allocation2 + $0x120] sm:$0x1] %vm83_vm1, %v32714_v0  ;;  %v308_v20 = vld [vmem:[%s32706_s0 + $0x78] sm:$0xff]  ;;  %v309_v21 = vld [vmem:[%s32706_s0 + $0x80] sm:$0xff] }
  0x42   :  { %97 = vst.msk [vmem:[#allocation2 + $0x138] sm:$0x1] %vm83_vm1, %v32714_v0  ;;  %98 = vst.msk [vmem:[#allocation2 + $0x150] sm:$0x1] %vm83_vm1, %v32714_v0  ;;  %v310_v22 = vld [vmem:[%s32706_s0 + $0x88] sm:$0xff]  ;;  %v311_v23 = vld [vmem:[%s32706_s0 + $0x90] sm:$0xff] }
  0x43   :  { %99 = vst.msk [vmem:[#allocation2 + $0x168] sm:$0x1] %vm83_vm1, %v32714_v0  ;;  %100 = vst.msk [vmem:[#allocation2 + $0x180] sm:$0x1] %vm83_vm1, %v32714_v0  ;;  %v312_v24 = vld [vmem:[%s32706_s0 + $0x98] sm:$0xff]  ;;  %v313_v26 = vld [vmem:[%s32706_s0 + $0xa0] sm:$0xff] }
  0x44   :  { %103 = vst.msk [vmem:[#allocation2 + $0x1c8] sm:$0x1] %vm83_vm1, %v32714_v0  ;;  %104 = vst.msk [vmem:[#allocation2 + $0x1e0] sm:$0x1] %vm83_vm1, %v32714_v0  ;;  %v314_v27 = vld [vmem:[%s32706_s0 + $0xa8] sm:$0xff]  ;;  %v315_v30 = vld [vmem:[%s32706_s0 + $0xb0] sm:$0xff] }
  0x45   :  { %105 = vst.msk [vmem:[#allocation2 + $0x1f8] sm:$0x1] %vm83_vm1, %v32714_v0  ;;  %106 = vst.msk [vmem:[#allocation2 + $0x210] sm:$0x1] %vm83_vm1, %v32714_v0  ;;  %v316_v31 = vld [vmem:[%s32706_s0 + $0xb8] sm:$0xff]  ;;  %v317_v36 = vld [vmem:[%s32706_s0 + $0xc0] sm:$0xff] }
  0x46   :  { %107 = vst.msk [vmem:[#allocation2 + $0x228] sm:$0x1] %vm83_vm1, %v32714_v0  ;;  %108 = vst.msk [vmem:[#allocation2 + $0x240] sm:$0x1] %vm83_vm1, %v32714_v0  ;;  %v318_v37 = vld [vmem:[%s32706_s0 + $0xc8] sm:$0xff]  ;;  %v319_v38 = vld [vmem:[%s32706_s0 + $0xd0] sm:$0xff] }
  0x47   :  { %109 = vst.msk [vmem:[#allocation2 + $0x258] sm:$0x1] %vm83_vm1, %v32714_v0  ;;  %110 = vst.msk [vmem:[#allocation2 + $0x270] sm:$0x1] %vm83_vm1, %v32714_v0  ;;  %v320_v39 = vld [vmem:[%s32706_s0 + $0xd8] sm:$0xff]  ;;  %v321_v40 = vld [vmem:[%s32706_s0 + $0xe0] sm:$0xff] }
  0x48   :  { %111 = vst.msk [vmem:[#allocation2 + $0x288] sm:$0x1] %vm83_vm1, %v32714_v0  ;;  %112 = vst.msk [vmem:[#allocation2 + $0x2a0] sm:$0x1] %vm83_vm1, %v32714_v0  ;;  %v322_v43 = vld [vmem:[%s32706_s0 + $0xe8] sm:$0xff]  ;;  %v325_v44 = vld [vmem:[%s32706_s0 + $0x100] sm:$0xff] }
  0x49   :  { %113 = vst.msk [vmem:[#allocation2 + $0x2b8] sm:$0x1] %vm83_vm1, %v32714_v0  ;;  %114 = vst.msk [vmem:[#allocation2 + $0x2d0] sm:$0x1] %vm83_vm1, %v32714_v0  ;;  %v326_v45 = vld [vmem:[%s32706_s0 + $0x108] sm:$0xff]  ;;  %v327_v46 = vld [vmem:[%s32706_s0 + $0x110] sm:$0xff] }
  0x4a   :  { %115 = vst.msk [vmem:[#allocation2 + $0x2e8] sm:$0x1] %vm83_vm1, %v32714_v0  ;;  %116 = vst.msk [vmem:[#allocation2 + $0x300] sm:$0x1] %vm83_vm1, %v32714_v0  ;;  %v328_v48 = vld [vmem:[%s32706_s0 + $0x118] sm:$0xff]  ;;  %v329_v49 = vld [vmem:[%s32706_s0 + $0x120] sm:$0xff] }
  0x4b   :  { %117 = vst.msk [vmem:[#allocation2 + $0x318] sm:$0x1] %vm83_vm1, %v32714_v0  ;;  %118 = vst.msk [vmem:[#allocation2 + $0x330] sm:$0x1] %vm83_vm1, %v32714_v0  ;;  %v330_v50 = vld [vmem:[%s32706_s0 + $0x128] sm:$0xff]  ;;  %v331_v51 = vld [vmem:[%s32706_s0 + $0x130] sm:$0xff] }
  0x4c   :  { %121 = vst.msk [vmem:[#allocation2 + $0x29] sm:$0x1] %vm83_vm1, %v32714_v0  ;;  %122 = vst.msk [vmem:[#allocation2 + $0x41] sm:$0x1] %vm83_vm1, %v32714_v0  ;;  %v332_v52 = vld [vmem:[%s32706_s0 + $0x138] sm:$0xff]  ;;  %v333_v53 = vld [vmem:[%s32706_s0 + $0x140] sm:$0xff] }
  0x4d   :  { %123 = vst.msk [vmem:[#allocation2 + $0x59] sm:$0x1] %vm83_vm1, %v32714_v0  ;;  %124 = vst.msk [vmem:[#allocation2 + $0x71] sm:$0x1] %vm83_vm1, %v32714_v0  ;;  %v334_v54 = vld [vmem:[%s32706_s0 + $0x148] sm:$0xff]  ;;  %v335_v55 = vld [vmem:[%s32706_s0 + $0x150] sm:$0xff] }
  0x4e   :  { %125 = vst.msk [vmem:[#allocation2 + $0x89] sm:$0x1] %vm83_vm1, %v32714_v0  ;;  %126 = vst.msk [vmem:[#allocation2 + $0xa1] sm:$0x1] %vm83_vm1, %v32714_v0  ;;  %v336_v56 = vld [vmem:[%s32706_s0 + $0x158] sm:$0xff]  ;;  %v337_v58 = vld [vmem:[%s32706_s0 + $0x160] sm:$0xff] }
  0x4f   :  { %127 = vst.msk [vmem:[#allocation2 + $0xb9] sm:$0x1] %vm83_vm1, %v32714_v0  ;;  %128 = vst.msk [vmem:[#allocation2 + $0xd1] sm:$0x1] %vm83_vm1, %v32714_v0  ;;  %v338_v59 = vld [vmem:[%s32706_s0 + $0x168] sm:$0xff]  ;;  %v339_v60 = vld [vmem:[%s32706_s0 + $0x170] sm:$0xff] }
  0x50   :  { %129 = vst.msk [vmem:[#allocation2 + $0xe9] sm:$0x1] %vm83_vm1, %v32714_v0  ;;  %130 = vst.msk [vmem:[#allocation2 + $0x101] sm:$0x1] %vm83_vm1, %v32714_v0  ;;  %v340_v61 = vld [vmem:[%s32706_s0 + $0x178] sm:$0xff]  ;;  %v341_v63 = vld [vmem:[%s32706_s0 + $0x180] sm:$0xff] }
  0x51   :  { %131 = vst.msk [vmem:[#allocation2 + $0x119] sm:$0x1] %vm83_vm1, %v32714_v0  ;;  %132 = vst.msk [vmem:[#allocation2 + $0x131] sm:$0x1] %vm83_vm1, %v32714_v0  ;;  %v342_v1 = vld [vmem:[%s32706_s0 + $0x188] sm:$0xff]  ;;  %vm15206_vm9 = vcmask 1043459  }
  0x52   :  { %133 = vst.msk [vmem:[#allocation2 + $0x149] sm:$0x1] %vm83_vm1, %v32714_v0  ;;  %134 = vst.msk [vmem:[#allocation2 + $0x161] sm:$0x1] %vm83_vm1, %v32714_v0  ;;  %vm15208_vm10 = vcmask 1044484   ;;  %vm15210_vm11 = vcmask 1045509  }
  0x53   :  { %135 = vst.msk [vmem:[#allocation2 + $0x179] sm:$0x1] %vm83_vm1, %v32714_v0  ;;  %136 = vst.msk [vmem:[#allocation2 + $0x191] sm:$0x1] %vm83_vm1, %v32714_v0  ;;  %vm15212_vm12 = vcmask 1046534   ;;  %vm15214_vm13 = vcmask 1047559  }
  0x54   :  { %139 = vst.msk [vmem:[#allocation2 + $0x1d9] sm:$0x1] %vm83_vm1, %v32714_v0  ;;  %140 = vst.msk [vmem:[#allocation2 + $0x1f1] sm:$0x1] %vm83_vm1, %v32714_v0  ;;  %vm17564_vm14 = vcmask 130112   ;;  %vm17571_vm15 = vcmask 195712  }
  0x55   :  { %141 = vst.msk [vmem:[#allocation2 + $0x209] sm:$0x1] %vm83_vm1, %v32714_v0  ;;  %142 = vst.msk [vmem:[#allocation2 + $0x221] sm:$0x1] %vm83_vm1, %v32714_v0 }
  0x56   :  { %143 = vst.msk [vmem:[#allocation2 + $0x239] sm:$0x1] %vm83_vm1, %v32714_v0  ;;  %144 = vst.msk [vmem:[#allocation2 + $0x251] sm:$0x1] %vm83_vm1, %v32714_v0 }
  0x57   :  { %145 = vst.msk [vmem:[#allocation2 + $0x269] sm:$0x1] %vm83_vm1, %v32714_v0  ;;  %146 = vst.msk [vmem:[#allocation2 + $0x281] sm:$0x1] %vm83_vm1, %v32714_v0 }
  0x58   :  { %147 = vst.msk [vmem:[#allocation2 + $0x299] sm:$0x1] %vm83_vm1, %v32714_v0  ;;  %148 = vst.msk [vmem:[#allocation2 + $0x2b1] sm:$0x1] %vm83_vm1, %v32714_v0 }
  0x59   :  { %149 = vst.msk [vmem:[#allocation2 + $0x2c9] sm:$0x1] %vm83_vm1, %v32714_v0  ;;  %150 = vst.msk [vmem:[#allocation2 + $0x2e1] sm:$0x1] %vm83_vm1, %v32714_v0 }
  0x5a   :  { %151 = vst.msk [vmem:[#allocation2 + $0x2f9] sm:$0x1] %vm83_vm1, %v32714_v0  ;;  %152 = vst.msk [vmem:[#allocation2 + $0x311] sm:$0x1] %vm83_vm1, %v32714_v0 }
  0x5b   :  { %153 = vst.msk [vmem:[#allocation2 + $0x329] sm:$0x1] %vm83_vm1, %v32714_v0  ;;  %154 = vst.msk [vmem:[#allocation2 + $0x341] sm:$0x1] %vm83_vm1, %v32714_v0 }
  0x5c   :  { %84 = vst.msk [vmem:[#allocation2] sm:$0x1] %vm83_vm1, %v32714_v0  ;;  %101 = vst.msk [vmem:[#allocation2 + $0x198] sm:$0x1] %vm83_vm1, %v32714_v0 }
  0x5d   :  { %102 = vst.msk [vmem:[#allocation2 + $0x1b0] sm:$0x1] %vm83_vm1, %v32714_v0  ;;  %119 = vst.msk [vmem:[#allocation2 + $0x348] sm:$0x1] %vm83_vm1, %v32714_v0 }
  0x5e   :  { %72 = vst.msk [vmem:[#allocation2 + $0x10] sm:$0x3] %vm71_vm2, %v32714_v0  ;;  %75 = vst.msk [vmem:[#allocation2 + $0x1c0] sm:$0x3] %vm71_vm2, %v32714_v0 }
  0x5f   :  { %79 = vst.msk [vmem:[#allocation2 + $0x1a8] sm:$0x3] %vm71_vm2, %v32714_v0  ;;  %82 = vst.msk [vmem:[#allocation2 + $0x358] sm:$0x3] %vm71_vm2, %v32714_v0  ;;  %vm17592_vm2 = vcmask 392512  }
  0x60   :  { %120 = vst.msk [vmem:[#allocation2 + $0x11] sm:$0x1] %vm83_vm1, %v32714_v0  ;;  %137 = vst.msk [vmem:[#allocation2 + $0x1a9] sm:$0x1] %vm83_vm1, %v32714_v0 }
  0x61   :  { %138 = vst.msk [vmem:[#allocation2 + $0x1c1] sm:$0x1] %vm83_vm1, %v32714_v0  ;;  %155 = vst.msk [vmem:[#allocation2 + $0x359] sm:$0x1] %vm83_vm1, %v32714_v0  ;;  %vm17585_vm1 = vcmask 326912  }
  0x62   :  { %358 = vst.msk [vmem:[#allocation2 + $0x19] sm:$0xff] %vm68_vm0, %v293_v3  ;;  %359 = vst.msk [vmem:[#allocation2 + $0x21] sm:$0xff] %vm68_vm0, %v294_v5  ;;  %v343_v5 = vld [vmem:[%s32706_s0 + $0x190] sm:$0xff] }
  0x63   :  { %v423_v7 = vld [vmem:[#allocation2] sm:$0xff]  ;;  %360 = vst.msk [vmem:[#allocation2 + $0x31] sm:$0xff] %vm68_vm0, %v295_v6  ;;  %361 = vst.msk [vmem:[#allocation2 + $0x39] sm:$0xff] %vm68_vm0, %v296_v8  ;;  %v344_v6 = vld [vmem:[%s32706_s0 + $0x198] sm:$0xff] }
  0x64   :  { %22479 = vmatprep.mubr.msk.f32.mxu0 %vm68_vm0, %v423_v7  ;;  %362 = vst.msk [vmem:[#allocation2 + $0x49] sm:$0xff] %vm68_vm0, %v297_v9  ;;  %363 = vst.msk [vmem:[#allocation2 + $0x51] sm:$0xff] %vm68_vm0, %v298_v10  ;;  %v345_v7 = vld [vmem:[%s32706_s0 + $0x1a0] sm:$0xff]  ;;  %v346_v8 = vld [vmem:[%s32706_s0 + $0x1a8] sm:$0xff] }
  0x65   :  { %22480 = vmatmul.mubr.msk.f32.vlgmr.msra.gmra.mrb[0].mxu0 %vm68_vm0, %v424_v4  ;;  %364 = vst.msk [vmem:[#allocation2 + $0x61] sm:$0xff] %vm68_vm0, %v299_v11  ;;  %365 = vst.msk [vmem:[#allocation2 + $0x69] sm:$0xff] %vm68_vm0, %v300_v12  ;;  %v26738_v10 = vld [vmem:[%s32707_s1 + $0xc] sm:$0x7] }
  0x66   :  { %22576 = vmatpush3.msk.msra.mxu0 %vm746_vm3, %v19553_v2  ;;  %366 = vst.msk [vmem:[#allocation2 + $0x79] sm:$0xff] %vm68_vm0, %v301_v13  ;;  %367 = vst.msk [vmem:[#allocation2 + $0x81] sm:$0xff] %vm68_vm0, %v302_v14 }
  0x67   :  { %368 = vst.msk [vmem:[#allocation2 + $0x91] sm:$0xff] %vm68_vm0, %v303_v15  ;;  %369 = vst.msk [vmem:[#allocation2 + $0x99] sm:$0xff] %vm68_vm0, %v304_v16  ;;  %22673 = vmatprep.subr.msk.mxu0 %vm746_vm3, %v26738_v10 }
  0x68   :  { %370 = vst.msk [vmem:[#allocation2 + $0xa9] sm:$0xff] %vm68_vm0, %v305_v17  ;;  %371 = vst.msk [vmem:[#allocation2 + $0xb1] sm:$0xff] %vm68_vm0, %v306_v18 }
  0x69   :  { %372 = vst.msk [vmem:[#allocation2 + $0xc1] sm:$0xff] %vm68_vm0, %v307_v19  ;;  %373 = vst.msk [vmem:[#allocation2 + $0xc9] sm:$0xff] %vm68_vm0, %v308_v20  ;;  %v26542_v25 = vld [vmem:[#allocation2 + $0x18] sm:$0xff]  ;;  %v26555_v28 = vld [vmem:[#allocation2 + $0x20] sm:$0xff] }
  0x6a   :  { %374 = vst.msk [vmem:[#allocation2 + $0xd9] sm:$0xff] %vm68_vm0, %v309_v21  ;;  %375 = vst.msk [vmem:[#allocation2 + $0xe1] sm:$0xff] %vm68_vm0, %v310_v22  ;;  %22482 = vmatprep.mubr.msk.f32.mxu0 %vm68_vm0, %v26542_v25  ;;  %v26557_v29 = vld [vmem:[#allocation2 + $0x30] sm:$0xff]  ;;  %v26572_v32 = vld [vmem:[#allocation2 + $0x38] sm:$0xff] }
  0x6b   :  { %376 = vst.msk [vmem:[#allocation2 + $0xf1] sm:$0xff] %vm68_vm0, %v311_v23  ;;  %377 = vst.msk [vmem:[#allocation2 + $0xf9] sm:$0xff] %vm68_vm0, %v312_v24  ;;  %22483 = vmatmul.mubr.msk.f32.gmra.mrb[2].mxu0 %vm68_vm0, %v26555_v28  ;;  %v26575_v33 = vld [vmem:[#allocation2 + $0x48] sm:$0xff]  ;;  %v26581_v34 = vld [vmem:[#allocation2 + $0x50] sm:$0xff] }
  0x6c   :  { %378 = vst.msk [vmem:[#allocation2 + $0x109] sm:$0xff] %vm68_vm0, %v313_v26  ;;  %379 = vst.msk [vmem:[#allocation2 + $0x111] sm:$0xff] %vm68_vm0, %v314_v27  ;;  %22485 = vmatprep.mubr.msk.f32.mxu0 %vm68_vm0, %v26557_v29  ;;  %v26583_v35 = vld [vmem:[#allocation2 + $0x60] sm:$0xff]  ;;  %v26607_v41 = vld [vmem:[#allocation2 + $0x68] sm:$0xff] }
  0x6d   :  { %380 = vst.msk [vmem:[#allocation2 + $0x121] sm:$0xff] %vm68_vm0, %v315_v30  ;;  %381 = vst.msk [vmem:[#allocation2 + $0x129] sm:$0xff] %vm68_vm0, %v316_v31  ;;  %v26609_v42 = vld [vmem:[#allocation2 + $0x78] sm:$0xff]  ;;  %v26626_v47 = vld [vmem:[#allocation2 + $0x80] sm:$0xff] }
  0x6e   :  { %382 = vst.msk [vmem:[#allocation2 + $0x139] sm:$0xff] %vm68_vm0, %v317_v36  ;;  %383 = vst.msk [vmem:[#allocation2 + $0x141] sm:$0xff] %vm68_vm0, %v318_v37  ;;  %v26668_v57 = vld [vmem:[#allocation2 + $0x90] sm:$0xff]  ;;  %v26692_v62 = vld [vmem:[#allocation2 + $0x98] sm:$0xff] }
  0x6f   :  { %22486 = vmatmul.mubr.msk.f32.gmra.mrb[4].mxu0 %vm68_vm0, %v26572_v32  ;;  %384 = vst.msk [vmem:[#allocation2 + $0x151] sm:$0xff] %vm68_vm0, %v319_v38  ;;  %385 = vst.msk [vmem:[#allocation2 + $0x159] sm:$0xff] %vm68_vm0, %v320_v39  ;;  %v26701_v2 = vld [vmem:[#allocation2 + $0xa8] sm:$0xff]  ;;  %v26709_v3 = vld [vmem:[#allocation2 + $0xb0] sm:$0xff] }
  0x70   :  { %22488 = vmatprep.mubr.msk.f32.mxu0 %vm68_vm0, %v26575_v33  ;;  %386 = vst.msk [vmem:[#allocation2 + $0x169] sm:$0xff] %vm68_vm0, %v321_v40  ;;  %387 = vst.msk [vmem:[#allocation2 + $0x171] sm:$0xff] %vm68_vm0, %v322_v43  ;;  %v26711_v4 = vld [vmem:[#allocation2 + $0xc0] sm:$0xff]  ;;  %v26732_v9 = vld [vmem:[#allocation2 + $0xc8] sm:$0xff] }
  0x71   :  { %390 = vst.msk [vmem:[#allocation2 + $0x1c9] sm:$0xff] %vm68_vm0, %v325_v44  ;;  %391 = vst.msk [vmem:[#allocation2 + $0x1d1] sm:$0xff] %vm68_vm0, %v326_v45  ;;  %v26740_v11 = vld [vmem:[#allocation2 + $0xd8] sm:$0xff]  ;;  %v26748_v12 = vld [vmem:[#allocation2 + $0xe0] sm:$0xff] }
  0x72   :  { %392 = vst.msk [vmem:[#allocation2 + $0x1e1] sm:$0xff] %vm68_vm0, %v327_v46  ;;  %393 = vst.msk [vmem:[#allocation2 + $0x1e9] sm:$0xff] %vm68_vm0, %v328_v48  ;;  %v26750_v13 = vld [vmem:[#allocation2 + $0xf0] sm:$0xff]  ;;  %v26756_v14 = vld [vmem:[#allocation2 + $0xf8] sm:$0xff] }
  0x73   :  { %22489 = vmatmul.mubr.msk.f32.gmra.mrb[6].mxu0 %vm68_vm0, %v26581_v34  ;;  %394 = vst.msk [vmem:[#allocation2 + $0x1f9] sm:$0xff] %vm68_vm0, %v329_v49  ;;  %395 = vst.msk [vmem:[#allocation2 + $0x201] sm:$0xff] %vm68_vm0, %v330_v50  ;;  %v26758_v15 = vld [vmem:[#allocation2 + $0x108] sm:$0xff]  ;;  %v26764_v16 = vld [vmem:[#allocation2 + $0x110] sm:$0xff] }
  0x74   :  { %22491 = vmatprep.mubr.msk.f32.mxu0 %vm68_vm0, %v26583_v35  ;;  %396 = vst.msk [vmem:[#allocation2 + $0x211] sm:$0xff] %vm68_vm0, %v331_v51  ;;  %397 = vst.msk [vmem:[#allocation2 + $0x219] sm:$0xff] %vm68_vm0, %v332_v52  ;;  %v26766_v17 = vld [vmem:[#allocation2 + $0x120] sm:$0xff]  ;;  %v26772_v18 = vld [vmem:[#allocation2 + $0x128] sm:$0xff] }
  0x75   :  { %398 = vst.msk [vmem:[#allocation2 + $0x229] sm:$0xff] %vm68_vm0, %v333_v53  ;;  %399 = vst.msk [vmem:[#allocation2 + $0x231] sm:$0xff] %vm68_vm0, %v334_v54  ;;  %v26774_v19 = vld [vmem:[#allocation2 + $0x138] sm:$0xff]  ;;  %v26780_v20 = vld [vmem:[#allocation2 + $0x140] sm:$0xff] }
  0x76   :  { %400 = vst.msk [vmem:[#allocation2 + $0x241] sm:$0xff] %vm68_vm0, %v335_v55  ;;  %401 = vst.msk [vmem:[#allocation2 + $0x249] sm:$0xff] %vm68_vm0, %v336_v56  ;;  %v26782_v21 = vld [vmem:[#allocation2 + $0x150] sm:$0xff]  ;;  %v26788_v22 = vld [vmem:[#allocation2 + $0x158] sm:$0xff] }
  0x77   :  { %22492 = vmatmul.mubr.msk.f32.gmra.mrb[8].mxu0 %vm68_vm0, %v26607_v41  ;;  %402 = vst.msk [vmem:[#allocation2 + $0x259] sm:$0xff] %vm68_vm0, %v337_v58  ;;  %403 = vst.msk [vmem:[#allocation2 + $0x261] sm:$0xff] %vm68_vm0, %v338_v59  ;;  %v26790_v23 = vld [vmem:[#allocation2 + $0x168] sm:$0xff]  ;;  %v26796_v24 = vld [vmem:[#allocation2 + $0x170] sm:$0xff] }
  0x78   :  { %22494 = vmatprep.mubr.msk.f32.mxu0 %vm68_vm0, %v26609_v42  ;;  %404 = vst.msk [vmem:[#allocation2 + $0x271] sm:$0xff] %vm68_vm0, %v339_v60  ;;  %405 = vst.msk [vmem:[#allocation2 + $0x279] sm:$0xff] %vm68_vm0, %v340_v61  ;;  %v455_v26 = vld [vmem:[#allocation2 + $0x1b0] sm:$0xff]  ;;  %v456_v27 = vld [vmem:[#allocation2 + $0x1b8] sm:$0xff] }
  0x79   :  { %406 = vst.msk [vmem:[#allocation2 + $0x289] sm:$0xff] %vm68_vm0, %v341_v63  ;;  %407 = vst.msk [vmem:[#allocation2 + $0x291] sm:$0xff] %vm68_vm0, %v342_v1  ;;  %v26801_v30 = vld [vmem:[#allocation2 + $0x1c8] sm:$0xff]  ;;  %v26806_v31 = vld [vmem:[#allocation2 + $0x1d0] sm:$0xff] }
  0x7a   :  { %408 = vst.msk [vmem:[#allocation2 + $0x2a1] sm:$0xff] %vm68_vm0, %v343_v5  ;;  %409 = vst.msk [vmem:[#allocation2 + $0x2a9] sm:$0xff] %vm68_vm0, %v344_v6  ;;  %v26808_v36 = vld [vmem:[#allocation2 + $0x1e0] sm:$0xff]  ;;  %v26814_v37 = vld [vmem:[#allocation2 + $0x1e8] sm:$0xff] }
  0x7b   :  { %22495 = vmatmul.mubr.msk.f32.gmra.mrb[10].mxu0 %vm68_vm0, %v26626_v47  ;;  %410 = vst.msk [vmem:[#allocation2 + $0x2b9] sm:$0xff] %vm68_vm0, %v345_v7  ;;  %411 = vst.msk [vmem:[#allocation2 + $0x2c1] sm:$0xff] %vm68_vm0, %v346_v8  ;;  %v26816_v38 = vld [vmem:[#allocation2 + $0x1f8] sm:$0xff]  ;;  %v26822_v39 = vld [vmem:[#allocation2 + $0x200] sm:$0xff] }
  0x7c   :  { %22497 = vmatprep.mubr.msk.f32.mxu0 %vm68_vm0, %v26668_v57  ;;  %v26824_v40 = vld [vmem:[#allocation2 + $0x210] sm:$0xff]  ;;  %v26830_v43 = vld [vmem:[#allocation2 + $0x218] sm:$0xff]  ;;  %v26832_v44 = vld [vmem:[#allocation2 + $0x228] sm:$0xff] }
  0x7d   :  { %v26838_v45 = vld [vmem:[#allocation2 + $0x230] sm:$0xff]  ;;  %v26840_v46 = vld [vmem:[#allocation2 + $0x240] sm:$0xff]  ;;  %v26846_v48 = vld [vmem:[#allocation2 + $0x248] sm:$0xff] }
  0x7e   :  { %v26848_v49 = vld [vmem:[#allocation2 + $0x258] sm:$0xff]  ;;  %v347_v50 = vld [vmem:[%s32706_s0 + $0x1b0] sm:$0xff]  ;;  %v26862_v52 = vld [vmem:[#allocation2 + $0x260] sm:$0xff] }
  0x7f   :  { %22498 = vmatmul.mubr.msk.f32.gmra.mrb[12].mxu0 %vm68_vm0, %v26692_v62  ;;  %v348_v51 = vld [vmem:[%s32706_s0 + $0x1b8] sm:$0xff]  ;;  %412 = vst.msk [vmem:[#allocation2 + $0x2d1] sm:$0xff] %vm68_vm0, %v347_v50  ;;  %v26864_v53 = vld [vmem:[#allocation2 + $0x270] sm:$0xff]  ;;  %v349_v54 = vld [vmem:[%s32706_s0 + $0x1c0] sm:$0xff] }
  0x80   :  { %22500 = vmatprep.mubr.msk.f32.mxu0 %vm68_vm0, %v26701_v2  ;;  %413 = vst.msk [vmem:[#allocation2 + $0x2d9] sm:$0xff] %vm68_vm0, %v348_v51  ;;  %v350_v55 = vld [vmem:[%s32706_s0 + $0x1c8] sm:$0xff]  ;;  %414 = vst.msk [vmem:[#allocation2 + $0x2e9] sm:$0xff] %vm68_vm0, %v349_v54  ;;  %v26878_v56 = vld [vmem:[#allocation2 + $0x278] sm:$0xff] }
  0x81   :  { %415 = vst.msk [vmem:[#allocation2 + $0x2f1] sm:$0xff] %vm68_vm0, %v350_v55  ;;  %v26880_v58 = vld [vmem:[#allocation2 + $0x288] sm:$0xff]  ;;  %v351_v59 = vld [vmem:[%s32706_s0 + $0x1d0] sm:$0xff]  ;;  %v352_v60 = vld [vmem:[%s32706_s0 + $0x1d8] sm:$0xff] }
  0x82   :  { %416 = vst.msk [vmem:[#allocation2 + $0x301] sm:$0xff] %vm68_vm0, %v351_v59  ;;  %417 = vst.msk [vmem:[#allocation2 + $0x309] sm:$0xff] %vm68_vm0, %v352_v60  ;;  %v26894_v61 = vld [vmem:[#allocation2 + $0x290] sm:$0xff]  ;;  %v26896_v63 = vld [vmem:[#allocation2 + $0x2a0] sm:$0xff] }
  0x83   :  { %22501 = vmatmul.mubr.msk.f32.gmra.mrb[14].mxu0 %vm68_vm0, %v26709_v3  ;;  %v353_v1 = vld [vmem:[%s32706_s0 + $0x1e0] sm:$0xff]  ;;  %v354_v5 = vld [vmem:[%s32706_s0 + $0x1e8] sm:$0xff]  ;;  %v26912_v7 = vld [vmem:[#allocation2 + $0x2b8] sm:$0xff] }
  0x84   :  { %22503 = vmatprep.mubr.msk.f32.mxu0 %vm68_vm0, %v26711_v4  ;;  %418 = vst.msk [vmem:[#allocation2 + $0x319] sm:$0xff] %vm68_vm0, %v353_v1  ;;  %419 = vst.msk [vmem:[#allocation2 + $0x321] sm:$0xff] %vm68_vm0, %v354_v5  ;;  %v26910_v6 = vld [vmem:[#allocation2 + $0x2a8] sm:$0xff]  ;;  %v26918_v8 = vld [vmem:[#allocation2 + $0x2c0] sm:$0xff] }
  0x85   :  { %v26923_v50 = vld [vmem:[#allocation2 + $0x1a] sm:$0xff]  ;;  %v26928_v51 = vld [vmem:[%s32707_s1 + $0x10] sm:$0x7]  ;;  %v26935_v54 = vld [vmem:[#allocation2 + $0x22] sm:$0xff] }
  0x86   :  { %v26937_v55 = vld [vmem:[#allocation2 + $0x32] sm:$0xff]  ;;  %v26945_v59 = vld [vmem:[#allocation2 + $0x3a] sm:$0xff]  ;;  %v26947_v60 = vld [vmem:[#allocation2 + $0x4a] sm:$0xff] }
  0x87   :  { %22504 = vmatmul.mubr.msk.f32.gmra.mrb[16].mxu0 %vm68_vm0, %v26732_v9  ;;  %32876 = vst [vmem:[#allocation15_spill] sm:$0xff] %v26947_v60  ;;  %v26955_v1 = vld [vmem:[#allocation2 + $0x62] sm:$0xff]  ;;  %v26961_v5 = vld [vmem:[#allocation2 + $0x6a] sm:$0xff]  ;;  %v26971_v0 = vld [vmem:[#allocation2 + $0x92] sm:$0xff] }
  0x88   :  { %22506 = vmatprep.mubr.msk.f32.mxu0 %vm68_vm0, %v26740_v11  ;;  %32878 = vst [vmem:[#allocation17_spill] sm:$0xff] %v26955_v1  ;;  %32879 = vst [vmem:[#allocation18_spill] sm:$0xff] %v26961_v5 }
  0x89   :  { %32882 = vst [vmem:[#allocation21_spill] sm:$0xff] %v26971_v0 }
  0x8b   :  { %22507 = vmatmul.mubr.msk.f32.gmra.mrb[18].mxu0 %vm68_vm0, %v26748_v12 }
  0x8c   :  { %22509 = vmatprep.mubr.msk.f32.mxu0 %vm68_vm0, %v26750_v13 }
  0x8f   :  { %22510 = vmatmul.mubr.msk.f32.gmra.mrb[20].mxu0 %vm68_vm0, %v26756_v14 }
  0x90   :  { %22512 = vmatprep.mubr.msk.f32.mxu0 %vm68_vm0, %v26758_v15 }
  0x93   :  { %22513 = vmatmul.mubr.msk.f32.gmra.mrb[22].mxu0 %vm68_vm0, %v26764_v16 }
  0x94   :  { %22515 = vmatprep.mubr.msk.f32.mxu0 %vm68_vm0, %v26766_v17 }
  0x97   :  { %22516 = vmatmul.mubr.msk.f32.gmra.mrb[24].mxu0 %vm68_vm0, %v26772_v18 }
  0x98   :  { %22518 = vmatprep.mubr.msk.f32.mxu0 %vm68_vm0, %v26774_v19 }
  0x9b   :  { %22519 = vmatmul.mubr.msk.f32.gmra.mrb[26].mxu0 %vm68_vm0, %v26780_v20 }
  0x9c   :  { %22521 = vmatprep.mubr.msk.f32.mxu0 %vm68_vm0, %v26782_v21 }
  0x9f   :  { %22522 = vmatmul.mubr.msk.f32.gmra.mrb[28].mxu0 %vm68_vm0, %v26788_v22 }
  0xa0   :  { %22524 = vmatprep.mubr.msk.f32.mxu0 %vm68_vm0, %v26790_v23 }
  0xa3   :  { %22525 = vmatmul.mubr.msk.f32.gmra.mrb[30].mxu0 %vm68_vm0, %v26796_v24 }
  0xa4   :  { %22527 = vmatprep.mubr.msk.f32.mxu0 %vm68_vm0, %v455_v26  ;;  %v1715_v26 = vld [vmem:[#allocation2 + $0x2] sm:$0xff] }
  0xa7   :  { %22528 = vmatmul.mubr.msk.f32.gmra.mrb[32].mxu0 %vm68_vm0, %v456_v27  ;;  %v1716_v27 = vld [vmem:[#allocation2 + $0xa] sm:$0xff] }
  0xa8   :  { %22530 = vmatprep.mubr.msk.f32.mxu0 %vm68_vm0, %v26801_v30 }
  0xab   :  { %22531 = vmatmul.mubr.msk.f32.gmra.mrb[34].mxu0 %vm68_vm0, %v26806_v31 }
  0xac   :  { %22533 = vmatprep.mubr.msk.f32.mxu0 %vm68_vm0, %v26808_v36 }
  0xaf   :  { %22534 = vmatmul.mubr.msk.f32.gmra.mrb[36].mxu0 %vm68_vm0, %v26814_v37 }
  0xb0   :  { %22536 = vmatprep.mubr.msk.f32.mxu0 %vm68_vm0, %v26816_v38 }
  0xb3   :  { %22537 = vmatmul.mubr.msk.f32.gmra.mrb[38].mxu0 %vm68_vm0, %v26822_v39 }
  0xb4   :  { %22539 = vmatprep.mubr.msk.f32.mxu0 %vm68_vm0, %v26824_v40 }
  0xb7   :  { %22540 = vmatmul.mubr.msk.f32.gmra.mrb[40].mxu0 %vm68_vm0, %v26830_v43 }
  0xb8   :  { %22542 = vmatprep.mubr.msk.f32.mxu0 %vm68_vm0, %v26832_v44 }
  0xbb   :  { %22543 = vmatmul.mubr.msk.f32.gmra.mrb[42].mxu0 %vm68_vm0, %v26838_v45 }
  0xbc   :  { %22545 = vmatprep.mubr.msk.f32.mxu0 %vm68_vm0, %v26840_v46 }
  0xbf   :  { %22546 = vmatmul.mubr.msk.f32.gmra.mrb[44].mxu0 %vm68_vm0, %v26846_v48 }
  0xc0   :  { %22548 = vmatprep.mubr.msk.f32.mxu0 %vm68_vm0, %v26848_v49 }
  0xc3   :  { %22549 = vmatmul.mubr.msk.f32.gmra.mrb[46].mxu0 %vm68_vm0, %v26862_v52 }
  0xc4   :  { %22551 = vmatprep.mubr.msk.f32.mxu0 %vm68_vm0, %v26864_v53 }
  0xc7   :  { %22552 = vmatmul.mubr.msk.f32.gmra.mrb[48].mxu0 %vm68_vm0, %v26878_v56 }
  0xc8   :  { %22554 = vmatprep.mubr.msk.f32.mxu0 %vm68_vm0, %v26880_v58 }
  0xcb   :  { %22555 = vmatmul.mubr.msk.f32.gmra.mrb[50].mxu0 %vm68_vm0, %v26894_v61 }
  0xcc   :  { %22557 = vmatprep.mubr.msk.f32.mxu0 %vm68_vm0, %v26896_v63 }
  0xcf   :  { %22558 = vmatmul.mubr.msk.f32.gmra.mrb[52].mxu0 %vm68_vm0, %v26910_v6 }
  0xd0   :  { %22560 = vmatprep.mubr.msk.f32.mxu0 %vm68_vm0, %v26912_v7 }
  0xd3   :  { %22561 = vmatmul.mubr.msk.f32.gmra.mrb[54].mxu0 %vm68_vm0, %v26918_v8 }
  0xd4   :  { %22577 = vmatprep.mubr.msk.f32.mxu0 %vm68_vm0, %v1715_v26  ;;  %v26963_v26 = vld [vmem:[#allocation2 + $0x7a] sm:$0xff] }
  0xd5   :  { %32880 = vst [vmem:[#allocation19_spill] sm:$0xff] %v26963_v26 }
  0xd7   :  { %22578 = vmatmul.mubr.msk.f32.vlgmr.msra.gmra.mrb[0].mxu0 %vm68_vm0, %v1716_v27  ;;  %v26969_v27 = vld [vmem:[#allocation2 + $0x82] sm:$0xff] }
  0xd8   :  { %22674 = vmatpush3.msk.msra.mxu0 %vm746_vm3, %v26738_v10  ;;  %22580 = vmatprep.mubr.msk.f32.mxu0 %vm68_vm0, %v26923_v50  ;;  %v26953_v10 = vld [vmem:[#allocation2 + $0x52] sm:$0xff]  ;;  %32881 = vst [vmem:[#allocation20_spill] sm:$0xff] %v26969_v27 }
  0xd9   :  { %22771 = vmatprep.subr.msk.mxu0 %vm746_vm3, %v26928_v51  ;;  %32877 = vst [vmem:[#allocation16_spill] sm:$0xff] %v26953_v10 }
  0xdb   :  { %22581 = vmatmul.mubr.msk.f32.gmra.mrb[2].mxu0 %vm68_vm0, %v26935_v54 }
  0xdc   :  { %22583 = vmatprep.mubr.msk.f32.mxu0 %vm68_vm0, %v26937_v55 }
  0xdf   :  { %22584 = vmatmul.mubr.msk.f32.gmra.mrb[4].mxu0 %vm68_vm0, %v26945_v59 }
  0xe0   :  { %22586 = vmatprep.mubr.msk.f32.mxu0 %vm68_vm0, %v26947_v60  ;;  %v1747_v60 = vld [vmem:[#allocation2 + $0x1b2] sm:$0xff] }
  0xe3   :  { %22587 = vmatmul.mubr.msk.f32.gmra.mrb[6].mxu0 %vm68_vm0, %v26953_v10  ;;  %v26979_v10 = vld [vmem:[#allocation2 + $0xaa] sm:$0xff] }
  0xe4   :  { %22589 = vmatprep.mubr.msk.f32.mxu0 %vm68_vm0, %v26955_v1  ;;  %v26977_v1 = vld [vmem:[#allocation2 + $0x9a] sm:$0xff]  ;;  %32884 = vst [vmem:[#allocation23_spill] sm:$0xff] %v26979_v10 }
  0xe5   :  { %32883 = vst [vmem:[#allocation22_spill] sm:$0xff] %v26977_v1 }
  0xe7   :  { %22590 = vmatmul.mubr.msk.f32.gmra.mrb[8].mxu0 %vm68_vm0, %v26961_v5  ;;  %v26987_v5 = vld [vmem:[#allocation2 + $0xc2] sm:$0xff] }
  0xe8   :  { %22592 = vmatprep.mubr.msk.f32.mxu0 %vm68_vm0, %v26963_v26  ;;  %v26985_v26 = vld [vmem:[#allocation2 + $0xb2] sm:$0xff]  ;;  %32886 = vst [vmem:[#allocation25_spill] sm:$0xff] %v26987_v5 }
  0xe9   :  { %32885 = vst [vmem:[#allocation24_spill] sm:$0xff] %v26985_v26 }
  0xeb   :  { %22593 = vmatmul.mubr.msk.f32.gmra.mrb[10].mxu0 %vm68_vm0, %v26969_v27  ;;  %v26995_v27 = vld [vmem:[#allocation2 + $0xda] sm:$0xff] }
  0xec   :  { %22595 = vmatprep.mubr.msk.f32.mxu0 %vm68_vm0, %v26971_v0  ;;  %v26993_v0 = vld [vmem:[#allocation2 + $0xca] sm:$0xff]  ;;  %32888 = vst [vmem:[#allocation27_spill] sm:$0xff] %v26995_v27 }
  0xed   :  { %32887 = vst [vmem:[#allocation26_spill] sm:$0xff] %v26993_v0 }
  0xef   :  { %22596 = vmatmul.mubr.msk.f32.gmra.mrb[12].mxu0 %vm68_vm0, %v26977_v1  ;;  %v27003_v1 = vld [vmem:[#allocation2 + $0xf2] sm:$0xff] }
  0xf0   :  { %22598 = vmatprep.mubr.msk.f32.mxu0 %vm68_vm0, %v26979_v10  ;;  %v27001_v10 = vld [vmem:[#allocation2 + $0xe2] sm:$0xff]  ;;  %32890 = vst [vmem:[#allocation29_spill] sm:$0xff] %v27003_v1 }
  0xf1   :  { %32889 = vst [vmem:[#allocation28_spill] sm:$0xff] %v27001_v10 }
  0xf3   :  { %22599 = vmatmul.mubr.msk.f32.gmra.mrb[14].mxu0 %vm68_vm0, %v26985_v26  ;;  %v27011_v26 = vld [vmem:[#allocation2 + $0x10a] sm:$0xff] }
  0xf4   :  { %22601 = vmatprep.mubr.msk.f32.mxu0 %vm68_vm0, %v26987_v5  ;;  %v27009_v5 = vld [vmem:[#allocation2 + $0xfa] sm:$0xff]  ;;  %32892 = vst [vmem:[#allocation31_spill] sm:$0xff] %v27011_v26 }
  0xf5   :  { %32891 = vst [vmem:[#allocation30_spill] sm:$0xff] %v27009_v5 }
  0xf7   :  { %22602 = vmatmul.mubr.msk.f32.gmra.mrb[16].mxu0 %vm68_vm0, %v26993_v0  ;;  %v27019_v0 = vld [vmem:[#allocation2 + $0x122] sm:$0xff] }
  0xf8   :  { %22604 = vmatprep.mubr.msk.f32.mxu0 %vm68_vm0, %v26995_v27  ;;  %v27017_v27 = vld [vmem:[#allocation2 + $0x112] sm:$0xff]  ;;  %32894 = vst [vmem:[#allocation33_spill] sm:$0xff] %v27019_v0 }
  0xf9   :  { %32893 = vst [vmem:[#allocation32_spill] sm:$0xff] %v27017_v27 }
  0xfb   :  { %22605 = vmatmul.mubr.msk.f32.gmra.mrb[18].mxu0 %vm68_vm0, %v27001_v10  ;;  %v27027_v10 = vld [vmem:[#allocation2 + $0x13a] sm:$0xff] }
  0xfc   :  { %22607 = vmatprep.mubr.msk.f32.mxu0 %vm68_vm0, %v27003_v1  ;;  %v27025_v1 = vld [vmem:[#allocation2 + $0x12a] sm:$0xff]  ;;  %32896 = vst [vmem:[#allocation35_spill] sm:$0xff] %v27027_v10 }
  0xfd   :  { %32895 = vst [vmem:[#allocation34_spill] sm:$0xff] %v27025_v1 }
  0xff   :  { %22608 = vmatmul.mubr.msk.f32.gmra.mrb[20].mxu0 %vm68_vm0, %v27009_v5  ;;  %v27035_v5 = vld [vmem:[#allocation2 + $0x152] sm:$0xff] }
 0x100   :  { %22610 = vmatprep.mubr.msk.f32.mxu0 %vm68_vm0, %v27011_v26  ;;  %v27033_v26 = vld [vmem:[#allocation2 + $0x142] sm:$0xff]  ;;  %32898 = vst [vmem:[#allocation37_spill] sm:$0xff] %v27035_v5 }
 0x101   :  { %32897 = vst [vmem:[#allocation36_spill] sm:$0xff] %v27033_v26 }
 0x103   :  { %22611 = vmatmul.mubr.msk.f32.gmra.mrb[22].mxu0 %vm68_vm0, %v27017_v27  ;;  %v323_v27 = vld [vmem:[%s32706_s0 + $0xf0] sm:$0xff] }
 0x104   :  { %22613 = vmatprep.mubr.msk.f32.mxu0 %vm68_vm0, %v27019_v0  ;;  %388 = vst.msk [vmem:[#allocation2 + $0x181] sm:$0xff] %vm68_vm0, %v323_v27  ;;  %v324_v0 = vld [vmem:[%s32706_s0 + $0xf8] sm:$0xff] }
 0x105   :  { %389 = vst.msk [vmem:[#allocation2 + $0x189] sm:$0xff] %vm68_vm0, %v324_v0  ;;  %v27057_v27 = vld [vmem:[#allocation2 + $0x172] sm:$0xff]  ;;  %v1748_v0 = vld [vmem:[#allocation2 + $0x1ba] sm:$0xff] }
 0x106   :  { %32900 = vst [vmem:[#allocation39_spill] sm:$0xff] %v27057_v27 }
 0x107   :  { %22614 = vmatmul.mubr.msk.f32.gmra.mrb[24].mxu0 %vm68_vm0, %v27025_v1  ;;  %v27051_v1 = vld [vmem:[#allocation2 + $0x16a] sm:$0xff] }
 0x108   :  { %22616 = vmatprep.mubr.msk.f32.mxu0 %vm68_vm0, %v27027_v10  ;;  %v27049_v10 = vld [vmem:[#allocation2 + $0x15a] sm:$0xff] }
 0x109   :  { %32899 = vst [vmem:[#allocation38_spill] sm:$0xff] %v27049_v10 }
 0x10b   :  { %22617 = vmatmul.mubr.msk.f32.gmra.mrb[26].mxu0 %vm68_vm0, %v27033_v26  ;;  %v27069_v26 = vld [vmem:[#allocation2 + $0x1e2] sm:$0xff] }
 0x10c   :  { %22619 = vmatprep.mubr.msk.f32.mxu0 %vm68_vm0, %v27035_v5  ;;  %v27062_v5 = vld [vmem:[#allocation2 + $0x1ca] sm:$0xff]  ;;  %32903 = vst [vmem:[#allocation42_spill] sm:$0xff] %v27069_v26 }
 0x10d   :  { %32901 = vst [vmem:[#allocation40_spill] sm:$0xff] %v27062_v5 }
 0x10f   :  { %22620 = vmatmul.mubr.msk.f32.gmra.mrb[28].mxu0 %vm68_vm0, %v27049_v10  ;;  %v27067_v10 = vld [vmem:[#allocation2 + $0x1d2] sm:$0xff] }
 0x110   :  { %22622 = vmatprep.mubr.msk.f32.mxu0 %vm68_vm0, %v27051_v1  ;;  %32902 = vst [vmem:[#allocation41_spill] sm:$0xff] %v27067_v10 }
 0x113   :  { %22623 = vmatmul.mubr.msk.f32.gmra.mrb[30].mxu0 %vm68_vm0, %v27057_v27  ;;  %v27075_v27 = vld [vmem:[#allocation2 + $0x1ea] sm:$0xff] }
 0x114   :  { %22625 = vmatprep.mubr.msk.f32.mxu0 %vm68_vm0, %v1747_v60  ;;  %32904 = vst [vmem:[#allocation43_spill] sm:$0xff] %v27075_v27  ;;  %v27077_v60 = vld [vmem:[#allocation2 + $0x1fa] sm:$0xff] }
 0x115   :  { %32905 = vst [vmem:[#allocation44_spill] sm:$0xff] %v27077_v60 }
 0x117   :  { %22626 = vmatmul.mubr.msk.f32.gmra.mrb[32].mxu0 %vm68_vm0, %v1748_v0  ;;  %v27083_v0 = vld [vmem:[#allocation2 + $0x202] sm:$0xff] }
 0x118   :  { %22628 = vmatprep.mubr.msk.f32.mxu0 %vm68_vm0, %v27062_v5  ;;  %32906 = vst [vmem:[#allocation45_spill] sm:$0xff] %v27083_v0  ;;  %v27085_v5 = vld [vmem:[#allocation2 + $0x212] sm:$0xff] }
 0x119   :  { %32907 = vst [vmem:[#allocation46_spill] sm:$0xff] %v27085_v5 }
 0x11b   :  { %22629 = vmatmul.mubr.msk.f32.gmra.mrb[34].mxu0 %vm68_vm0, %v27067_v10  ;;  %v27093_v10 = vld [vmem:[#allocation2 + $0x22a] sm:$0xff] }
 0x11c   :  { %22631 = vmatprep.mubr.msk.f32.mxu0 %vm68_vm0, %v27069_v26  ;;  %v27091_v26 = vld [vmem:[#allocation2 + $0x21a] sm:$0xff]  ;;  %32909 = vst [vmem:[#allocation48_spill] sm:$0xff] %v27093_v10 }
 0x11d   :  { %32908 = vst [vmem:[#allocation47_spill] sm:$0xff] %v27091_v26 }
 0x11f   :  { %22632 = vmatmul.mubr.msk.f32.gmra.mrb[36].mxu0 %vm68_vm0, %v27075_v27  ;;  %v27101_v27 = vld [vmem:[#allocation2 + $0x242] sm:$0xff] }
 0x120   :  { %22634 = vmatprep.mubr.msk.f32.mxu0 %vm68_vm0, %v27077_v60  ;;  %v27099_v60 = vld [vmem:[#allocation2 + $0x232] sm:$0xff]  ;;  %32911 = vst [vmem:[#allocation50_spill] sm:$0xff] %v27101_v27 }
 0x121   :  { %32910 = vst [vmem:[#allocation49_spill] sm:$0xff] %v27099_v60 }
 0x123   :  { %22635 = vmatmul.mubr.msk.f32.gmra.mrb[38].mxu0 %vm68_vm0, %v27083_v0  ;;  %v27109_v0 = vld [vmem:[#allocation2 + $0x25a] sm:$0xff] }
 0x124   :  { %22637 = vmatprep.mubr.msk.f32.mxu0 %vm68_vm0, %v27085_v5  ;;  %v27107_v5 = vld [vmem:[#allocation2 + $0x24a] sm:$0xff]  ;;  %32913 = vst [vmem:[#allocation52_spill] sm:$0xff] %v27109_v0 }
 0x125   :  { %32912 = vst [vmem:[#allocation51_spill] sm:$0xff] %v27107_v5 }
 0x127   :  { %22638 = vmatmul.mubr.msk.f32.gmra.mrb[40].mxu0 %vm68_vm0, %v27091_v26  ;;  %v27117_v26 = vld [vmem:[#allocation2 + $0x272] sm:$0xff] }
 0x128   :  { %22640 = vmatprep.mubr.msk.f32.mxu0 %vm68_vm0, %v27093_v10  ;;  %v27115_v10 = vld [vmem:[#allocation2 + $0x262] sm:$0xff]  ;;  %32915 = vst [vmem:[#allocation54_spill] sm:$0xff] %v27117_v26 }
 0x129   :  { %32914 = vst [vmem:[#allocation53_spill] sm:$0xff] %v27115_v10 }
 0x12b   :  { %22641 = vmatmul.mubr.msk.f32.gmra.mrb[42].mxu0 %vm68_vm0, %v27099_v60  ;;  %v27125_v60 = vld [vmem:[#allocation2 + $0x28a] sm:$0xff] }
 0x12c   :  { %22643 = vmatprep.mubr.msk.f32.mxu0 %vm68_vm0, %v27101_v27  ;;  %v27123_v27 = vld [vmem:[#allocation2 + $0x27a] sm:$0xff]  ;;  %32917 = vst [vmem:[#allocation56_spill] sm:$0xff] %v27125_v60 }
 0x12d   :  { %32916 = vst [vmem:[#allocation55_spill] sm:$0xff] %v27123_v27 }
 0x12f   :  { %22644 = vmatmul.mubr.msk.f32.gmra.mrb[44].mxu0 %vm68_vm0, %v27107_v5  ;;  %v27133_v5 = vld [vmem:[#allocation2 + $0x2a2] sm:$0xff] }
 0x130   :  { %22646 = vmatprep.mubr.msk.f32.mxu0 %vm68_vm0, %v27109_v0  ;;  %v27131_v0 = vld [vmem:[#allocation2 + $0x292] sm:$0xff]  ;;  %32919 = vst [vmem:[#allocation58_spill] sm:$0xff] %v27133_v5 }
 0x131   :  { %32918 = vst [vmem:[#allocation57_spill] sm:$0xff] %v27131_v0 }
 0x133   :  { %22647 = vmatmul.mubr.msk.f32.gmra.mrb[46].mxu0 %vm68_vm0, %v27115_v10  ;;  %v27141_v10 = vld [vmem:[#allocation2 + $0x2ba] sm:$0xff] }
 0x134   :  { %22649 = vmatprep.mubr.msk.f32.mxu0 %vm68_vm0, %v27117_v26  ;;  %v27139_v26 = vld [vmem:[#allocation2 + $0x2aa] sm:$0xff]  ;;  %32921 = vst [vmem:[#allocation60_spill] sm:$0xff] %v27141_v10 }
 0x135   :  { %32920 = vst [vmem:[#allocation59_spill] sm:$0xff] %v27139_v26 }
 0x137   :  { %22650 = vmatmul.mubr.msk.f32.gmra.mrb[48].mxu0 %vm68_vm0, %v27123_v27  ;;  %v27149_v27 = vld [vmem:[#allocation2 + $0x2d2] sm:$0xff] }
 0x138   :  { %22652 = vmatprep.mubr.msk.f32.mxu0 %vm68_vm0, %v27125_v60  ;;  %v27147_v60 = vld [vmem:[#allocation2 + $0x2c2] sm:$0xff]  ;;  %32923 = vst [vmem:[#allocation62_spill] sm:$0xff] %v27149_v27 }
 0x139   :  { %32922 = vst [vmem:[#allocation61_spill] sm:$0xff] %v27147_v60 }
 0x13b   :  { %22653 = vmatmul.mubr.msk.f32.gmra.mrb[50].mxu0 %vm68_vm0, %v27131_v0  ;;  %v27157_v0 = vld [vmem:[#allocation2 + $0x2ea] sm:$0xff] }
 0x13c   :  { %22655 = vmatprep.mubr.msk.f32.mxu0 %vm68_vm0, %v27133_v5  ;;  %v27155_v5 = vld [vmem:[#allocation2 + $0x2da] sm:$0xff]  ;;  %32925 = vst [vmem:[#allocation64_spill] sm:$0xff] %v27157_v0 }
 0x13d   :  { %32924 = vst [vmem:[#allocation63_spill] sm:$0xff] %v27155_v5 }
 0x13f   :  { %22656 = vmatmul.mubr.msk.f32.gmra.mrb[52].mxu0 %vm68_vm0, %v27139_v26  ;;  %v27165_v26 = vld [vmem:[#allocation2 + $0x302] sm:$0xff] }
 0x140   :  { %22658 = vmatprep.mubr.msk.f32.mxu0 %vm68_vm0, %v27141_v10  ;;  %v27163_v10 = vld [vmem:[#allocation2 + $0x2f2] sm:$0xff] }
 0x143   :  { %22659 = vmatmul.mubr.msk.f32.gmra.mrb[54].mxu0 %vm68_vm0, %v27147_v60  ;;  %v355_v60 = vld [vmem:[%s32706_s0 + $0x1f0] sm:$0xff] }
 0x144   :  { %22661 = vmatprep.mubr.msk.f32.mxu0 %vm68_vm0, %v27149_v27  ;;  %420 = vst.msk [vmem:[#allocation2 + $0x331] sm:$0xff] %vm68_vm0, %v355_v60  ;;  %v356_v27 = vld [vmem:[%s32706_s0 + $0x1f8] sm:$0xff]  ;;  %v27187_v60 = vld [vmem:[#allocation2 + $0x322] sm:$0xff] }
 0x145   :  { %421 = vst.msk [vmem:[#allocation2 + $0x339] sm:$0xff] %vm68_vm0, %v356_v27  ;;  %v27196_v27 = vld [vmem:[%s32707_s1 + $0x14] sm:$0x7] }
 0x147   :  { %22662 = vmatmul.mubr.msk.f32.gmra.mrb[56].mxu0 %vm68_vm0, %v27155_v5  ;;  %v27181_v5 = vld [vmem:[#allocation2 + $0x31a] sm:$0xff] }
 0x148   :  { %22664 = vmatprep.mubr.msk.f32.mxu0 %vm68_vm0, %v27157_v0  ;;  %v27179_v0 = vld [vmem:[#allocation2 + $0x30a] sm:$0xff] }
 0x14b   :  { %22665 = vmatmul.mubr.msk.f32.gmra.mrb[58].mxu0 %vm68_vm0, %v27163_v10 }
 0x14c   :  { %22667 = vmatprep.mubr.msk.f32.mxu0 %vm68_vm0, %v27165_v26 }
 0x14f   :  { %22668 = vmatmul.mubr.msk.f32.gmra.mrb[60].mxu0 %vm68_vm0, %v27179_v0 }
 0x150   :  { %22670 = vmatprep.mubr.msk.f32.mxu0 %vm68_vm0, %v27181_v5 }
 0x153   :  { %22671 = vmatmul.mubr.msk.f32.gmra.mrb[62].mxu0 %vm68_vm0, %v27187_v60 }
 0x154   :  { %22675 = vmatprep.mubr.msk.f32.mxu0 %vm68_vm0, %v26542_v25  ;;  %v27258_v25 = vld [vmem:[#allocation2 + $0x180] sm:$0xff] }
 0x157   :  { %22676 = vmatmul.mubr.msk.f32.vlgmr.msra.gmra.mrb[0].mxu0 %vm68_vm0, %v26555_v28  ;;  %v27264_v28 = vld [vmem:[#allocation2 + $0x188] sm:$0xff] }
 0x158   :  { %22772 = vmatpush3.msk.msra.mxu0 %vm746_vm3, %v26928_v51  ;;  %22678 = vmatprep.mubr.msk.f32.mxu0 %vm68_vm0, %v26557_v29  ;;  %v27310_v29 = vld [vmem:[#allocation2 + $0x2d0] sm:$0xff]  ;;  %v27511_v51 = vld [vmem:[#allocation2 + $0x219] sm:$0xff] }
 0x159   :  { %22869 = vmatprep.subr.msk.mxu0 %vm746_vm3, %v27196_v27  ;;  %32928 = vst [vmem:[#allocation67_spill] sm:$0xff] %v27511_v51 }
 0x15b   :  { %22679 = vmatmul.mubr.msk.f32.gmra.mrb[2].mxu0 %vm68_vm0, %v26572_v32  ;;  %v27316_v32 = vld [vmem:[#allocation2 + $0x2d8] sm:$0xff] }
 0x15c   :  { %22681 = vmatprep.mubr.msk.f32.mxu0 %vm68_vm0, %v26575_v33  ;;  %v27318_v33 = vld [vmem:[#allocation2 + $0x2e8] sm:$0xff] }
 0x15f   :  { %22682 = vmatmul.mubr.msk.f32.gmra.mrb[4].mxu0 %vm68_vm0, %v26581_v34  ;;  %v27324_v34 = vld [vmem:[#allocation2 + $0x2f0] sm:$0xff] }
 0x160   :  { %22684 = vmatprep.mubr.msk.f32.mxu0 %vm68_vm0, %v26583_v35  ;;  %v27326_v35 = vld [vmem:[#allocation2 + $0x300] sm:$0xff] }
 0x163   :  { %22685 = vmatmul.mubr.msk.f32.gmra.mrb[6].mxu0 %vm68_vm0, %v26607_v41  ;;  %v27332_v41 = vld [vmem:[#allocation2 + $0x308] sm:$0xff] }
 0x164   :  { %22687 = vmatprep.mubr.msk.f32.mxu0 %vm68_vm0, %v26609_v42  ;;  %v27334_v42 = vld [vmem:[#allocation2 + $0x318] sm:$0xff] }
 0x167   :  { %22688 = vmatmul.mubr.msk.f32.gmra.mrb[8].mxu0 %vm68_vm0, %v26626_v47  ;;  %v27340_v47 = vld [vmem:[#allocation2 + $0x320] sm:$0xff] }
 0x168   :  { %22690 = vmatprep.mubr.msk.f32.mxu0 %vm68_vm0, %v26668_v57  ;;  %v27342_v57 = vld [vmem:[#allocation2 + $0x330] sm:$0xff] }
 0x16b   :  { %22691 = vmatmul.mubr.msk.f32.gmra.mrb[10].mxu0 %vm68_vm0, %v26692_v62  ;;  %v27348_v62 = vld [vmem:[#allocation2 + $0x338] sm:$0xff] }
 0x16c   :  { %22693 = vmatprep.mubr.msk.f32.mxu0 %vm68_vm0, %v26701_v2  ;;  %v27350_v2 = vld [vmem:[#allocation2 + $0x19] sm:$0xff] }
 0x16f   :  { %22694 = vmatmul.mubr.msk.f32.gmra.mrb[12].mxu0 %vm68_vm0, %v26709_v3  ;;  %v27356_v3 = vld [vmem:[#allocation2 + $0x21] sm:$0xff] }
 0x170   :  { %22696 = vmatprep.mubr.msk.f32.mxu0 %vm68_vm0, %v26711_v4  ;;  %v27358_v4 = vld [vmem:[#allocation2 + $0x31] sm:$0xff] }
 0x173   :  { %22697 = vmatmul.mubr.msk.f32.gmra.mrb[14].mxu0 %vm68_vm0, %v26732_v9  ;;  %v27363_v9 = vld [vmem:[%s32707_s1 + $0x18] sm:$0x7] }
 0x174   :  { %22699 = vmatprep.mubr.msk.f32.mxu0 %vm68_vm0, %v26740_v11  ;;  %v27371_v11 = vld [vmem:[#allocation2 + $0x39] sm:$0xff] }
 0x177   :  { %22700 = vmatmul.mubr.msk.f32.gmra.mrb[16].mxu0 %vm68_vm0, %v26748_v12  ;;  %v27373_v12 = vld [vmem:[#allocation2 + $0x49] sm:$0xff] }
 0x178   :  { %22702 = vmatprep.mubr.msk.f32.mxu0 %vm68_vm0, %v26750_v13  ;;  %v27381_v13 = vld [vmem:[#allocation2 + $0x51] sm:$0xff] }
 0x17b   :  { %22703 = vmatmul.mubr.msk.f32.gmra.mrb[18].mxu0 %vm68_vm0, %v26756_v14  ;;  %v27383_v14 = vld [vmem:[#allocation2 + $0x61] sm:$0xff] }
 0x17c   :  { %22705 = vmatprep.mubr.msk.f32.mxu0 %vm68_vm0, %v26758_v15  ;;  %v27389_v15 = vld [vmem:[#allocation2 + $0x69] sm:$0xff] }
 0x17f   :  { %22706 = vmatmul.mubr.msk.f32.gmra.mrb[20].mxu0 %vm68_vm0, %v26764_v16  ;;  %v27391_v16 = vld [vmem:[#allocation2 + $0x79] sm:$0xff] }
 0x180   :  { %22708 = vmatprep.mubr.msk.f32.mxu0 %vm68_vm0, %v26766_v17  ;;  %v27397_v17 = vld [vmem:[#allocation2 + $0x81] sm:$0xff] }
 0x183   :  { %22709 = vmatmul.mubr.msk.f32.gmra.mrb[22].mxu0 %vm68_vm0, %v26772_v18  ;;  %v27399_v18 = vld [vmem:[#allocation2 + $0x91] sm:$0xff] }
 0x184   :  { %22711 = vmatprep.mubr.msk.f32.mxu0 %vm68_vm0, %v26774_v19  ;;  %v27405_v19 = vld [vmem:[#allocation2 + $0x99] sm:$0xff] }
 0x187   :  { %22712 = vmatmul.mubr.msk.f32.gmra.mrb[24].mxu0 %vm68_vm0, %v26780_v20  ;;  %v27407_v20 = vld [vmem:[#allocation2 + $0xa9] sm:$0xff] }
 0x188   :  { %22714 = vmatprep.mubr.msk.f32.mxu0 %vm68_vm0, %v26782_v21  ;;  %v27413_v21 = vld [vmem:[#allocation2 + $0xb1] sm:$0xff] }
 0x18b   :  { %22715 = vmatmul.mubr.msk.f32.gmra.mrb[26].mxu0 %vm68_vm0, %v26788_v22  ;;  %v27415_v22 = vld [vmem:[#allocation2 + $0xc1] sm:$0xff] }
 0x18c   :  { %22717 = vmatprep.mubr.msk.f32.mxu0 %vm68_vm0, %v26790_v23  ;;  %v27421_v23 = vld [vmem:[#allocation2 + $0xc9] sm:$0xff] }
 0x18f   :  { %22718 = vmatmul.mubr.msk.f32.gmra.mrb[28].mxu0 %vm68_vm0, %v26796_v24  ;;  %v27423_v24 = vld [vmem:[#allocation2 + $0xd9] sm:$0xff] }
 0x190   :  { %22720 = vmatprep.mubr.msk.f32.mxu0 %vm68_vm0, %v27258_v25 }
 0x193   :  { %22721 = vmatmul.mubr.msk.f32.gmra.mrb[30].mxu0 %vm68_vm0, %v27264_v28 }
 0x194   :  { %22723 = vmatprep.mubr.msk.f32.mxu0 %vm68_vm0, %v26801_v30  ;;  %v27429_v30 = vld [vmem:[#allocation2 + $0xe1] sm:$0xff] }
 0x197   :  { %22724 = vmatmul.mubr.msk.f32.gmra.mrb[32].mxu0 %vm68_vm0, %v26806_v31  ;;  %v27431_v31 = vld [vmem:[#allocation2 + $0xf1] sm:$0xff] }
 0x198   :  { %22726 = vmatprep.mubr.msk.f32.mxu0 %vm68_vm0, %v26808_v36  ;;  %v27437_v36 = vld [vmem:[#allocation2 + $0xf9] sm:$0xff] }
 0x19b   :  { %22727 = vmatmul.mubr.msk.f32.gmra.mrb[34].mxu0 %vm68_vm0, %v26814_v37  ;;  %v27439_v37 = vld [vmem:[#allocation2 + $0x109] sm:$0xff] }
 0x19c   :  { %22729 = vmatprep.mubr.msk.f32.mxu0 %vm68_vm0, %v26816_v38  ;;  %v27445_v38 = vld [vmem:[#allocation2 + $0x111] sm:$0xff] }
 0x19f   :  { %22730 = vmatmul.mubr.msk.f32.gmra.mrb[36].mxu0 %vm68_vm0, %v26822_v39  ;;  %v27447_v39 = vld [vmem:[#allocation2 + $0x121] sm:$0xff] }
 0x1a0   :  { %22732 = vmatprep.mubr.msk.f32.mxu0 %vm68_vm0, %v26824_v40  ;;  %v27453_v40 = vld [vmem:[#allocation2 + $0x129] sm:$0xff] }
 0x1a3   :  { %22733 = vmatmul.mubr.msk.f32.gmra.mrb[38].mxu0 %vm68_vm0, %v26830_v43  ;;  %v27455_v43 = vld [vmem:[#allocation2 + $0x139] sm:$0xff] }
 0x1a4   :  { %22735 = vmatprep.mubr.msk.f32.mxu0 %vm68_vm0, %v26832_v44  ;;  %v27461_v44 = vld [vmem:[#allocation2 + $0x141] sm:$0xff] }
 0x1a7   :  { %22736 = vmatmul.mubr.msk.f32.gmra.mrb[40].mxu0 %vm68_vm0, %v26838_v45  ;;  %v27463_v45 = vld [vmem:[#allocation2 + $0x151] sm:$0xff] }
 0x1a8   :  { %22738 = vmatprep.mubr.msk.f32.mxu0 %vm68_vm0, %v26840_v46  ;;  %v27469_v46 = vld [vmem:[#allocation2 + $0x159] sm:$0xff] }
 0x1ab   :  { %22739 = vmatmul.mubr.msk.f32.gmra.mrb[42].mxu0 %vm68_vm0, %v26846_v48  ;;  %v27471_v48 = vld [vmem:[#allocation2 + $0x169] sm:$0xff] }
 0x1ac   :  { %22741 = vmatprep.mubr.msk.f32.mxu0 %vm68_vm0, %v26848_v49  ;;  %v27477_v49 = vld [vmem:[#allocation2 + $0x171] sm:$0xff] }
 0x1af   :  { %22742 = vmatmul.mubr.msk.f32.gmra.mrb[44].mxu0 %vm68_vm0, %v26862_v52  ;;  %v27479_v52 = vld [vmem:[#allocation2 + $0x181] sm:$0xff] }
 0x1b0   :  { %22744 = vmatprep.mubr.msk.f32.mxu0 %vm68_vm0, %v26864_v53  ;;  %v27485_v53 = vld [vmem:[#allocation2 + $0x189] sm:$0xff] }
 0x1b3   :  { %22745 = vmatmul.mubr.msk.f32.gmra.mrb[46].mxu0 %vm68_vm0, %v26878_v56  ;;  %v3167_v56 = vld [vmem:[#allocation2 + $0x1c9] sm:$0xff] }
 0x1b4   :  { %22747 = vmatprep.mubr.msk.f32.mxu0 %vm68_vm0, %v26880_v58  ;;  %v3168_v58 = vld [vmem:[#allocation2 + $0x1d1] sm:$0xff] }
 0x1b7   :  { %22748 = vmatmul.mubr.msk.f32.gmra.mrb[48].mxu0 %vm68_vm0, %v26894_v61  ;;  %v27490_v61 = vld [vmem:[#allocation2 + $0x1e1] sm:$0xff] }
 0x1b8   :  { %22750 = vmatprep.mubr.msk.f32.mxu0 %vm68_vm0, %v26896_v63  ;;  %v27495_v63 = vld [vmem:[#allocation2 + $0x1e9] sm:$0xff] }
 0x1bb   :  { %22751 = vmatmul.mubr.msk.f32.gmra.mrb[50].mxu0 %vm68_vm0, %v26910_v6  ;;  %v27497_v6 = vld [vmem:[#allocation2 + $0x1f9] sm:$0xff] }
 0x1bc   :  { %22753 = vmatprep.mubr.msk.f32.mxu0 %vm68_vm0, %v26912_v7  ;;  %v27503_v7 = vld [vmem:[#allocation2 + $0x201] sm:$0xff] }
 0x1bd   :  { %32926 = vst [vmem:[#allocation65_spill] sm:$0xff] %v27503_v7 }
 0x1bf   :  { %22754 = vmatmul.mubr.msk.f32.gmra.mrb[52].mxu0 %vm68_vm0, %v26918_v8  ;;  %v27505_v8 = vld [vmem:[#allocation2 + $0x211] sm:$0xff] }
 0x1c0   :  { %22756 = vmatprep.mubr.msk.f32.mxu0 %vm68_vm0, %v27310_v29  ;;  %32927 = vst [vmem:[#allocation66_spill] sm:$0xff] %v27505_v8 }
 0x1c3   :  { %22757 = vmatmul.mubr.msk.f32.gmra.mrb[54].mxu0 %vm68_vm0, %v27316_v32 }
 0x1c4   :  { %22759 = vmatprep.mubr.msk.f32.mxu0 %vm68_vm0, %v27318_v33 }
 0x1c7   :  { %22760 = vmatmul.mubr.msk.f32.gmra.mrb[56].mxu0 %vm68_vm0, %v27324_v34 }
 0x1c8   :  { %22762 = vmatprep.mubr.msk.f32.mxu0 %vm68_vm0, %v27326_v35 }
 0x1cb   :  { %22763 = vmatmul.mubr.msk.f32.gmra.mrb[58].mxu0 %vm68_vm0, %v27332_v41 }
 0x1cc   :  { %22765 = vmatprep.mubr.msk.f32.mxu0 %vm68_vm0, %v27334_v42 }
 0x1cf   :  { %22766 = vmatmul.mubr.msk.f32.gmra.mrb[60].mxu0 %vm68_vm0, %v27340_v47 }
 0x1d0   :  { %22768 = vmatprep.mubr.msk.f32.mxu0 %vm68_vm0, %v27342_v57 }
 0x1d3   :  { %22769 = vmatmul.mubr.msk.f32.gmra.mrb[62].mxu0 %vm68_vm0, %v27348_v62 }
 0x1d4   :  { %22773 = vmatprep.mubr.msk.f32.mxu0 %vm68_vm0, %v27350_v2 }
 0x1d7   :  { %22774 = vmatmul.mubr.msk.f32.vlgmr.msra.gmra.mrb[0].mxu0 %vm68_vm0, %v27356_v3 }
 0x1d8   :  { %22870 = vmatpush3.msk.msra.mxu0 %vm746_vm3, %v27196_v27  ;;  %22776 = vmatprep.mubr.msk.f32.mxu0 %vm68_vm0, %v27358_v4  ;;  %v27513_v27 = vld [vmem:[#allocation2 + $0x229] sm:$0xff] }
 0x1d9   :  { %22967 = vmatprep.subr.msk.mxu0 %vm746_vm3, %v27363_v9  ;;  %32929 = vst [vmem:[#allocation68_spill] sm:$0xff] %v27513_v27 }
 0x1db   :  { %22777 = vmatmul.mubr.msk.f32.gmra.mrb[2].mxu0 %vm68_vm0, %v27371_v11 }
 0x1dc   :  { %22779 = vmatprep.mubr.msk.f32.mxu0 %vm68_vm0, %v27373_v12 }
 0x1df   :  { %22780 = vmatmul.mubr.msk.f32.gmra.mrb[4].mxu0 %vm68_vm0, %v27381_v13 }
 0x1e0   :  { %22782 = vmatprep.mubr.msk.f32.mxu0 %vm68_vm0, %v27383_v14 }
 0x1e3   :  { %22783 = vmatmul.mubr.msk.f32.gmra.mrb[6].mxu0 %vm68_vm0, %v27389_v15 }
 0x1e4   :  { %22785 = vmatprep.mubr.msk.f32.mxu0 %vm68_vm0, %v27391_v16 }
 0x1e7   :  { %22786 = vmatmul.mubr.msk.f32.gmra.mrb[8].mxu0 %vm68_vm0, %v27397_v17 }
 0x1e8   :  { %22788 = vmatprep.mubr.msk.f32.mxu0 %vm68_vm0, %v27399_v18 }
 0x1eb   :  { %22789 = vmatmul.mubr.msk.f32.gmra.mrb[10].mxu0 %vm68_vm0, %v27405_v19 }
 0x1ec   :  { %22791 = vmatprep.mubr.msk.f32.mxu0 %vm68_vm0, %v27407_v20 }
 0x1ef   :  { %22792 = vmatmul.mubr.msk.f32.gmra.mrb[12].mxu0 %vm68_vm0, %v27413_v21 }
 0x1f0   :  { %22794 = vmatprep.mubr.msk.f32.mxu0 %vm68_vm0, %v27415_v22 }
 0x1f3   :  { %22795 = vmatmul.mubr.msk.f32.gmra.mrb[14].mxu0 %vm68_vm0, %v27421_v23 }
 0x1f4   :  { %22797 = vmatprep.mubr.msk.f32.mxu0 %vm68_vm0, %v27423_v24 }
 0x1f7   :  { %22798 = vmatmul.mubr.msk.f32.gmra.mrb[16].mxu0 %vm68_vm0, %v27429_v30 }
 0x1f8   :  { %22800 = vmatprep.mubr.msk.f32.mxu0 %vm68_vm0, %v27431_v31 }
 0x1fb   :  { %22801 = vmatmul.mubr.msk.f32.gmra.mrb[18].mxu0 %vm68_vm0, %v27437_v36 }
 0x1fc   :  { %22803 = vmatprep.mubr.msk.f32.mxu0 %vm68_vm0, %v27439_v37 }
 0x1ff   :  { %22804 = vmatmul.mubr.msk.f32.gmra.mrb[20].mxu0 %vm68_vm0, %v27445_v38 }
 0x200   :  { %22806 = vmatprep.mubr.msk.f32.mxu0 %vm68_vm0, %v27447_v39 }
 0x203   :  { %22807 = vmatmul.mubr.msk.f32.gmra.mrb[22].mxu0 %vm68_vm0, %v27453_v40 }
 0x204   :  { %22809 = vmatprep.mubr.msk.f32.mxu0 %vm68_vm0, %v27455_v43 }
 0x207   :  { %22810 = vmatmul.mubr.msk.f32.gmra.mrb[24].mxu0 %vm68_vm0, %v27461_v44 }
 0x208   :  { %22812 = vmatprep.mubr.msk.f32.mxu0 %vm68_vm0, %v27463_v45 }
 0x20b   :  { %22813 = vmatmul.mubr.msk.f32.gmra.mrb[26].mxu0 %vm68_vm0, %v27469_v46 }
 0x20c   :  { %22815 = vmatprep.mubr.msk.f32.mxu0 %vm68_vm0, %v27471_v48 }
 0x20f   :  { %22816 = vmatmul.mubr.msk.f32.gmra.mrb[28].mxu0 %vm68_vm0, %v27477_v49 }
 0x210   :  { %22818 = vmatprep.mubr.msk.f32.mxu0 %vm68_vm0, %v27479_v52 }
 0x213   :  { %22819 = vmatmul.mubr.msk.f32.gmra.mrb[30].mxu0 %vm68_vm0, %v27485_v53 }
 0x214   :  { %22821 = vmatprep.mubr.msk.f32.mxu0 %vm68_vm0, %v3167_v56  ;;  %v27519_v56 = vld [vmem:[#allocation2 + $0x231] sm:$0xff] }
 0x215   :  { %32930 = vst [vmem:[#allocation69_spill] sm:$0xff] %v27519_v56 }
 0x217   :  { %22822 = vmatmul.mubr.msk.f32.gmra.mrb[32].mxu0 %vm68_vm0, %v3168_v58  ;;  %v27521_v58 = vld [vmem:[#allocation2 + $0x241] sm:$0xff] }
 0x218   :  { %22824 = vmatprep.mubr.msk.f32.mxu0 %vm68_vm0, %v27490_v61  ;;  %32931 = vst [vmem:[#allocation70_spill] sm:$0xff] %v27521_v58 }
 0x21b   :  { %22825 = vmatmul.mubr.msk.f32.gmra.mrb[34].mxu0 %vm68_vm0, %v27495_v63 }
 0x21c   :  { %22827 = vmatprep.mubr.msk.f32.mxu0 %vm68_vm0, %v27497_v6 }
 0x21f   :  { %22828 = vmatmul.mubr.msk.f32.gmra.mrb[36].mxu0 %vm68_vm0, %v27503_v7  ;;  %v27529_v7 = vld [vmem:[#allocation2 + $0x259] sm:$0xff] }
 0x220   :  { %22830 = vmatprep.mubr.msk.f32.mxu0 %vm68_vm0, %v27505_v8  ;;  %v27527_v8 = vld [vmem:[#allocation2 + $0x249] sm:$0xff]  ;;  %32933 = vst [vmem:[#allocation72_spill] sm:$0xff] %v27529_v7 }
 0x221   :  { %32932 = vst [vmem:[#allocation71_spill] sm:$0xff] %v27527_v8 }
 0x223   :  { %22831 = vmatmul.mubr.msk.f32.gmra.mrb[38].mxu0 %vm68_vm0, %v27511_v51  ;;  %v27537_v51 = vld [vmem:[#allocation2 + $0x271] sm:$0xff] }
 0x224   :  { %22833 = vmatprep.mubr.msk.f32.mxu0 %vm68_vm0, %v27513_v27  ;;  %v27535_v27 = vld [vmem:[#allocation2 + $0x261] sm:$0xff]  ;;  %32935 = vst [vmem:[#allocation74_spill] sm:$0xff] %v27537_v51 }
 0x225   :  { %32934 = vst [vmem:[#allocation73_spill] sm:$0xff] %v27535_v27 }
 0x227   :  { %22834 = vmatmul.mubr.msk.f32.gmra.mrb[40].mxu0 %vm68_vm0, %v27519_v56  ;;  %v27545_v56 = vld [vmem:[#allocation2 + $0x289] sm:$0xff] }
 0x228   :  { %22836 = vmatprep.mubr.msk.f32.mxu0 %vm68_vm0, %v27521_v58  ;;  %v27543_v58 = vld [vmem:[#allocation2 + $0x279] sm:$0xff]  ;;  %32937 = vst [vmem:[#allocation76_spill] sm:$0xff] %v27545_v56 }
 0x229   :  { %32936 = vst [vmem:[#allocation75_spill] sm:$0xff] %v27543_v58 }
 0x22b   :  { %22837 = vmatmul.mubr.msk.f32.gmra.mrb[42].mxu0 %vm68_vm0, %v27527_v8  ;;  %v27553_v8 = vld [vmem:[#allocation2 + $0x2a1] sm:$0xff] }
 0x22c   :  { %22839 = vmatprep.mubr.msk.f32.mxu0 %vm68_vm0, %v27529_v7  ;;  %v27551_v7 = vld [vmem:[#allocation2 + $0x291] sm:$0xff]  ;;  %32939 = vst [vmem:[#allocation78_spill] sm:$0xff] %v27553_v8 }
 0x22d   :  { %32938 = vst [vmem:[#allocation77_spill] sm:$0xff] %v27551_v7 }
 0x22f   :  { %22840 = vmatmul.mubr.msk.f32.gmra.mrb[44].mxu0 %vm68_vm0, %v27535_v27  ;;  %v27561_v27 = vld [vmem:[#allocation2 + $0x2b9] sm:$0xff] }
 0x230   :  { %22842 = vmatprep.mubr.msk.f32.mxu0 %vm68_vm0, %v27537_v51  ;;  %v27559_v51 = vld [vmem:[#allocation2 + $0x2a9] sm:$0xff]  ;;  %32941 = vst [vmem:[#allocation80_spill] sm:$0xff] %v27561_v27 }
 0x231   :  { %32940 = vst [vmem:[#allocation79_spill] sm:$0xff] %v27559_v51 }
 0x233   :  { %22843 = vmatmul.mubr.msk.f32.gmra.mrb[46].mxu0 %vm68_vm0, %v27543_v58  ;;  %v27569_v58 = vld [vmem:[#allocation2 + $0x2d1] sm:$0xff] }
 0x234   :  { %22845 = vmatprep.mubr.msk.f32.mxu0 %vm68_vm0, %v27545_v56  ;;  %v27567_v56 = vld [vmem:[#allocation2 + $0x2c1] sm:$0xff]  ;;  %32943 = vst [vmem:[#allocation82_spill] sm:$0xff] %v27569_v58 }
 0x235   :  { %32942 = vst [vmem:[#allocation81_spill] sm:$0xff] %v27567_v56 }
 0x237   :  { %22846 = vmatmul.mubr.msk.f32.gmra.mrb[48].mxu0 %vm68_vm0, %v27551_v7  ;;  %v27577_v7 = vld [vmem:[#allocation2 + $0x2e9] sm:$0xff] }
 0x238   :  { %22848 = vmatprep.mubr.msk.f32.mxu0 %vm68_vm0, %v27553_v8  ;;  %v27575_v8 = vld [vmem:[#allocation2 + $0x2d9] sm:$0xff]  ;;  %32945 = vst [vmem:[#allocation84_spill] sm:$0xff] %v27577_v7 }
 0x239   :  { %32944 = vst [vmem:[#allocation83_spill] sm:$0xff] %v27575_v8 }
 0x23b   :  { %22849 = vmatmul.mubr.msk.f32.gmra.mrb[50].mxu0 %vm68_vm0, %v27559_v51  ;;  %v27585_v51 = vld [vmem:[#allocation2 + $0x301] sm:$0xff] }
 0x23c   :  { %22851 = vmatprep.mubr.msk.f32.mxu0 %vm68_vm0, %v27561_v27  ;;  %v27583_v27 = vld [vmem:[#allocation2 + $0x2f1] sm:$0xff]  ;;  %32946 = vst [vmem:[#allocation85_spill] sm:$0xff] %v27585_v51 }
 0x23f   :  { %22852 = vmatmul.mubr.msk.f32.gmra.mrb[52].mxu0 %vm68_vm0, %v27567_v56  ;;  %v27593_v56 = vld [vmem:[#allocation2 + $0x319] sm:$0xff] }
 0x240   :  { %22854 = vmatprep.mubr.msk.f32.mxu0 %vm68_vm0, %v27569_v58  ;;  %v27591_v58 = vld [vmem:[#allocation2 + $0x309] sm:$0xff]  ;;  %32947 = vst [vmem:[#allocation86_spill] sm:$0xff] %v27593_v56 }
 0x243   :  { %22855 = vmatmul.mubr.msk.f32.gmra.mrb[54].mxu0 %vm68_vm0, %v27575_v8  ;;  %v27601_v8 = vld [vmem:[#allocation2 + $0x331] sm:$0xff] }
 0x244   :  { %22857 = vmatprep.mubr.msk.f32.mxu0 %vm68_vm0, %v27577_v7  ;;  %v27599_v7 = vld [vmem:[#allocation2 + $0x321] sm:$0xff]  ;;  %32949 = vst [vmem:[#allocation88_spill] sm:$0xff] %v27601_v8 }
 0x245   :  { %32948 = vst [vmem:[#allocation87_spill] sm:$0xff] %v27599_v7 }
 0x247   :  { %22858 = vmatmul.mubr.msk.f32.gmra.mrb[56].mxu0 %vm68_vm0, %v27583_v27 }
 0x248   :  { %22860 = vmatprep.mubr.msk.f32.mxu0 %vm68_vm0, %v27585_v51  ;;  %v27607_v51 = vld [vmem:[#allocation2 + $0x339] sm:$0xff] }
 0x249   :  { %32950 = vst [vmem:[#allocation89_spill] sm:$0xff] %v27607_v51 }
 0x24b   :  { %22861 = vmatmul.mubr.msk.f32.gmra.mrb[58].mxu0 %vm68_vm0, %v27591_v58 }
 0x24c   :  { %22863 = vmatprep.mubr.msk.f32.mxu0 %vm68_vm0, %v27593_v56  ;;  %v27616_v56 = vld [vmem:[%s32707_s1 + $0x1c] sm:$0x7] }
 0x24f   :  { %22864 = vmatmul.mubr.msk.f32.gmra.mrb[60].mxu0 %vm68_vm0, %v27599_v7  ;;  %v32957_v7 = vld [vmem:[#allocation21_spill] sm:$0xff] }
 0x250   :  { %22866 = vmatprep.mubr.msk.f32.mxu0 %vm68_vm0, %v27601_v8  ;;  %v32953_v8 = vld [vmem:[#allocation17_spill] sm:$0xff] }
 0x253   :  { %22867 = vmatmul.mubr.msk.f32.gmra.mrb[62].mxu0 %vm68_vm0, %v27607_v51  ;;  %v32952_v51 = vld [vmem:[#allocation16_spill] sm:$0xff] }
 0x254   :  { %22871 = vmatprep.mubr.msk.f32.mxu0 %vm68_vm0, %v26923_v50  ;;  %v32951_v50 = vld [vmem:[#allocation15_spill] sm:$0xff] }
 0x257   :  { %22872 = vmatmul.mubr.msk.f32.vlgmr.msra.gmra.mrb[0].mxu0 %vm68_vm0, %v26935_v54  ;;  %v32954_v54 = vld [vmem:[#allocation18_spill] sm:$0xff] }
 0x258   :  { %22968 = vmatpush3.msk.msra.mxu0 %vm746_vm3, %v27363_v9  ;;  %22874 = vmatprep.mubr.msk.f32.mxu0 %vm68_vm0, %v26937_v55  ;;  %v32955_v9 = vld [vmem:[#allocation19_spill] sm:$0xff]  ;;  %v32956_v55 = vld [vmem:[#allocation20_spill] sm:$0xff] }
 0x259   :  { %23065 = vmatprep.subr.msk.mxu0 %vm746_vm3, %v27616_v56 }
 0x25b   :  { %22875 = vmatmul.mubr.msk.f32.gmra.mrb[2].mxu0 %vm68_vm0, %v26945_v59  ;;  %v32958_v59 = vld [vmem:[#allocation22_spill] sm:$0xff] }
 0x25c   :  { %22877 = vmatprep.mubr.msk.f32.mxu0 %vm68_vm0, %v32951_v50  ;;  %v32959_v50 = vld [vmem:[#allocation23_spill] sm:$0xff] }
 0x25f   :  { %22878 = vmatmul.mubr.msk.f32.gmra.mrb[4].mxu0 %vm68_vm0, %v32952_v51  ;;  %v32960_v51 = vld [vmem:[#allocation24_spill] sm:$0xff] }
 0x260   :  { %22880 = vmatprep.mubr.msk.f32.mxu0 %vm68_vm0, %v32953_v8  ;;  %v32961_v8 = vld [vmem:[#allocation25_spill] sm:$0xff] }
 0x263   :  { %22881 = vmatmul.mubr.msk.f32.gmra.mrb[6].mxu0 %vm68_vm0, %v32954_v54  ;;  %v32962_v54 = vld [vmem:[#allocation26_spill] sm:$0xff] }
 0x264   :  { %22883 = vmatprep.mubr.msk.f32.mxu0 %vm68_vm0, %v32955_v9  ;;  %v32963_v9 = vld [vmem:[#allocation27_spill] sm:$0xff] }
 0x267   :  { %22884 = vmatmul.mubr.msk.f32.gmra.mrb[8].mxu0 %vm68_vm0, %v32956_v55  ;;  %v32964_v55 = vld [vmem:[#allocation28_spill] sm:$0xff] }
 0x268   :  { %22886 = vmatprep.mubr.msk.f32.mxu0 %vm68_vm0, %v32957_v7  ;;  %v32965_v7 = vld [vmem:[#allocation29_spill] sm:$0xff] }
 0x26b   :  { %22887 = vmatmul.mubr.msk.f32.gmra.mrb[10].mxu0 %vm68_vm0, %v32958_v59  ;;  %v32966_v59 = vld [vmem:[#allocation30_spill] sm:$0xff] }
 0x26c   :  { %22889 = vmatprep.mubr.msk.f32.mxu0 %vm68_vm0, %v32959_v50  ;;  %v32967_v50 = vld [vmem:[#allocation31_spill] sm:$0xff] }
 0x26f   :  { %22890 = vmatmul.mubr.msk.f32.gmra.mrb[12].mxu0 %vm68_vm0, %v32960_v51  ;;  %v32968_v51 = vld [vmem:[#allocation32_spill] sm:$0xff] }
 0x270   :  { %22892 = vmatprep.mubr.msk.f32.mxu0 %vm68_vm0, %v32961_v8  ;;  %v32969_v8 = vld [vmem:[#allocation33_spill] sm:$0xff] }
 0x273   :  { %22893 = vmatmul.mubr.msk.f32.gmra.mrb[14].mxu0 %vm68_vm0, %v32962_v54  ;;  %v32970_v54 = vld [vmem:[#allocation34_spill] sm:$0xff] }
 0x274   :  { %22895 = vmatprep.mubr.msk.f32.mxu0 %vm68_vm0, %v32963_v9  ;;  %v32971_v9 = vld [vmem:[#allocation35_spill] sm:$0xff] }
 0x277   :  { %22896 = vmatmul.mubr.msk.f32.gmra.mrb[16].mxu0 %vm68_vm0, %v32964_v55  ;;  %v32972_v55 = vld [vmem:[#allocation36_spill] sm:$0xff] }
 0x278   :  { %22898 = vmatprep.mubr.msk.f32.mxu0 %vm68_vm0, %v32965_v7  ;;  %v32973_v7 = vld [vmem:[#allocation37_spill] sm:$0xff] }
 0x27b   :  { %22899 = vmatmul.mubr.msk.f32.gmra.mrb[18].mxu0 %vm68_vm0, %v32966_v59  ;;  %v32974_v59 = vld [vmem:[#allocation38_spill] sm:$0xff] }
 0x27c   :  { %22901 = vmatprep.mubr.msk.f32.mxu0 %vm68_vm0, %v32967_v50  ;;  %v27678_v50 = vld [vmem:[#allocation2 + $0x182] sm:$0xff] }
 0x27f   :  { %22902 = vmatmul.mubr.msk.f32.gmra.mrb[20].mxu0 %vm68_vm0, %v32968_v51  ;;  %v32975_v51 = vld [vmem:[#allocation39_spill] sm:$0xff] }
 0x280   :  { %22904 = vmatprep.mubr.msk.f32.mxu0 %vm68_vm0, %v32969_v8  ;;  %v27684_v8 = vld [vmem:[#allocation2 + $0x18a] sm:$0xff] }
 0x281   :  { %32976 = vst [vmem:[#allocation15_spill] sm:$0xff] %v27684_v8 }
 0x283   :  { %22905 = vmatmul.mubr.msk.f32.gmra.mrb[22].mxu0 %vm68_vm0, %v32970_v54  ;;  %v32977_v54 = vld [vmem:[#allocation40_spill] sm:$0xff] }
 0x284   :  { %22907 = vmatprep.mubr.msk.f32.mxu0 %vm68_vm0, %v32971_v9  ;;  %v32978_v9 = vld [vmem:[#allocation41_spill] sm:$0xff] }
 0x287   :  { %22908 = vmatmul.mubr.msk.f32.gmra.mrb[24].mxu0 %vm68_vm0, %v32972_v55  ;;  %v32980_v55 = vld [vmem:[#allocation43_spill] sm:$0xff] }
 0x288   :  { %22910 = vmatprep.mubr.msk.f32.mxu0 %vm68_vm0, %v32973_v7  ;;  %v32981_v7 = vld [vmem:[#allocation44_spill] sm:$0xff] }
 0x28b   :  { %22911 = vmatmul.mubr.msk.f32.gmra.mrb[26].mxu0 %vm68_vm0, %v32974_v59  ;;  %v32982_v59 = vld [vmem:[#allocation45_spill] sm:$0xff] }
 0x28c   :  { %22913 = vmatprep.mubr.msk.f32.mxu0 %vm68_vm0, %v27051_v1  ;;  %v32979_v1 = vld [vmem:[#allocation42_spill] sm:$0xff] }
 0x28f   :  { %22914 = vmatmul.mubr.msk.f32.gmra.mrb[28].mxu0 %vm68_vm0, %v32975_v51  ;;  %v32983_v51 = vld [vmem:[#allocation46_spill] sm:$0xff] }
 0x290   :  { %22916 = vmatprep.mubr.msk.f32.mxu0 %vm68_vm0, %v27678_v50 }
 0x293   :  { %22917 = vmatmul.mubr.msk.f32.gmra.mrb[30].mxu0 %vm68_vm0, %v27684_v8  ;;  %v32984_v8 = vld [vmem:[#allocation47_spill] sm:$0xff] }
 0x294   :  { %22919 = vmatprep.mubr.msk.f32.mxu0 %vm68_vm0, %v32977_v54  ;;  %v32985_v54 = vld [vmem:[#allocation48_spill] sm:$0xff] }
 0x297   :  { %22920 = vmatmul.mubr.msk.f32.gmra.mrb[32].mxu0 %vm68_vm0, %v32978_v9  ;;  %v32986_v9 = vld [vmem:[#allocation49_spill] sm:$0xff] }
 0x298   :  { %22922 = vmatprep.mubr.msk.f32.mxu0 %vm68_vm0, %v32979_v1  ;;  %v32987_v1 = vld [vmem:[#allocation50_spill] sm:$0xff] }
 0x29b   :  { %22923 = vmatmul.mubr.msk.f32.gmra.mrb[34].mxu0 %vm68_vm0, %v32980_v55  ;;  %v32988_v55 = vld [vmem:[#allocation51_spill] sm:$0xff] }
 0x29c   :  { %22925 = vmatprep.mubr.msk.f32.mxu0 %vm68_vm0, %v32981_v7  ;;  %v32989_v7 = vld [vmem:[#allocation52_spill] sm:$0xff] }
 0x29f   :  { %22926 = vmatmul.mubr.msk.f32.gmra.mrb[36].mxu0 %vm68_vm0, %v32982_v59  ;;  %v32990_v59 = vld [vmem:[#allocation53_spill] sm:$0xff] }
 0x2a0   :  { %22928 = vmatprep.mubr.msk.f32.mxu0 %vm68_vm0, %v32983_v51  ;;  %v32991_v51 = vld [vmem:[#allocation54_spill] sm:$0xff] }
 0x2a3   :  { %22929 = vmatmul.mubr.msk.f32.gmra.mrb[38].mxu0 %vm68_vm0, %v32984_v8  ;;  %v32992_v8 = vld [vmem:[#allocation55_spill] sm:$0xff] }
 0x2a4   :  { %22931 = vmatprep.mubr.msk.f32.mxu0 %vm68_vm0, %v32985_v54  ;;  %v32993_v54 = vld [vmem:[#allocation56_spill] sm:$0xff] }
 0x2a7   :  { %22932 = vmatmul.mubr.msk.f32.gmra.mrb[40].mxu0 %vm68_vm0, %v32986_v9  ;;  %v32994_v9 = vld [vmem:[#allocation57_spill] sm:$0xff] }
 0x2a8   :  { %22934 = vmatprep.mubr.msk.f32.mxu0 %vm68_vm0, %v32987_v1  ;;  %v32995_v1 = vld [vmem:[#allocation58_spill] sm:$0xff] }
 0x2ab   :  { %22935 = vmatmul.mubr.msk.f32.gmra.mrb[42].mxu0 %vm68_vm0, %v32988_v55  ;;  %v32996_v55 = vld [vmem:[#allocation59_spill] sm:$0xff] }
 0x2ac   :  { %22937 = vmatprep.mubr.msk.f32.mxu0 %vm68_vm0, %v32989_v7  ;;  %v32997_v7 = vld [vmem:[#allocation60_spill] sm:$0xff] }
 0x2af   :  { %22938 = vmatmul.mubr.msk.f32.gmra.mrb[44].mxu0 %vm68_vm0, %v32990_v59  ;;  %v32998_v59 = vld [vmem:[#allocation61_spill] sm:$0xff] }
 0x2b0   :  { %22940 = vmatprep.mubr.msk.f32.mxu0 %vm68_vm0, %v32991_v51  ;;  %v32999_v51 = vld [vmem:[#allocation62_spill] sm:$0xff] }
 0x2b3   :  { %22941 = vmatmul.mubr.msk.f32.gmra.mrb[46].mxu0 %vm68_vm0, %v32992_v8  ;;  %v33000_v8 = vld [vmem:[#allocation63_spill] sm:$0xff] }
 0x2b4   :  { %22943 = vmatprep.mubr.msk.f32.mxu0 %vm68_vm0, %v32993_v54  ;;  %v33001_v54 = vld [vmem:[#allocation64_spill] sm:$0xff] }
 0x2b7   :  { %22944 = vmatmul.mubr.msk.f32.gmra.mrb[48].mxu0 %vm68_vm0, %v32994_v9  ;;  %v3907_v9 = vld [vmem:[#allocation2 + $0x332] sm:$0xff] }
 0x2b8   :  { %22946 = vmatprep.mubr.msk.f32.mxu0 %vm68_vm0, %v32995_v1  ;;  %v3908_v1 = vld [vmem:[#allocation2 + $0x33a] sm:$0xff] }
 0x2bb   :  { %22947 = vmatmul.mubr.msk.f32.gmra.mrb[50].mxu0 %vm68_vm0, %v32996_v55  ;;  %v4556_v55 = vld [vmem:[#allocation2 + $0x30] sm:$0xff] }
 0x2bc   :  { %22949 = vmatprep.mubr.msk.f32.mxu0 %vm68_vm0, %v32997_v7  ;;  %v4561_v7 = vld [vmem:[#allocation2 + $0x68] sm:$0xff] }
 0x2bf   :  { %22950 = vmatmul.mubr.msk.f32.gmra.mrb[52].mxu0 %vm68_vm0, %v32998_v59  ;;  %v4562_v59 = vld [vmem:[#allocation2 + $0x78] sm:$0xff] }
 0x2c0   :  { %22952 = vmatprep.mubr.msk.f32.mxu0 %vm68_vm0, %v32999_v51  ;;  %v4563_v51 = vld [vmem:[#allocation2 + $0x80] sm:$0xff] }
 0x2c3   :  { %22953 = vmatmul.mubr.msk.f32.gmra.mrb[54].mxu0 %vm68_vm0, %v33000_v8  ;;  %v4564_v8 = vld [vmem:[#allocation2 + $0x90] sm:$0xff] }
 0x2c4   :  { %22955 = vmatprep.mubr.msk.f32.mxu0 %vm68_vm0, %v33001_v54  ;;  %v4566_v54 = vld [vmem:[#allocation2 + $0xa8] sm:$0xff] }
 0x2c7   :  { %22956 = vmatmul.mubr.msk.f32.gmra.mrb[56].mxu0 %vm68_vm0, %v27163_v10  ;;  %v4557_v10 = vld [vmem:[#allocation2 + $0x38] sm:$0xff] }
 0x2c8   :  { %22958 = vmatprep.mubr.msk.f32.mxu0 %vm68_vm0, %v27165_v26  ;;  %v4558_v26 = vld [vmem:[#allocation2 + $0x48] sm:$0xff] }
 0x2cb   :  { %22959 = vmatmul.mubr.msk.f32.gmra.mrb[58].mxu0 %vm68_vm0, %v27179_v0  ;;  %v27754_v0 = vld [vmem:[%s32707_s1 + $0x20] sm:$0x7] }
 0x2cc   :  { %22961 = vmatprep.mubr.msk.f32.mxu0 %vm68_vm0, %v27181_v5  ;;  %v4559_v5 = vld [vmem:[#allocation2 + $0x50] sm:$0xff] }
 0x2cf   :  { %22962 = vmatmul.mubr.msk.f32.gmra.mrb[60].mxu0 %vm68_vm0, %v27187_v60  ;;  %v4560_v60 = vld [vmem:[#allocation2 + $0x60] sm:$0xff] }
 0x2d0   :  { %22964 = vmatprep.mubr.msk.f32.mxu0 %vm68_vm0, %v3907_v9  ;;  %v4567_v9 = vld [vmem:[#allocation2 + $0xb0] sm:$0xff] }
 0x2d3   :  { %22965 = vmatmul.mubr.msk.f32.gmra.mrb[62].mxu0 %vm68_vm0, %v3908_v1  ;;  %v4568_v1 = vld [vmem:[#allocation2 + $0xc0] sm:$0xff] }
 0x2d4   :  { %22969 = vmatprep.mubr.msk.f32.mxu0 %vm68_vm0, %v4556_v55  ;;  %v4569_v55 = vld [vmem:[#allocation2 + $0xc8] sm:$0xff] }
 0x2d7   :  { %22970 = vmatmul.mubr.msk.f32.vlgmr.msra.gmra.mrb[0].mxu0 %vm68_vm0, %v4557_v10  ;;  %v4570_v10 = vld [vmem:[#allocation2 + $0xd8] sm:$0xff] }
 0x2d8   :  { %23066 = vmatpush3.msk.msra.mxu0 %vm746_vm3, %v27616_v56  ;;  %22972 = vmatprep.mubr.msk.f32.mxu0 %vm68_vm0, %v4558_v26  ;;  %v4565_v56 = vld [vmem:[#allocation2 + $0x98] sm:$0xff]  ;;  %v4571_v26 = vld [vmem:[#allocation2 + $0xe0] sm:$0xff] }
 0x2d9   :  { %23163 = vmatprep.subr.msk.mxu0 %vm746_vm3, %v27754_v0 }
 0x2db   :  { %22973 = vmatmul.mubr.msk.f32.gmra.mrb[2].mxu0 %vm68_vm0, %v4559_v5  ;;  %v4572_v5 = vld [vmem:[#allocation2 + $0xf0] sm:$0xff] }
 0x2dc   :  { %22975 = vmatprep.mubr.msk.f32.mxu0 %vm68_vm0, %v4560_v60  ;;  %v4573_v60 = vld [vmem:[#allocation2 + $0xf8] sm:$0xff] }
 0x2df   :  { %22976 = vmatmul.mubr.msk.f32.gmra.mrb[4].mxu0 %vm68_vm0, %v4561_v7  ;;  %v4574_v7 = vld [vmem:[#allocation2 + $0x108] sm:$0xff] }
 0x2e0   :  { %22978 = vmatprep.mubr.msk.f32.mxu0 %vm68_vm0, %v4562_v59  ;;  %v4575_v59 = vld [vmem:[#allocation2 + $0x110] sm:$0xff] }
 0x2e3   :  { %22979 = vmatmul.mubr.msk.f32.gmra.mrb[6].mxu0 %vm68_vm0, %v4563_v51  ;;  %v4576_v51 = vld [vmem:[#allocation2 + $0x120] sm:$0xff] }
 0x2e4   :  { %22981 = vmatprep.mubr.msk.f32.mxu0 %vm68_vm0, %v4564_v8  ;;  %v4577_v8 = vld [vmem:[#allocation2 + $0x128] sm:$0xff] }
 0x2e7   :  { %22982 = vmatmul.mubr.msk.f32.gmra.mrb[8].mxu0 %vm68_vm0, %v4565_v56  ;;  %v4578_v56 = vld [vmem:[#allocation2 + $0x138] sm:$0xff] }
 0x2e8   :  { %22984 = vmatprep.mubr.msk.f32.mxu0 %vm68_vm0, %v4566_v54  ;;  %v4579_v54 = vld [vmem:[#allocation2 + $0x140] sm:$0xff] }
 0x2eb   :  { %22985 = vmatmul.mubr.msk.f32.gmra.mrb[10].mxu0 %vm68_vm0, %v4567_v9  ;;  %v4580_v9 = vld [vmem:[#allocation2 + $0x150] sm:$0xff] }
 0x2ec   :  { %22987 = vmatprep.mubr.msk.f32.mxu0 %vm68_vm0, %v4568_v1  ;;  %v4581_v1 = vld [vmem:[#allocation2 + $0x158] sm:$0xff] }
 0x2ef   :  { %22988 = vmatmul.mubr.msk.f32.gmra.mrb[12].mxu0 %vm68_vm0, %v4569_v55  ;;  %v4582_v55 = vld [vmem:[#allocation2 + $0x168] sm:$0xff] }
 0x2f0   :  { %22990 = vmatprep.mubr.msk.f32.mxu0 %vm68_vm0, %v4570_v10  ;;  %v4583_v10 = vld [vmem:[#allocation2 + $0x170] sm:$0xff] }
 0x2f3   :  { %22991 = vmatmul.mubr.msk.f32.gmra.mrb[14].mxu0 %vm68_vm0, %v4571_v26  ;;  %v4586_v26 = vld [vmem:[#allocation2 + $0x198] sm:$0xff] }
 0x2f4   :  { %22993 = vmatprep.mubr.msk.f32.mxu0 %vm68_vm0, %v4572_v5  ;;  %v4587_v5 = vld [vmem:[#allocation2 + $0x1a0] sm:$0xff] }
 0x2f7   :  { %22994 = vmatmul.mubr.msk.f32.gmra.mrb[16].mxu0 %vm68_vm0, %v4573_v60  ;;  %v4588_v60 = vld [vmem:[#allocation2 + $0x1e0] sm:$0xff] }
 0x2f8   :  { %22996 = vmatprep.mubr.msk.f32.mxu0 %vm68_vm0, %v4574_v7  ;;  %v4589_v7 = vld [vmem:[#allocation2 + $0x1e8] sm:$0xff] }
 0x2fb   :  { %22997 = vmatmul.mubr.msk.f32.gmra.mrb[18].mxu0 %vm68_vm0, %v4575_v59  ;;  %v4590_v59 = vld [vmem:[#allocation2 + $0x1f8] sm:$0xff] }
 0x2fc   :  { %22999 = vmatprep.mubr.msk.f32.mxu0 %vm68_vm0, %v4576_v51  ;;  %v4591_v51 = vld [vmem:[#allocation2 + $0x200] sm:$0xff] }
 0x2ff   :  { %23000 = vmatmul.mubr.msk.f32.gmra.mrb[20].mxu0 %vm68_vm0, %v4577_v8  ;;  %v4594_v8 = vld [vmem:[#allocation2 + $0x228] sm:$0xff] }
 0x300   :  { %23002 = vmatprep.mubr.msk.f32.mxu0 %vm68_vm0, %v4578_v56  ;;  %v4595_v56 = vld [vmem:[#allocation2 + $0x230] sm:$0xff] }
 0x303   :  { %23003 = vmatmul.mubr.msk.f32.gmra.mrb[22].mxu0 %vm68_vm0, %v4579_v54  ;;  %v4596_v54 = vld [vmem:[#allocation2 + $0x240] sm:$0xff] }
 0x304   :  { %23005 = vmatprep.mubr.msk.f32.mxu0 %vm68_vm0, %v4580_v9  ;;  %v4597_v9 = vld [vmem:[#allocation2 + $0x248] sm:$0xff] }
 0x307   :  { %23006 = vmatmul.mubr.msk.f32.gmra.mrb[24].mxu0 %vm68_vm0, %v4581_v1  ;;  %v4598_v1 = vld [vmem:[#allocation2 + $0x258] sm:$0xff] }
 0x308   :  { %23008 = vmatprep.mubr.msk.f32.mxu0 %vm68_vm0, %v4582_v55  ;;  %v4599_v55 = vld [vmem:[#allocation2 + $0x260] sm:$0xff] }
 0x30b   :  { %23009 = vmatmul.mubr.msk.f32.gmra.mrb[26].mxu0 %vm68_vm0, %v4583_v10  ;;  %v4600_v10 = vld [vmem:[#allocation2 + $0x270] sm:$0xff] }
 0x30c   :  { %23011 = vmatprep.mubr.msk.f32.mxu0 %vm68_vm0, %v27258_v25  ;;  %v4592_v25 = vld [vmem:[#allocation2 + $0x210] sm:$0xff] }
 0x30f   :  { %23012 = vmatmul.mubr.msk.f32.gmra.mrb[28].mxu0 %vm68_vm0, %v27264_v28  ;;  %v4593_v28 = vld [vmem:[#allocation2 + $0x218] sm:$0xff] }
 0x310   :  { %23014 = vmatprep.mubr.msk.f32.mxu0 %vm68_vm0, %v4586_v26  ;;  %v4601_v26 = vld [vmem:[#allocation2 + $0x278] sm:$0xff] }
 0x313   :  { %23015 = vmatmul.mubr.msk.f32.gmra.mrb[30].mxu0 %vm68_vm0, %v4587_v5  ;;  %v4602_v5 = vld [vmem:[#allocation2 + $0x288] sm:$0xff] }
 0x314   :  { %23017 = vmatprep.mubr.msk.f32.mxu0 %vm68_vm0, %v4588_v60  ;;  %v4603_v60 = vld [vmem:[#allocation2 + $0x290] sm:$0xff] }
 0x317   :  { %23018 = vmatmul.mubr.msk.f32.gmra.mrb[32].mxu0 %vm68_vm0, %v4589_v7  ;;  %v4604_v7 = vld [vmem:[#allocation2 + $0x2a0] sm:$0xff] }
 0x318   :  { %23020 = vmatprep.mubr.msk.f32.mxu0 %vm68_vm0, %v4590_v59  ;;  %v19422_v59 = vld [vmem:[%s32707_s1 + $0x4] sm:$0x7] }
 0x319   :  { %22379 = vmatprep.subr.msk.mxu1 %vm746_vm3, %v19422_v59 }
 0x31a   :  { %22380 = vmatpush3.msk.msra.mxu1 %vm746_vm3, %v19422_v59  ;;  %v33006_v59 = vld [vmem:[#allocation69_spill] sm:$0xff] }
 0x31b   :  { %23021 = vmatmul.mubr.msk.f32.gmra.mrb[34].mxu0 %vm68_vm0, %v4591_v51  ;;  %v488_v51 = vld [vmem:[#allocation2 + $0x1] sm:$0xff] }
 0x31c   :  { %23023 = vmatprep.mubr.msk.f32.mxu0 %vm68_vm0, %v4592_v25  ;;  %v489_v25 = vld [vmem:[#allocation2 + $0x9] sm:$0xff]  ;;  %22381 = vmatprep.mubr.msk.f32.mxu1 %vm68_vm0, %v488_v51  ;;  %v544_v51 = vld [vmem:[#allocation2 + $0x2d1] sm:$0xff] }
 0x31d   :  { %22382 = vmatmul.mubr.msk.f32.vlgmr.msra.gmra.mrb[0].mxu1 %vm68_vm0, %v489_v25  ;;  %v545_v25 = vld [vmem:[#allocation2 + $0x2d9] sm:$0xff] }
 0x31e   :  { %22384 = vmatprep.mubr.msk.f32.mxu1 %vm68_vm0, %v27350_v2  ;;  %v4619_v2 = vld [vmem:[#allocation2 + $0x350] sm:$0xff] }
 0x31f   :  { %23024 = vmatmul.mubr.msk.f32.gmra.mrb[36].mxu0 %vm68_vm0, %v4593_v28  ;;  %v4605_v28 = vld [vmem:[#allocation2 + $0x2a8] sm:$0xff] }
 0x320   :  { %23026 = vmatprep.mubr.msk.f32.mxu0 %vm68_vm0, %v4594_v8  ;;  %v4606_v8 = vld [vmem:[#allocation2 + $0x2b8] sm:$0xff] }
 0x321   :  { %22385 = vmatmul.mubr.msk.f32.gmra.mrb[2].mxu1 %vm68_vm0, %v27356_v3  ;;  %v507_v3 = vld [vmem:[#allocation2 + $0xe1] sm:$0xff] }
 0x322   :  { %22387 = vmatprep.mubr.msk.f32.mxu1 %vm68_vm0, %v27358_v4 }
 0x323   :  { %23027 = vmatmul.mubr.msk.f32.gmra.mrb[38].mxu0 %vm68_vm0, %v4595_v56  ;;  %v26087_v56 = vld [vmem:[%s32707_s1] sm:$0x7] }
 0x324   :  { %23029 = vmatprep.mubr.msk.f32.mxu0 %vm68_vm0, %v4596_v54  ;;  %24917 = vmatprep.subr.msk.mxu1 %vm746_vm3, %v26087_v56  ;;  %v4607_v54 = vld [vmem:[#allocation2 + $0x2c0] sm:$0xff] }
 0x325   :  { %24918 = vmatpush3.msk.msra.mxu1 %vm746_vm3, %v26087_v56  ;;  %v546_v56 = vld [vmem:[#allocation2 + $0x2e9] sm:$0xff] }
 0x326   :  { %22388 = vmatmul.mubr.msk.f32.gmra.mrb[4].mxu1 %vm68_vm0, %v27371_v11 }
 0x327   :  { %23030 = vmatmul.mubr.msk.f32.gmra.mrb[40].mxu0 %vm68_vm0, %v4597_v9  ;;  %22390 = vmatprep.mubr.msk.f32.mxu1 %vm68_vm0, %v27373_v12  ;;  %v509_v9 = vld [vmem:[#allocation2 + $0xf9] sm:$0xff] }
 0x328   :  { %23032 = vmatprep.mubr.msk.f32.mxu0 %vm68_vm0, %v4598_v1  ;;  %v5297_v1 = vld [vmem:[#allocation2 + $0x1a1] sm:$0xff] }
 0x32a   :  { %22391 = vmatmul.mubr.msk.f32.gmra.mrb[6].mxu1 %vm68_vm0, %v27381_v13 }
 0x32b   :  { %23033 = vmatmul.mubr.msk.f32.gmra.mrb[42].mxu0 %vm68_vm0, %v4599_v55  ;;  %22393 = vmatprep.mubr.msk.f32.mxu1 %vm68_vm0, %v27383_v14  ;;  %v539_v55 = vld [vmem:[#allocation2 + $0x291] sm:$0xff] }
 0x32c   :  { %23035 = vmatprep.mubr.msk.f32.mxu0 %vm68_vm0, %v4600_v10  ;;  %v33002_v10 = vld [vmem:[#allocation65_spill] sm:$0xff] }
 0x32e   :  { %22394 = vmatmul.mubr.msk.f32.gmra.mrb[8].mxu1 %vm68_vm0, %v27389_v15 }
 0x32f   :  { %23036 = vmatmul.mubr.msk.f32.gmra.mrb[44].mxu0 %vm68_vm0, %v4601_v26  ;;  %v541_v26 = vld [vmem:[#allocation2 + $0x2a9] sm:$0xff] }
 0x330   :  { %23038 = vmatprep.mubr.msk.f32.mxu0 %vm68_vm0, %v4602_v5  ;;  %v33003_v5 = vld [vmem:[#allocation66_spill] sm:$0xff] }
 0x333   :  { %23039 = vmatmul.mubr.msk.f32.gmra.mrb[46].mxu0 %vm68_vm0, %v4603_v60  ;;  %v543_v60 = vld [vmem:[#allocation2 + $0x2c1] sm:$0xff] }
 0x334   :  { %23041 = vmatprep.mubr.msk.f32.mxu0 %vm68_vm0, %v4604_v7  ;;  %v33005_v7 = vld [vmem:[#allocation68_spill] sm:$0xff] }
 0x337   :  { %23042 = vmatmul.mubr.msk.f32.gmra.mrb[48].mxu0 %vm68_vm0, %v4605_v28  ;;  %v33007_v28 = vld [vmem:[#allocation70_spill] sm:$0xff] }
 0x338   :  { %23044 = vmatprep.mubr.msk.f32.mxu0 %vm68_vm0, %v4606_v8  ;;  %v33008_v8 = vld [vmem:[#allocation71_spill] sm:$0xff] }
 0x33b   :  { %23045 = vmatmul.mubr.msk.f32.gmra.mrb[50].mxu0 %vm68_vm0, %v4607_v54  ;;  %v547_v54 = vld [vmem:[#allocation2 + $0x2f1] sm:$0xff] }
 0x33c   :  { %23047 = vmatprep.mubr.msk.f32.mxu0 %vm68_vm0, %v27310_v29  ;;  %v498_v29 = vld [vmem:[#allocation2 + $0x79] sm:$0xff] }
 0x33d   :  { %22396 = vmatprep.mubr.msk.f32.mxu1 %vm68_vm0, %v498_v29  ;;  %v33009_v29 = vld [vmem:[#allocation72_spill] sm:$0xff] }
 0x33f   :  { %23048 = vmatmul.mubr.msk.f32.gmra.mrb[52].mxu0 %vm68_vm0, %v27316_v32  ;;  %v499_v32 = vld [vmem:[#allocation2 + $0x81] sm:$0xff] }
 0x340   :  { %23050 = vmatprep.mubr.msk.f32.mxu0 %vm68_vm0, %v27318_v33  ;;  %22397 = vmatmul.mubr.msk.f32.gmra.mrb[10].mxu1 %vm68_vm0, %v499_v32  ;;  %v500_v33 = vld [vmem:[#allocation2 + $0x91] sm:$0xff] }
 0x341   :  { %22399 = vmatprep.mubr.msk.f32.mxu1 %vm68_vm0, %v500_v33  ;;  %v33010_v32 = vld [vmem:[#allocation73_spill] sm:$0xff]  ;;  %v548_v33 = vld [vmem:[#allocation2 + $0x301] sm:$0xff] }
 0x343   :  { %23051 = vmatmul.mubr.msk.f32.gmra.mrb[54].mxu0 %vm68_vm0, %v27324_v34  ;;  %v501_v34 = vld [vmem:[#allocation2 + $0x99] sm:$0xff] }
 0x344   :  { %23053 = vmatprep.mubr.msk.f32.mxu0 %vm68_vm0, %v27326_v35  ;;  %v4618_v35 = vld [vmem:[#allocation2 + $0x348] sm:$0xff]  ;;  %22400 = vmatmul.mubr.msk.f32.gmra.mrb[12].mxu1 %vm68_vm0, %v501_v34 }
 0x345   :  { %v549_v34 = vld [vmem:[#allocation2 + $0x309] sm:$0xff] }
 0x347   :  { %23054 = vmatmul.mubr.msk.f32.gmra.mrb[56].mxu0 %vm68_vm0, %v27332_v41  ;;  %v502_v41 = vld [vmem:[#allocation2 + $0xa9] sm:$0xff] }
 0x348   :  { %23056 = vmatprep.mubr.msk.f32.mxu0 %vm68_vm0, %v27334_v42  ;;  %v503_v42 = vld [vmem:[#allocation2 + $0xb1] sm:$0xff]  ;;  %22402 = vmatprep.mubr.msk.f32.mxu1 %vm68_vm0, %v502_v41  ;;  %v33012_v41 = vld [vmem:[#allocation75_spill] sm:$0xff] }
 0x349   :  { %22403 = vmatmul.mubr.msk.f32.gmra.mrb[14].mxu1 %vm68_vm0, %v503_v42  ;;  %v550_v42 = vld [vmem:[#allocation2 + $0x319] sm:$0xff] }
 0x34b   :  { %23057 = vmatmul.mubr.msk.f32.gmra.mrb[58].mxu0 %vm68_vm0, %v27340_v47  ;;  %v504_v47 = vld [vmem:[#allocation2 + $0xc1] sm:$0xff] }
 0x34c   :  { %23059 = vmatprep.mubr.msk.f32.mxu0 %vm68_vm0, %v27342_v57  ;;  %v505_v57 = vld [vmem:[#allocation2 + $0xc9] sm:$0xff]  ;;  %22405 = vmatprep.mubr.msk.f32.mxu1 %vm68_vm0, %v504_v47 }
 0x34d   :  { %22406 = vmatmul.mubr.msk.f32.gmra.mrb[16].mxu1 %vm68_vm0, %v505_v57  ;;  %v33013_v47 = vld [vmem:[#allocation76_spill] sm:$0xff]  ;;  %v33014_v57 = vld [vmem:[#allocation77_spill] sm:$0xff] }
 0x34f   :  { %23060 = vmatmul.mubr.msk.f32.gmra.mrb[60].mxu0 %vm68_vm0, %v27348_v62  ;;  %v506_v62 = vld [vmem:[#allocation2 + $0xd9] sm:$0xff] }
 0x350   :  { %23062 = vmatprep.mubr.msk.f32.mxu0 %vm68_vm0, %v4618_v35  ;;  %22408 = vmatprep.mubr.msk.f32.mxu1 %vm68_vm0, %v506_v62  ;;  %v33011_v35 = vld [vmem:[#allocation74_spill] sm:$0xff]  ;;  %v479_v62 = vld [vmem:[#allocation2 + $0x2d0] sm:$0xff] }
 0x351   :  { %22409 = vmatmul.mubr.msk.f32.gmra.mrb[18].mxu1 %vm68_vm0, %v507_v3  ;;  %v480_v3 = vld [vmem:[#allocation2 + $0x2d8] sm:$0xff] }
 0x353   :  { %23063 = vmatmul.mubr.msk.f32.gmra.mrb[62].mxu0 %vm68_vm0, %v4619_v2  ;;  %v551_v2 = vld [vmem:[#allocation2 + $0x321] sm:$0xff] }
 0x354   :  { %23067 = vmatprep.mubr.msk.f32.mxu0 %vm68_vm0, %v27358_v4  ;;  %v508_v4 = vld [vmem:[#allocation2 + $0xf1] sm:$0xff] }
 0x355   :  { %22411 = vmatprep.mubr.msk.f32.mxu1 %vm68_vm0, %v508_v4  ;;  %v33015_v4 = vld [vmem:[#allocation78_spill] sm:$0xff] }
 0x356   :  { %22412 = vmatmul.mubr.msk.f32.gmra.mrb[20].mxu1 %vm68_vm0, %v509_v9  ;;  %v33016_v9 = vld [vmem:[#allocation79_spill] sm:$0xff] }
 0x357   :  { %23068 = vmatmul.mubr.msk.f32.vlgmr.msra.gmra.mrb[0].mxu0 %vm68_vm0, %v27371_v11  ;;  %v510_v11 = vld [vmem:[#allocation2 + $0x109] sm:$0xff] }
 0x358   :  { %23164 = vmatpush3.msk.msra.mxu0 %vm746_vm3, %v27754_v0  ;;  %23070 = vmatprep.mubr.msk.f32.mxu0 %vm68_vm0, %v27373_v12  ;;  %v511_v12 = vld [vmem:[#allocation2 + $0x111] sm:$0xff]  ;;  %v535_v0 = vld [vmem:[#allocation2 + $0x261] sm:$0xff]  ;;  %vm17599_vm3 = vcmask 458112  }
 0x359   :  { %22414 = vmatprep.mubr.msk.f32.mxu1 %vm68_vm0, %v510_v11  ;;  %v481_v11 = vld [vmem:[#allocation2 + $0x2e8] sm:$0xff] }
 0x35a   :  { %22415 = vmatmul.mubr.msk.f32.gmra.mrb[22].mxu1 %vm68_vm0, %v511_v12  ;;  %v482_v12 = vld [vmem:[#allocation2 + $0x2f0] sm:$0xff] }
 0x35b   :  { %23071 = vmatmul.mubr.msk.f32.gmra.mrb[2].mxu0 %vm68_vm0, %v27381_v13  ;;  %v512_v13 = vld [vmem:[#allocation2 + $0x121] sm:$0xff] }
 0x35c   :  { %23073 = vmatprep.mubr.msk.f32.mxu0 %vm68_vm0, %v27383_v14  ;;  %v513_v14 = vld [vmem:[#allocation2 + $0x129] sm:$0xff]  ;;  %22417 = vmatprep.mubr.msk.f32.mxu1 %vm68_vm0, %v512_v13 }
 0x35d   :  { %v33017_v13 = vld [vmem:[#allocation80_spill] sm:$0xff] }
 0x35e   :  { %22418 = vmatmul.mubr.msk.f32.gmra.mrb[24].mxu1 %vm68_vm0, %v513_v14  ;;  %v33018_v14 = vld [vmem:[#allocation81_spill] sm:$0xff] }
 0x35f   :  { %23074 = vmatmul.mubr.msk.f32.gmra.mrb[4].mxu0 %vm68_vm0, %v27389_v15  ;;  %v514_v15 = vld [vmem:[#allocation2 + $0x139] sm:$0xff] }
 0x360   :  { %23076 = vmatprep.mubr.msk.f32.mxu0 %vm68_vm0, %v27391_v16  ;;  %v515_v16 = vld [vmem:[#allocation2 + $0x141] sm:$0xff]  ;;  %22420 = vmatprep.mubr.msk.f32.mxu1 %vm68_vm0, %v514_v15 }
 0x361   :  { %v483_v15 = vld [vmem:[#allocation2 + $0x300] sm:$0xff] }
 0x362   :  { %22421 = vmatmul.mubr.msk.f32.gmra.mrb[26].mxu1 %vm68_vm0, %v515_v16  ;;  %v484_v16 = vld [vmem:[#allocation2 + $0x308] sm:$0xff] }
 0x363   :  { %23077 = vmatmul.mubr.msk.f32.gmra.mrb[6].mxu0 %vm68_vm0, %v27397_v17  ;;  %v516_v17 = vld [vmem:[#allocation2 + $0x151] sm:$0xff] }
 0x364   :  { %23079 = vmatprep.mubr.msk.f32.mxu0 %vm68_vm0, %v27399_v18  ;;  %v517_v18 = vld [vmem:[#allocation2 + $0x159] sm:$0xff]  ;;  %22423 = vmatprep.mubr.msk.f32.mxu1 %vm68_vm0, %v516_v17 }
 0x365   :  { %v33019_v17 = vld [vmem:[#allocation82_spill] sm:$0xff] }
 0x366   :  { %22424 = vmatmul.mubr.msk.f32.gmra.mrb[28].mxu1 %vm68_vm0, %v517_v18  ;;  %v33020_v18 = vld [vmem:[#allocation83_spill] sm:$0xff] }
 0x367   :  { %23080 = vmatmul.mubr.msk.f32.gmra.mrb[8].mxu0 %vm68_vm0, %v27405_v19  ;;  %v518_v19 = vld [vmem:[#allocation2 + $0x169] sm:$0xff] }
 0x368   :  { %23082 = vmatprep.mubr.msk.f32.mxu0 %vm68_vm0, %v27407_v20  ;;  %v519_v20 = vld [vmem:[#allocation2 + $0x171] sm:$0xff]  ;;  %22426 = vmatprep.mubr.msk.f32.mxu1 %vm68_vm0, %v518_v19 }
 0x369   :  { %v485_v19 = vld [vmem:[#allocation2 + $0x318] sm:$0xff] }
 0x36a   :  { %22427 = vmatmul.mubr.msk.f32.gmra.mrb[30].mxu1 %vm68_vm0, %v519_v20  ;;  %v486_v20 = vld [vmem:[#allocation2 + $0x320] sm:$0xff] }
 0x36b   :  { %23083 = vmatmul.mubr.msk.f32.gmra.mrb[10].mxu0 %vm68_vm0, %v27413_v21  ;;  %v520_v21 = vld [vmem:[#allocation2 + $0x1b1] sm:$0xff] }
 0x36c   :  { %23085 = vmatprep.mubr.msk.f32.mxu0 %vm68_vm0, %v27415_v22  ;;  %v521_v22 = vld [vmem:[#allocation2 + $0x1b9] sm:$0xff]  ;;  %22429 = vmatprep.mubr.msk.f32.mxu1 %vm68_vm0, %v520_v21  ;;  %v33021_v21 = vld [vmem:[#allocation84_spill] sm:$0xff] }
 0x36e   :  { %22430 = vmatmul.mubr.msk.f32.gmra.mrb[32].mxu1 %vm68_vm0, %v521_v22  ;;  %v33022_v22 = vld [vmem:[#allocation85_spill] sm:$0xff] }
 0x36f   :  { %23086 = vmatmul.mubr.msk.f32.gmra.mrb[12].mxu0 %vm68_vm0, %v27421_v23  ;;  %v522_v23 = vld [vmem:[#allocation2 + $0x1c9] sm:$0xff] }
 0x370   :  { %23088 = vmatprep.mubr.msk.f32.mxu0 %vm68_vm0, %v27423_v24  ;;  %v523_v24 = vld [vmem:[#allocation2 + $0x1d1] sm:$0xff]  ;;  %22432 = vmatprep.mubr.msk.f32.mxu1 %vm68_vm0, %v522_v23  ;;  %v33023_v23 = vld [vmem:[#allocation86_spill] sm:$0xff] }
 0x372   :  { %22433 = vmatmul.mubr.msk.f32.gmra.mrb[34].mxu1 %vm68_vm0, %v523_v24  ;;  %v33024_v24 = vld [vmem:[#allocation87_spill] sm:$0xff] }
 0x373   :  { %23089 = vmatmul.mubr.msk.f32.gmra.mrb[14].mxu0 %vm68_vm0, %v27429_v30  ;;  %v524_v30 = vld [vmem:[#allocation2 + $0x1e1] sm:$0xff] }
 0x374   :  { %23091 = vmatprep.mubr.msk.f32.mxu0 %vm68_vm0, %v27431_v31  ;;  %v525_v31 = vld [vmem:[#allocation2 + $0x1e9] sm:$0xff]  ;;  %22435 = vmatprep.mubr.msk.f32.mxu1 %vm68_vm0, %v524_v30 }
 0x375   :  { %v33025_v30 = vld [vmem:[#allocation88_spill] sm:$0xff] }
 0x376   :  { %22436 = vmatmul.mubr.msk.f32.gmra.mrb[36].mxu1 %vm68_vm0, %v525_v31  ;;  %v5328_v31 = vld [vmem:[#allocation2 + $0x349] sm:$0xff] }
 0x377   :  { %23092 = vmatmul.mubr.msk.f32.gmra.mrb[16].mxu0 %vm68_vm0, %v27437_v36  ;;  %v526_v36 = vld [vmem:[#allocation2 + $0x1f9] sm:$0xff] }
 0x378   :  { %23094 = vmatprep.mubr.msk.f32.mxu0 %vm68_vm0, %v27439_v37  ;;  %v527_v37 = vld [vmem:[#allocation2 + $0x201] sm:$0xff]  ;;  %22438 = vmatprep.mubr.msk.f32.mxu1 %vm68_vm0, %v526_v36  ;;  %v33026_v36 = vld [vmem:[#allocation89_spill] sm:$0xff] }
 0x37a   :  { %22439 = vmatmul.mubr.msk.f32.gmra.mrb[38].mxu1 %vm68_vm0, %v527_v37  ;;  %v5976_v37 = vld [vmem:[#allocation2 + $0x32] sm:$0xff] }
 0x37b   :  { %23095 = vmatmul.mubr.msk.f32.gmra.mrb[18].mxu0 %vm68_vm0, %v27445_v38  ;;  %v528_v38 = vld [vmem:[#allocation2 + $0x211] sm:$0xff] }
 0x37c   :  { %23097 = vmatprep.mubr.msk.f32.mxu0 %vm68_vm0, %v27447_v39  ;;  %v529_v39 = vld [vmem:[#allocation2 + $0x219] sm:$0xff]  ;;  %22441 = vmatprep.mubr.msk.f32.mxu1 %vm68_vm0, %v528_v38  ;;  %v20017_v38 = vld [vmem:[%s32708_s2 + $0x48] sm:$0xff] }
 0x37e   :  { %22442 = vmatmul.mubr.msk.f32.gmra.mrb[40].mxu1 %vm68_vm0, %v529_v39  ;;  %v5977_v39 = vld [vmem:[#allocation2 + $0x3a] sm:$0xff] }
 0x37f   :  { %23098 = vmatmul.mubr.msk.f32.gmra.mrb[20].mxu0 %vm68_vm0, %v27453_v40  ;;  %v530_v40 = vld [vmem:[#allocation2 + $0x229] sm:$0xff] }
 0x380   :  { %23100 = vmatprep.mubr.msk.f32.mxu0 %vm68_vm0, %v27455_v43  ;;  %v531_v43 = vld [vmem:[#allocation2 + $0x231] sm:$0xff]  ;;  %22444 = vmatprep.mubr.msk.f32.mxu1 %vm68_vm0, %v530_v40 }
 0x382   :  { %22445 = vmatmul.mubr.msk.f32.gmra.mrb[42].mxu1 %vm68_vm0, %v531_v43  ;;  %v33027_v43 = vmov 0.0  }
 0x383   :  { %23101 = vmatmul.mubr.msk.f32.gmra.mrb[22].mxu0 %vm68_vm0, %v27461_v44  ;;  %v532_v44 = vld [vmem:[#allocation2 + $0x241] sm:$0xff]  ;;  %157 = vst.msk [vmem:[#allocation3] sm:$0xff] %vm156_vm4, %v33027_v43  ;;  %158 = vst.msk [vmem:[#allocation3 + $0x8] sm:$0xff] %vm156_vm4, %v33027_v43 }
 0x384   :  { %23103 = vmatprep.mubr.msk.f32.mxu0 %vm68_vm0, %v27463_v45  ;;  %v533_v45 = vld [vmem:[#allocation2 + $0x249] sm:$0xff]  ;;  %22447 = vmatprep.mubr.msk.f32.mxu1 %vm68_vm0, %v532_v44  ;;  %161 = vst.msk [vmem:[#allocation3 + $0x1b0] sm:$0xff] %vm156_vm4, %v33027_v43  ;;  %162 = vst.msk [vmem:[#allocation3 + $0x1b8] sm:$0xff] %vm156_vm4, %v33027_v43 }
 0x385   :  { %165 = vst.msk [vmem:[#allocation3 + $0x198] sm:$0xff] %vm156_vm4, %v33027_v43  ;;  %166 = vst.msk [vmem:[#allocation3 + $0x1a0] sm:$0xff] %vm156_vm4, %v33027_v43  ;;  %v5978_v44 = vld [vmem:[#allocation2 + $0x4a] sm:$0xff] }
 0x386   :  { %22448 = vmatmul.mubr.msk.f32.gmra.mrb[44].mxu1 %vm68_vm0, %v533_v45  ;;  %168 = vst.msk [vmem:[#allocation3 + $0x348] sm:$0xff] %vm156_vm4, %v33027_v43  ;;  %169 = vst.msk [vmem:[#allocation3 + $0x350] sm:$0xff] %vm156_vm4, %v33027_v43  ;;  %v5979_v45 = vld [vmem:[#allocation2 + $0x52] sm:$0xff] }
 0x387   :  { %23104 = vmatmul.mubr.msk.f32.gmra.mrb[24].mxu0 %vm68_vm0, %v27469_v46  ;;  %v5296_v46 = vld [vmem:[#allocation2 + $0x199] sm:$0xff]  ;;  %244 = vst.msk [vmem:[#allocation4] sm:$0xff] %vm156_vm4, %v33027_v43  ;;  %246 = vst.msk [vmem:[#allocation4 + $0xa0] sm:$0xff] %vm156_vm4, %v33027_v43 }
 0x388   :  { %23106 = vmatprep.mubr.msk.f32.mxu0 %vm68_vm0, %v27471_v48  ;;  %v534_v48 = vld [vmem:[#allocation2 + $0x259] sm:$0xff]  ;;  %249 = vst.msk [vmem:[#allocation4 + $0x90] sm:$0xff] %vm156_vm4, %v33027_v43  ;;  %251 = vst.msk [vmem:[#allocation4 + $0x130] sm:$0xff] %vm156_vm4, %v33027_v43 }
 0x389   :  { %22450 = vmatprep.mubr.msk.f32.mxu1 %vm68_vm0, %v534_v48  ;;  %v5981_v48 = vld [vmem:[#allocation2 + $0x6a] sm:$0xff]  ;;  %160 = vst.msk [vmem:[#allocation3 + $0x10] sm:$0x3] %vm159_vm5, %v33027_v43  ;;  %163 = vst.msk [vmem:[#allocation3 + $0x1c0] sm:$0x3] %vm159_vm5, %v33027_v43 }
 0x38a   :  { %22451 = vmatmul.mubr.msk.f32.gmra.mrb[46].mxu1 %vm68_vm0, %v535_v0  ;;  %v5982_v0 = vld [vmem:[#allocation2 + $0x7a] sm:$0xff]  ;;  %167 = vst.msk [vmem:[#allocation3 + $0x1a8] sm:$0x3] %vm159_vm5, %v33027_v43  ;;  %170 = vst.msk [vmem:[#allocation3 + $0x358] sm:$0x3] %vm159_vm5, %v33027_v43 }
 0x38b   :  { %23107 = vmatmul.mubr.msk.f32.gmra.mrb[26].mxu0 %vm68_vm0, %v27477_v49  ;;  %v536_v49 = vld [vmem:[#allocation2 + $0x271] sm:$0xff]  ;;  %245 = vst.msk [vmem:[#allocation4 + $0x8] sm:$0x3] %vm159_vm5, %v33027_v43  ;;  %247 = vst.msk [vmem:[#allocation4 + $0xa8] sm:$0x3] %vm159_vm5, %v33027_v43 }
 0x38c   :  { %23109 = vmatprep.mubr.msk.f32.mxu0 %vm68_vm0, %v27479_v52  ;;  %v537_v52 = vld [vmem:[#allocation2 + $0x279] sm:$0xff]  ;;  %22453 = vmatprep.mubr.msk.f32.mxu1 %vm68_vm0, %v536_v49  ;;  %250 = vst.msk [vmem:[#allocation4 + $0x98] sm:$0x3] %vm159_vm5, %v33027_v43  ;;  %252 = vst.msk [vmem:[#allocation4 + $0x138] sm:$0x3] %vm159_vm5, %v33027_v43 }
 0x38d   :  { %v5984_v49 = vld [vmem:[#allocation2 + $0x92] sm:$0xff]  ;;  %172 = vst.msk [vmem:[#allocation3] sm:$0x1] %vm171_vm6, %v33027_v43  ;;  %173 = vst.msk [vmem:[#allocation3 + $0x18] sm:$0x1] %vm171_vm6, %v33027_v43 }
 0x38e   :  { %22454 = vmatmul.mubr.msk.f32.gmra.mrb[48].mxu1 %vm68_vm0, %v537_v52  ;;  %v5985_v52 = vld [vmem:[#allocation2 + $0x9a] sm:$0xff]  ;;  %174 = vst.msk [vmem:[#allocation3 + $0x30] sm:$0x1] %vm171_vm6, %v33027_v43  ;;  %175 = vst.msk [vmem:[#allocation3 + $0x48] sm:$0x1] %vm171_vm6, %v33027_v43 }
 0x38f   :  { %23110 = vmatmul.mubr.msk.f32.gmra.mrb[28].mxu0 %vm68_vm0, %v27485_v53  ;;  %v538_v53 = vld [vmem:[#allocation2 + $0x289] sm:$0xff]  ;;  %176 = vst.msk [vmem:[#allocation3 + $0x60] sm:$0x1] %vm171_vm6, %v33027_v43  ;;  %177 = vst.msk [vmem:[#allocation3 + $0x78] sm:$0x1] %vm171_vm6, %v33027_v43 }
 0x390   :  { %23112 = vmatprep.mubr.msk.f32.mxu0 %vm68_vm0, %v5296_v46  ;;  %22456 = vmatprep.mubr.msk.f32.mxu1 %vm68_vm0, %v538_v53  ;;  %v5980_v46 = vld [vmem:[#allocation2 + $0x62] sm:$0xff]  ;;  %v5986_v53 = vld [vmem:[#allocation2 + $0xaa] sm:$0xff]  ;;  %178 = vst.msk [vmem:[#allocation3 + $0x90] sm:$0x1] %vm171_vm6, %v33027_v43  ;;  %179 = vst.msk [vmem:[#allocation3 + $0xa8] sm:$0x1] %vm171_vm6, %v33027_v43 }
 0x391   :  { %180 = vst.msk [vmem:[#allocation3 + $0xc0] sm:$0x1] %vm171_vm6, %v33027_v43  ;;  %181 = vst.msk [vmem:[#allocation3 + $0xd8] sm:$0x1] %vm171_vm6, %v33027_v43 }
 0x392   :  { %22457 = vmatmul.mubr.msk.f32.gmra.mrb[50].mxu1 %vm68_vm0, %v539_v55  ;;  %v5987_v55 = vld [vmem:[#allocation2 + $0xb2] sm:$0xff]  ;;  %182 = vst.msk [vmem:[#allocation3 + $0xf0] sm:$0x1] %vm171_vm6, %v33027_v43  ;;  %183 = vst.msk [vmem:[#allocation3 + $0x108] sm:$0x1] %vm171_vm6, %v33027_v43 }
 0x393   :  { %23113 = vmatmul.mubr.msk.f32.gmra.mrb[30].mxu0 %vm68_vm0, %v5297_v1  ;;  %v5983_v1 = vld [vmem:[#allocation2 + $0x82] sm:$0xff]  ;;  %184 = vst.msk [vmem:[#allocation3 + $0x120] sm:$0x1] %vm171_vm6, %v33027_v43  ;;  %185 = vst.msk [vmem:[#allocation3 + $0x138] sm:$0x1] %vm171_vm6, %v33027_v43 }
 0x394   :  { %23115 = vmatprep.mubr.msk.f32.mxu0 %vm68_vm0, %v27490_v61  ;;  %v540_v61 = vld [vmem:[#allocation2 + $0x2a1] sm:$0xff]  ;;  %186 = vst.msk [vmem:[#allocation3 + $0x150] sm:$0x1] %vm171_vm6, %v33027_v43  ;;  %187 = vst.msk [vmem:[#allocation3 + $0x168] sm:$0x1] %vm171_vm6, %v33027_v43 }
 0x395   :  { %22459 = vmatprep.mubr.msk.f32.mxu1 %vm68_vm0, %v540_v61  ;;  %v5989_v61 = vld [vmem:[#allocation2 + $0xca] sm:$0xff]  ;;  %188 = vst.msk [vmem:[#allocation3 + $0x180] sm:$0x1] %vm171_vm6, %v33027_v43  ;;  %189 = vst.msk [vmem:[#allocation3 + $0x198] sm:$0x1] %vm171_vm6, %v33027_v43 }
 0x396   :  { %22460 = vmatmul.mubr.msk.f32.gmra.mrb[52].mxu1 %vm68_vm0, %v541_v26  ;;  %v5990_v26 = vld [vmem:[#allocation2 + $0xda] sm:$0xff]  ;;  %190 = vst.msk [vmem:[#allocation3 + $0x1b0] sm:$0x1] %vm171_vm6, %v33027_v43  ;;  %191 = vst.msk [vmem:[#allocation3 + $0x1c8] sm:$0x1] %vm171_vm6, %v33027_v43 }
 0x397   :  { %23116 = vmatmul.mubr.msk.f32.gmra.mrb[32].mxu0 %vm68_vm0, %v27495_v63  ;;  %v33004_v63 = vld [vmem:[#allocation67_spill] sm:$0xff]  ;;  %192 = vst.msk [vmem:[#allocation3 + $0x1e0] sm:$0x1] %vm171_vm6, %v33027_v43  ;;  %193 = vst.msk [vmem:[#allocation3 + $0x1f8] sm:$0x1] %vm171_vm6, %v33027_v43 }
 0x398   :  { %23118 = vmatprep.mubr.msk.f32.mxu0 %vm68_vm0, %v27497_v6  ;;  %v542_v6 = vld [vmem:[#allocation2 + $0x2b9] sm:$0xff]  ;;  %194 = vst.msk [vmem:[#allocation3 + $0x210] sm:$0x1] %vm171_vm6, %v33027_v43  ;;  %195 = vst.msk [vmem:[#allocation3 + $0x228] sm:$0x1] %vm171_vm6, %v33027_v43 }
 0x399   :  { %22462 = vmatprep.mubr.msk.f32.mxu1 %vm68_vm0, %v542_v6  ;;  %v5993_v6 = vld [vmem:[#allocation2 + $0xfa] sm:$0xff]  ;;  %196 = vst.msk [vmem:[#allocation3 + $0x240] sm:$0x1] %vm171_vm6, %v33027_v43  ;;  %197 = vst.msk [vmem:[#allocation3 + $0x258] sm:$0x1] %vm171_vm6, %v33027_v43 }
 0x39a   :  { %22463 = vmatmul.mubr.msk.f32.gmra.mrb[54].mxu1 %vm68_vm0, %v543_v60  ;;  %v5994_v60 = vld [vmem:[#allocation2 + $0x10a] sm:$0xff]  ;;  %198 = vst.msk [vmem:[#allocation3 + $0x270] sm:$0x1] %vm171_vm6, %v33027_v43  ;;  %199 = vst.msk [vmem:[#allocation3 + $0x288] sm:$0x1] %vm171_vm6, %v33027_v43 }
 0x39b   :  { %23119 = vmatmul.mubr.msk.f32.gmra.mrb[34].mxu0 %vm68_vm0, %v33002_v10  ;;  %22465 = vmatprep.mubr.msk.f32.mxu1 %vm68_vm0, %v544_v51  ;;  %v5988_v10 = vld [vmem:[#allocation2 + $0xc2] sm:$0xff]  ;;  %v5997_v51 = vld [vmem:[#allocation2 + $0x12a] sm:$0xff]  ;;  %200 = vst.msk [vmem:[#allocation3 + $0x2a0] sm:$0x1] %vm171_vm6, %v33027_v43  ;;  %201 = vst.msk [vmem:[#allocation3 + $0x2b8] sm:$0x1] %vm171_vm6, %v33027_v43 }
 0x39c   :  { %23121 = vmatprep.mubr.msk.f32.mxu0 %vm68_vm0, %v33003_v5  ;;  %v5991_v5 = vld [vmem:[#allocation2 + $0xe2] sm:$0xff]  ;;  %202 = vst.msk [vmem:[#allocation3 + $0x2d0] sm:$0x1] %vm171_vm6, %v33027_v43  ;;  %203 = vst.msk [vmem:[#allocation3 + $0x2e8] sm:$0x1] %vm171_vm6, %v33027_v43 }
 0x39d   :  { %204 = vst.msk [vmem:[#allocation3 + $0x300] sm:$0x1] %vm171_vm6, %v33027_v43  ;;  %205 = vst.msk [vmem:[#allocation3 + $0x318] sm:$0x1] %vm171_vm6, %v33027_v43 }
 0x39e   :  { %22466 = vmatmul.mubr.msk.f32.gmra.mrb[56].mxu1 %vm68_vm0, %v545_v25  ;;  %v5998_v25 = vld [vmem:[#allocation2 + $0x13a] sm:$0xff]  ;;  %206 = vst.msk [vmem:[#allocation3 + $0x330] sm:$0x1] %vm171_vm6, %v33027_v43  ;;  %207 = vst.msk [vmem:[#allocation3 + $0x348] sm:$0x1] %vm171_vm6, %v33027_v43 }
 0x39f   :  { %23122 = vmatmul.mubr.msk.f32.gmra.mrb[36].mxu0 %vm68_vm0, %v33004_v63  ;;  %22468 = vmatprep.mubr.msk.f32.mxu1 %vm68_vm0, %v546_v56  ;;  %v5992_v63 = vld [vmem:[#allocation2 + $0xf2] sm:$0xff]  ;;  %v6001_v56 = vld [vmem:[#allocation2 + $0x15a] sm:$0xff]  ;;  %208 = vst.msk [vmem:[#allocation3 + $0x11] sm:$0x1] %vm171_vm6, %v33027_v43  ;;  %209 = vst.msk [vmem:[#allocation3 + $0x29] sm:$0x1] %vm171_vm6, %v33027_v43 }
 0x3a0   :  { %23124 = vmatprep.mubr.msk.f32.mxu0 %vm68_vm0, %v33005_v7  ;;  %v5995_v7 = vld [vmem:[#allocation2 + $0x112] sm:$0xff]  ;;  %210 = vst.msk [vmem:[#allocation3 + $0x41] sm:$0x1] %vm171_vm6, %v33027_v43  ;;  %211 = vst.msk [vmem:[#allocation3 + $0x59] sm:$0x1] %vm171_vm6, %v33027_v43 }
 0x3a1   :  { %212 = vst.msk [vmem:[#allocation3 + $0x71] sm:$0x1] %vm171_vm6, %v33027_v43  ;;  %213 = vst.msk [vmem:[#allocation3 + $0x89] sm:$0x1] %vm171_vm6, %v33027_v43 }
 0x3a2   :  { %22469 = vmatmul.mubr.msk.f32.gmra.mrb[58].mxu1 %vm68_vm0, %v547_v54  ;;  %v6002_v54 = vld [vmem:[#allocation2 + $0x16a] sm:$0xff]  ;;  %214 = vst.msk [vmem:[#allocation3 + $0xa1] sm:$0x1] %vm171_vm6, %v33027_v43  ;;  %215 = vst.msk [vmem:[#allocation3 + $0xb9] sm:$0x1] %vm171_vm6, %v33027_v43 }
 0x3a3   :  { %23125 = vmatmul.mubr.msk.f32.gmra.mrb[38].mxu0 %vm68_vm0, %v33006_v59  ;;  %22471 = vmatprep.mubr.msk.f32.mxu1 %vm68_vm0, %v548_v33  ;;  %v5996_v59 = vld [vmem:[#allocation2 + $0x122] sm:$0xff]  ;;  %216 = vst.msk [vmem:[#allocation3 + $0xd1] sm:$0x1] %vm171_vm6, %v33027_v43  ;;  %217 = vst.msk [vmem:[#allocation3 + $0xe9] sm:$0x1] %vm171_vm6, %v33027_v43 }
 0x3a4   :  { %23127 = vmatprep.mubr.msk.f32.mxu0 %vm68_vm0, %v33007_v28  ;;  %v5999_v28 = vld [vmem:[#allocation2 + $0x142] sm:$0xff]  ;;  %218 = vst.msk [vmem:[#allocation3 + $0x101] sm:$0x1] %vm171_vm6, %v33027_v43  ;;  %219 = vst.msk [vmem:[#allocation3 + $0x119] sm:$0x1] %vm171_vm6, %v33027_v43 }
 0x3a5   :  { %220 = vst.msk [vmem:[#allocation3 + $0x131] sm:$0x1] %vm171_vm6, %v33027_v43  ;;  %221 = vst.msk [vmem:[#allocation3 + $0x149] sm:$0x1] %vm171_vm6, %v33027_v43 }
 0x3a6   :  { %22472 = vmatmul.mubr.msk.f32.gmra.mrb[60].mxu1 %vm68_vm0, %v549_v34  ;;  %v6006_v34 = vld [vmem:[#allocation2 + $0x19a] sm:$0xff]  ;;  %222 = vst.msk [vmem:[#allocation3 + $0x161] sm:$0x1] %vm171_vm6, %v33027_v43  ;;  %223 = vst.msk [vmem:[#allocation3 + $0x179] sm:$0x1] %vm171_vm6, %v33027_v43 }
 0x3a7   :  { %23128 = vmatmul.mubr.msk.f32.gmra.mrb[40].mxu0 %vm68_vm0, %v33008_v8  ;;  %22474 = vmatprep.mubr.msk.f32.mxu1 %vm68_vm0, %v550_v42  ;;  %v6000_v8 = vld [vmem:[#allocation2 + $0x152] sm:$0xff]  ;;  %v33028_v42 = vld [vmem:[#allocation15_spill] sm:$0xff]  ;;  %224 = vst.msk [vmem:[#allocation3 + $0x191] sm:$0x1] %vm171_vm6, %v33027_v43  ;;  %225 = vst.msk [vmem:[#allocation3 + $0x1a9] sm:$0x1] %vm171_vm6, %v33027_v43 }
 0x3a8   :  { %23130 = vmatprep.mubr.msk.f32.mxu0 %vm68_vm0, %v33009_v29  ;;  %v6003_v29 = vld [vmem:[#allocation2 + $0x172] sm:$0xff]  ;;  %226 = vst.msk [vmem:[#allocation3 + $0x1c1] sm:$0x1] %vm171_vm6, %v33027_v43  ;;  %227 = vst.msk [vmem:[#allocation3 + $0x1d9] sm:$0x1] %vm171_vm6, %v33027_v43 }
 0x3a9   :  { %228 = vst.msk [vmem:[#allocation3 + $0x1f1] sm:$0x1] %vm171_vm6, %v33027_v43  ;;  %229 = vst.msk [vmem:[#allocation3 + $0x209] sm:$0x1] %vm171_vm6, %v33027_v43 }
 0x3aa   :  { %22475 = vmatmul.mubr.msk.f32.gmra.mrb[62].mxu1 %vm68_vm0, %v551_v2  ;;  %v6007_v2 = vld [vmem:[#allocation2 + $0x1a2] sm:$0xff]  ;;  %230 = vst.msk [vmem:[#allocation3 + $0x221] sm:$0x1] %vm171_vm6, %v33027_v43  ;;  %231 = vst.msk [vmem:[#allocation3 + $0x239] sm:$0x1] %vm171_vm6, %v33027_v43 }
 0x3ab   :  { %23131 = vmatmul.mubr.msk.f32.gmra.mrb[42].mxu0 %vm68_vm0, %v33010_v32  ;;  %22563 = vmatprep.mubr.msk.f32.mxu1 %vm68_vm0, %v479_v62  ;;  %232 = vst.msk [vmem:[#allocation3 + $0x251] sm:$0x1] %vm171_vm6, %v33027_v43  ;;  %233 = vst.msk [vmem:[#allocation3 + $0x269] sm:$0x1] %vm171_vm6, %v33027_v43 }
 0x3ac   :  { %23133 = vmatprep.mubr.msk.f32.mxu0 %vm68_vm0, %v33011_v35  ;;  %234 = vst.msk [vmem:[#allocation3 + $0x281] sm:$0x1] %vm171_vm6, %v33027_v43  ;;  %235 = vst.msk [vmem:[#allocation3 + $0x299] sm:$0x1] %vm171_vm6, %v33027_v43 }
 0x3ad   :  { %236 = vst.msk [vmem:[#allocation3 + $0x2b1] sm:$0x1] %vm171_vm6, %v33027_v43  ;;  %237 = vst.msk [vmem:[#allocation3 + $0x2c9] sm:$0x1] %vm171_vm6, %v33027_v43 }
 0x3ae   :  { %22564 = vmatmul.mubr.msk.f32.vlgmr.msra.gmra.mrb[56].mxu1 %vm68_vm0, %v480_v3  ;;  %v6010_v3 = vld [vmem:[#allocation2 + $0x1fa] sm:$0xff]  ;;  %238 = vst.msk [vmem:[#allocation3 + $0x2e1] sm:$0x1] %vm171_vm6, %v33027_v43  ;;  %239 = vst.msk [vmem:[#allocation3 + $0x2f9] sm:$0x1] %vm171_vm6, %v33027_v43 }
 0x3af   :  { %23134 = vmatmul.mubr.msk.f32.gmra.mrb[44].mxu0 %vm68_vm0, %v33012_v41  ;;  %22566 = vmatprep.mubr.msk.f32.mxu1 %vm68_vm0, %v481_v11  ;;  %v6011_v11 = vld [vmem:[#allocation2 + $0x202] sm:$0xff]  ;;  %240 = vst.msk [vmem:[#allocation3 + $0x311] sm:$0x1] %vm171_vm6, %v33027_v43  ;;  %241 = vst.msk [vmem:[#allocation3 + $0x329] sm:$0x1] %vm171_vm6, %v33027_v43 }
 0x3b0   :  { %23136 = vmatprep.mubr.msk.f32.mxu0 %vm68_vm0, %v33013_v47  ;;  %v6008_v47 = vld [vmem:[#allocation2 + $0x1e2] sm:$0xff]  ;;  %242 = vst.msk [vmem:[#allocation3 + $0x341] sm:$0x1] %vm171_vm6, %v33027_v43  ;;  %243 = vst.msk [vmem:[#allocation3 + $0x359] sm:$0x1] %vm171_vm6, %v33027_v43 }
 0x3b1   :  { %253 = vst.msk [vmem:[#allocation4] sm:$0x1] %vm171_vm6, %v33027_v43  ;;  %254 = vst.msk [vmem:[#allocation4 + $0x10] sm:$0x1] %vm171_vm6, %v33027_v43 }
 0x3b2   :  { %22567 = vmatmul.mubr.msk.f32.gmra.mrb[58].mxu1 %vm68_vm0, %v482_v12  ;;  %v6012_v12 = vld [vmem:[#allocation2 + $0x212] sm:$0xff]  ;;  %255 = vst.msk [vmem:[#allocation4 + $0x20] sm:$0x1] %vm171_vm6, %v33027_v43  ;;  %256 = vst.msk [vmem:[#allocation4 + $0x30] sm:$0x1] %vm171_vm6, %v33027_v43 }
 0x3b3   :  { %23137 = vmatmul.mubr.msk.f32.gmra.mrb[46].mxu0 %vm68_vm0, %v33014_v57  ;;  %22569 = vmatprep.mubr.msk.f32.mxu1 %vm68_vm0, %v483_v15  ;;  %v6013_v15 = vld [vmem:[#allocation2 + $0x21a] sm:$0xff]  ;;  %257 = vst.msk [vmem:[#allocation4 + $0x40] sm:$0x1] %vm171_vm6, %v33027_v43  ;;  %258 = vst.msk [vmem:[#allocation4 + $0x50] sm:$0x1] %vm171_vm6, %v33027_v43 }
 0x3b4   :  { %23139 = vmatprep.mubr.msk.f32.mxu0 %vm68_vm0, %v33015_v4  ;;  %259 = vst.msk [vmem:[#allocation4 + $0x60] sm:$0x1] %vm171_vm6, %v33027_v43  ;;  %260 = vst.msk [vmem:[#allocation4 + $0x70] sm:$0x1] %vm171_vm6, %v33027_v43 }
 0x3b5   :  { %261 = vst.msk [vmem:[#allocation4 + $0x80] sm:$0x1] %vm171_vm6, %v33027_v43  ;;  %262 = vst.msk [vmem:[#allocation4 + $0x90] sm:$0x1] %vm171_vm6, %v33027_v43 }
 0x3b6   :  { %22570 = vmatmul.mubr.msk.f32.gmra.mrb[60].mxu1 %vm68_vm0, %v484_v16  ;;  %v6014_v16 = vld [vmem:[#allocation2 + $0x22a] sm:$0xff]  ;;  %263 = vst.msk [vmem:[#allocation4 + $0xa0] sm:$0x1] %vm171_vm6, %v33027_v43  ;;  %264 = vst.msk [vmem:[#allocation4 + $0xb0] sm:$0x1] %vm171_vm6, %v33027_v43 }
 0x3b7   :  { %23140 = vmatmul.mubr.msk.f32.gmra.mrb[48].mxu0 %vm68_vm0, %v33016_v9  ;;  %22572 = vmatprep.mubr.msk.f32.mxu1 %vm68_vm0, %v485_v19  ;;  %v6017_v19 = vld [vmem:[#allocation2 + $0x24a] sm:$0xff]  ;;  %265 = vst.msk [vmem:[#allocation4 + $0xc0] sm:$0x1] %vm171_vm6, %v33027_v43  ;;  %266 = vst.msk [vmem:[#allocation4 + $0xd0] sm:$0x1] %vm171_vm6, %v33027_v43 }
 0x3b8   :  { %23142 = vmatprep.mubr.msk.f32.mxu0 %vm68_vm0, %v33017_v13  ;;  %267 = vst.msk [vmem:[#allocation4 + $0xe0] sm:$0x1] %vm171_vm6, %v33027_v43  ;;  %268 = vst.msk [vmem:[#allocation4 + $0xf0] sm:$0x1] %vm171_vm6, %v33027_v43 }
 0x3b9   :  { %269 = vst.msk [vmem:[#allocation4 + $0x100] sm:$0x1] %vm171_vm6, %v33027_v43  ;;  %270 = vst.msk [vmem:[#allocation4 + $0x110] sm:$0x1] %vm171_vm6, %v33027_v43 }
 0x3ba   :  { %22573 = vmatmul.mubr.msk.f32.gmra.mrb[62].mxu1 %vm68_vm0, %v486_v20  ;;  %v6018_v20 = vld [vmem:[#allocation2 + $0x25a] sm:$0xff]  ;;  %271 = vst.msk [vmem:[#allocation4 + $0x120] sm:$0x1] %vm171_vm6, %v33027_v43  ;;  %272 = vst.msk [vmem:[#allocation4 + $0x130] sm:$0x1] %vm171_vm6, %v33027_v43 }
 0x3bb   :  { %23143 = vmatmul.mubr.msk.f32.gmra.mrb[50].mxu0 %vm68_vm0, %v33018_v14  ;;  %273 = vst.msk [vmem:[#allocation4 + $0x9] sm:$0x1] %vm171_vm6, %v33027_v43  ;;  %274 = vst.msk [vmem:[#allocation4 + $0x19] sm:$0x1] %vm171_vm6, %v33027_v43 }
 0x3bc   :  { %23145 = vmatprep.mubr.msk.f32.mxu0 %vm68_vm0, %v33019_v17  ;;  %v6015_v17 = vld [vmem:[#allocation2 + $0x232] sm:$0xff]  ;;  %275 = vst.msk [vmem:[#allocation4 + $0x29] sm:$0x1] %vm171_vm6, %v33027_v43  ;;  %276 = vst.msk [vmem:[#allocation4 + $0x39] sm:$0x1] %vm171_vm6, %v33027_v43 }
 0x3bd   :  { %277 = vst.msk [vmem:[#allocation4 + $0x49] sm:$0x1] %vm171_vm6, %v33027_v43  ;;  %278 = vst.msk [vmem:[#allocation4 + $0x59] sm:$0x1] %vm171_vm6, %v33027_v43 }
 0x3be   :  { %279 = vst.msk [vmem:[#allocation4 + $0x69] sm:$0x1] %vm171_vm6, %v33027_v43  ;;  %280 = vst.msk [vmem:[#allocation4 + $0x79] sm:$0x1] %vm171_vm6, %v33027_v43 }
 0x3bf   :  { %23146 = vmatmul.mubr.msk.f32.gmra.mrb[52].mxu0 %vm68_vm0, %v33020_v18  ;;  %v6016_v18 = vld [vmem:[#allocation2 + $0x242] sm:$0xff]  ;;  %281 = vst.msk [vmem:[#allocation4 + $0x89] sm:$0x1] %vm171_vm6, %v33027_v43  ;;  %282 = vst.msk [vmem:[#allocation4 + $0x99] sm:$0x1] %vm171_vm6, %v33027_v43 }
 0x3c0   :  { %23148 = vmatprep.mubr.msk.f32.mxu0 %vm68_vm0, %v33021_v21  ;;  %v6019_v21 = vld [vmem:[#allocation2 + $0x262] sm:$0xff]  ;;  %283 = vst.msk [vmem:[#allocation4 + $0xa9] sm:$0x1] %vm171_vm6, %v33027_v43  ;;  %284 = vst.msk [vmem:[#allocation4 + $0xb9] sm:$0x1] %vm171_vm6, %v33027_v43 }
 0x3c1   :  { %285 = vst.msk [vmem:[#allocation4 + $0xc9] sm:$0x1] %vm171_vm6, %v33027_v43  ;;  %286 = vst.msk [vmem:[#allocation4 + $0xd9] sm:$0x1] %vm171_vm6, %v33027_v43 }
 0x3c2   :  { %287 = vst.msk [vmem:[#allocation4 + $0xe9] sm:$0x1] %vm171_vm6, %v33027_v43  ;;  %288 = vst.msk [vmem:[#allocation4 + $0xf9] sm:$0x1] %vm171_vm6, %v33027_v43 }
 0x3c3   :  { %23149 = vmatmul.mubr.msk.f32.gmra.mrb[54].mxu0 %vm68_vm0, %v27583_v27  ;;  %v5329_v27 = vld [vmem:[#allocation2 + $0x351] sm:$0xff]  ;;  %289 = vst.msk [vmem:[#allocation4 + $0x109] sm:$0x1] %vm171_vm6, %v33027_v43  ;;  %290 = vst.msk [vmem:[#allocation4 + $0x119] sm:$0x1] %vm171_vm6, %v33027_v43 }
 0x3c4   :  { %23151 = vmatprep.mubr.msk.f32.mxu0 %vm68_vm0, %v33022_v22  ;;  %v20018_v22 = vld [vmem:[%s32708_s2 + $0x50] sm:$0xff]  ;;  %291 = vst.msk [vmem:[#allocation4 + $0x129] sm:$0x1] %vm171_vm6, %v33027_v43  ;;  %292 = vst.msk [vmem:[#allocation4 + $0x139] sm:$0x1] %vm171_vm6, %v33027_v43  ;;  %vm19371_vm6 = vcmask 9216  }
 0x3c5   :  { %v6957_v43 = vld [vmem:[#allocation3 + $0x9] sm:$0xff] }
 0x3c7   :  { %23152 = vmatmul.mubr.msk.f32.gmra.mrb[56].mxu0 %vm68_vm0, %v27591_v58  ;;  %v20016_v58 = vld [vmem:[%s32708_s2 + $0x40] sm:$0xff] }
 0x3c8   :  { %23154 = vmatprep.mubr.msk.f32.mxu0 %vm68_vm0, %v33023_v23  ;;  %v24629_v40 = vpack.c.bf16 %v20017_v38, %v20016_v58  ;;  %v20019_v23 = vld [vmem:[%s32708_s2 + $0x58] sm:$0xff] }
 0x3ca   :  { %24630 = vmatprep.subr.bf16.mxu1 %v24629_v40 }
 0x3cb   :  { %23155 = vmatmul.mubr.msk.f32.gmra.mrb[58].mxu0 %vm68_vm0, %v33024_v24  ;;  %24632 = vmatpush3.bf16.msra.mxu1 %v24629_v40  ;;  %v6020_v24 = vld [vmem:[#allocation2 + $0x272] sm:$0xff] }
 0x3cc   :  { %23157 = vmatprep.mubr.msk.f32.mxu0 %vm68_vm0, %v33025_v30  ;;  %v24633_v30 = vpack.c.bf16 %v20019_v23, %v20018_v22  ;;  %v28182_v40 = vld [vmem:[#allocation2 + $0x292] sm:$0xff] }
 0x3ce   :  { %24634 = vmatprep.subr.bf16.mxu1 %v24633_v30 }
 0x3cf   :  { %23158 = vmatmul.mubr.msk.f32.gmra.mrb[60].mxu0 %vm68_vm0, %v33026_v36  ;;  %24636 = vmatpush3.bf16.msra.mxu1 %v24633_v30  ;;  %v20020_v36 = vld [vmem:[%s32708_s2 + $0x60] sm:$0xff] }
 0x3d0   :  { %23160 = vmatprep.mubr.msk.f32.mxu0 %vm68_vm0, %v5328_v31  ;;  %v6021_v31 = vld [vmem:[#allocation2 + $0x27a] sm:$0xff] }
 0x3d3   :  { %23161 = vmatmul.mubr.msk.f32.gmra.mrb[62].mxu0 %vm68_vm0, %v5329_v27  ;;  %v20021_v27 = vld [vmem:[%s32708_s2 + $0x68] sm:$0xff] }
 0x3d4   :  { %23165 = vmatprep.mubr.msk.f32.mxu0 %vm68_vm0, %v5976_v37  ;;  %v6022_v37 = vld [vmem:[#allocation2 + $0x28a] sm:$0xff]  ;;  %v24637_v38 = vpack.c.bf16 %v20021_v27, %v20020_v36  ;;  %v6951_v36 = vld [vmem:[%s32708_s2 + $0x18] sm:$0xff] }
 0x3d6   :  { %24638 = vmatprep.subr.bf16.mxu1 %v24637_v38 }
 0x3d7   :  { %23166 = vmatmul.mubr.msk.f32.vlgmr.msra.gmra.mrb[0].mxu0 %vm68_vm0, %v5977_v39  ;;  %24640 = vmatpush3.bf16.msra.mxu1 %v24637_v38 }
 0x3d8   :  { %23168 = vmatprep.mubr.msk.f32.mxu0 %vm68_vm0, %v5978_v44  ;;  %v20022_v44 = vld [vmem:[%s32708_s2 + $0x70] sm:$0xff] }
 0x3db   :  { %23169 = vmatmul.mubr.msk.f32.gmra.mrb[2].mxu0 %vm68_vm0, %v5979_v45  ;;  %v20023_v45 = vld [vmem:[%s32708_s2 + $0x78] sm:$0xff] }
 0x3dc   :  { %23171 = vmatprep.mubr.msk.f32.mxu0 %vm68_vm0, %v5980_v46  ;;  %v28190_v46 = vld [vmem:[#allocation2 + $0x2a2] sm:$0xff] }
 0x3df   :  { %23172 = vmatmul.mubr.msk.f32.gmra.mrb[4].mxu0 %vm68_vm0, %v5981_v48 }
 0x3e0   :  { %23174 = vmatprep.mubr.msk.f32.mxu0 %vm68_vm0, %v5982_v0  ;;  %v28194_v0 = vpack.c.bf16 %v20023_v45, %v20022_v44 }
 0x3e2   :  { %24642 = vmatprep.subr.bf16.mxu1 %v28194_v0 }
 0x3e3   :  { %23175 = vmatmul.mubr.msk.f32.gmra.mrb[6].mxu0 %vm68_vm0, %v5983_v1  ;;  %24644 = vmatpush3.bf16.msra.mxu1 %v28194_v0 }
 0x3e4   :  { %23177 = vmatprep.mubr.msk.f32.mxu0 %vm68_vm0, %v5984_v49  ;;  %v6025_v49 = vld [vmem:[#allocation2 + $0x2aa] sm:$0xff] }
 0x3e7   :  { %23178 = vmatmul.mubr.msk.f32.gmra.mrb[8].mxu0 %vm68_vm0, %v5985_v52  ;;  %v6026_v52 = vld [vmem:[#allocation2 + $0x2ba] sm:$0xff] }
 0x3e8   :  { %23180 = vmatprep.mubr.msk.f32.mxu0 %vm68_vm0, %v5986_v53 }
 0x3eb   :  { %23181 = vmatmul.mubr.msk.f32.gmra.mrb[10].mxu0 %vm68_vm0, %v5987_v55  ;;  %v6956_v55 = vld [vmem:[#allocation3 + $0x1] sm:$0xff] }
 0x3ec   :  { %23183 = vmatprep.mubr.msk.f32.mxu0 %vm68_vm0, %v5988_v10  ;;  %23277 = vmatprep.mubr.msk.f32.mxu1 %vm156_vm4, %v6956_v55 }
 0x3ed   :  { %23278 = vmatmul.mubr.msk.f32.vlgmr.msra.gmra.mrb[64].mxu1 %vm156_vm4, %v6957_v43 }
 0x3ef   :  { %23184 = vmatmul.mubr.msk.f32.gmra.mrb[12].mxu0 %vm68_vm0, %v5989_v61  ;;  %v6027_v61 = vld [vmem:[#allocation2 + $0x2c2] sm:$0xff] }
 0x3f0   :  { %23186 = vmatprep.mubr.msk.f32.mxu0 %vm68_vm0, %v5990_v26  ;;  %v28108_v32 = vpop.f32.mrb[0].mxu1  ;;  %v6028_v26 = vld [vmem:[#allocation2 + $0x2d2] sm:$0xff] }
 0x3f1   :  { %v28110_v33 = vpop.f32.mrb[1].mxu1 }
 0x3f3   :  { %23187 = vmatmul.mubr.msk.f32.gmra.mrb[14].mxu0 %vm68_vm0, %v5991_v5 }
 0x3f4   :  { %23189 = vmatprep.mubr.msk.f32.mxu0 %vm68_vm0, %v5992_v63  ;;  %v28115_v35 = vpop.f32.mrb[2].mxu1 }
 0x3f5   :  { %v28117_v41 = vpop.f32.mrb[3].mxu1 }
 0x3f7   :  { %23190 = vmatmul.mubr.msk.f32.gmra.mrb[16].mxu0 %vm68_vm0, %v5993_v6  ;;  %v6029_v6 = vld [vmem:[#allocation2 + $0x2da] sm:$0xff] }
 0x3f8   :  { %23192 = vmatprep.mubr.msk.f32.mxu0 %vm68_vm0, %v5994_v60  ;;  %v6030_v60 = vld [vmem:[#allocation2 + $0x2ea] sm:$0xff] }
 0x3f9   :  { %v28122_v57 = vpop.f32.mrb[4].mxu1 }
 0x3fa   :  { %v28124_v62 = vpop.f32.mrb[5].mxu1 }
 0x3fb   :  { %23193 = vmatmul.mubr.msk.f32.gmra.mrb[18].mxu0 %vm68_vm0, %v5995_v7  ;;  %v6948_v7 = vld [vmem:[%s32708_s2] sm:$0xff] }
 0x3fc   :  { %23195 = vmatprep.mubr.msk.f32.mxu0 %vm68_vm0, %v5996_v59  ;;  %v6949_v59 = vld [vmem:[%s32708_s2 + $0x8] sm:$0xff] }
 0x3fd   :  { %v28128_v4 = vpop.f32.mrb[6].mxu1 }
 0x3fe   :  { %v28130_v9 = vpop.f32.mrb[7].mxu1 }
 0x3ff   :  { %23196 = vmatmul.mubr.msk.f32.gmra.mrb[20].mxu0 %vm68_vm0, %v5997_v51 }
 0x400   :  { %23198 = vmatprep.mubr.msk.f32.mxu0 %vm68_vm0, %v5998_v25  ;;  %v24645_v25 = vpack.c.bf16 %v6949_v59, %v6948_v7  ;;  %v6952_v59 = vld [vmem:[%s32708_s2 + $0x20] sm:$0xff] }
 0x401   :  { %v28134_v13 = vpop.f32.mrb[8].mxu1 }
 0x402   :  { %v28136_v14 = vpop.f32.mrb[9].mxu1  ;;  %24646 = vmatprep.subr.bf16.mxu1 %v24645_v25 }
 0x403   :  { %23199 = vmatmul.mubr.msk.f32.gmra.mrb[22].mxu0 %vm68_vm0, %v5999_v28  ;;  %24648 = vmatpush3.bf16.msra.mxu1 %v24645_v25  ;;  %v6953_v25 = vld [vmem:[%s32708_s2 + $0x28] sm:$0xff] }
 0x404   :  { %23201 = vmatprep.mubr.msk.f32.mxu0 %vm68_vm0, %v6000_v8  ;;  %v6031_v8 = vld [vmem:[#allocation2 + $0x2f2] sm:$0xff] }
 0x407   :  { %23202 = vmatmul.mubr.msk.f32.gmra.mrb[24].mxu0 %vm68_vm0, %v6001_v56  ;;  %v6032_v56 = vld [vmem:[#allocation2 + $0x302] sm:$0xff] }
 0x408   :  { %23204 = vmatprep.mubr.msk.f32.mxu0 %vm68_vm0, %v6002_v54 }
 0x40b   :  { %23205 = vmatmul.mubr.msk.f32.gmra.mrb[26].mxu0 %vm68_vm0, %v6003_v29 }
 0x40c   :  { %23207 = vmatprep.mubr.msk.f32.mxu0 %vm68_vm0, %v27678_v50  ;;  %v6009_v50 = vld [vmem:[#allocation2 + $0x1ea] sm:$0xff] }
 0x40f   :  { %23208 = vmatmul.mubr.msk.f32.gmra.mrb[28].mxu0 %vm68_vm0, %v33028_v42  ;;  %v6034_v42 = vld [vmem:[#allocation2 + $0x31a] sm:$0xff] }
 0x410   :  { %23210 = vmatprep.mubr.msk.f32.mxu0 %vm68_vm0, %v6006_v34  ;;  %v6033_v34 = vld [vmem:[#allocation2 + $0x30a] sm:$0xff] }
 0x413   :  { %23211 = vmatmul.mubr.msk.f32.gmra.mrb[30].mxu0 %vm68_vm0, %v6007_v2  ;;  %v28160_v58 = vpop.f32.mrb[10].mxu1 }
 0x414   :  { %23213 = vmatprep.mubr.msk.f32.mxu0 %vm68_vm0, %v6008_v47  ;;  %v28162_v39 = vpop.f32.mrb[11].mxu1 }
 0x417   :  { %23214 = vmatmul.mubr.msk.f32.gmra.mrb[32].mxu0 %vm68_vm0, %v6009_v50  ;;  %v28192_v48 = vpop.f32.mrb[12].mxu1  ;;  %v6035_v50 = vld [vmem:[#allocation2 + $0x322] sm:$0xff] }
 0x418   :  { %23216 = vmatprep.mubr.msk.f32.mxu0 %vm68_vm0, %v6010_v3  ;;  %v28420_v1 = vpop.f32.mrb[13].mxu1  ;;  %v6036_v3 = vld [vmem:[#allocation2 + $0x332] sm:$0xff] }
 0x41b   :  { %23217 = vmatmul.mubr.msk.f32.gmra.mrb[34].mxu0 %vm68_vm0, %v6011_v11 }
 0x41c   :  { %23219 = vmatprep.mubr.msk.f32.mxu0 %vm68_vm0, %v6012_v12  ;;  %v28428_v53 = vpop.f32.mrb[14].mxu1 }
 0x41d   :  { %v28430_v10 = vpop.f32.mrb[15].mxu1 }
 0x41f   :  { %23220 = vmatmul.mubr.msk.f32.gmra.mrb[36].mxu0 %vm68_vm0, %v6013_v15  ;;  %v6037_v15 = vld [vmem:[#allocation2 + $0x33a] sm:$0xff] }
 0x420   :  { %23222 = vmatprep.mubr.msk.f32.mxu0 %vm68_vm0, %v6014_v16  ;;  %v28436_v5 = vpop.f32.mrb[16].mxu1  ;;  %v6038_v16 = vld [vmem:[#allocation2 + $0x34a] sm:$0xff] }
 0x421   :  { %v28438_v63 = vpop.f32.mrb[17].mxu1 }
 0x423   :  { %23223 = vmatmul.mubr.msk.f32.gmra.mrb[38].mxu0 %vm68_vm0, %v6015_v17 }
 0x424   :  { %23225 = vmatprep.mubr.msk.f32.mxu0 %vm68_vm0, %v6016_v18  ;;  %v28448_v51 = vpop.f32.mrb[18].mxu1 }
 0x425   :  { %v28450_v28 = vpop.f32.mrb[19].mxu1 }
 0x427   :  { %23226 = vmatmul.mubr.msk.f32.gmra.mrb[40].mxu0 %vm68_vm0, %v6017_v19  ;;  %v6039_v19 = vld [vmem:[#allocation2 + $0x352] sm:$0xff] }
 0x428   :  { %23228 = vmatprep.mubr.msk.f32.mxu0 %vm68_vm0, %v6018_v20 }
 0x429   :  { %v28454_v54 = vpop.f32.mrb[20].mxu1 }
 0x42a   :  { %v28456_v29 = vpop.f32.mrb[21].mxu1 }
 0x42b   :  { %23229 = vmatmul.mubr.msk.f32.gmra.mrb[42].mxu0 %vm68_vm0, %v6019_v21 }
 0x42c   :  { %23231 = vmatprep.mubr.msk.f32.mxu0 %vm68_vm0, %v6020_v24 }
 0x42d   :  { %v28460_v2 = vpop.f32.mrb[22].mxu1 }
 0x42e   :  { %v28462_v47 = vpop.f32.mrb[23].mxu1 }
 0x42f   :  { %23232 = vmatmul.mubr.msk.f32.gmra.mrb[44].mxu0 %vm68_vm0, %v6021_v31  ;;  %v6950_v31 = vld [vmem:[%s32708_s2 + $0x10] sm:$0xff] }
 0x430   :  { %23234 = vmatprep.mubr.msk.f32.mxu0 %vm68_vm0, %v6022_v37  ;;  %v24649_v37 = vpack.c.bf16 %v6951_v36, %v6950_v31 }
 0x431   :  { %v28466_v11 = vpop.f32.mrb[24].mxu1 }
 0x432   :  { %v28468_v12 = vpop.f32.mrb[25].mxu1  ;;  %24650 = vmatprep.subr.bf16.mxu1 %v24649_v37 }
 0x433   :  { %23235 = vmatmul.mubr.msk.f32.gmra.mrb[46].mxu0 %vm68_vm0, %v28182_v40  ;;  %24652 = vmatpush3.bf16.msra.mxu1 %v24649_v37 }
 0x434   :  { %23237 = vmatprep.mubr.msk.f32.mxu0 %vm68_vm0, %v28190_v46 }
 0x435   :  { %v28472_v17 = vpop.f32.mrb[26].mxu1 }
 0x436   :  { %v28474_v18 = vpop.f32.mrb[27].mxu1 }
 0x437   :  { %23238 = vmatmul.mubr.msk.f32.gmra.mrb[48].mxu0 %vm68_vm0, %v6025_v49 }
 0x438   :  { %23240 = vmatprep.mubr.msk.f32.mxu0 %vm68_vm0, %v6026_v52 }
 0x439   :  { %v28478_v20 = vpop.f32.mrb[28].mxu1 }
 0x43a   :  { %v28480_v21 = vpop.f32.mrb[29].mxu1 }
 0x43b   :  { %23241 = vmatmul.mubr.msk.f32.gmra.mrb[50].mxu0 %vm68_vm0, %v6027_v61 }
 0x43c   :  { %23243 = vmatprep.mubr.msk.f32.mxu0 %vm68_vm0, %v6028_v26 }
 0x43d   :  { %v28483_v22 = vpop.f32.mrb[30].mxu1 }
 0x43e   :  { %v28485_v23 = vpop.f32.mrb[31].mxu1 }
 0x43f   :  { %23244 = vmatmul.mubr.msk.f32.gmra.mrb[52].mxu0 %vm68_vm0, %v6029_v6 }
 0x440   :  { %23246 = vmatprep.mubr.msk.f32.mxu0 %vm68_vm0, %v6030_v60 }
 0x441   :  { %v28487_v24 = vpop.f32.mrb[32].mxu1 }
 0x442   :  { %v28489_v30 = vpop.f32.mrb[33].mxu1 }
 0x443   :  { %23247 = vmatmul.mubr.msk.f32.gmra.mrb[54].mxu0 %vm68_vm0, %v6031_v8 }
 0x444   :  { %23249 = vmatprep.mubr.msk.f32.mxu0 %vm68_vm0, %v6032_v56  ;;  %v24653_v56 = vpack.c.bf16 %v6953_v25, %v6952_v59 }
 0x445   :  { %v28497_v27 = vpop.f32.mrb[34].mxu1 }
 0x446   :  { %v28499_v38 = vpop.f32.mrb[35].mxu1  ;;  %24654 = vmatprep.subr.bf16.mxu1 %v24653_v56 }
 0x447   :  { %23250 = vmatmul.mubr.msk.f32.gmra.mrb[56].mxu0 %vm68_vm0, %v6033_v34  ;;  %24656 = vmatpush3.bf16.msra.mxu1 %v24653_v56 }
 0x448   :  { %23252 = vmatprep.mubr.msk.f32.mxu0 %vm68_vm0, %v6034_v42 }
 0x449   :  { %v28501_v40 = vpop.f32.mrb[36].mxu1 }
 0x44a   :  { %v28503_v44 = vpop.f32.mrb[37].mxu1 }
 0x44b   :  { %23253 = vmatmul.mubr.msk.f32.gmra.mrb[58].mxu0 %vm68_vm0, %v6035_v50 }
 0x44c   :  { %23255 = vmatprep.mubr.msk.f32.mxu0 %vm68_vm0, %v6036_v3 }
 0x44d   :  { %v28505_v45 = vpop.f32.mrb[38].mxu1 }
 0x44e   :  { %v28507_v46 = vpop.f32.mrb[39].mxu1 }
 0x44f   :  { %23256 = vmatmul.mubr.msk.f32.gmra.mrb[60].mxu0 %vm68_vm0, %v6037_v15 }
 0x450   :  { %23258 = vmatprep.mubr.msk.f32.mxu0 %vm68_vm0, %v6038_v16 }
 0x451   :  { %v28509_v0 = vpop.f32.mrb[40].mxu1 }
 0x452   :  { %v28511_v49 = vpop.f32.mrb[41].mxu1 }
 0x453   :  { %23259 = vmatmul.mubr.msk.f32.gmra.mrb[62].mxu0 %vm68_vm0, %v6039_v19  ;;  %vm17578_vm0 = vcmask 261312  }
 0x455   :  { %v28513_v52 = vpop.f32.mrb[42].mxu1 }
 0x456   :  { %v28515_v55 = vpop.f32.mrb[43].mxu1 }
 0x459   :  { %v28517_v43 = vpop.f32.mrb[44].mxu1 }
 0x45a   :  { %v28519_v61 = vpop.f32.mrb[45].mxu1 }
 0x45d   :  { %v28521_v26 = vpop.f32.mrb[46].mxu1 }
 0x45e   :  { %v28523_v6 = vpop.f32.mrb[47].mxu1 }
 0x461   :  { %v28525_v60 = vpop.f32.mrb[48].mxu1 }
 0x462   :  { %v28527_v7 = vpop.f32.mrb[49].mxu1 }
 0x465   :  { %v28535_v8 = vpop.f32.mrb[50].mxu1 }
 0x466   :  { %33029 = vst [vmem:[#allocation16_spill] sm:$0xff] %v28535_v8  ;;  %v28537_v34 = vpop.f32.mrb[51].mxu1 }
 0x467   :  { %33030 = vst [vmem:[#allocation17_spill] sm:$0xff] %v28537_v34 }
 0x469   :  { %v28539_v42 = vpop.f32.mrb[52].mxu1 }
 0x46a   :  { %33031 = vst [vmem:[#allocation18_spill] sm:$0xff] %v28539_v42  ;;  %v28541_v50 = vpop.f32.mrb[53].mxu1 }
 0x46b   :  { %33032 = vst [vmem:[#allocation19_spill] sm:$0xff] %v28541_v50 }
 0x46d   :  { %v28543_v3 = vpop.f32.mrb[54].mxu1 }
 0x46e   :  { %33033 = vst [vmem:[#allocation20_spill] sm:$0xff] %v28543_v3  ;;  %v28545_v15 = vpop.f32.mrb[55].mxu1 }
 0x46f   :  { %33034 = vst [vmem:[#allocation21_spill] sm:$0xff] %v28545_v15  ;;  %v6954_v15 = vld [vmem:[%s32708_s2 + $0x30] sm:$0xff] }
 0x481   :  { %v28547_v16 = vpop.f32.mrb[56].mxu1 }
 0x482   :  { %33035 = vst [vmem:[#allocation22_spill] sm:$0xff] %v28547_v16  ;;  %v28549_v19 = vpop.f32.mrb[57].mxu1 }
 0x483   :  { %33036 = vst [vmem:[#allocation23_spill] sm:$0xff] %v28549_v19  ;;  %v6955_v19 = vld [vmem:[%s32708_s2 + $0x38] sm:$0xff] }
 0x484   :  { %v24657_v16 = vpack.c.bf16 %v6955_v19, %v6954_v15 }
 0x485   :  { %v28551_v31 = vpop.f32.mrb[58].mxu1 }
 0x486   :  { %33037 = vst [vmem:[#allocation24_spill] sm:$0xff] %v28551_v31  ;;  %v28553_v36 = vpop.f32.mrb[59].mxu1  ;;  %24658 = vmatprep.subr.bf16.mxu1 %v24657_v16 }
 0x487   :  { %33038 = vst [vmem:[#allocation25_spill] sm:$0xff] %v28553_v36  ;;  %24660 = vmatpush3.bf16.msra.mxu1 %v24657_v16 }
 0x489   :  { %v28555_v37 = vpop.f32.mrb[60].mxu1 }
 0x48a   :  { %33039 = vst [vmem:[#allocation26_spill] sm:$0xff] %v28555_v37  ;;  %v28557_v59 = vpop.f32.mrb[61].mxu1  ;;  %v28572_v37 = vld [vmem:[%s32710_s4] ss:$0 sm:$0xff] }
 0x48b   :  { %33040 = vst [vmem:[#allocation27_spill] sm:$0xff] %v28557_v59 }
 0x48d   :  { %v28559_v25 = vpop.f32.mrb[62].mxu1 }
 0x48e   :  { %33041 = vst [vmem:[#allocation28_spill] sm:$0xff] %v28559_v25  ;;  %v28561_v56 = vpop.f32.mrb[63].mxu1 }
 0x48f   :  { %33042 = vst [vmem:[#allocation29_spill] sm:$0xff] %v28561_v56 }
 0x4aa   :  { %v23167_v59 = vpop.f32.mrb[0].mxu0 }
 0x4ab   :  { %v24919_v25 = vadd.f32 %v23167_v59, %v28108_v32  ;;  %v6303_v56 = vpop.f32.mrb[1].mxu0 }
 0x4ac   :  { %v24920_v36 = vadd.f32 %v6303_v56, %v28110_v33 }
 0x4ad   :  { %v6691_v31 = vadd.f32 %v24919_v25, %v28572_v37 }
 0x4ae   :  { %v6690_v3 = vadd.f32 %v24920_v36, %v28572_v37  ;;  %v23170_v50 = vpop.f32.mrb[2].mxu0 }
 0x4af   :  { %v6755_v42 = vmax.f32 %v6691_v31, 0.0  ;;  %v24921_v15 = vadd.f32 %v23170_v50, %v28115_v35  ;;  %v6313_v16 = vpop.f32.mrb[3].mxu0 }
 0x4b0   :  { %v6754_v19 = vmax.f32 %v6690_v3, 0.0  ;;  %v24922_v34 = vadd.f32 %v6313_v16, %v28117_v41  ;;  %v20152_v41 = vld [vmem:[%s32708_s2 + $0x80] sm:$0xff] }
 0x4b1   :  { %6820 = vst.msk [vmem:[#allocation3 + $0x21] sm:$0xff] %vm156_vm4, %v6755_v42  ;;  %v6693_v8 = vadd.f32 %v24921_v15, %v28572_v37  ;;  %v20153_v42 = vld [vmem:[%s32708_s2 + $0x88] sm:$0xff] }
 0x4b2   :  { %6819 = vst.msk [vmem:[#allocation3 + $0x19] sm:$0xff] %vm156_vm4, %v6754_v19  ;;  %v6692_v32 = vadd.f32 %v24922_v34, %v28572_v37  ;;  %v23173_v33 = vpop.f32.mrb[4].mxu0  ;;  %v28594_v50 = vpack.c.bf16 %v20153_v42, %v20152_v41 }
 0x4b3   :  { %v6757_v59 = vmax.f32 %v6693_v8, 0.0  ;;  %v24923_v36 = vadd.f32 %v23173_v33, %v28122_v57  ;;  %v6323_v25 = vpop.f32.mrb[5].mxu0 }
 0x4b4   :  { %v6756_v31 = vmax.f32 %v6692_v32, 0.0  ;;  %v24924_v35 = vadd.f32 %v6323_v25, %v28124_v62  ;;  %24662 = vmatprep.subr.bf16.mxu1 %v28594_v50 }
 0x4b5   :  { %6822 = vst.msk [vmem:[#allocation3 + $0x39] sm:$0xff] %vm156_vm4, %v6757_v59  ;;  %v6695_v34 = vadd.f32 %v24923_v36, %v28572_v37 }
 0x4b6   :  { %6821 = vst.msk [vmem:[#allocation3 + $0x31] sm:$0xff] %vm156_vm4, %v6756_v31  ;;  %v6694_v57 = vadd.f32 %v24924_v35, %v28572_v37  ;;  %v23176_v8 = vpop.f32.mrb[6].mxu0 }
 0x4b7   :  { %v6759_v62 = vmax.f32 %v6695_v34, 0.0  ;;  %v24925_v3 = vadd.f32 %v23176_v8, %v28128_v4  ;;  %v6333_v56 = vpop.f32.mrb[7].mxu0 }
 0x4b8   :  { %v6758_v15 = vmax.f32 %v6694_v57, 0.0  ;;  %v24926_v16 = vadd.f32 %v6333_v56, %v28130_v9  ;;  %v6959_v36 = vld [vmem:[#allocation3 + $0x21] sm:$0xff] }
 0x4b9   :  { %6824 = vst.msk [vmem:[#allocation3 + $0x51] sm:$0xff] %vm156_vm4, %v6759_v62  ;;  %v6697_v19 = vadd.f32 %v24925_v3, %v28572_v37  ;;  %v6958_v32 = vld [vmem:[#allocation3 + $0x19] sm:$0xff] }
 0x4ba   :  { %6823 = vst.msk [vmem:[#allocation3 + $0x49] sm:$0xff] %vm156_vm4, %v6758_v15  ;;  %v6696_v33 = vadd.f32 %v24926_v16, %v28572_v37  ;;  %v23179_v59 = vpop.f32.mrb[8].mxu0  ;;  %23280 = vmatprep.mubr.msk.f32.mxu1 %vm156_vm4, %v6958_v32 }
 0x4bb   :  { %v6761_v4 = vmax.f32 %v6697_v19, 0.0  ;;  %v24927_v25 = vadd.f32 %v23179_v59, %v28134_v13  ;;  %v6343_v31 = vpop.f32.mrb[9].mxu0  ;;  %23281 = vmatmul.mubr.msk.f32.gmra.mrb[66].mxu1 %vm156_vm4, %v6959_v36 }
 0x4bc   :  { %v6760_v9 = vmax.f32 %v6696_v33, 0.0  ;;  %v24928_v35 = vadd.f32 %v6343_v31, %v28136_v14  ;;  %v6961_v8 = vld [vmem:[#allocation3 + $0x39] sm:$0xff] }
 0x4bd   :  { %6826 = vst.msk [vmem:[#allocation3 + $0x69] sm:$0xff] %vm156_vm4, %v6761_v4  ;;  %v6699_v41 = vadd.f32 %v24927_v25, %v28572_v37  ;;  %v6960_v42 = vld [vmem:[#allocation3 + $0x31] sm:$0xff] }
 0x4be   :  { %6825 = vst.msk [vmem:[#allocation3 + $0x61] sm:$0xff] %vm156_vm4, %v6760_v9  ;;  %v6698_v34 = vadd.f32 %v24928_v35, %v28572_v37  ;;  %v23182_v57 = vpop.f32.mrb[10].mxu0  ;;  %23283 = vmatprep.mubr.msk.f32.mxu1 %vm156_vm4, %v6960_v42 }
 0x4bf   :  { %v6763_v13 = vmax.f32 %v6699_v41, 0.0  ;;  %v24929_v62 = vadd.f32 %v23182_v57, %v28160_v58  ;;  %v6353_v3 = vpop.f32.mrb[11].mxu0  ;;  %23284 = vmatmul.mubr.msk.f32.gmra.mrb[68].mxu1 %vm156_vm4, %v6961_v8 }
 0x4c0   :  { %v6762_v14 = vmax.f32 %v6698_v34, 0.0  ;;  %v24930_v56 = vadd.f32 %v6353_v3, %v28162_v39  ;;  %v6963_v33 = vld [vmem:[#allocation3 + $0x51] sm:$0xff] }
 0x4c1   :  { %6828 = vst.msk [vmem:[#allocation3 + $0x81] sm:$0xff] %vm156_vm4, %v6763_v13  ;;  %v6701_v15 = vadd.f32 %v24929_v62, %v28572_v37  ;;  %v6962_v16 = vld [vmem:[#allocation3 + $0x49] sm:$0xff] }
 0x4c2   :  { %6827 = vst.msk [vmem:[#allocation3 + $0x79] sm:$0xff] %vm156_vm4, %v6762_v14  ;;  %v6700_v19 = vadd.f32 %v24930_v56, %v28572_v37  ;;  %v23185_v32 = vpop.f32.mrb[12].mxu0  ;;  %23286 = vmatprep.mubr.msk.f32.mxu1 %vm156_vm4, %v6962_v16 }
 0x4c3   :  { %v6765_v58 = vmax.f32 %v6701_v15, 0.0  ;;  %v24931_v59 = vadd.f32 %v23185_v32, %v28192_v48  ;;  %v6363_v36 = vpop.f32.mrb[13].mxu0  ;;  %23287 = vmatmul.mubr.msk.f32.gmra.mrb[70].mxu1 %vm156_vm4, %v6963_v33 }
 0x4c4   :  { %v6764_v39 = vmax.f32 %v6700_v19, 0.0  ;;  %v24932_v4 = vadd.f32 %v6363_v36, %v28420_v1  ;;  %v6965_v41 = vld [vmem:[#allocation3 + $0x69] sm:$0xff] }
 0x4c5   :  { %6830 = vst.msk [vmem:[#allocation3 + $0x99] sm:$0xff] %vm156_vm4, %v6765_v58  ;;  %v6703_v25 = vadd.f32 %v24931_v59, %v28572_v37  ;;  %v6964_v31 = vld [vmem:[#allocation3 + $0x61] sm:$0xff] }
 0x4c6   :  { %6829 = vst.msk [vmem:[#allocation3 + $0x91] sm:$0xff] %vm156_vm4, %v6764_v39  ;;  %v6702_v9 = vadd.f32 %v24932_v4, %v28572_v37  ;;  %v23188_v35 = vpop.f32.mrb[14].mxu0  ;;  %23289 = vmatprep.mubr.msk.f32.mxu1 %vm156_vm4, %v6964_v31 }
 0x4c7   :  { %v6767_v48 = vmax.f32 %v6703_v25, 0.0  ;;  %v24933_v42 = vadd.f32 %v23188_v35, %v28428_v53  ;;  %v6373_v34 = vpop.f32.mrb[15].mxu0  ;;  %23290 = vmatmul.mubr.msk.f32.gmra.mrb[72].mxu1 %vm156_vm4, %v6965_v41 }
 0x4c8   :  { %v6766_v1 = vmax.f32 %v6702_v9, 0.0  ;;  %v24934_v57 = vadd.f32 %v6373_v34, %v28430_v10  ;;  %v6967_v14 = vld [vmem:[#allocation3 + $0x81] sm:$0xff] }
 0x4c9   :  { %6832 = vst.msk [vmem:[#allocation3 + $0xb1] sm:$0xff] %vm156_vm4, %v6767_v48  ;;  %v6705_v8 = vadd.f32 %v24933_v42, %v28572_v37  ;;  %v6966_v13 = vld [vmem:[#allocation3 + $0x79] sm:$0xff] }
 0x4ca   :  { %6831 = vst.msk [vmem:[#allocation3 + $0xa9] sm:$0xff] %vm156_vm4, %v6766_v1  ;;  %v6704_v62 = vadd.f32 %v24934_v57, %v28572_v37  ;;  %v23191_v3 = vpop.f32.mrb[16].mxu0  ;;  %23292 = vmatprep.mubr.msk.f32.mxu1 %vm156_vm4, %v6966_v13 }
 0x4cb   :  { %v6769_v53 = vmax.f32 %v6705_v8, 0.0  ;;  %v24935_v56 = vadd.f32 %v23191_v3, %v28436_v5  ;;  %v6383_v15 = vpop.f32.mrb[17].mxu0  ;;  %23293 = vmatmul.mubr.msk.f32.gmra.mrb[74].mxu1 %vm156_vm4, %v6967_v14 }
 0x4cc   :  { %v6768_v10 = vmax.f32 %v6704_v62, 0.0  ;;  %v24936_v16 = vadd.f32 %v6383_v15, %v28438_v63  ;;  %v6969_v59 = vld [vmem:[#allocation3 + $0x99] sm:$0xff] }
 0x4cd   :  { %6834 = vst.msk [vmem:[#allocation3 + $0xc9] sm:$0xff] %vm156_vm4, %v6769_v53  ;;  %v6707_v19 = vadd.f32 %v24935_v56, %v28572_v37  ;;  %v6968_v32 = vld [vmem:[#allocation3 + $0x91] sm:$0xff] }
 0x4ce   :  { %6833 = vst.msk [vmem:[#allocation3 + $0xc1] sm:$0xff] %vm156_vm4, %v6768_v10  ;;  %v6706_v33 = vadd.f32 %v24936_v16, %v28572_v37  ;;  %v23194_v58 = vpop.f32.mrb[18].mxu0  ;;  %23295 = vmatprep.mubr.msk.f32.mxu1 %vm156_vm4, %v6968_v32 }
 0x4cf   :  { %v6771_v5 = vmax.f32 %v6707_v19, 0.0  ;;  %v24937_v36 = vadd.f32 %v23194_v58, %v28448_v51  ;;  %v6393_v39 = vpop.f32.mrb[19].mxu0  ;;  %23296 = vmatmul.mubr.msk.f32.gmra.mrb[76].mxu1 %vm156_vm4, %v6969_v59 }
 0x4d0   :  { %v6770_v63 = vmax.f32 %v6706_v33, 0.0  ;;  %v24938_v4 = vadd.f32 %v6393_v39, %v28450_v28  ;;  %v6971_v41 = vld [vmem:[#allocation3 + $0xb1] sm:$0xff] }
 0x4d1   :  { %6836 = vst.msk [vmem:[#allocation3 + $0xe1] sm:$0xff] %vm156_vm4, %v6771_v5  ;;  %v6709_v25 = vadd.f32 %v24937_v36, %v28572_v37  ;;  %v6970_v31 = vld [vmem:[#allocation3 + $0xa9] sm:$0xff] }
 0x4d2   :  { %6835 = vst.msk [vmem:[#allocation3 + $0xd9] sm:$0xff] %vm156_vm4, %v6770_v63  ;;  %v6708_v9 = vadd.f32 %v24938_v4, %v28572_v37  ;;  %v23197_v35 = vpop.f32.mrb[20].mxu0  ;;  %23298 = vmatprep.mubr.msk.f32.mxu1 %vm156_vm4, %v6970_v31 }
 0x4d3   :  { %v6773_v51 = vmax.f32 %v6709_v25, 0.0  ;;  %v24939_v48 = vadd.f32 %v23197_v35, %v28454_v54  ;;  %v6403_v42 = vpop.f32.mrb[21].mxu0  ;;  %23299 = vmatmul.mubr.msk.f32.gmra.mrb[78].mxu1 %vm156_vm4, %v6971_v41 }
 0x4d4   :  { %v6772_v28 = vmax.f32 %v6708_v9, 0.0  ;;  %v24940_v34 = vadd.f32 %v6403_v42, %v28456_v29  ;;  %v6973_v62 = vld [vmem:[#allocation3 + $0xc9] sm:$0xff] }
 0x4d5   :  { %6838 = vst.msk [vmem:[#allocation3 + $0xf9] sm:$0xff] %vm156_vm4, %v6773_v51  ;;  %v6711_v1 = vadd.f32 %v24939_v48, %v28572_v37  ;;  %v6972_v57 = vld [vmem:[#allocation3 + $0xc1] sm:$0xff] }
 0x4d6   :  { %6837 = vst.msk [vmem:[#allocation3 + $0xf1] sm:$0xff] %vm156_vm4, %v6772_v28  ;;  %v6710_v8 = vadd.f32 %v24940_v34, %v28572_v37  ;;  %v23200_v13 = vpop.f32.mrb[22].mxu0  ;;  %23301 = vmatprep.mubr.msk.f32.mxu1 %vm156_vm4, %v6972_v57 }
 0x4d7   :  { %v6775_v54 = vmax.f32 %v6711_v1, 0.0  ;;  %v24941_v3 = vadd.f32 %v23200_v13, %v28460_v2  ;;  %v6413_v14 = vpop.f32.mrb[23].mxu0  ;;  %23302 = vmatmul.mubr.msk.f32.gmra.mrb[80].mxu1 %vm156_vm4, %v6973_v62 }
 0x4d8   :  { %v6774_v29 = vmax.f32 %v6710_v8, 0.0  ;;  %v24942_v53 = vadd.f32 %v6413_v14, %v28462_v47  ;;  %v6975_v19 = vld [vmem:[#allocation3 + $0xe1] sm:$0xff] }
 0x4d9   :  { %6840 = vst.msk [vmem:[#allocation3 + $0x111] sm:$0xff] %vm156_vm4, %v6775_v54  ;;  %v6713_v56 = vadd.f32 %v24941_v3, %v28572_v37  ;;  %v6974_v15 = vld [vmem:[#allocation3 + $0xd9] sm:$0xff] }
 0x4da   :  { %6839 = vst.msk [vmem:[#allocation3 + $0x109] sm:$0xff] %vm156_vm4, %v6774_v29  ;;  %v6712_v10 = vadd.f32 %v24942_v53, %v28572_v37  ;;  %v23203_v16 = vpop.f32.mrb[24].mxu0  ;;  %23304 = vmatprep.mubr.msk.f32.mxu1 %vm156_vm4, %v6974_v15 }
 0x4db   :  { %v6777_v2 = vmax.f32 %v6713_v56, 0.0  ;;  %v24943_v32 = vadd.f32 %v23203_v16, %v28466_v11  ;;  %v6423_v33 = vpop.f32.mrb[25].mxu0  ;;  %23305 = vmatmul.mubr.msk.f32.gmra.mrb[82].mxu1 %vm156_vm4, %v6975_v19 }
 0x4dc   :  { %v6776_v47 = vmax.f32 %v6712_v10, 0.0  ;;  %v24944_v58 = vadd.f32 %v6423_v33, %v28468_v12  ;;  %v6977_v63 = vld [vmem:[#allocation3 + $0xf9] sm:$0xff] }
 0x4dd   :  { %6842 = vst.msk [vmem:[#allocation3 + $0x129] sm:$0xff] %vm156_vm4, %v6777_v2  ;;  %v6715_v59 = vadd.f32 %v24943_v32, %v28572_v37  ;;  %v6976_v5 = vld [vmem:[#allocation3 + $0xf1] sm:$0xff] }
 0x4de   :  { %6841 = vst.msk [vmem:[#allocation3 + $0x121] sm:$0xff] %vm156_vm4, %v6776_v47  ;;  %v6714_v36 = vadd.f32 %v24944_v58, %v28572_v37  ;;  %v23206_v39 = vpop.f32.mrb[26].mxu0  ;;  %23307 = vmatprep.mubr.msk.f32.mxu1 %vm156_vm4, %v6976_v5 }
 0x4df   :  { %v6779_v11 = vmax.f32 %v6715_v59, 0.0  ;;  %v24945_v4 = vadd.f32 %v23206_v39, %v28472_v17  ;;  %v6433_v25 = vpop.f32.mrb[27].mxu0  ;;  %23308 = vmatmul.mubr.msk.f32.gmra.mrb[84].mxu1 %vm156_vm4, %v6977_v63 }
 0x4e0   :  { %v6778_v12 = vmax.f32 %v6714_v36, 0.0  ;;  %v24946_v31 = vadd.f32 %v6433_v25, %v28474_v18  ;;  %v6979_v48 = vld [vmem:[#allocation3 + $0x111] sm:$0xff] }
 0x4e1   :  { %6844 = vst.msk [vmem:[#allocation3 + $0x141] sm:$0xff] %vm156_vm4, %v6779_v11  ;;  %v6717_v9 = vadd.f32 %v24945_v4, %v28572_v37  ;;  %v6978_v35 = vld [vmem:[#allocation3 + $0x109] sm:$0xff]  ;;  %v6988_v4 = vld [vmem:[#allocation3 + $0x1b1] sm:$0xff] }
 0x4e2   :  { %6843 = vst.msk [vmem:[#allocation3 + $0x139] sm:$0xff] %vm156_vm4, %v6778_v12  ;;  %v6716_v41 = vadd.f32 %v24946_v31, %v28572_v37  ;;  %v23209_v51 = vpop.f32.mrb[28].mxu0  ;;  %23310 = vmatprep.mubr.msk.f32.mxu1 %vm156_vm4, %v6978_v35 }
 0x4e3   :  { %v6781_v17 = vmax.f32 %v6717_v9, 0.0  ;;  %v24947_v42 = vadd.f32 %v23209_v51, %v28478_v20  ;;  %v6443_v28 = vpop.f32.mrb[29].mxu0  ;;  %23311 = vmatmul.mubr.msk.f32.gmra.mrb[86].mxu1 %vm156_vm4, %v6979_v48  ;;  %v6989_v51 = vld [vmem:[#allocation3 + $0x1b9] sm:$0xff] }
 0x4e4   :  { %v6780_v18 = vmax.f32 %v6716_v41, 0.0  ;;  %v24948_v34 = vadd.f32 %v6443_v28, %v28480_v21  ;;  %v6981_v62 = vld [vmem:[#allocation3 + $0x129] sm:$0xff] }
 0x4e5   :  { %6846 = vst.msk [vmem:[#allocation3 + $0x159] sm:$0xff] %vm156_vm4, %v6781_v17  ;;  %v6719_v1 = vadd.f32 %v24947_v42, %v28572_v37  ;;  %v6980_v57 = vld [vmem:[#allocation3 + $0x121] sm:$0xff] }
 0x4e6   :  { %6845 = vst.msk [vmem:[#allocation3 + $0x151] sm:$0xff] %vm156_vm4, %v6780_v18  ;;  %v6718_v8 = vadd.f32 %v24948_v34, %v28572_v37  ;;  %v23212_v13 = vpop.f32.mrb[30].mxu0  ;;  %23313 = vmatprep.mubr.msk.f32.mxu1 %vm156_vm4, %v6980_v57 }
 0x4e7   :  { %v6783_v20 = vmax.f32 %v6719_v1, 0.0  ;;  %v24949_v54 = vadd.f32 %v23212_v13, %v28483_v22  ;;  %v6453_v3 = vpop.f32.mrb[31].mxu0  ;;  %23314 = vmatmul.mubr.msk.f32.gmra.mrb[88].mxu1 %vm156_vm4, %v6981_v62 }
 0x4e8   :  { %v6782_v21 = vmax.f32 %v6718_v8, 0.0  ;;  %v24950_v14 = vadd.f32 %v6453_v3, %v28485_v23  ;;  %v6983_v10 = vld [vmem:[#allocation3 + $0x141] sm:$0xff] }
 0x4e9   :  { %6848 = vst.msk [vmem:[#allocation3 + $0x171] sm:$0xff] %vm156_vm4, %v6783_v20  ;;  %v6721_v29 = vadd.f32 %v24949_v54, %v28572_v37  ;;  %v6982_v53 = vld [vmem:[#allocation3 + $0x139] sm:$0xff] }
 0x4ea   :  { %6847 = vst.msk [vmem:[#allocation3 + $0x169] sm:$0xff] %vm156_vm4, %v6782_v21  ;;  %v6720_v56 = vadd.f32 %v24950_v14, %v28572_v37  ;;  %v23215_v15 = vpop.f32.mrb[32].mxu0  ;;  %23316 = vmatprep.mubr.msk.f32.mxu1 %vm156_vm4, %v6982_v53 }
 0x4eb   :  { %v6785_v22 = vmax.f32 %v6721_v29, 0.0  ;;  %v24951_v16 = vadd.f32 %v23215_v15, %v28487_v24  ;;  %v6463_v19 = vpop.f32.mrb[33].mxu0  ;;  %23317 = vmatmul.mubr.msk.f32.gmra.mrb[90].mxu1 %vm156_vm4, %v6983_v10 }
 0x4ec   :  { %v6784_v23 = vmax.f32 %v6720_v56, 0.0  ;;  %v24952_v2 = vadd.f32 %v6463_v19, %v28489_v30  ;;  %v6985_v59 = vld [vmem:[#allocation3 + $0x159] sm:$0xff] }
 0x4ed   :  { %6850 = vst.msk [vmem:[#allocation3 + $0x189] sm:$0xff] %vm156_vm4, %v6785_v22  ;;  %v6723_v32 = vadd.f32 %v24951_v16, %v28572_v37  ;;  %v6984_v33 = vld [vmem:[#allocation3 + $0x151] sm:$0xff] }
 0x4ee   :  { %6849 = vst.msk [vmem:[#allocation3 + $0x181] sm:$0xff] %vm156_vm4, %v6784_v23  ;;  %v6722_v47 = vadd.f32 %v24952_v2, %v28572_v37  ;;  %v23218_v58 = vpop.f32.mrb[34].mxu0  ;;  %23319 = vmatprep.mubr.msk.f32.mxu1 %vm156_vm4, %v6984_v33 }
 0x4ef   :  { %v6787_v24 = vmax.f32 %v6723_v32, 0.0  ;;  %v24953_v5 = vadd.f32 %v23218_v58, %v28497_v27  ;;  %v6473_v36 = vpop.f32.mrb[35].mxu0  ;;  %23320 = vmatmul.mubr.msk.f32.gmra.mrb[92].mxu1 %vm156_vm4, %v6985_v59 }
 0x4f0   :  { %v6786_v30 = vmax.f32 %v6722_v47, 0.0  ;;  %v24954_v39 = vadd.f32 %v6473_v36, %v28499_v38  ;;  %v6987_v27 = vld [vmem:[#allocation3 + $0x171] sm:$0xff] }
 0x4f1   :  { %6852 = vst.msk [vmem:[#allocation3 + $0x1d1] sm:$0xff] %vm156_vm4, %v6787_v24  ;;  %v6725_v63 = vadd.f32 %v24953_v5, %v28572_v37  ;;  %v6986_v11 = vld [vmem:[#allocation3 + $0x169] sm:$0xff] }
 0x4f2   :  { %6851 = vst.msk [vmem:[#allocation3 + $0x1c9] sm:$0xff] %vm156_vm4, %v6786_v30  ;;  %v6724_v25 = vadd.f32 %v24954_v39, %v28572_v37  ;;  %v23221_v12 = vpop.f32.mrb[36].mxu0  ;;  %23322 = vmatprep.mubr.msk.f32.mxu1 %vm156_vm4, %v6986_v11 }
 0x4f3   :  { %v6789_v31 = vmax.f32 %v6725_v63, 0.0  ;;  %v24955_v9 = vadd.f32 %v23221_v12, %v28501_v40  ;;  %v6483_v35 = vpop.f32.mrb[37].mxu0  ;;  %23323 = vmatmul.mubr.msk.f32.gmra.mrb[94].mxu1 %vm156_vm4, %v6987_v27 }
 0x4f4   :  { %v6788_v38 = vmax.f32 %v6724_v25, 0.0  ;;  %v24956_v41 = vadd.f32 %v6483_v35, %v28503_v44  ;;  %23325 = vmatprep.mubr.msk.f32.mxu1 %vm156_vm4, %v6988_v4 }
 0x4f5   :  { %6854 = vst.msk [vmem:[#allocation3 + $0x1e9] sm:$0xff] %vm156_vm4, %v6789_v31  ;;  %v6727_v48 = vadd.f32 %v24955_v9, %v28572_v37 }
 0x4f6   :  { %6853 = vst.msk [vmem:[#allocation3 + $0x1e1] sm:$0xff] %vm156_vm4, %v6788_v38  ;;  %v6726_v17 = vadd.f32 %v24956_v41, %v28572_v37  ;;  %v23224_v42 = vpop.f32.mrb[38].mxu0 }
 0x4f7   :  { %v6791_v28 = vmax.f32 %v6727_v48, 0.0  ;;  %v24957_v40 = vadd.f32 %v23224_v42, %v28505_v45  ;;  %v6493_v18 = vpop.f32.mrb[39].mxu0  ;;  %23326 = vmatmul.mubr.msk.f32.gmra.mrb[96].mxu1 %vm156_vm4, %v6989_v51 }
 0x4f8   :  { %v6790_v34 = vmax.f32 %v6726_v17, 0.0  ;;  %v24958_v44 = vadd.f32 %v6493_v18, %v28507_v46  ;;  %v6991_v62 = vld [vmem:[#allocation3 + $0x1d1] sm:$0xff] }
 0x4f9   :  { %6856 = vst.msk [vmem:[#allocation3 + $0x201] sm:$0xff] %vm156_vm4, %v6791_v28  ;;  %v6729_v1 = vadd.f32 %v24957_v40, %v28572_v37  ;;  %v6990_v57 = vld [vmem:[#allocation3 + $0x1c9] sm:$0xff] }
 0x4fa   :  { %6855 = vst.msk [vmem:[#allocation3 + $0x1f9] sm:$0xff] %vm156_vm4, %v6790_v34  ;;  %v6728_v8 = vadd.f32 %v24958_v44, %v28572_v37  ;;  %v23227_v13 = vpop.f32.mrb[40].mxu0  ;;  %23328 = vmatprep.mubr.msk.f32.mxu1 %vm156_vm4, %v6990_v57  ;;  %v33043_v28 = vld [vmem:[#allocation16_spill] sm:$0xff]  ;;  %v33044_v34 = vld [vmem:[#allocation17_spill] sm:$0xff] }
 0x4fb   :  { %v6793_v45 = vmax.f32 %v6729_v1, 0.0  ;;  %v24959_v20 = vadd.f32 %v23227_v13, %v28509_v0  ;;  %v6503_v54 = vpop.f32.mrb[41].mxu0  ;;  %23329 = vmatmul.mubr.msk.f32.gmra.mrb[98].mxu1 %vm156_vm4, %v6991_v62 }
 0x4fc   :  { %v6792_v46 = vmax.f32 %v6728_v8, 0.0  ;;  %v24960_v3 = vadd.f32 %v6503_v54, %v28511_v49  ;;  %v6993_v56 = vld [vmem:[#allocation3 + $0x1e9] sm:$0xff] }
 0x4fd   :  { %6858 = vst.msk [vmem:[#allocation3 + $0x219] sm:$0xff] %vm156_vm4, %v6793_v45  ;;  %v6731_v21 = vadd.f32 %v24959_v20, %v28572_v37  ;;  %v6992_v14 = vld [vmem:[#allocation3 + $0x1e1] sm:$0xff] }
 0x4fe   :  { %6857 = vst.msk [vmem:[#allocation3 + $0x211] sm:$0xff] %vm156_vm4, %v6792_v46  ;;  %v6730_v29 = vadd.f32 %v24960_v3, %v28572_v37  ;;  %v23230_v53 = vpop.f32.mrb[42].mxu0  ;;  %23331 = vmatprep.mubr.msk.f32.mxu1 %vm156_vm4, %v6992_v14  ;;  %v33045_v20 = vld [vmem:[#allocation18_spill] sm:$0xff] }
 0x4ff   :  { %v6795_v0 = vmax.f32 %v6731_v21, 0.0  ;;  %v24961_v15 = vadd.f32 %v23230_v53, %v28513_v52  ;;  %v6513_v10 = vpop.f32.mrb[43].mxu0  ;;  %23332 = vmatmul.mubr.msk.f32.gmra.mrb[100].mxu1 %vm156_vm4, %v6993_v56  ;;  %v33046_v21 = vld [vmem:[#allocation19_spill] sm:$0xff] }
 0x500   :  { %v6794_v49 = vmax.f32 %v6730_v29, 0.0  ;;  %v24962_v22 = vadd.f32 %v6513_v10, %v28515_v55  ;;  %v6995_v32 = vld [vmem:[#allocation3 + $0x201] sm:$0xff] }
 0x501   :  { %6860 = vst.msk [vmem:[#allocation3 + $0x231] sm:$0xff] %vm156_vm4, %v6795_v0  ;;  %v6733_v16 = vadd.f32 %v24961_v15, %v28572_v37  ;;  %v6994_v19 = vld [vmem:[#allocation3 + $0x1f9] sm:$0xff] }
 0x502   :  { %6859 = vst.msk [vmem:[#allocation3 + $0x229] sm:$0xff] %vm156_vm4, %v6794_v49  ;;  %v6732_v23 = vadd.f32 %v24962_v22, %v28572_v37  ;;  %v23233_v2 = vpop.f32.mrb[44].mxu0  ;;  %23334 = vmatprep.mubr.msk.f32.mxu1 %vm156_vm4, %v6994_v19  ;;  %v33047_v49 = vld [vmem:[#allocation20_spill] sm:$0xff] }
 0x503   :  { %v6797_v52 = vmax.f32 %v6733_v16, 0.0  ;;  %v24963_v33 = vadd.f32 %v23233_v2, %v28517_v43  ;;  %v6523_v47 = vpop.f32.mrb[45].mxu0  ;;  %23335 = vmatmul.mubr.msk.f32.gmra.mrb[102].mxu1 %vm156_vm4, %v6995_v32 }
 0x504   :  { %v6796_v55 = vmax.f32 %v6732_v23, 0.0  ;;  %v24964_v58 = vadd.f32 %v6523_v47, %v28519_v61  ;;  %v6997_v30 = vld [vmem:[#allocation3 + $0x219] sm:$0xff] }
 0x505   :  { %6862 = vst.msk [vmem:[#allocation3 + $0x249] sm:$0xff] %vm156_vm4, %v6797_v52  ;;  %v6735_v59 = vadd.f32 %v24963_v33, %v28572_v37  ;;  %v6996_v24 = vld [vmem:[#allocation3 + $0x211] sm:$0xff] }
 0x506   :  { %6861 = vst.msk [vmem:[#allocation3 + $0x241] sm:$0xff] %vm156_vm4, %v6796_v55  ;;  %v6734_v5 = vadd.f32 %v24964_v58, %v28572_v37  ;;  %v23236_v36 = vpop.f32.mrb[46].mxu0  ;;  %23337 = vmatprep.mubr.msk.f32.mxu1 %vm156_vm4, %v6996_v24  ;;  %v33048_v23 = vld [vmem:[#allocation21_spill] sm:$0xff] }
 0x507   :  { %v6799_v43 = vmax.f32 %v6735_v59, 0.0  ;;  %v24965_v39 = vadd.f32 %v23236_v36, %v28521_v26  ;;  %v6533_v63 = vpop.f32.mrb[47].mxu0  ;;  %23338 = vmatmul.mubr.msk.f32.gmra.mrb[104].mxu1 %vm156_vm4, %v6997_v30  ;;  %v33049_v59 = vld [vmem:[#allocation22_spill] sm:$0xff]  ;;  %v33050_v30 = vld [vmem:[#allocation23_spill] sm:$0xff] }
 0x508   :  { %v6798_v61 = vmax.f32 %v6734_v5, 0.0  ;;  %v24966_v11 = vadd.f32 %v6533_v63, %v28523_v6  ;;  %v6999_v31 = vld [vmem:[#allocation3 + $0x231] sm:$0xff] }
 0x509   :  { %6864 = vst.msk [vmem:[#allocation3 + $0x261] sm:$0xff] %vm156_vm4, %v6799_v43  ;;  %v6737_v4 = vadd.f32 %v24965_v39, %v28572_v37  ;;  %v6998_v25 = vld [vmem:[#allocation3 + $0x229] sm:$0xff] }
 0x50a   :  { %6863 = vst.msk [vmem:[#allocation3 + $0x259] sm:$0xff] %vm156_vm4, %v6798_v61  ;;  %v6736_v12 = vadd.f32 %v24966_v11, %v28572_v37  ;;  %v23239_v27 = vpop.f32.mrb[48].mxu0  ;;  %23340 = vmatprep.mubr.msk.f32.mxu1 %vm156_vm4, %v6998_v25 }
 0x50b   :  { %v6801_v26 = vmax.f32 %v6737_v4, 0.0  ;;  %v24967_v9 = vadd.f32 %v23239_v27, %v28525_v60  ;;  %v6543_v35 = vpop.f32.mrb[49].mxu0  ;;  %23341 = vmatmul.mubr.msk.f32.gmra.mrb[106].mxu1 %vm156_vm4, %v6999_v31 }
 0x50c   :  { %v6800_v6 = vmax.f32 %v6736_v12, 0.0  ;;  %v24968_v38 = vadd.f32 %v6543_v35, %v28527_v7  ;;  %v7001_v42 = vld [vmem:[#allocation3 + $0x249] sm:$0xff] }
 0x50d   :  { %6866 = vst.msk [vmem:[#allocation3 + $0x279] sm:$0xff] %vm156_vm4, %v6801_v26  ;;  %v6739_v41 = vadd.f32 %v24967_v9, %v28572_v37  ;;  %v7000_v51 = vld [vmem:[#allocation3 + $0x241] sm:$0xff]  ;;  %v33051_v12 = vld [vmem:[#allocation24_spill] sm:$0xff]  ;;  %v33052_v9 = vld [vmem:[#allocation25_spill] sm:$0xff] }
 0x50e   :  { %6865 = vst.msk [vmem:[#allocation3 + $0x271] sm:$0xff] %vm156_vm4, %v6800_v6  ;;  %v6738_v48 = vadd.f32 %v24968_v38, %v28572_v37  ;;  %v23242_v17 = vpop.f32.mrb[50].mxu0  ;;  %23343 = vmatprep.mubr.msk.f32.mxu1 %vm156_vm4, %v7000_v51 }
 0x50f   :  { %v6803_v60 = vmax.f32 %v6739_v41, 0.0  ;;  %v24969_v40 = vadd.f32 %v23242_v17, %v33043_v28  ;;  %v6553_v18 = vpop.f32.mrb[51].mxu0  ;;  %23344 = vmatmul.mubr.msk.f32.gmra.mrb[108].mxu1 %vm156_vm4, %v7001_v42  ;;  %v33053_v42 = vld [vmem:[#allocation26_spill] sm:$0xff] }
 0x510   :  { %v6802_v7 = vmax.f32 %v6738_v48, 0.0  ;;  %v24970_v44 = vadd.f32 %v6553_v18, %v33044_v34  ;;  %v7003_v62 = vld [vmem:[#allocation3 + $0x261] sm:$0xff] }
 0x511   :  { %6868 = vst.msk [vmem:[#allocation3 + $0x291] sm:$0xff] %vm156_vm4, %v6803_v60  ;;  %v6741_v1 = vadd.f32 %v24969_v40, %v28572_v37  ;;  %v7002_v57 = vld [vmem:[#allocation3 + $0x259] sm:$0xff]  ;;  %v33054_v18 = vld [vmem:[#allocation27_spill] sm:$0xff] }
 0x512   :  { %6867 = vst.msk [vmem:[#allocation3 + $0x289] sm:$0xff] %vm156_vm4, %v6802_v7  ;;  %v6740_v8 = vadd.f32 %v24970_v44, %v28572_v37  ;;  %v23245_v13 = vpop.f32.mrb[52].mxu0  ;;  %23346 = vmatprep.mubr.msk.f32.mxu1 %vm156_vm4, %v7002_v57 }
 0x513   :  { %v6805_v45 = vmax.f32 %v6741_v1, 0.0  ;;  %v24971_v54 = vadd.f32 %v23245_v13, %v33045_v20  ;;  %v6563_v46 = vpop.f32.mrb[53].mxu0  ;;  %23347 = vmatmul.mubr.msk.f32.gmra.mrb[110].mxu1 %vm156_vm4, %v7003_v62  ;;  %v33055_v62 = vld [vmem:[#allocation28_spill] sm:$0xff] }
 0x514   :  { %v6804_v3 = vmax.f32 %v6740_v8, 0.0  ;;  %v24972_v14 = vadd.f32 %v6563_v46, %v33046_v21  ;;  %v7005_v15 = vld [vmem:[#allocation3 + $0x279] sm:$0xff] }
 0x515   :  { %6870 = vst.msk [vmem:[#allocation3 + $0x2a9] sm:$0xff] %vm156_vm4, %v6805_v45  ;;  %v6743_v29 = vadd.f32 %v24971_v54, %v28572_v37  ;;  %v7004_v53 = vld [vmem:[#allocation3 + $0x271] sm:$0xff] }
 0x516   :  { %6869 = vst.msk [vmem:[#allocation3 + $0x2a1] sm:$0xff] %vm156_vm4, %v6804_v3  ;;  %v6742_v56 = vadd.f32 %v24972_v14, %v28572_v37  ;;  %v23248_v0 = vpop.f32.mrb[54].mxu0  ;;  %23349 = vmatprep.mubr.msk.f32.mxu1 %vm156_vm4, %v7004_v53  ;;  %v33056_v46 = vld [vmem:[#allocation29_spill] sm:$0xff] }
 0x517   :  { %v6807_v10 = vmax.f32 %v6743_v29, 0.0  ;;  %v24973_v22 = vadd.f32 %v23248_v0, %v33047_v49  ;;  %v6573_v16 = vpop.f32.mrb[55].mxu0  ;;  %23350 = vmatmul.mubr.msk.f32.gmra.mrb[112].mxu1 %vm156_vm4, %v7005_v15 }
 0x518   :  { %v6806_v19 = vmax.f32 %v6742_v56, 0.0  ;;  %v24974_v2 = vadd.f32 %v6573_v16, %v33048_v23  ;;  %v7007_v55 = vld [vmem:[#allocation3 + $0x291] sm:$0xff]  ;;  %v6885_v23 = vld [vmem:[#allocation3 + $0x8] sm:$0xff] }
 0x519   :  { %6872 = vst.msk [vmem:[#allocation3 + $0x2c1] sm:$0xff] %vm156_vm4, %v6807_v10  ;;  %v6745_v32 = vadd.f32 %v24973_v22, %v28572_v37  ;;  %v7006_v52 = vld [vmem:[#allocation3 + $0x289] sm:$0xff]  ;;  %v6884_v22 = vld [vmem:[#allocation3] sm:$0xff] }
 0x51a   :  { %6871 = vst.msk [vmem:[#allocation3 + $0x2b9] sm:$0xff] %vm156_vm4, %v6806_v19  ;;  %v6744_v33 = vadd.f32 %v24974_v2, %v28572_v37  ;;  %v23251_v47 = vpop.f32.mrb[56].mxu0  ;;  %23352 = vmatprep.mubr.msk.f32.mxu1 %vm156_vm4, %v7006_v52  ;;  %v20154_v16 = vld [vmem:[%s32708_s2 + $0x90] sm:$0xff]  ;;  %v20155_v19 = vld [vmem:[%s32708_s2 + $0x98] sm:$0xff]  ;;  %v20157_v52 = vld [vmem:[%s32708_s2 + $0xa8] sm:$0xff] }
 0x51b   :  { %v6809_v58 = vmax.f32 %v6745_v32, 0.0  ;;  %v24975_v24 = vadd.f32 %v23251_v47, %v33049_v59  ;;  %v6583_v5 = vpop.f32.mrb[57].mxu0  ;;  %23353 = vmatmul.mubr.msk.f32.gmra.mrb[114].mxu1 %vm156_vm4, %v7007_v55  ;;  %v24665_v2 = vpack.c.bf16 %v20155_v19, %v20154_v16  ;;  %v20156_v32 = vld [vmem:[%s32708_s2 + $0xa0] sm:$0xff]  ;;  %v20159_v59 = vld [vmem:[%s32708_s2 + $0xb8] sm:$0xff] }
 0x51c   :  { %v6808_v36 = vmax.f32 %v6744_v33, 0.0  ;;  %v24976_v43 = vadd.f32 %v6583_v5, %v33050_v30  ;;  %v7009_v4 = vld [vmem:[#allocation3 + $0x2a9] sm:$0xff]  ;;  %v28851_v33 = vld [vmem:[#allocation3 + $0x18] sm:$0xff]  ;;  %v24669_v47 = vpack.c.bf16 %v20157_v52, %v20156_v32  ;;  %v28856_v55 = vld [vmem:[#allocation3 + $0x20] sm:$0xff] }
 0x51d   :  { %6874 = vst.msk [vmem:[#allocation3 + $0x2d9] sm:$0xff] %vm156_vm4, %v6809_v58  ;;  %v6747_v39 = vadd.f32 %v24975_v24, %v28572_v37  ;;  %v7008_v63 = vld [vmem:[#allocation3 + $0x2a1] sm:$0xff]  ;;  %v20158_v58 = vld [vmem:[%s32708_s2 + $0xb0] sm:$0xff]  ;;  %v28870_v5 = vld [vmem:[#allocation3 + $0x38] sm:$0xff] }
 0x51e   :  { %6873 = vst.msk [vmem:[#allocation3 + $0x2d1] sm:$0xff] %vm156_vm4, %v6808_v36  ;;  %v6746_v61 = vadd.f32 %v24976_v43, %v28572_v37  ;;  %v23254_v11 = vpop.f32.mrb[58].mxu0  ;;  %23355 = vmatprep.mubr.msk.f32.mxu1 %vm156_vm4, %v7008_v63  ;;  %v28866_v24 = vld [vmem:[#allocation3 + $0x30] sm:$0xff]  ;;  %v20224_v36 = vld [vmem:[%s32708_s2 + $0xc0] sm:$0xff]  ;;  %v20225_v30 = vld [vmem:[%s32708_s2 + $0xc8] sm:$0xff] }
 0x51f   :  { %v6811_v25 = vmax.f32 %v6747_v39, 0.0  ;;  %v24977_v27 = vadd.f32 %v23254_v11, %v33051_v12  ;;  %v6593_v31 = vpop.f32.mrb[59].mxu0  ;;  %23356 = vmatmul.mubr.msk.f32.gmra.mrb[116].mxu1 %vm156_vm4, %v7009_v4  ;;  %v28880_v43 = vld [vmem:[#allocation3 + $0x48] sm:$0xff]  ;;  %v28884_v39 = vpack.c.bf16 %v20225_v30, %v20224_v36  ;;  %v28886_v63 = vld [vmem:[#allocation3 + $0x50] sm:$0xff]  ;;  %v28899_v4 = vld [vmem:[#allocation3 + $0x78] sm:$0xff] }
 0x520   :  { %v6810_v26 = vmax.f32 %v6746_v61, 0.0  ;;  %v24978_v35 = vadd.f32 %v6593_v31, %v33052_v9  ;;  %v7011_v48 = vld [vmem:[#allocation3 + $0x2c1] sm:$0xff]  ;;  %v28907_v12 = vld [vmem:[#allocation3 + $0x90] sm:$0xff] }
 0x521   :  { %6876 = vst.msk [vmem:[#allocation3 + $0x2f1] sm:$0xff] %vm156_vm4, %v6811_v25  ;;  %v6749_v6 = vadd.f32 %v24977_v27, %v28572_v37  ;;  %v7010_v38 = vld [vmem:[#allocation3 + $0x2b9] sm:$0xff]  ;;  %v28895_v11 = vld [vmem:[#allocation3 + $0x68] sm:$0xff] }
 0x522   :  { %6875 = vst.msk [vmem:[#allocation3 + $0x2e9] sm:$0xff] %vm156_vm4, %v6810_v26  ;;  %v6748_v41 = vadd.f32 %v24978_v35, %v28572_v37  ;;  %v23257_v51 = vpop.f32.mrb[60].mxu0  ;;  %23358 = vmatprep.mubr.msk.f32.mxu1 %vm156_vm4, %v7010_v38  ;;  %v28890_v61 = vld [vmem:[#allocation3 + $0x60] sm:$0xff]  ;;  %v28911_v27 = vld [vmem:[#allocation3 + $0x98] sm:$0xff]  ;;  %v28915_v31 = vld [vmem:[#allocation3 + $0xa8] sm:$0xff] }
 0x523   :  { %v6813_v17 = vmax.f32 %v6749_v6, 0.0  ;;  %v24979_v60 = vadd.f32 %v23257_v51, %v33053_v42  ;;  %v6603_v28 = vpop.f32.mrb[61].mxu0  ;;  %23359 = vmatmul.mubr.msk.f32.gmra.mrb[118].mxu1 %vm156_vm4, %v7011_v48  ;;  %v28903_v25 = vld [vmem:[#allocation3 + $0x80] sm:$0xff]  ;;  %v28919_v26 = vld [vmem:[#allocation3 + $0xb0] sm:$0xff]  ;;  %v28927_v35 = vld [vmem:[#allocation3 + $0xc8] sm:$0xff] }
 0x524   :  { %v6812_v40 = vmax.f32 %v6748_v41, 0.0  ;;  %v24980_v7 = vadd.f32 %v6603_v28, %v33054_v18  ;;  %v7013_v8 = vld [vmem:[#allocation3 + $0x2d9] sm:$0xff]  ;;  %v28939_v41 = vld [vmem:[#allocation3 + $0xf0] sm:$0xff]  ;;  %v28947_v48 = vld [vmem:[#allocation3 + $0x108] sm:$0xff] }
 0x525   :  { %6878 = vst.msk [vmem:[#allocation3 + $0x309] sm:$0xff] %vm156_vm4, %v6813_v17  ;;  %v6751_v34 = vadd.f32 %v24979_v60, %v28572_v37  ;;  %v7012_v44 = vld [vmem:[#allocation3 + $0x2d1] sm:$0xff]  ;;  %v28923_v9 = vld [vmem:[#allocation3 + $0xc0] sm:$0xff]  ;;  %v28959_v60 = vld [vmem:[#allocation3 + $0x128] sm:$0xff] }
 0x526   :  { %6877 = vst.msk [vmem:[#allocation3 + $0x301] sm:$0xff] %vm156_vm4, %v6812_v40  ;;  %v6750_v1 = vadd.f32 %v24980_v7, %v28572_v37  ;;  %v23260_v57 = vpop.f32.mrb[62].mxu0  ;;  %23361 = vmatprep.mubr.msk.f32.mxu1 %vm156_vm4, %v7012_v44  ;;  %v28931_v6 = vld [vmem:[#allocation3 + $0xd8] sm:$0xff]  ;;  %v28935_v38 = vld [vmem:[#allocation3 + $0xe0] sm:$0xff]  ;;  %v28951_v17 = vld [vmem:[#allocation3 + $0x110] sm:$0xff] }
 0x527   :  { %v6815_v13 = vmax.f32 %v6751_v34, 0.0  ;;  %v24981_v45 = vadd.f32 %v23260_v57, %v33055_v62  ;;  %v6613_v20 = vpop.f32.mrb[63].mxu0  ;;  %23362 = vmatmul.mubr.msk.f32.gmra.mrb[120].mxu1 %vm156_vm4, %v7013_v8  ;;  %v28943_v51 = vld [vmem:[#allocation3 + $0xf8] sm:$0xff]  ;;  %v28955_v42 = vld [vmem:[#allocation3 + $0x120] sm:$0xff]  ;;  %v28971_v18 = vld [vmem:[#allocation3 + $0x150] sm:$0xff] }
 0x528   :  { %v6814_v54 = vmax.f32 %v6750_v1, 0.0  ;;  %v24982_v3 = vadd.f32 %v6613_v20, %v33056_v46  ;;  %v7015_v53 = vld [vmem:[#allocation3 + $0x2f1] sm:$0xff]  ;;  %v28967_v40 = vld [vmem:[#allocation3 + $0x140] sm:$0xff]  ;;  %v28979_v34 = vld [vmem:[#allocation3 + $0x168] sm:$0xff] }
 0x529   :  { %6880 = vst.msk [vmem:[#allocation3 + $0x321] sm:$0xff] %vm156_vm4, %v6815_v13  ;;  %v6753_v21 = vadd.f32 %v24981_v45, %v28572_v37  ;;  %v7014_v14 = vld [vmem:[#allocation3 + $0x2e9] sm:$0xff]  ;;  %v28963_v28 = vld [vmem:[#allocation3 + $0x138] sm:$0xff]  ;;  %v28997_v62 = vld [vmem:[#allocation3 + $0x1e0] sm:$0xff] }
 0x52a   :  { %6879 = vst.msk [vmem:[#allocation3 + $0x319] sm:$0xff] %vm156_vm4, %v6814_v54  ;;  %v6752_v29 = vadd.f32 %v24982_v3, %v28572_v37  ;;  %23364 = vmatprep.mubr.msk.f32.mxu1 %vm156_vm4, %v7014_v14  ;;  %v28975_v7 = vld [vmem:[#allocation3 + $0x158] sm:$0xff]  ;;  %v6916_v44 = vld [vmem:[#allocation3 + $0x1b0] sm:$0xff]  ;;  %v28989_v8 = vld [vmem:[#allocation3 + $0x1c8] sm:$0xff] }
 0x52b   :  { %v6817_v56 = vmax.f32 %v6753_v21, 0.0  ;;  %23365 = vmatmul.mubr.msk.f32.gmra.mrb[122].mxu1 %vm156_vm4, %v7015_v53  ;;  %v28983_v1 = vld [vmem:[#allocation3 + $0x170] sm:$0xff]  ;;  %v6917_v57 = vld [vmem:[#allocation3 + $0x1b8] sm:$0xff]  ;;  %v29001_v45 = vld [vmem:[#allocation3 + $0x1e8] sm:$0xff] }
 0x52c   :  { %v6816_v0 = vmax.f32 %v6752_v29, 0.0  ;;  %v7017_v10 = vld [vmem:[#allocation3 + $0x309] sm:$0xff]  ;;  %v29005_v20 = vld [vmem:[#allocation3 + $0x1f8] sm:$0xff]  ;;  %v29009_v54 = vld [vmem:[#allocation3 + $0x200] sm:$0xff] }
 0x52d   :  { %6882 = vst.msk [vmem:[#allocation3 + $0x339] sm:$0xff] %vm156_vm4, %v6817_v56  ;;  %v7016_v15 = vld [vmem:[#allocation3 + $0x301] sm:$0xff]  ;;  %v28993_v13 = vld [vmem:[#allocation3 + $0x1d0] sm:$0xff]  ;;  %v29017_v3 = vld [vmem:[#allocation3 + $0x218] sm:$0xff] }
 0x52e   :  { %6881 = vst.msk [vmem:[#allocation3 + $0x331] sm:$0xff] %vm156_vm4, %v6816_v0  ;;  %23367 = vmatprep.mubr.msk.f32.mxu1 %vm156_vm4, %v7016_v15  ;;  %v29013_v46 = vld [vmem:[#allocation3 + $0x210] sm:$0xff]  ;;  %v29021_v21 = vld [vmem:[#allocation3 + $0x228] sm:$0xff]  ;;  %v29029_v29 = vld [vmem:[#allocation3 + $0x240] sm:$0xff] }
 0x52f   :  { %23368 = vmatmul.mubr.msk.f32.gmra.mrb[124].mxu1 %vm156_vm4, %v7017_v10  ;;  %v29025_v14 = vld [vmem:[#allocation3 + $0x230] sm:$0xff]  ;;  %v29033_v53 = vld [vmem:[#allocation3 + $0x248] sm:$0xff]  ;;  %v29037_v56 = vld [vmem:[#allocation3 + $0x258] sm:$0xff] }
 0x530   :  { %v7019_v37 = vld [vmem:[#allocation3 + $0x321] sm:$0xff]  ;;  %v29045_v15 = vld [vmem:[#allocation3 + $0x270] sm:$0xff]  ;;  %v29049_v10 = vld [vmem:[#allocation3 + $0x278] sm:$0xff] }
 0x531   :  { %v7018_v49 = vld [vmem:[#allocation3 + $0x319] sm:$0xff]  ;;  %v29065_v16 = vld [vmem:[#allocation3 + $0x2a8] sm:$0xff] }
 0x532   :  { %23370 = vmatprep.mubr.msk.f32.mxu1 %vm156_vm4, %v7018_v49  ;;  %v29041_v0 = vld [vmem:[#allocation3 + $0x260] sm:$0xff]  ;;  %v29053_v49 = vld [vmem:[#allocation3 + $0x288] sm:$0xff]  ;;  %v29069_v19 = vld [vmem:[#allocation3 + $0x2b8] sm:$0xff] }
 0x533   :  { %23371 = vmatmul.mubr.msk.f32.gmra.mrb[126].mxu1 %vm156_vm4, %v7019_v37  ;;  %v29061_v37 = vld [vmem:[#allocation3 + $0x2a0] sm:$0xff]  ;;  %v29081_v32 = vld [vmem:[#allocation3 + $0x2d8] sm:$0xff]  ;;  %v29085_v52 = vld [vmem:[#allocation3 + $0x2e8] sm:$0xff] }
 0x534   :  { %23389 = vmatprep.mubr.msk.f32.mxu1 %vm156_vm4, %v6884_v22  ;;  %v29057_v22 = vld [vmem:[#allocation3 + $0x290] sm:$0xff]  ;;  %33057 = vst [vmem:[#allocation30_spill] sm:$0xff] %v29085_v52  ;;  %v8183_v36 = vld [vmem:[#allocation3 + $0x2] sm:$0xff] }
 0x535   :  { %v29105_v30 = vld [vmem:[#allocation3 + $0x320] sm:$0xff] }
 0x536   :  { %33062 = vst [vmem:[#allocation35_spill] sm:$0xff] %v29105_v30 }
 0x537   :  { %23390 = vmatmul.mubr.msk.f32.vlgmr.msra.gmra.mrb[64].mxu1 %vm156_vm4, %v6885_v23  ;;  %v29073_v23 = vld [vmem:[#allocation3 + $0x2c0] sm:$0xff] }
 0x538   :  { %24664 = vmatpush3.bf16.msra.mxu1 %v28594_v50  ;;  %23392 = vmatprep.mubr.msk.f32.mxu1 %vm156_vm4, %v28851_v33  ;;  %v24673_v50 = vpack.c.bf16 %v20159_v59, %v20158_v58  ;;  %v29093_v58 = vld [vmem:[#allocation3 + $0x300] sm:$0xff]  ;;  %v29097_v59 = vld [vmem:[#allocation3 + $0x308] sm:$0xff] }
 0x539   :  { %24666 = vmatprep.subr.bf16.mxu1 %v24665_v2  ;;  %33059 = vst [vmem:[#allocation32_spill] sm:$0xff] %v29093_v58  ;;  %33060 = vst [vmem:[#allocation33_spill] sm:$0xff] %v29097_v59 }
 0x53b   :  { %23393 = vmatmul.mubr.msk.f32.gmra.mrb[66].mxu1 %vm156_vm4, %v28856_v55 }
 0x53c   :  { %23395 = vmatprep.mubr.msk.f32.mxu1 %vm156_vm4, %v28866_v24  ;;  %24668 = vmatpush3.bf16.msra.mxu1 %v24665_v2  ;;  %v29077_v2 = vld [vmem:[#allocation3 + $0x2d0] sm:$0xff] }
 0x53d   :  { %24670 = vmatprep.subr.bf16.mxu1 %v24669_v47 }
 0x53f   :  { %23396 = vmatmul.mubr.msk.f32.gmra.mrb[68].mxu1 %vm156_vm4, %v28870_v5 }
 0x540   :  { %23398 = vmatprep.mubr.msk.f32.mxu1 %vm156_vm4, %v28880_v43  ;;  %24672 = vmatpush3.bf16.msra.mxu1 %v24669_v47  ;;  %v29089_v47 = vld [vmem:[#allocation3 + $0x2f0] sm:$0xff] }
 0x541   :  { %24674 = vmatprep.subr.bf16.mxu1 %v24673_v50  ;;  %33058 = vst [vmem:[#allocation31_spill] sm:$0xff] %v29089_v47 }
 0x543   :  { %23399 = vmatmul.mubr.msk.f32.gmra.mrb[70].mxu1 %vm156_vm4, %v28886_v63 }
 0x544   :  { %23401 = vmatprep.mubr.msk.f32.mxu1 %vm156_vm4, %v28890_v61  ;;  %24676 = vmatpush3.bf16.msra.mxu1 %v24673_v50  ;;  %v29101_v50 = vld [vmem:[#allocation3 + $0x318] sm:$0xff] }
 0x545   :  { %24678 = vmatprep.subr.bf16.mxu1 %v28884_v39  ;;  %33061 = vst [vmem:[#allocation34_spill] sm:$0xff] %v29101_v50 }
 0x547   :  { %23402 = vmatmul.mubr.msk.f32.gmra.mrb[72].mxu1 %vm156_vm4, %v28895_v11 }
 0x548   :  { %23404 = vmatprep.mubr.msk.f32.mxu1 %vm156_vm4, %v28899_v4 }
 0x54b   :  { %23405 = vmatmul.mubr.msk.f32.gmra.mrb[74].mxu1 %vm156_vm4, %v28903_v25 }
 0x54c   :  { %23407 = vmatprep.mubr.msk.f32.mxu1 %vm156_vm4, %v28907_v12 }
 0x54f   :  { %23408 = vmatmul.mubr.msk.f32.gmra.mrb[76].mxu1 %vm156_vm4, %v28911_v27 }
 0x550   :  { %23410 = vmatprep.mubr.msk.f32.mxu1 %vm156_vm4, %v28915_v31 }
 0x553   :  { %23411 = vmatmul.mubr.msk.f32.gmra.mrb[78].mxu1 %vm156_vm4, %v28919_v26 }
 0x554   :  { %23413 = vmatprep.mubr.msk.f32.mxu1 %vm156_vm4, %v28923_v9 }
 0x557   :  { %23414 = vmatmul.mubr.msk.f32.gmra.mrb[80].mxu1 %vm156_vm4, %v28927_v35 }
 0x558   :  { %23416 = vmatprep.mubr.msk.f32.mxu1 %vm156_vm4, %v28931_v6 }
 0x55b   :  { %23417 = vmatmul.mubr.msk.f32.gmra.mrb[82].mxu1 %vm156_vm4, %v28935_v38 }
 0x55c   :  { %23419 = vmatprep.mubr.msk.f32.mxu1 %vm156_vm4, %v28939_v41 }
 0x55f   :  { %23420 = vmatmul.mubr.msk.f32.gmra.mrb[84].mxu1 %vm156_vm4, %v28943_v51 }
 0x560   :  { %23422 = vmatprep.mubr.msk.f32.mxu1 %vm156_vm4, %v28947_v48 }
 0x563   :  { %23423 = vmatmul.mubr.msk.f32.gmra.mrb[86].mxu1 %vm156_vm4, %v28951_v17 }
 0x564   :  { %23425 = vmatprep.mubr.msk.f32.mxu1 %vm156_vm4, %v28955_v42 }
 0x567   :  { %23426 = vmatmul.mubr.msk.f32.gmra.mrb[88].mxu1 %vm156_vm4, %v28959_v60 }
 0x568   :  { %23428 = vmatprep.mubr.msk.f32.mxu1 %vm156_vm4, %v28963_v28 }
 0x56b   :  { %23429 = vmatmul.mubr.msk.f32.gmra.mrb[90].mxu1 %vm156_vm4, %v28967_v40 }
 0x56c   :  { %23431 = vmatprep.mubr.msk.f32.mxu1 %vm156_vm4, %v28971_v18 }
 0x56f   :  { %23432 = vmatmul.mubr.msk.f32.gmra.mrb[92].mxu1 %vm156_vm4, %v28975_v7 }
 0x570   :  { %23434 = vmatprep.mubr.msk.f32.mxu1 %vm156_vm4, %v28979_v34 }
 0x573   :  { %23435 = vmatmul.mubr.msk.f32.gmra.mrb[94].mxu1 %vm156_vm4, %v28983_v1 }
 0x574   :  { %23437 = vmatprep.mubr.msk.f32.mxu1 %vm156_vm4, %v6916_v44  ;;  %v20226_v44 = vld [vmem:[%s32708_s2 + $0xd0] sm:$0xff] }
 0x577   :  { %23438 = vmatmul.mubr.msk.f32.gmra.mrb[96].mxu1 %vm156_vm4, %v6917_v57  ;;  %v20227_v57 = vld [vmem:[%s32708_s2 + $0xd8] sm:$0xff] }
 0x578   :  { %23440 = vmatprep.mubr.msk.f32.mxu1 %vm156_vm4, %v28989_v8 }
 0x57b   :  { %23441 = vmatmul.mubr.msk.f32.gmra.mrb[98].mxu1 %vm156_vm4, %v28993_v13 }
 0x57c   :  { %23443 = vmatprep.mubr.msk.f32.mxu1 %vm156_vm4, %v28997_v62 }
 0x57f   :  { %23444 = vmatmul.mubr.msk.f32.gmra.mrb[100].mxu1 %vm156_vm4, %v29001_v45 }
 0x580   :  { %23446 = vmatprep.mubr.msk.f32.mxu1 %vm156_vm4, %v29005_v20 }
 0x583   :  { %23447 = vmatmul.mubr.msk.f32.gmra.mrb[102].mxu1 %vm156_vm4, %v29009_v54 }
 0x584   :  { %23449 = vmatprep.mubr.msk.f32.mxu1 %vm156_vm4, %v29013_v46 }
 0x587   :  { %23450 = vmatmul.mubr.msk.f32.gmra.mrb[104].mxu1 %vm156_vm4, %v29017_v3 }
 0x588   :  { %23452 = vmatprep.mubr.msk.f32.mxu1 %vm156_vm4, %v29021_v21 }
 0x58b   :  { %23453 = vmatmul.mubr.msk.f32.gmra.mrb[106].mxu1 %vm156_vm4, %v29025_v14 }
 0x58c   :  { %23455 = vmatprep.mubr.msk.f32.mxu1 %vm156_vm4, %v29029_v29 }
 0x58f   :  { %23456 = vmatmul.mubr.msk.f32.gmra.mrb[108].mxu1 %vm156_vm4, %v29033_v53 }
 0x590   :  { %23458 = vmatprep.mubr.msk.f32.mxu1 %vm156_vm4, %v29037_v56 }
 0x593   :  { %23459 = vmatmul.mubr.msk.f32.gmra.mrb[110].mxu1 %vm156_vm4, %v29041_v0 }
 0x594   :  { %23461 = vmatprep.mubr.msk.f32.mxu1 %vm156_vm4, %v29045_v15 }
 0x597   :  { %23462 = vmatmul.mubr.msk.f32.gmra.mrb[112].mxu1 %vm156_vm4, %v29049_v10 }
 0x598   :  { %23464 = vmatprep.mubr.msk.f32.mxu1 %vm156_vm4, %v29053_v49 }
 0x59b   :  { %23465 = vmatmul.mubr.msk.f32.gmra.mrb[114].mxu1 %vm156_vm4, %v29057_v22 }
 0x59c   :  { %23467 = vmatprep.mubr.msk.f32.mxu1 %vm156_vm4, %v29061_v37 }
 0x59f   :  { %23468 = vmatmul.mubr.msk.f32.gmra.mrb[116].mxu1 %vm156_vm4, %v29065_v16 }
 0x5a0   :  { %23470 = vmatprep.mubr.msk.f32.mxu1 %vm156_vm4, %v29069_v19 }
 0x5a3   :  { %23471 = vmatmul.mubr.msk.f32.gmra.mrb[118].mxu1 %vm156_vm4, %v29073_v23 }
 0x5a4   :  { %23473 = vmatprep.mubr.msk.f32.mxu1 %vm156_vm4, %v29077_v2 }
 0x5a7   :  { %23474 = vmatmul.mubr.msk.f32.gmra.mrb[120].mxu1 %vm156_vm4, %v29081_v32 }
 0x5a8   :  { %23476 = vmatprep.mubr.msk.f32.mxu1 %vm156_vm4, %v29085_v52  ;;  %v29123_v52 = vld [vmem:[#allocation3 + $0x1a] sm:$0xff] }
 0x5a9   :  { %33063 = vst [vmem:[#allocation36_spill] sm:$0xff] %v29123_v52 }
 0x5ab   :  { %23477 = vmatmul.mubr.msk.f32.gmra.mrb[122].mxu1 %vm156_vm4, %v29089_v47  ;;  %v20229_v47 = vld [vmem:[%s32708_s2 + $0xe8] sm:$0xff] }
 0x5ac   :  { %23479 = vmatprep.mubr.msk.f32.mxu1 %vm156_vm4, %v29093_v58  ;;  %v24681_v58 = vpack.c.bf16 %v20227_v57, %v20226_v44  ;;  %v29128_v44 = vld [vmem:[#allocation3 + $0x22] sm:$0xff]  ;;  %v20230_v57 = vld [vmem:[%s32708_s2 + $0xf0] sm:$0xff] }
 0x5ad   :  { %33064 = vst [vmem:[#allocation37_spill] sm:$0xff] %v29128_v44 }
 0x5af   :  { %23480 = vmatmul.mubr.msk.f32.gmra.mrb[124].mxu1 %vm156_vm4, %v29097_v59  ;;  %v8184_v59 = vld [vmem:[#allocation3 + $0xa] sm:$0xff] }
 0x5b0   :  { %23482 = vmatprep.mubr.msk.f32.mxu1 %vm156_vm4, %v29101_v50  ;;  %v20228_v50 = vld [vmem:[%s32708_s2 + $0xe0] sm:$0xff] }
 0x5b3   :  { %23483 = vmatmul.mubr.msk.f32.gmra.mrb[126].mxu1 %vm156_vm4, %v29105_v30  ;;  %v20231_v30 = vld [vmem:[%s32708_s2 + $0xf8] sm:$0xff] }
 0x5b4   :  { %23501 = vmatprep.mubr.msk.f32.mxu1 %vm156_vm4, %v8183_v36  ;;  %v24685_v36 = vpack.c.bf16 %v20229_v47, %v20228_v50  ;;  %v29142_v47 = vld [vmem:[#allocation3 + $0x3a] sm:$0xff] }
 0x5b5   :  { %33065 = vst [vmem:[#allocation38_spill] sm:$0xff] %v29142_v47  ;;  %v20296_v50 = vld [vmem:[%s32708_s2 + $0x100] sm:$0xff] }
 0x5b7   :  { %23502 = vmatmul.mubr.msk.f32.vlgmr.msra.gmra.mrb[64].mxu1 %vm156_vm4, %v8184_v59  ;;  %v29138_v59 = vld [vmem:[#allocation3 + $0x32] sm:$0xff] }
 0x5b8   :  { %24680 = vmatpush3.bf16.msra.mxu1 %v28884_v39  ;;  %23504 = vmatprep.mubr.msk.f32.mxu1 %vm156_vm4, %v29123_v52  ;;  %v24689_v39 = vpack.c.bf16 %v20231_v30, %v20230_v57  ;;  %v20297_v52 = vld [vmem:[%s32708_s2 + $0x108] sm:$0xff]  ;;  %v29158_v30 = vld [vmem:[#allocation3 + $0x52] sm:$0xff] }
 0x5b9   :  { %24682 = vmatprep.subr.bf16.mxu1 %v24681_v58  ;;  %v29162_v57 = vld [vmem:[#allocation3 + $0x62] sm:$0xff] }
 0x5ba   :  { %33066 = vst [vmem:[#allocation39_spill] sm:$0xff] %v29162_v57 }
 0x5bb   :  { %23505 = vmatmul.mubr.msk.f32.gmra.mrb[66].mxu1 %vm156_vm4, %v29128_v44  ;;  %v29152_v44 = vld [vmem:[#allocation3 + $0x4a] sm:$0xff] }
 0x5bc   :  { %23507 = vmatprep.mubr.msk.f32.mxu1 %vm156_vm4, %v29138_v59  ;;  %24684 = vmatpush3.bf16.msra.mxu1 %v24681_v58  ;;  %v29156_v58 = vpack.c.bf16 %v20297_v52, %v20296_v50  ;;  %v29171_v52 = vld [vmem:[#allocation3 + $0x7a] sm:$0xff]  ;;  %v29179_v50 = vld [vmem:[#allocation3 + $0x92] sm:$0xff] }
 0x5bd   :  { %24686 = vmatprep.subr.bf16.mxu1 %v24685_v36  ;;  %33068 = vst [vmem:[#allocation41_spill] sm:$0xff] %v29171_v52  ;;  %33070 = vst [vmem:[#allocation43_spill] sm:$0xff] %v29179_v50 }
 0x5bf   :  { %23508 = vmatmul.mubr.msk.f32.gmra.mrb[68].mxu1 %vm156_vm4, %v29142_v47  ;;  %v29167_v47 = vld [vmem:[#allocation3 + $0x6a] sm:$0xff] }
 0x5c0   :  { %23510 = vmatprep.mubr.msk.f32.mxu1 %vm156_vm4, %v29152_v44  ;;  %24688 = vmatpush3.bf16.msra.mxu1 %v24685_v36  ;;  %33067 = vst [vmem:[#allocation40_spill] sm:$0xff] %v29167_v47  ;;  %v29175_v36 = vld [vmem:[#allocation3 + $0x82] sm:$0xff] }
 0x5c1   :  { %24690 = vmatprep.subr.bf16.mxu1 %v24689_v39  ;;  %33069 = vst [vmem:[#allocation42_spill] sm:$0xff] %v29175_v36 }
 0x5c3   :  { %23511 = vmatmul.mubr.msk.f32.gmra.mrb[70].mxu1 %vm156_vm4, %v29158_v30 }
 0x5c4   :  { %23513 = vmatprep.mubr.msk.f32.mxu1 %vm156_vm4, %v29162_v57  ;;  %24692 = vmatpush3.bf16.msra.mxu1 %v24689_v39  ;;  %v29183_v39 = vld [vmem:[#allocation3 + $0x9a] sm:$0xff]  ;;  %v29255_v57 = vld [vmem:[#allocation3 + $0x172] sm:$0xff] }
 0x5c5   :  { %24694 = vmatprep.subr.bf16.mxu1 %v29156_v58  ;;  %33071 = vst [vmem:[#allocation44_spill] sm:$0xff] %v29183_v39  ;;  %33089 = vst [vmem:[#allocation62_spill] sm:$0xff] %v29255_v57 }
 0x5c7   :  { %23514 = vmatmul.mubr.msk.f32.gmra.mrb[72].mxu1 %vm156_vm4, %v29167_v47  ;;  %v29187_v47 = vld [vmem:[#allocation3 + $0xaa] sm:$0xff] }
 0x5c8   :  { %23516 = vmatprep.mubr.msk.f32.mxu1 %vm156_vm4, %v29171_v52  ;;  %33072 = vst [vmem:[#allocation45_spill] sm:$0xff] %v29187_v47  ;;  %v29191_v52 = vld [vmem:[#allocation3 + $0xb2] sm:$0xff] }
 0x5c9   :  { %33073 = vst [vmem:[#allocation46_spill] sm:$0xff] %v29191_v52 }
 0x5cb   :  { %23517 = vmatmul.mubr.msk.f32.gmra.mrb[74].mxu1 %vm156_vm4, %v29175_v36  ;;  %v29195_v36 = vld [vmem:[#allocation3 + $0xc2] sm:$0xff] }
 0x5cc   :  { %23519 = vmatprep.mubr.msk.f32.mxu1 %vm156_vm4, %v29179_v50  ;;  %33074 = vst [vmem:[#allocation47_spill] sm:$0xff] %v29195_v36  ;;  %v29199_v50 = vld [vmem:[#allocation3 + $0xca] sm:$0xff] }
 0x5cd   :  { %33075 = vst [vmem:[#allocation48_spill] sm:$0xff] %v29199_v50 }
 0x5cf   :  { %23520 = vmatmul.mubr.msk.f32.gmra.mrb[76].mxu1 %vm156_vm4, %v29183_v39  ;;  %v29203_v39 = vld [vmem:[#allocation3 + $0xda] sm:$0xff] }
 0x5d0   :  { %23522 = vmatprep.mubr.msk.f32.mxu1 %vm156_vm4, %v29187_v47  ;;  %33076 = vst [vmem:[#allocation49_spill] sm:$0xff] %v29203_v39  ;;  %v29207_v47 = vld [vmem:[#allocation3 + $0xe2] sm:$0xff] }
 0x5d1   :  { %33077 = vst [vmem:[#allocation50_spill] sm:$0xff] %v29207_v47 }
 0x5d3   :  { %23523 = vmatmul.mubr.msk.f32.gmra.mrb[78].mxu1 %vm156_vm4, %v29191_v52  ;;  %v29211_v52 = vld [vmem:[#allocation3 + $0xf2] sm:$0xff] }
 0x5d4   :  { %23525 = vmatprep.mubr.msk.f32.mxu1 %vm156_vm4, %v29195_v36  ;;  %33078 = vst [vmem:[#allocation51_spill] sm:$0xff] %v29211_v52  ;;  %v29215_v36 = vld [vmem:[#allocation3 + $0xfa] sm:$0xff] }
 0x5d5   :  { %33079 = vst [vmem:[#allocation52_spill] sm:$0xff] %v29215_v36 }
 0x5d7   :  { %23526 = vmatmul.mubr.msk.f32.gmra.mrb[80].mxu1 %vm156_vm4, %v29199_v50  ;;  %v29219_v50 = vld [vmem:[#allocation3 + $0x10a] sm:$0xff] }
 0x5d8   :  { %23528 = vmatprep.mubr.msk.f32.mxu1 %vm156_vm4, %v29203_v39  ;;  %33080 = vst [vmem:[#allocation53_spill] sm:$0xff] %v29219_v50  ;;  %v29223_v39 = vld [vmem:[#allocation3 + $0x112] sm:$0xff] }
 0x5d9   :  { %33081 = vst [vmem:[#allocation54_spill] sm:$0xff] %v29223_v39 }
 0x5db   :  { %23529 = vmatmul.mubr.msk.f32.gmra.mrb[82].mxu1 %vm156_vm4, %v29207_v47  ;;  %v29227_v47 = vld [vmem:[#allocation3 + $0x122] sm:$0xff] }
 0x5dc   :  { %23531 = vmatprep.mubr.msk.f32.mxu1 %vm156_vm4, %v29211_v52  ;;  %33082 = vst [vmem:[#allocation55_spill] sm:$0xff] %v29227_v47  ;;  %v29231_v52 = vld [vmem:[#allocation3 + $0x12a] sm:$0xff] }
 0x5dd   :  { %33083 = vst [vmem:[#allocation56_spill] sm:$0xff] %v29231_v52 }
 0x5df   :  { %23532 = vmatmul.mubr.msk.f32.gmra.mrb[84].mxu1 %vm156_vm4, %v29215_v36  ;;  %v29235_v36 = vld [vmem:[#allocation3 + $0x13a] sm:$0xff] }
 0x5e0   :  { %23534 = vmatprep.mubr.msk.f32.mxu1 %vm156_vm4, %v29219_v50  ;;  %33084 = vst [vmem:[#allocation57_spill] sm:$0xff] %v29235_v36  ;;  %v29239_v50 = vld [vmem:[#allocation3 + $0x142] sm:$0xff] }
 0x5e1   :  { %33085 = vst [vmem:[#allocation58_spill] sm:$0xff] %v29239_v50 }
 0x5e3   :  { %23535 = vmatmul.mubr.msk.f32.gmra.mrb[86].mxu1 %vm156_vm4, %v29223_v39  ;;  %v29243_v39 = vld [vmem:[#allocation3 + $0x152] sm:$0xff] }
 0x5e4   :  { %23537 = vmatprep.mubr.msk.f32.mxu1 %vm156_vm4, %v29227_v47  ;;  %33086 = vst [vmem:[#allocation59_spill] sm:$0xff] %v29243_v39  ;;  %v29247_v47 = vld [vmem:[#allocation3 + $0x15a] sm:$0xff] }
 0x5e5   :  { %33087 = vst [vmem:[#allocation60_spill] sm:$0xff] %v29247_v47 }
 0x5e7   :  { %23538 = vmatmul.mubr.msk.f32.gmra.mrb[88].mxu1 %vm156_vm4, %v29231_v52  ;;  %v29251_v52 = vld [vmem:[#allocation3 + $0x16a] sm:$0xff] }
 0x5e8   :  { %23540 = vmatprep.mubr.msk.f32.mxu1 %vm156_vm4, %v29235_v36  ;;  %33088 = vst [vmem:[#allocation61_spill] sm:$0xff] %v29251_v52  ;;  %v8215_v36 = vld [vmem:[#allocation3 + $0x1b2] sm:$0xff] }
 0x5eb   :  { %23541 = vmatmul.mubr.msk.f32.gmra.mrb[90].mxu1 %vm156_vm4, %v29239_v50  ;;  %v8216_v50 = vld [vmem:[#allocation3 + $0x1ba] sm:$0xff] }
 0x5ec   :  { %23543 = vmatprep.mubr.msk.f32.mxu1 %vm156_vm4, %v29243_v39  ;;  %v29261_v39 = vld [vmem:[#allocation3 + $0x1ca] sm:$0xff] }
 0x5ed   :  { %33090 = vst [vmem:[#allocation63_spill] sm:$0xff] %v29261_v39 }
 0x5ef   :  { %23544 = vmatmul.mubr.msk.f32.gmra.mrb[92].mxu1 %vm156_vm4, %v29247_v47  ;;  %v29265_v47 = vld [vmem:[#allocation3 + $0x1d2] sm:$0xff] }
 0x5f0   :  { %23546 = vmatprep.mubr.msk.f32.mxu1 %vm156_vm4, %v29251_v52  ;;  %33091 = vst [vmem:[#allocation64_spill] sm:$0xff] %v29265_v47  ;;  %v29269_v52 = vld [vmem:[#allocation3 + $0x1e2] sm:$0xff] }
 0x5f1   :  { %33092 = vst [vmem:[#allocation65_spill] sm:$0xff] %v29269_v52 }
 0x5f3   :  { %23547 = vmatmul.mubr.msk.f32.gmra.mrb[94].mxu1 %vm156_vm4, %v29255_v57  ;;  %v29273_v57 = vld [vmem:[#allocation3 + $0x1ea] sm:$0xff] }
 0x5f4   :  { %23549 = vmatprep.mubr.msk.f32.mxu1 %vm156_vm4, %v8215_v36  ;;  %33093 = vst [vmem:[#allocation66_spill] sm:$0xff] %v29273_v57  ;;  %v29277_v36 = vld [vmem:[#allocation3 + $0x1fa] sm:$0xff] }
 0x5f5   :  { %33094 = vst [vmem:[#allocation67_spill] sm:$0xff] %v29277_v36 }
 0x5f7   :  { %23550 = vmatmul.mubr.msk.f32.gmra.mrb[96].mxu1 %vm156_vm4, %v8216_v50  ;;  %v29281_v50 = vld [vmem:[#allocation3 + $0x202] sm:$0xff] }
 0x5f8   :  { %23552 = vmatprep.mubr.msk.f32.mxu1 %vm156_vm4, %v29261_v39  ;;  %33095 = vst [vmem:[#allocation68_spill] sm:$0xff] %v29281_v50  ;;  %v20301_v39 = vld [vmem:[%s32708_s2 + $0x128] sm:$0xff] }
 0x5fb   :  { %23553 = vmatmul.mubr.msk.f32.gmra.mrb[98].mxu1 %vm156_vm4, %v29265_v47  ;;  %v29285_v47 = vld [vmem:[#allocation3 + $0x212] sm:$0xff] }
 0x5fc   :  { %23555 = vmatprep.mubr.msk.f32.mxu1 %vm156_vm4, %v29269_v52  ;;  %33096 = vst [vmem:[#allocation69_spill] sm:$0xff] %v29285_v47  ;;  %v29289_v52 = vld [vmem:[#allocation3 + $0x21a] sm:$0xff] }
 0x5fd   :  { %33097 = vst [vmem:[#allocation70_spill] sm:$0xff] %v29289_v52 }
 0x5ff   :  { %23556 = vmatmul.mubr.msk.f32.gmra.mrb[100].mxu1 %vm156_vm4, %v29273_v57  ;;  %v29293_v57 = vld [vmem:[#allocation3 + $0x22a] sm:$0xff] }
 0x600   :  { %23558 = vmatprep.mubr.msk.f32.mxu1 %vm156_vm4, %v29277_v36  ;;  %33098 = vst [vmem:[#allocation71_spill] sm:$0xff] %v29293_v57  ;;  %v29297_v36 = vld [vmem:[#allocation3 + $0x232] sm:$0xff] }
 0x601   :  { %33099 = vst [vmem:[#allocation72_spill] sm:$0xff] %v29297_v36 }
 0x603   :  { %23559 = vmatmul.mubr.msk.f32.gmra.mrb[102].mxu1 %vm156_vm4, %v29281_v50  ;;  %v29301_v50 = vld [vmem:[#allocation3 + $0x242] sm:$0xff] }
 0x604   :  { %23561 = vmatprep.mubr.msk.f32.mxu1 %vm156_vm4, %v29285_v47  ;;  %33100 = vst [vmem:[#allocation73_spill] sm:$0xff] %v29301_v50  ;;  %v29305_v47 = vld [vmem:[#allocation3 + $0x24a] sm:$0xff] }
 0x605   :  { %33101 = vst [vmem:[#allocation74_spill] sm:$0xff] %v29305_v47 }
 0x607   :  { %23562 = vmatmul.mubr.msk.f32.gmra.mrb[104].mxu1 %vm156_vm4, %v29289_v52  ;;  %v29309_v52 = vld [vmem:[#allocation3 + $0x25a] sm:$0xff] }
 0x608   :  { %23564 = vmatprep.mubr.msk.f32.mxu1 %vm156_vm4, %v29293_v57  ;;  %33102 = vst [vmem:[#allocation75_spill] sm:$0xff] %v29309_v52  ;;  %v29313_v57 = vld [vmem:[#allocation3 + $0x262] sm:$0xff] }
 0x609   :  { %33103 = vst [vmem:[#allocation76_spill] sm:$0xff] %v29313_v57 }
 0x60b   :  { %23565 = vmatmul.mubr.msk.f32.gmra.mrb[106].mxu1 %vm156_vm4, %v29297_v36  ;;  %v29317_v36 = vld [vmem:[#allocation3 + $0x272] sm:$0xff] }
 0x60c   :  { %23567 = vmatprep.mubr.msk.f32.mxu1 %vm156_vm4, %v29301_v50  ;;  %33104 = vst [vmem:[#allocation77_spill] sm:$0xff] %v29317_v36  ;;  %v29321_v50 = vld [vmem:[#allocation3 + $0x27a] sm:$0xff] }
 0x60d   :  { %33105 = vst [vmem:[#allocation78_spill] sm:$0xff] %v29321_v50 }
 0x60f   :  { %23568 = vmatmul.mubr.msk.f32.gmra.mrb[108].mxu1 %vm156_vm4, %v29305_v47  ;;  %v29325_v47 = vld [vmem:[#allocation3 + $0x28a] sm:$0xff] }
 0x610   :  { %23570 = vmatprep.mubr.msk.f32.mxu1 %vm156_vm4, %v29309_v52  ;;  %33106 = vst [vmem:[#allocation79_spill] sm:$0xff] %v29325_v47  ;;  %v29329_v52 = vld [vmem:[#allocation3 + $0x292] sm:$0xff] }
 0x611   :  { %33107 = vst [vmem:[#allocation80_spill] sm:$0xff] %v29329_v52 }
 0x613   :  { %23571 = vmatmul.mubr.msk.f32.gmra.mrb[110].mxu1 %vm156_vm4, %v29313_v57  ;;  %v29333_v57 = vld [vmem:[#allocation3 + $0x2a2] sm:$0xff] }
 0x614   :  { %23573 = vmatprep.mubr.msk.f32.mxu1 %vm156_vm4, %v29317_v36  ;;  %33108 = vst [vmem:[#allocation81_spill] sm:$0xff] %v29333_v57  ;;  %v29337_v36 = vld [vmem:[#allocation3 + $0x2aa] sm:$0xff] }
 0x615   :  { %33109 = vst [vmem:[#allocation82_spill] sm:$0xff] %v29337_v36 }
 0x617   :  { %23574 = vmatmul.mubr.msk.f32.gmra.mrb[112].mxu1 %vm156_vm4, %v29321_v50  ;;  %v29341_v50 = vld [vmem:[#allocation3 + $0x2ba] sm:$0xff] }
 0x618   :  { %23576 = vmatprep.mubr.msk.f32.mxu1 %vm156_vm4, %v29325_v47  ;;  %33110 = vst [vmem:[#allocation83_spill] sm:$0xff] %v29341_v50  ;;  %v29345_v47 = vld [vmem:[#allocation3 + $0x2c2] sm:$0xff] }
 0x619   :  { %33111 = vst [vmem:[#allocation84_spill] sm:$0xff] %v29345_v47 }
 0x61b   :  { %23577 = vmatmul.mubr.msk.f32.gmra.mrb[114].mxu1 %vm156_vm4, %v29329_v52  ;;  %v29349_v52 = vld [vmem:[#allocation3 + $0x2d2] sm:$0xff] }
 0x61c   :  { %23579 = vmatprep.mubr.msk.f32.mxu1 %vm156_vm4, %v29333_v57  ;;  %33112 = vst [vmem:[#allocation85_spill] sm:$0xff] %v29349_v52  ;;  %v29353_v57 = vld [vmem:[#allocation3 + $0x2da] sm:$0xff] }
 0x61d   :  { %33113 = vst [vmem:[#allocation86_spill] sm:$0xff] %v29353_v57 }
 0x61f   :  { %23580 = vmatmul.mubr.msk.f32.gmra.mrb[116].mxu1 %vm156_vm4, %v29337_v36  ;;  %v29357_v36 = vld [vmem:[#allocation3 + $0x2ea] sm:$0xff] }
 0x620   :  { %23582 = vmatprep.mubr.msk.f32.mxu1 %vm156_vm4, %v29341_v50  ;;  %33114 = vst [vmem:[#allocation87_spill] sm:$0xff] %v29357_v36  ;;  %v29361_v50 = vld [vmem:[#allocation3 + $0x2f2] sm:$0xff] }
 0x621   :  { %33115 = vst [vmem:[#allocation88_spill] sm:$0xff] %v29361_v50 }
 0x623   :  { %23583 = vmatmul.mubr.msk.f32.gmra.mrb[118].mxu1 %vm156_vm4, %v29345_v47  ;;  %v29365_v47 = vld [vmem:[#allocation3 + $0x302] sm:$0xff] }
 0x624   :  { %23585 = vmatprep.mubr.msk.f32.mxu1 %vm156_vm4, %v29349_v52  ;;  %33116 = vst [vmem:[#allocation89_spill] sm:$0xff] %v29365_v47  ;;  %v29369_v52 = vld [vmem:[#allocation3 + $0x30a] sm:$0xff] }
 0x625   :  { %33117 = vst [vmem:[#allocation15_spill] sm:$0xff] %v29369_v52 }
 0x627   :  { %23586 = vmatmul.mubr.msk.f32.gmra.mrb[120].mxu1 %vm156_vm4, %v29353_v57  ;;  %v29373_v57 = vld [vmem:[#allocation3 + $0x31a] sm:$0xff] }
 0x628   :  { %23588 = vmatprep.mubr.msk.f32.mxu1 %vm156_vm4, %v29357_v36  ;;  %33118 = vst [vmem:[#allocation16_spill] sm:$0xff] %v29373_v57  ;;  %v29377_v36 = vld [vmem:[#allocation3 + $0x322] sm:$0xff] }
 0x629   :  { %33119 = vst [vmem:[#allocation17_spill] sm:$0xff] %v29377_v36 }
 0x62b   :  { %23589 = vmatmul.mubr.msk.f32.gmra.mrb[122].mxu1 %vm156_vm4, %v29361_v50  ;;  %v20298_v50 = vld [vmem:[%s32708_s2 + $0x110] sm:$0xff] }
 0x62c   :  { %23591 = vmatprep.mubr.msk.f32.mxu1 %vm156_vm4, %v29365_v47  ;;  %v20299_v47 = vld [vmem:[%s32708_s2 + $0x118] sm:$0xff] }
 0x62f   :  { %23592 = vmatmul.mubr.msk.f32.gmra.mrb[124].mxu1 %vm156_vm4, %v29369_v52  ;;  %v24697_v52 = vpack.c.bf16 %v20299_v47, %v20298_v50  ;;  %v20303_v47 = vld [vmem:[%s32708_s2 + $0x138] sm:$0xff]  ;;  %v9643_v50 = vld [vmem:[#allocation3 + $0x1c9] sm:$0xff] }
 0x630   :  { %23594 = vmatprep.mubr.msk.f32.mxu1 %vm156_vm4, %v29373_v57  ;;  %v20300_v57 = vld [vmem:[%s32708_s2 + $0x120] sm:$0xff] }
 0x633   :  { %23595 = vmatmul.mubr.msk.f32.gmra.mrb[126].mxu1 %vm156_vm4, %v29377_v36  ;;  %v24701_v36 = vpack.c.bf16 %v20301_v39, %v20300_v57  ;;  %v29679_v57 = vld [vmem:[#allocation3 + $0x169] sm:$0xff]  ;;  %v29687_v39 = vld [vmem:[#allocation3 + $0x181] sm:$0xff] }
 0x634   :  { %23613 = vmatprep.mubr.msk.f32.mxu1 %vm156_vm4, %v28851_v33  ;;  %v20302_v33 = vld [vmem:[%s32708_s2 + $0x130] sm:$0xff] }
 0x637   :  { %23614 = vmatmul.mubr.msk.f32.vlgmr.msra.gmra.mrb[64].mxu1 %vm156_vm4, %v28856_v55  ;;  %v24705_v55 = vpack.c.bf16 %v20303_v47, %v20302_v33  ;;  %v9644_v33 = vld [vmem:[#allocation3 + $0x1d1] sm:$0xff]  ;;  %v29697_v47 = vld [vmem:[#allocation3 + $0x1e1] sm:$0xff] }
 0x638   :  { %24696 = vmatpush3.bf16.msra.mxu1 %v29156_v58  ;;  %23616 = vmatprep.mubr.msk.f32.mxu1 %vm156_vm4, %v28866_v24  ;;  %v20368_v24 = vld [vmem:[%s32708_s2 + $0x140] sm:$0xff]  ;;  %v20369_v58 = vld [vmem:[%s32708_s2 + $0x148] sm:$0xff] }
 0x639   :  { %24698 = vmatprep.subr.bf16.mxu1 %v24697_v52 }
 0x63b   :  { %23617 = vmatmul.mubr.msk.f32.gmra.mrb[66].mxu1 %vm156_vm4, %v28870_v5  ;;  %v29420_v5 = vpack.c.bf16 %v20369_v58, %v20368_v24  ;;  %v29705_v24 = vld [vmem:[#allocation3 + $0x1f9] sm:$0xff]  ;;  %v29709_v58 = vld [vmem:[#allocation3 + $0x201] sm:$0xff] }
 0x63c   :  { %23619 = vmatprep.mubr.msk.f32.mxu1 %vm156_vm4, %v28880_v43  ;;  %24700 = vmatpush3.bf16.msra.mxu1 %v24697_v52  ;;  %v29469_v43 = vld [vmem:[#allocation3 + $0x180] sm:$0xff]  ;;  %v29683_v52 = vld [vmem:[#allocation3 + $0x171] sm:$0xff] }
 0x63d   :  { %24702 = vmatprep.subr.bf16.mxu1 %v24701_v36 }
 0x63f   :  { %23620 = vmatmul.mubr.msk.f32.gmra.mrb[68].mxu1 %vm156_vm4, %v28886_v63  ;;  %v29473_v63 = vld [vmem:[#allocation3 + $0x188] sm:$0xff] }
 0x640   :  { %23622 = vmatprep.mubr.msk.f32.mxu1 %vm156_vm4, %v28890_v61  ;;  %24704 = vmatpush3.bf16.msra.mxu1 %v24701_v36  ;;  %v33120_v61 = vld [vmem:[#allocation30_spill] sm:$0xff]  ;;  %v29691_v36 = vld [vmem:[#allocation3 + $0x189] sm:$0xff] }
 0x641   :  { %24706 = vmatprep.subr.bf16.mxu1 %v24705_v55 }
 0x643   :  { %23623 = vmatmul.mubr.msk.f32.gmra.mrb[70].mxu1 %vm156_vm4, %v28895_v11  ;;  %v33121_v11 = vld [vmem:[#allocation31_spill] sm:$0xff] }
 0x644   :  { %23625 = vmatprep.mubr.msk.f32.mxu1 %vm156_vm4, %v28899_v4  ;;  %24708 = vmatpush3.bf16.msra.mxu1 %v24705_v55  ;;  %v33122_v4 = vld [vmem:[#allocation32_spill] sm:$0xff] }
 0x645   :  { %24710 = vmatprep.subr.bf16.mxu1 %v29420_v5  ;;  %v29701_v55 = vld [vmem:[#allocation3 + $0x1e9] sm:$0xff] }
 0x647   :  { %23626 = vmatmul.mubr.msk.f32.gmra.mrb[72].mxu1 %vm156_vm4, %v28903_v25  ;;  %v33123_v25 = vld [vmem:[#allocation33_spill] sm:$0xff] }
 0x648   :  { %23628 = vmatprep.mubr.msk.f32.mxu1 %vm156_vm4, %v28907_v12  ;;  %v33124_v12 = vld [vmem:[#allocation34_spill] sm:$0xff] }
 0x64b   :  { %23629 = vmatmul.mubr.msk.f32.gmra.mrb[74].mxu1 %vm156_vm4, %v28911_v27  ;;  %v33125_v27 = vld [vmem:[#allocation35_spill] sm:$0xff] }
 0x64c   :  { %23631 = vmatprep.mubr.msk.f32.mxu1 %vm156_vm4, %v28915_v31  ;;  %v29537_v31 = vld [vmem:[#allocation3 + $0x330] sm:$0xff] }
 0x64f   :  { %23632 = vmatmul.mubr.msk.f32.gmra.mrb[76].mxu1 %vm156_vm4, %v28919_v26  ;;  %v29541_v26 = vld [vmem:[#allocation3 + $0x338] sm:$0xff] }
 0x650   :  { %23634 = vmatprep.mubr.msk.f32.mxu1 %vm156_vm4, %v28923_v9  ;;  %v20370_v9 = vld [vmem:[%s32708_s2 + $0x150] sm:$0xff] }
 0x653   :  { %23635 = vmatmul.mubr.msk.f32.gmra.mrb[78].mxu1 %vm156_vm4, %v28927_v35  ;;  %v20371_v35 = vld [vmem:[%s32708_s2 + $0x158] sm:$0xff] }
 0x654   :  { %23637 = vmatprep.mubr.msk.f32.mxu1 %vm156_vm4, %v28931_v6  ;;  %v9611_v6 = vld [vmem:[#allocation3 + $0x19] sm:$0xff] }
 0x657   :  { %23638 = vmatmul.mubr.msk.f32.gmra.mrb[80].mxu1 %vm156_vm4, %v28935_v38  ;;  %v24713_v38 = vpack.c.bf16 %v20371_v35, %v20370_v9  ;;  %v29741_v9 = vld [vmem:[#allocation3 + $0x261] sm:$0xff]  ;;  %v29745_v35 = vld [vmem:[#allocation3 + $0x271] sm:$0xff] }
 0x658   :  { %23640 = vmatprep.mubr.msk.f32.mxu1 %vm156_vm4, %v28939_v41  ;;  %v9612_v41 = vld [vmem:[#allocation3 + $0x21] sm:$0xff] }
 0x65b   :  { %23641 = vmatmul.mubr.msk.f32.gmra.mrb[82].mxu1 %vm156_vm4, %v28943_v51  ;;  %v20372_v51 = vld [vmem:[%s32708_s2 + $0x160] sm:$0xff] }
 0x65c   :  { %23643 = vmatprep.mubr.msk.f32.mxu1 %vm156_vm4, %v28947_v48  ;;  %v20373_v48 = vld [vmem:[%s32708_s2 + $0x168] sm:$0xff] }
 0x65f   :  { %23644 = vmatmul.mubr.msk.f32.gmra.mrb[84].mxu1 %vm156_vm4, %v28951_v17  ;;  %v29559_v17 = vld [vmem:[#allocation3 + $0x31] sm:$0xff] }
 0x660   :  { %23646 = vmatprep.mubr.msk.f32.mxu1 %vm156_vm4, %v28955_v42  ;;  %v24717_v42 = vpack.c.bf16 %v20373_v48, %v20372_v51  ;;  %v29761_v51 = vld [vmem:[#allocation3 + $0x2a1] sm:$0xff]  ;;  %v29765_v48 = vld [vmem:[#allocation3 + $0x2a9] sm:$0xff] }
 0x663   :  { %23647 = vmatmul.mubr.msk.f32.gmra.mrb[86].mxu1 %vm156_vm4, %v28959_v60  ;;  %v29564_v60 = vld [vmem:[#allocation3 + $0x39] sm:$0xff] }
 0x664   :  { %23649 = vmatprep.mubr.msk.f32.mxu1 %vm156_vm4, %v28963_v28  ;;  %v20374_v28 = vld [vmem:[%s32708_s2 + $0x170] sm:$0xff] }
 0x667   :  { %23650 = vmatmul.mubr.msk.f32.gmra.mrb[88].mxu1 %vm156_vm4, %v28967_v40  ;;  %v20375_v40 = vld [vmem:[%s32708_s2 + $0x178] sm:$0xff] }
 0x668   :  { %23652 = vmatprep.mubr.msk.f32.mxu1 %vm156_vm4, %v28971_v18  ;;  %v29574_v18 = vld [vmem:[#allocation3 + $0x49] sm:$0xff] }
 0x66b   :  { %23653 = vmatmul.mubr.msk.f32.gmra.mrb[90].mxu1 %vm156_vm4, %v28975_v7  ;;  %v24721_v7 = vpack.c.bf16 %v20375_v40, %v20374_v28  ;;  %v29773_v28 = vld [vmem:[#allocation3 + $0x2c1] sm:$0xff]  ;;  %v29777_v40 = vld [vmem:[#allocation3 + $0x2d1] sm:$0xff] }
 0x66c   :  { %23655 = vmatprep.mubr.msk.f32.mxu1 %vm156_vm4, %v28979_v34  ;;  %v29578_v34 = vld [vmem:[#allocation3 + $0x51] sm:$0xff]  ;;  %33127 = vst [vmem:[#allocation19_spill] sm:$0xff] %v29773_v28  ;;  %33128 = vst [vmem:[#allocation20_spill] sm:$0xff] %v29777_v40 }
 0x66f   :  { %23656 = vmatmul.mubr.msk.f32.gmra.mrb[92].mxu1 %vm156_vm4, %v28983_v1  ;;  %v20440_v1 = vld [vmem:[%s32708_s2 + $0x180] sm:$0xff] }
 0x670   :  { %23658 = vmatprep.mubr.msk.f32.mxu1 %vm156_vm4, %v29469_v43 }
 0x673   :  { %23659 = vmatmul.mubr.msk.f32.gmra.mrb[94].mxu1 %vm156_vm4, %v29473_v63 }
 0x674   :  { %23661 = vmatprep.mubr.msk.f32.mxu1 %vm156_vm4, %v28989_v8  ;;  %v20441_v8 = vld [vmem:[%s32708_s2 + $0x188] sm:$0xff] }
 0x677   :  { %23662 = vmatmul.mubr.msk.f32.gmra.mrb[96].mxu1 %vm156_vm4, %v28993_v13  ;;  %v29588_v13 = vld [vmem:[#allocation3 + $0x61] sm:$0xff] }
 0x678   :  { %23664 = vmatprep.mubr.msk.f32.mxu1 %vm156_vm4, %v28997_v62  ;;  %v29592_v62 = vpack.c.bf16 %v20441_v8, %v20440_v1  ;;  %v29785_v1 = vld [vmem:[#allocation3 + $0x2e9] sm:$0xff]  ;;  %v29789_v8 = vld [vmem:[#allocation3 + $0x2f1] sm:$0xff] }
 0x679   :  { %33130 = vst [vmem:[#allocation22_spill] sm:$0xff] %v29785_v1  ;;  %33131 = vst [vmem:[#allocation23_spill] sm:$0xff] %v29789_v8 }
 0x67b   :  { %23665 = vmatmul.mubr.msk.f32.gmra.mrb[98].mxu1 %vm156_vm4, %v29001_v45  ;;  %v29594_v45 = vld [vmem:[#allocation3 + $0x69] sm:$0xff] }
 0x67c   :  { %23667 = vmatprep.mubr.msk.f32.mxu1 %vm156_vm4, %v29005_v20  ;;  %v29598_v20 = vld [vmem:[#allocation3 + $0x79] sm:$0xff] }
 0x67f   :  { %23668 = vmatmul.mubr.msk.f32.gmra.mrb[100].mxu1 %vm156_vm4, %v29009_v54  ;;  %v29603_v54 = vld [vmem:[#allocation3 + $0x81] sm:$0xff] }
 0x680   :  { %23670 = vmatprep.mubr.msk.f32.mxu1 %vm156_vm4, %v29013_v46  ;;  %v29607_v46 = vld [vmem:[#allocation3 + $0x91] sm:$0xff] }
 0x683   :  { %23671 = vmatmul.mubr.msk.f32.gmra.mrb[102].mxu1 %vm156_vm4, %v29017_v3  ;;  %v29611_v3 = vld [vmem:[#allocation3 + $0x99] sm:$0xff] }
 0x684   :  { %23673 = vmatprep.mubr.msk.f32.mxu1 %vm156_vm4, %v29021_v21  ;;  %v29615_v21 = vld [vmem:[#allocation3 + $0xa9] sm:$0xff] }
 0x687   :  { %23674 = vmatmul.mubr.msk.f32.gmra.mrb[104].mxu1 %vm156_vm4, %v29025_v14  ;;  %v29619_v14 = vld [vmem:[#allocation3 + $0xb1] sm:$0xff] }
 0x688   :  { %23676 = vmatprep.mubr.msk.f32.mxu1 %vm156_vm4, %v29029_v29  ;;  %v29623_v29 = vld [vmem:[#allocation3 + $0xc1] sm:$0xff] }
 0x68b   :  { %23677 = vmatmul.mubr.msk.f32.gmra.mrb[106].mxu1 %vm156_vm4, %v29033_v53  ;;  %v29627_v53 = vld [vmem:[#allocation3 + $0xc9] sm:$0xff] }
 0x68c   :  { %23679 = vmatprep.mubr.msk.f32.mxu1 %vm156_vm4, %v29037_v56  ;;  %v29631_v56 = vld [vmem:[#allocation3 + $0xd9] sm:$0xff] }
 0x68f   :  { %23680 = vmatmul.mubr.msk.f32.gmra.mrb[108].mxu1 %vm156_vm4, %v29041_v0  ;;  %v29635_v0 = vld [vmem:[#allocation3 + $0xe1] sm:$0xff] }
 0x690   :  { %23682 = vmatprep.mubr.msk.f32.mxu1 %vm156_vm4, %v29045_v15  ;;  %v29639_v15 = vld [vmem:[#allocation3 + $0xf1] sm:$0xff] }
 0x693   :  { %23683 = vmatmul.mubr.msk.f32.gmra.mrb[110].mxu1 %vm156_vm4, %v29049_v10  ;;  %v29643_v10 = vld [vmem:[#allocation3 + $0xf9] sm:$0xff] }
 0x694   :  { %23685 = vmatprep.mubr.msk.f32.mxu1 %vm156_vm4, %v29053_v49  ;;  %v29647_v49 = vld [vmem:[#allocation3 + $0x109] sm:$0xff] }
 0x697   :  { %23686 = vmatmul.mubr.msk.f32.gmra.mrb[112].mxu1 %vm156_vm4, %v29057_v22  ;;  %v29651_v22 = vld [vmem:[#allocation3 + $0x111] sm:$0xff] }
 0x698   :  { %23688 = vmatprep.mubr.msk.f32.mxu1 %vm156_vm4, %v29061_v37  ;;  %v29655_v37 = vld [vmem:[#allocation3 + $0x121] sm:$0xff] }
 0x69b   :  { %23689 = vmatmul.mubr.msk.f32.gmra.mrb[114].mxu1 %vm156_vm4, %v29065_v16  ;;  %v29659_v16 = vld [vmem:[#allocation3 + $0x129] sm:$0xff] }
 0x69c   :  { %23691 = vmatprep.mubr.msk.f32.mxu1 %vm156_vm4, %v29069_v19  ;;  %v29663_v19 = vld [vmem:[#allocation3 + $0x139] sm:$0xff] }
 0x69f   :  { %23692 = vmatmul.mubr.msk.f32.gmra.mrb[116].mxu1 %vm156_vm4, %v29073_v23  ;;  %v29667_v23 = vld [vmem:[#allocation3 + $0x141] sm:$0xff] }
 0x6a0   :  { %23694 = vmatprep.mubr.msk.f32.mxu1 %vm156_vm4, %v29077_v2  ;;  %v29671_v2 = vld [vmem:[#allocation3 + $0x151] sm:$0xff] }
 0x6a3   :  { %23695 = vmatmul.mubr.msk.f32.gmra.mrb[118].mxu1 %vm156_vm4, %v29081_v32  ;;  %v29675_v32 = vld [vmem:[#allocation3 + $0x159] sm:$0xff] }
 0x6a4   :  { %23697 = vmatprep.mubr.msk.f32.mxu1 %vm156_vm4, %v33120_v61  ;;  %v29717_v61 = vld [vmem:[#allocation3 + $0x219] sm:$0xff] }
 0x6a7   :  { %23698 = vmatmul.mubr.msk.f32.gmra.mrb[120].mxu1 %vm156_vm4, %v33121_v11  ;;  %v29721_v11 = vld [vmem:[#allocation3 + $0x229] sm:$0xff] }
 0x6a8   :  { %23700 = vmatprep.mubr.msk.f32.mxu1 %vm156_vm4, %v33122_v4  ;;  %v29725_v4 = vld [vmem:[#allocation3 + $0x231] sm:$0xff] }
 0x6ab   :  { %23701 = vmatmul.mubr.msk.f32.gmra.mrb[122].mxu1 %vm156_vm4, %v33123_v25  ;;  %v29729_v25 = vld [vmem:[#allocation3 + $0x241] sm:$0xff] }
 0x6ac   :  { %23703 = vmatprep.mubr.msk.f32.mxu1 %vm156_vm4, %v33124_v12  ;;  %v29733_v12 = vld [vmem:[#allocation3 + $0x249] sm:$0xff] }
 0x6af   :  { %23704 = vmatmul.mubr.msk.f32.gmra.mrb[124].mxu1 %vm156_vm4, %v33125_v27  ;;  %v29737_v27 = vld [vmem:[#allocation3 + $0x259] sm:$0xff] }
 0x6b0   :  { %23706 = vmatprep.mubr.msk.f32.mxu1 %vm156_vm4, %v29537_v31 }
 0x6b3   :  { %23707 = vmatmul.mubr.msk.f32.gmra.mrb[126].mxu1 %vm156_vm4, %v29541_v26 }
 0x6b4   :  { %23725 = vmatprep.mubr.msk.f32.mxu1 %vm156_vm4, %v9611_v6  ;;  %v29749_v6 = vld [vmem:[#allocation3 + $0x279] sm:$0xff] }
 0x6b7   :  { %23726 = vmatmul.mubr.msk.f32.vlgmr.msra.gmra.mrb[64].mxu1 %vm156_vm4, %v9612_v41  ;;  %v29757_v41 = vld [vmem:[#allocation3 + $0x291] sm:$0xff] }
 0x6b8   :  { %24712 = vmatpush3.bf16.msra.mxu1 %v29420_v5  ;;  %23728 = vmatprep.mubr.msk.f32.mxu1 %vm156_vm4, %v29559_v17  ;;  %v29713_v5 = vld [vmem:[#allocation3 + $0x211] sm:$0xff] }
 0x6b9   :  { %24714 = vmatprep.subr.bf16.mxu1 %v24713_v38 }
 0x6bb   :  { %23729 = vmatmul.mubr.msk.f32.gmra.mrb[66].mxu1 %vm156_vm4, %v29564_v60 }
 0x6bc   :  { %23731 = vmatprep.mubr.msk.f32.mxu1 %vm156_vm4, %v29574_v18  ;;  %24716 = vmatpush3.bf16.msra.mxu1 %v24713_v38  ;;  %v29753_v38 = vld [vmem:[#allocation3 + $0x289] sm:$0xff] }
 0x6bd   :  { %24718 = vmatprep.subr.bf16.mxu1 %v24717_v42 }
 0x6bf   :  { %23732 = vmatmul.mubr.msk.f32.gmra.mrb[68].mxu1 %vm156_vm4, %v29578_v34 }
 0x6c0   :  { %23734 = vmatprep.mubr.msk.f32.mxu1 %vm156_vm4, %v29588_v13  ;;  %24720 = vmatpush3.bf16.msra.mxu1 %v24717_v42  ;;  %v29769_v42 = vld [vmem:[#allocation3 + $0x2b9] sm:$0xff] }
 0x6c1   :  { %24722 = vmatprep.subr.bf16.mxu1 %v24721_v7  ;;  %33126 = vst [vmem:[#allocation18_spill] sm:$0xff] %v29769_v42 }
 0x6c3   :  { %23735 = vmatmul.mubr.msk.f32.gmra.mrb[70].mxu1 %vm156_vm4, %v29594_v45 }
 0x6c4   :  { %23737 = vmatprep.mubr.msk.f32.mxu1 %vm156_vm4, %v29598_v20  ;;  %24724 = vmatpush3.bf16.msra.mxu1 %v24721_v7  ;;  %v29781_v7 = vld [vmem:[#allocation3 + $0x2d9] sm:$0xff] }
 0x6c5   :  { %24726 = vmatprep.subr.bf16.mxu1 %v29592_v62  ;;  %33129 = vst [vmem:[#allocation21_spill] sm:$0xff] %v29781_v7 }
 0x6c7   :  { %23738 = vmatmul.mubr.msk.f32.gmra.mrb[72].mxu1 %vm156_vm4, %v29603_v54 }
 0x6c8   :  { %23740 = vmatprep.mubr.msk.f32.mxu1 %vm156_vm4, %v29607_v46 }
 0x6cb   :  { %23741 = vmatmul.mubr.msk.f32.gmra.mrb[74].mxu1 %vm156_vm4, %v29611_v3 }
 0x6cc   :  { %23743 = vmatprep.mubr.msk.f32.mxu1 %vm156_vm4, %v29615_v21 }
 0x6cf   :  { %23744 = vmatmul.mubr.msk.f32.gmra.mrb[76].mxu1 %vm156_vm4, %v29619_v14 }
 0x6d0   :  { %23746 = vmatprep.mubr.msk.f32.mxu1 %vm156_vm4, %v29623_v29 }
 0x6d3   :  { %23747 = vmatmul.mubr.msk.f32.gmra.mrb[78].mxu1 %vm156_vm4, %v29627_v53 }
 0x6d4   :  { %23749 = vmatprep.mubr.msk.f32.mxu1 %vm156_vm4, %v29631_v56 }
 0x6d7   :  { %23750 = vmatmul.mubr.msk.f32.gmra.mrb[80].mxu1 %vm156_vm4, %v29635_v0 }
 0x6d8   :  { %23752 = vmatprep.mubr.msk.f32.mxu1 %vm156_vm4, %v29639_v15 }
 0x6db   :  { %23753 = vmatmul.mubr.msk.f32.gmra.mrb[82].mxu1 %vm156_vm4, %v29643_v10 }
 0x6dc   :  { %23755 = vmatprep.mubr.msk.f32.mxu1 %vm156_vm4, %v29647_v49 }
 0x6df   :  { %23756 = vmatmul.mubr.msk.f32.gmra.mrb[84].mxu1 %vm156_vm4, %v29651_v22 }
 0x6e0   :  { %23758 = vmatprep.mubr.msk.f32.mxu1 %vm156_vm4, %v29655_v37 }
 0x6e3   :  { %23759 = vmatmul.mubr.msk.f32.gmra.mrb[86].mxu1 %vm156_vm4, %v29659_v16 }
 0x6e4   :  { %23761 = vmatprep.mubr.msk.f32.mxu1 %vm156_vm4, %v29663_v19 }
 0x6e7   :  { %23762 = vmatmul.mubr.msk.f32.gmra.mrb[88].mxu1 %vm156_vm4, %v29667_v23 }
 0x6e8   :  { %23764 = vmatprep.mubr.msk.f32.mxu1 %vm156_vm4, %v29671_v2 }
 0x6eb   :  { %23765 = vmatmul.mubr.msk.f32.gmra.mrb[90].mxu1 %vm156_vm4, %v29675_v32 }
 0x6ec   :  { %23767 = vmatprep.mubr.msk.f32.mxu1 %vm156_vm4, %v29679_v57 }
 0x6ef   :  { %23768 = vmatmul.mubr.msk.f32.gmra.mrb[92].mxu1 %vm156_vm4, %v29683_v52 }
 0x6f0   :  { %23770 = vmatprep.mubr.msk.f32.mxu1 %vm156_vm4, %v29687_v39 }
 0x6f3   :  { %23771 = vmatmul.mubr.msk.f32.gmra.mrb[94].mxu1 %vm156_vm4, %v29691_v36 }
 0x6f4   :  { %23773 = vmatprep.mubr.msk.f32.mxu1 %vm156_vm4, %v9643_v50  ;;  %v29793_v50 = vld [vmem:[#allocation3 + $0x301] sm:$0xff] }
 0x6f5   :  { %33132 = vst [vmem:[#allocation24_spill] sm:$0xff] %v29793_v50 }
 0x6f7   :  { %23774 = vmatmul.mubr.msk.f32.gmra.mrb[96].mxu1 %vm156_vm4, %v9644_v33  ;;  %v29797_v33 = vld [vmem:[#allocation3 + $0x309] sm:$0xff] }
 0x6f8   :  { %23776 = vmatprep.mubr.msk.f32.mxu1 %vm156_vm4, %v29697_v47  ;;  %33133 = vst [vmem:[#allocation25_spill] sm:$0xff] %v29797_v33 }
 0x6fb   :  { %23777 = vmatmul.mubr.msk.f32.gmra.mrb[98].mxu1 %vm156_vm4, %v29701_v55 }
 0x6fc   :  { %23779 = vmatprep.mubr.msk.f32.mxu1 %vm156_vm4, %v29705_v24 }
 0x6ff   :  { %23780 = vmatmul.mubr.msk.f32.gmra.mrb[100].mxu1 %vm156_vm4, %v29709_v58 }
 0x700   :  { %23782 = vmatprep.mubr.msk.f32.mxu1 %vm156_vm4, %v29713_v5 }
 0x703   :  { %23783 = vmatmul.mubr.msk.f32.gmra.mrb[102].mxu1 %vm156_vm4, %v29717_v61 }
 0x704   :  { %23785 = vmatprep.mubr.msk.f32.mxu1 %vm156_vm4, %v29721_v11 }
 0x707   :  { %23786 = vmatmul.mubr.msk.f32.gmra.mrb[104].mxu1 %vm156_vm4, %v29725_v4 }
 0x708   :  { %23788 = vmatprep.mubr.msk.f32.mxu1 %vm156_vm4, %v29729_v25 }
 0x70b   :  { %23789 = vmatmul.mubr.msk.f32.gmra.mrb[106].mxu1 %vm156_vm4, %v29733_v12 }
 0x70c   :  { %23791 = vmatprep.mubr.msk.f32.mxu1 %vm156_vm4, %v29737_v27 }
 0x70f   :  { %23792 = vmatmul.mubr.msk.f32.gmra.mrb[108].mxu1 %vm156_vm4, %v29741_v9 }
 0x710   :  { %23794 = vmatprep.mubr.msk.f32.mxu1 %vm156_vm4, %v29745_v35 }
 0x713   :  { %23795 = vmatmul.mubr.msk.f32.gmra.mrb[110].mxu1 %vm156_vm4, %v29749_v6 }
 0x714   :  { %23797 = vmatprep.mubr.msk.f32.mxu1 %vm156_vm4, %v29753_v38 }
 0x717   :  { %23798 = vmatmul.mubr.msk.f32.gmra.mrb[112].mxu1 %vm156_vm4, %v29757_v41 }
 0x718   :  { %23800 = vmatprep.mubr.msk.f32.mxu1 %vm156_vm4, %v29761_v51 }
 0x71b   :  { %23801 = vmatmul.mubr.msk.f32.gmra.mrb[114].mxu1 %vm156_vm4, %v29765_v48 }
 0x71c   :  { %23803 = vmatprep.mubr.msk.f32.mxu1 %vm156_vm4, %v29769_v42  ;;  %v33139_v42 = vld [vmem:[#allocation37_spill] sm:$0xff] }
 0x71f   :  { %23804 = vmatmul.mubr.msk.f32.gmra.mrb[116].mxu1 %vm156_vm4, %v29773_v28  ;;  %v20445_v28 = vld [vmem:[%s32708_s2 + $0x1a8] sm:$0xff] }
 0x720   :  { %23806 = vmatprep.mubr.msk.f32.mxu1 %vm156_vm4, %v29777_v40  ;;  %v33138_v40 = vld [vmem:[#allocation36_spill] sm:$0xff] }
 0x723   :  { %23807 = vmatmul.mubr.msk.f32.gmra.mrb[118].mxu1 %vm156_vm4, %v29781_v7  ;;  %v29801_v7 = vld [vmem:[#allocation3 + $0x319] sm:$0xff] }
 0x724   :  { %23809 = vmatprep.mubr.msk.f32.mxu1 %vm156_vm4, %v29785_v1  ;;  %33134 = vst [vmem:[#allocation26_spill] sm:$0xff] %v29801_v7  ;;  %v29805_v1 = vld [vmem:[#allocation3 + $0x321] sm:$0xff] }
 0x725   :  { %33135 = vst [vmem:[#allocation27_spill] sm:$0xff] %v29805_v1 }
 0x727   :  { %23810 = vmatmul.mubr.msk.f32.gmra.mrb[120].mxu1 %vm156_vm4, %v29789_v8  ;;  %v29809_v8 = vld [vmem:[#allocation3 + $0x331] sm:$0xff] }
 0x728   :  { %23812 = vmatprep.mubr.msk.f32.mxu1 %vm156_vm4, %v29793_v50  ;;  %33136 = vst [vmem:[#allocation28_spill] sm:$0xff] %v29809_v8  ;;  %v29813_v50 = vld [vmem:[#allocation3 + $0x339] sm:$0xff] }
 0x729   :  { %33137 = vst [vmem:[#allocation29_spill] sm:$0xff] %v29813_v50 }
 0x72b   :  { %23813 = vmatmul.mubr.msk.f32.gmra.mrb[122].mxu1 %vm156_vm4, %v29797_v33  ;;  %v20442_v33 = vld [vmem:[%s32708_s2 + $0x190] sm:$0xff] }
 0x72c   :  { %23815 = vmatprep.mubr.msk.f32.mxu1 %vm156_vm4, %v29801_v7  ;;  %v20443_v7 = vld [vmem:[%s32708_s2 + $0x198] sm:$0xff] }
 0x72f   :  { %23816 = vmatmul.mubr.msk.f32.gmra.mrb[124].mxu1 %vm156_vm4, %v29805_v1  ;;  %v24729_v1 = vpack.c.bf16 %v20443_v7, %v20442_v33  ;;  %v20447_v7 = vld [vmem:[%s32708_s2 + $0x1b8] sm:$0xff] }
 0x730   :  { %23818 = vmatprep.mubr.msk.f32.mxu1 %vm156_vm4, %v29809_v8  ;;  %v20444_v8 = vld [vmem:[%s32708_s2 + $0x1a0] sm:$0xff] }
 0x731   :  { %v33140_v33 = vld [vmem:[#allocation38_spill] sm:$0xff] }
 0x733   :  { %23819 = vmatmul.mubr.msk.f32.gmra.mrb[126].mxu1 %vm156_vm4, %v29813_v50  ;;  %v24733_v50 = vpack.c.bf16 %v20445_v28, %v20444_v8  ;;  %v33141_v28 = vld [vmem:[#allocation39_spill] sm:$0xff]  ;;  %v33143_v8 = vld [vmem:[#allocation41_spill] sm:$0xff] }
 0x734   :  { %23837 = vmatprep.mubr.msk.f32.mxu1 %vm156_vm4, %v33138_v40  ;;  %v20446_v40 = vld [vmem:[%s32708_s2 + $0x1b0] sm:$0xff] }
 0x737   :  { %23838 = vmatmul.mubr.msk.f32.vlgmr.msra.gmra.mrb[64].mxu1 %vm156_vm4, %v33139_v42  ;;  %v20513_v42 = vld [vmem:[%s32708_s2 + $0x1c8] sm:$0xff] }
 0x738   :  { %24728 = vmatpush3.bf16.msra.mxu1 %v29592_v62  ;;  %23840 = vmatprep.mubr.msk.f32.mxu1 %vm156_vm4, %v29138_v59  ;;  %v24737_v62 = vpack.c.bf16 %v20447_v7, %v20446_v40  ;;  %v20512_v59 = vld [vmem:[%s32708_s2 + $0x1c0] sm:$0xff]  ;;  %v33146_v7 = vld [vmem:[#allocation44_spill] sm:$0xff] }
 0x739   :  { %24730 = vmatprep.subr.bf16.mxu1 %v24729_v1  ;;  %v33144_v40 = vld [vmem:[#allocation42_spill] sm:$0xff] }
 0x73b   :  { %23841 = vmatmul.mubr.msk.f32.gmra.mrb[66].mxu1 %vm156_vm4, %v33140_v33  ;;  %v33148_v33 = vld [vmem:[#allocation46_spill] sm:$0xff] }
 0x73c   :  { %23843 = vmatprep.mubr.msk.f32.mxu1 %vm156_vm4, %v29152_v44  ;;  %24732 = vmatpush3.bf16.msra.mxu1 %v24729_v1  ;;  %v29856_v44 = vpack.c.bf16 %v20513_v42, %v20512_v59  ;;  %v33142_v1 = vld [vmem:[#allocation40_spill] sm:$0xff]  ;;  %v33149_v59 = vld [vmem:[#allocation47_spill] sm:$0xff]  ;;  %v33151_v42 = vld [vmem:[#allocation49_spill] sm:$0xff] }
 0x73d   :  { %24734 = vmatprep.subr.bf16.mxu1 %v24733_v50 }
 0x73f   :  { %23844 = vmatmul.mubr.msk.f32.gmra.mrb[68].mxu1 %vm156_vm4, %v29158_v30  ;;  %v33145_v30 = vld [vmem:[#allocation43_spill] sm:$0xff] }
 0x740   :  { %23846 = vmatprep.mubr.msk.f32.mxu1 %vm156_vm4, %v33141_v28  ;;  %24736 = vmatpush3.bf16.msra.mxu1 %v24733_v50  ;;  %v33147_v50 = vld [vmem:[#allocation45_spill] sm:$0xff]  ;;  %v33152_v28 = vld [vmem:[#allocation50_spill] sm:$0xff] }
 0x741   :  { %24738 = vmatprep.subr.bf16.mxu1 %v24737_v62 }
 0x743   :  { %23847 = vmatmul.mubr.msk.f32.gmra.mrb[70].mxu1 %vm156_vm4, %v33142_v1  ;;  %v33153_v1 = vld [vmem:[#allocation51_spill] sm:$0xff] }
 0x744   :  { %23849 = vmatprep.mubr.msk.f32.mxu1 %vm156_vm4, %v33143_v8  ;;  %24740 = vmatpush3.bf16.msra.mxu1 %v24737_v62  ;;  %v33150_v62 = vld [vmem:[#allocation48_spill] sm:$0xff] }
 0x745   :  { %24742 = vmatprep.subr.bf16.mxu1 %v29856_v44  ;;  %v33154_v8 = vld [vmem:[#allocation52_spill] sm:$0xff] }
 0x747   :  { %23850 = vmatmul.mubr.msk.f32.gmra.mrb[72].mxu1 %vm156_vm4, %v33144_v40  ;;  %v33155_v40 = vld [vmem:[#allocation53_spill] sm:$0xff] }
 0x748   :  { %23852 = vmatprep.mubr.msk.f32.mxu1 %vm156_vm4, %v33145_v30  ;;  %v33156_v30 = vld [vmem:[#allocation54_spill] sm:$0xff] }
 0x74b   :  { %23853 = vmatmul.mubr.msk.f32.gmra.mrb[74].mxu1 %vm156_vm4, %v33146_v7  ;;  %v33157_v7 = vld [vmem:[#allocation55_spill] sm:$0xff] }
 0x74c   :  { %23855 = vmatprep.mubr.msk.f32.mxu1 %vm156_vm4, %v33147_v50  ;;  %v33158_v50 = vld [vmem:[#allocation56_spill] sm:$0xff] }
 0x74f   :  { %23856 = vmatmul.mubr.msk.f32.gmra.mrb[76].mxu1 %vm156_vm4, %v33148_v33  ;;  %v33159_v33 = vld [vmem:[#allocation57_spill] sm:$0xff] }
 0x750   :  { %23858 = vmatprep.mubr.msk.f32.mxu1 %vm156_vm4, %v33149_v59  ;;  %v33160_v59 = vld [vmem:[#allocation58_spill] sm:$0xff] }
 0x753   :  { %23859 = vmatmul.mubr.msk.f32.gmra.mrb[78].mxu1 %vm156_vm4, %v33150_v62  ;;  %v33161_v62 = vld [vmem:[#allocation59_spill] sm:$0xff] }
 0x754   :  { %23861 = vmatprep.mubr.msk.f32.mxu1 %vm156_vm4, %v33151_v42  ;;  %v33162_v42 = vld [vmem:[#allocation60_spill] sm:$0xff] }
 0x757   :  { %23862 = vmatmul.mubr.msk.f32.gmra.mrb[80].mxu1 %vm156_vm4, %v33152_v28  ;;  %v33163_v28 = vld [vmem:[#allocation61_spill] sm:$0xff] }
 0x758   :  { %23864 = vmatprep.mubr.msk.f32.mxu1 %vm156_vm4, %v33153_v1  ;;  %v33164_v1 = vld [vmem:[#allocation62_spill] sm:$0xff] }
 0x75b   :  { %23865 = vmatmul.mubr.msk.f32.gmra.mrb[82].mxu1 %vm156_vm4, %v33154_v8  ;;  %v29905_v8 = vld [vmem:[#allocation3 + $0x182] sm:$0xff] }
 0x75c   :  { %23867 = vmatprep.mubr.msk.f32.mxu1 %vm156_vm4, %v33155_v40  ;;  %v29909_v40 = vld [vmem:[#allocation3 + $0x18a] sm:$0xff] }
 0x75d   :  { %33165 = vst [vmem:[#allocation30_spill] sm:$0xff] %v29909_v40 }
 0x75f   :  { %23868 = vmatmul.mubr.msk.f32.gmra.mrb[84].mxu1 %vm156_vm4, %v33156_v30  ;;  %v33166_v30 = vld [vmem:[#allocation63_spill] sm:$0xff] }
 0x760   :  { %23870 = vmatprep.mubr.msk.f32.mxu1 %vm156_vm4, %v33157_v7  ;;  %v33167_v7 = vld [vmem:[#allocation64_spill] sm:$0xff] }
 0x763   :  { %23871 = vmatmul.mubr.msk.f32.gmra.mrb[86].mxu1 %vm156_vm4, %v33158_v50  ;;  %v33168_v50 = vld [vmem:[#allocation65_spill] sm:$0xff] }
 0x764   :  { %23873 = vmatprep.mubr.msk.f32.mxu1 %vm156_vm4, %v33159_v33  ;;  %v33169_v33 = vld [vmem:[#allocation66_spill] sm:$0xff] }
 0x767   :  { %23874 = vmatmul.mubr.msk.f32.gmra.mrb[88].mxu1 %vm156_vm4, %v33160_v59  ;;  %v33170_v59 = vld [vmem:[#allocation67_spill] sm:$0xff] }
 0x768   :  { %23876 = vmatprep.mubr.msk.f32.mxu1 %vm156_vm4, %v33161_v62  ;;  %v33171_v62 = vld [vmem:[#allocation68_spill] sm:$0xff] }
 0x76b   :  { %23877 = vmatmul.mubr.msk.f32.gmra.mrb[90].mxu1 %vm156_vm4, %v33162_v42  ;;  %v33172_v42 = vld [vmem:[#allocation69_spill] sm:$0xff] }
 0x76c   :  { %23879 = vmatprep.mubr.msk.f32.mxu1 %vm156_vm4, %v33163_v28  ;;  %v33173_v28 = vld [vmem:[#allocation70_spill] sm:$0xff] }
 0x76f   :  { %23880 = vmatmul.mubr.msk.f32.gmra.mrb[92].mxu1 %vm156_vm4, %v33164_v1  ;;  %v33174_v1 = vld [vmem:[#allocation71_spill] sm:$0xff] }
 0x770   :  { %23882 = vmatprep.mubr.msk.f32.mxu1 %vm156_vm4, %v29905_v8 }
 0x773   :  { %23883 = vmatmul.mubr.msk.f32.gmra.mrb[94].mxu1 %vm156_vm4, %v29909_v40  ;;  %v11044_v40 = vld [vmem:[#allocation3 + $0x60] sm:$0xff] }
 0x774   :  { %23885 = vmatprep.mubr.msk.f32.mxu1 %vm156_vm4, %v33166_v30  ;;  %v33175_v30 = vld [vmem:[#allocation72_spill] sm:$0xff] }
 0x777   :  { %23886 = vmatmul.mubr.msk.f32.gmra.mrb[96].mxu1 %vm156_vm4, %v33167_v7  ;;  %v33176_v7 = vld [vmem:[#allocation73_spill] sm:$0xff] }
 0x778   :  { %23888 = vmatprep.mubr.msk.f32.mxu1 %vm156_vm4, %v33168_v50  ;;  %v33177_v50 = vld [vmem:[#allocation74_spill] sm:$0xff] }
 0x77b   :  { %23889 = vmatmul.mubr.msk.f32.gmra.mrb[98].mxu1 %vm156_vm4, %v33169_v33  ;;  %v33178_v33 = vld [vmem:[#allocation75_spill] sm:$0xff] }
 0x77c   :  { %23891 = vmatprep.mubr.msk.f32.mxu1 %vm156_vm4, %v33170_v59  ;;  %v33179_v59 = vld [vmem:[#allocation76_spill] sm:$0xff] }
 0x77f   :  { %23892 = vmatmul.mubr.msk.f32.gmra.mrb[100].mxu1 %vm156_vm4, %v33171_v62  ;;  %v33180_v62 = vld [vmem:[#allocation77_spill] sm:$0xff] }
 0x780   :  { %23894 = vmatprep.mubr.msk.f32.mxu1 %vm156_vm4, %v33172_v42  ;;  %v33181_v42 = vld [vmem:[#allocation78_spill] sm:$0xff] }
 0x783   :  { %23895 = vmatmul.mubr.msk.f32.gmra.mrb[102].mxu1 %vm156_vm4, %v33173_v28  ;;  %v33182_v28 = vld [vmem:[#allocation79_spill] sm:$0xff] }
 0x784   :  { %23897 = vmatprep.mubr.msk.f32.mxu1 %vm156_vm4, %v33174_v1  ;;  %v33183_v1 = vld [vmem:[#allocation80_spill] sm:$0xff] }
 0x787   :  { %23898 = vmatmul.mubr.msk.f32.gmra.mrb[104].mxu1 %vm156_vm4, %v33175_v30  ;;  %v33184_v30 = vld [vmem:[#allocation81_spill] sm:$0xff] }
 0x788   :  { %23900 = vmatprep.mubr.msk.f32.mxu1 %vm156_vm4, %v33176_v7  ;;  %v33185_v7 = vld [vmem:[#allocation82_spill] sm:$0xff] }
 0x78b   :  { %23901 = vmatmul.mubr.msk.f32.gmra.mrb[106].mxu1 %vm156_vm4, %v33177_v50  ;;  %v33186_v50 = vld [vmem:[#allocation83_spill] sm:$0xff] }
 0x78c   :  { %23903 = vmatprep.mubr.msk.f32.mxu1 %vm156_vm4, %v33178_v33  ;;  %v33187_v33 = vld [vmem:[#allocation84_spill] sm:$0xff] }
 0x78f   :  { %23904 = vmatmul.mubr.msk.f32.gmra.mrb[108].mxu1 %vm156_vm4, %v33179_v59  ;;  %v33188_v59 = vld [vmem:[#allocation85_spill] sm:$0xff] }
 0x790   :  { %23906 = vmatprep.mubr.msk.f32.mxu1 %vm156_vm4, %v33180_v62  ;;  %v33189_v62 = vld [vmem:[#allocation86_spill] sm:$0xff] }
 0x793   :  { %23907 = vmatmul.mubr.msk.f32.gmra.mrb[110].mxu1 %vm156_vm4, %v33181_v42  ;;  %v33190_v42 = vld [vmem:[#allocation87_spill] sm:$0xff] }
 0x794   :  { %23909 = vmatprep.mubr.msk.f32.mxu1 %vm156_vm4, %v33182_v28  ;;  %v33191_v28 = vld [vmem:[#allocation88_spill] sm:$0xff] }
 0x797   :  { %23910 = vmatmul.mubr.msk.f32.gmra.mrb[112].mxu1 %vm156_vm4, %v33183_v1  ;;  %v33192_v1 = vld [vmem:[#allocation89_spill] sm:$0xff] }
 0x798   :  { %23912 = vmatprep.mubr.msk.f32.mxu1 %vm156_vm4, %v33184_v30  ;;  %v33193_v30 = vld [vmem:[#allocation15_spill] sm:$0xff] }
 0x79b   :  { %23913 = vmatmul.mubr.msk.f32.gmra.mrb[114].mxu1 %vm156_vm4, %v33185_v7  ;;  %v33194_v7 = vld [vmem:[#allocation16_spill] sm:$0xff] }
 0x79c   :  { %23915 = vmatprep.mubr.msk.f32.mxu1 %vm156_vm4, %v33186_v50  ;;  %v33195_v50 = vld [vmem:[#allocation17_spill] sm:$0xff] }
 0x79f   :  { %23916 = vmatmul.mubr.msk.f32.gmra.mrb[116].mxu1 %vm156_vm4, %v33187_v33  ;;  %v29973_v33 = vld [vmem:[#allocation3 + $0x332] sm:$0xff] }
 0x7a0   :  { %23918 = vmatprep.mubr.msk.f32.mxu1 %vm156_vm4, %v33188_v59  ;;  %33196 = vst [vmem:[#allocation31_spill] sm:$0xff] %v29973_v33  ;;  %v29977_v59 = vld [vmem:[#allocation3 + $0x33a] sm:$0xff] }
 0x7a1   :  { %33197 = vst [vmem:[#allocation32_spill] sm:$0xff] %v29977_v59 }
 0x7a3   :  { %23919 = vmatmul.mubr.msk.f32.gmra.mrb[118].mxu1 %vm156_vm4, %v33189_v62  ;;  %v20514_v62 = vld [vmem:[%s32708_s2 + $0x1d0] sm:$0xff] }
 0x7a4   :  { %23921 = vmatprep.mubr.msk.f32.mxu1 %vm156_vm4, %v33190_v42  ;;  %v20515_v42 = vld [vmem:[%s32708_s2 + $0x1d8] sm:$0xff] }
 0x7a7   :  { %23922 = vmatmul.mubr.msk.f32.gmra.mrb[120].mxu1 %vm156_vm4, %v33191_v28  ;;  %v11040_v28 = vld [vmem:[#allocation3 + $0x30] sm:$0xff] }
 0x7a8   :  { %23924 = vmatprep.mubr.msk.f32.mxu1 %vm156_vm4, %v33192_v1  ;;  %v24745_v1 = vpack.c.bf16 %v20515_v42, %v20514_v62  ;;  %v20518_v62 = vld [vmem:[%s32708_s2 + $0x1f0] sm:$0xff]  ;;  %v20519_v42 = vld [vmem:[%s32708_s2 + $0x1f8] sm:$0xff] }
 0x7ab   :  { %23925 = vmatmul.mubr.msk.f32.gmra.mrb[122].mxu1 %vm156_vm4, %v33193_v30  ;;  %v11041_v30 = vld [vmem:[#allocation3 + $0x38] sm:$0xff] }
 0x7ac   :  { %23927 = vmatprep.mubr.msk.f32.mxu1 %vm156_vm4, %v33194_v7  ;;  %v20516_v7 = vld [vmem:[%s32708_s2 + $0x1e0] sm:$0xff] }
 0x7af   :  { %23928 = vmatmul.mubr.msk.f32.gmra.mrb[124].mxu1 %vm156_vm4, %v33195_v50  ;;  %v20517_v50 = vld [vmem:[%s32708_s2 + $0x1e8] sm:$0xff] }
 0x7b0   :  { %23930 = vmatprep.mubr.msk.f32.mxu1 %vm156_vm4, %v29973_v33  ;;  %v11042_v33 = vld [vmem:[#allocation3 + $0x48] sm:$0xff] }
 0x7b3   :  { %23931 = vmatmul.mubr.msk.f32.gmra.mrb[126].mxu1 %vm156_vm4, %v29977_v59  ;;  %v24749_v59 = vpack.c.bf16 %v20517_v50, %v20516_v7  ;;  %v20585_v7 = vld [vmem:[%s32708_s2 + $0x208] sm:$0xff]  ;;  %v11046_v50 = vld [vmem:[#allocation3 + $0x78] sm:$0xff] }
 0x7b4   :  { %23949 = vmatprep.mubr.msk.f32.mxu1 %vm156_vm4, %v11040_v28  ;;  %v11043_v28 = vld [vmem:[#allocation3 + $0x50] sm:$0xff] }
 0x7b7   :  { %23950 = vmatmul.mubr.msk.f32.vlgmr.msra.gmra.mrb[64].mxu1 %vm156_vm4, %v11041_v30  ;;  %v20584_v30 = vld [vmem:[%s32708_s2 + $0x200] sm:$0xff] }
 0x7b8   :  { %24744 = vmatpush3.bf16.msra.mxu1 %v29856_v44  ;;  %23952 = vmatprep.mubr.msk.f32.mxu1 %vm156_vm4, %v11042_v33  ;;  %v24753_v44 = vpack.c.bf16 %v20519_v42, %v20518_v62  ;;  %v11045_v33 = vld [vmem:[#allocation3 + $0x68] sm:$0xff]  ;;  %v11049_v62 = vld [vmem:[#allocation3 + $0x98] sm:$0xff] }
 0x7b9   :  { %24746 = vmatprep.subr.bf16.mxu1 %v24745_v1  ;;  %v11050_v42 = vld [vmem:[#allocation3 + $0xa8] sm:$0xff] }
 0x7bb   :  { %23953 = vmatmul.mubr.msk.f32.gmra.mrb[66].mxu1 %vm156_vm4, %v11043_v28  ;;  %v11048_v28 = vld [vmem:[#allocation3 + $0x90] sm:$0xff] }
 0x7bc   :  { %23955 = vmatprep.mubr.msk.f32.mxu1 %vm156_vm4, %v11044_v40  ;;  %24748 = vmatpush3.bf16.msra.mxu1 %v24745_v1  ;;  %v30013_v40 = vpack.c.bf16 %v20585_v7, %v20584_v30  ;;  %v11047_v1 = vld [vmem:[#allocation3 + $0x80] sm:$0xff]  ;;  %v11053_v30 = vld [vmem:[#allocation3 + $0xc8] sm:$0xff]  ;;  %v11054_v7 = vld [vmem:[#allocation3 + $0xd8] sm:$0xff] }
 0x7bd   :  { %24750 = vmatprep.subr.bf16.mxu1 %v24749_v59 }
 0x7bf   :  { %23956 = vmatmul.mubr.msk.f32.gmra.mrb[68].mxu1 %vm156_vm4, %v11045_v33  ;;  %v11051_v33 = vld [vmem:[#allocation3 + $0xb0] sm:$0xff] }
 0x7c0   :  { %23958 = vmatprep.mubr.msk.f32.mxu1 %vm156_vm4, %v11046_v50  ;;  %24752 = vmatpush3.bf16.msra.mxu1 %v24749_v59  ;;  %v11052_v59 = vld [vmem:[#allocation3 + $0xc0] sm:$0xff]  ;;  %v11056_v50 = vld [vmem:[#allocation3 + $0xf0] sm:$0xff] }
 0x7c1   :  { %24754 = vmatprep.subr.bf16.mxu1 %v24753_v44 }
 0x7c3   :  { %23959 = vmatmul.mubr.msk.f32.gmra.mrb[70].mxu1 %vm156_vm4, %v11047_v1  ;;  %v11057_v1 = vld [vmem:[#allocation3 + $0xf8] sm:$0xff] }
 0x7c4   :  { %23961 = vmatprep.mubr.msk.f32.mxu1 %vm156_vm4, %v11048_v28  ;;  %24756 = vmatpush3.bf16.msra.mxu1 %v24753_v44  ;;  %v11055_v44 = vld [vmem:[#allocation3 + $0xe0] sm:$0xff]  ;;  %v11058_v28 = vld [vmem:[#allocation3 + $0x108] sm:$0xff] }
 0x7c5   :  { %24758 = vmatprep.subr.bf16.mxu1 %v30013_v40 }
 0x7c7   :  { %23962 = vmatmul.mubr.msk.f32.gmra.mrb[72].mxu1 %vm156_vm4, %v11049_v62  ;;  %v11059_v62 = vld [vmem:[#allocation3 + $0x110] sm:$0xff] }
 0x7c8   :  { %23964 = vmatprep.mubr.msk.f32.mxu1 %vm156_vm4, %v11050_v42  ;;  %v11060_v42 = vld [vmem:[#allocation3 + $0x120] sm:$0xff] }
 0x7cb   :  { %23965 = vmatmul.mubr.msk.f32.gmra.mrb[74].mxu1 %vm156_vm4, %v11051_v33  ;;  %v11061_v33 = vld [vmem:[#allocation3 + $0x128] sm:$0xff] }
 0x7cc   :  { %23967 = vmatprep.mubr.msk.f32.mxu1 %vm156_vm4, %v11052_v59  ;;  %v11062_v59 = vld [vmem:[#allocation3 + $0x138] sm:$0xff] }
 0x7cf   :  { %23968 = vmatmul.mubr.msk.f32.gmra.mrb[76].mxu1 %vm156_vm4, %v11053_v30  ;;  %v11063_v30 = vld [vmem:[#allocation3 + $0x140] sm:$0xff] }
 0x7d0   :  { %23970 = vmatprep.mubr.msk.f32.mxu1 %vm156_vm4, %v11054_v7  ;;  %v11064_v7 = vld [vmem:[#allocation3 + $0x150] sm:$0xff] }
 0x7d3   :  { %23971 = vmatmul.mubr.msk.f32.gmra.mrb[78].mxu1 %vm156_vm4, %v11055_v44  ;;  %v11065_v44 = vld [vmem:[#allocation3 + $0x158] sm:$0xff] }
 0x7d4   :  { %23973 = vmatprep.mubr.msk.f32.mxu1 %vm156_vm4, %v11056_v50  ;;  %v11066_v50 = vld [vmem:[#allocation3 + $0x168] sm:$0xff] }
 0x7d7   :  { %23974 = vmatmul.mubr.msk.f32.gmra.mrb[80].mxu1 %vm156_vm4, %v11057_v1  ;;  %v11067_v1 = vld [vmem:[#allocation3 + $0x170] sm:$0xff] }
 0x7d8   :  { %23976 = vmatprep.mubr.msk.f32.mxu1 %vm156_vm4, %v11058_v28  ;;  %v11070_v28 = vld [vmem:[#allocation3 + $0x198] sm:$0xff] }
 0x7db   :  { %23977 = vmatmul.mubr.msk.f32.gmra.mrb[82].mxu1 %vm156_vm4, %v11059_v62  ;;  %v11071_v62 = vld [vmem:[#allocation3 + $0x1a0] sm:$0xff] }
 0x7dc   :  { %23979 = vmatprep.mubr.msk.f32.mxu1 %vm156_vm4, %v11060_v42  ;;  %v11072_v42 = vld [vmem:[#allocation3 + $0x1e0] sm:$0xff] }
 0x7df   :  { %23980 = vmatmul.mubr.msk.f32.gmra.mrb[84].mxu1 %vm156_vm4, %v11061_v33  ;;  %v11073_v33 = vld [vmem:[#allocation3 + $0x1e8] sm:$0xff] }
 0x7e0   :  { %23982 = vmatprep.mubr.msk.f32.mxu1 %vm156_vm4, %v11062_v59  ;;  %v11074_v59 = vld [vmem:[#allocation3 + $0x1f8] sm:$0xff] }
 0x7e3   :  { %23983 = vmatmul.mubr.msk.f32.gmra.mrb[86].mxu1 %vm156_vm4, %v11063_v30  ;;  %v11075_v30 = vld [vmem:[#allocation3 + $0x200] sm:$0xff] }
 0x7e4   :  { %23985 = vmatprep.mubr.msk.f32.mxu1 %vm156_vm4, %v11064_v7  ;;  %v11078_v7 = vld [vmem:[#allocation3 + $0x228] sm:$0xff] }
 0x7e7   :  { %23986 = vmatmul.mubr.msk.f32.gmra.mrb[88].mxu1 %vm156_vm4, %v11065_v44  ;;  %v11079_v44 = vld [vmem:[#allocation3 + $0x230] sm:$0xff] }
 0x7e8   :  { %23988 = vmatprep.mubr.msk.f32.mxu1 %vm156_vm4, %v11066_v50  ;;  %v11080_v50 = vld [vmem:[#allocation3 + $0x240] sm:$0xff] }
 0x7eb   :  { %23989 = vmatmul.mubr.msk.f32.gmra.mrb[90].mxu1 %vm156_vm4, %v11067_v1  ;;  %v11081_v1 = vld [vmem:[#allocation3 + $0x248] sm:$0xff] }
 0x7ec   :  { %23991 = vmatprep.mubr.msk.f32.mxu1 %vm156_vm4, %v29469_v43  ;;  %v11076_v43 = vld [vmem:[#allocation3 + $0x210] sm:$0xff] }
 0x7ef   :  { %23992 = vmatmul.mubr.msk.f32.gmra.mrb[92].mxu1 %vm156_vm4, %v29473_v63  ;;  %v11077_v63 = vld [vmem:[#allocation3 + $0x218] sm:$0xff] }
 0x7f0   :  { %23994 = vmatprep.mubr.msk.f32.mxu1 %vm156_vm4, %v11070_v28  ;;  %v11082_v28 = vld [vmem:[#allocation3 + $0x258] sm:$0xff] }
 0x7f3   :  { %23995 = vmatmul.mubr.msk.f32.gmra.mrb[94].mxu1 %vm156_vm4, %v11071_v62  ;;  %v11083_v62 = vld [vmem:[#allocation3 + $0x260] sm:$0xff] }
 0x7f4   :  { %23997 = vmatprep.mubr.msk.f32.mxu1 %vm156_vm4, %v11072_v42  ;;  %v11084_v42 = vld [vmem:[#allocation3 + $0x270] sm:$0xff] }
 0x7f7   :  { %23998 = vmatmul.mubr.msk.f32.gmra.mrb[96].mxu1 %vm156_vm4, %v11073_v33  ;;  %v11085_v33 = vld [vmem:[#allocation3 + $0x278] sm:$0xff] }
 0x7f8   :  { %24000 = vmatprep.mubr.msk.f32.mxu1 %vm156_vm4, %v11074_v59  ;;  %v11086_v59 = vld [vmem:[#allocation3 + $0x288] sm:$0xff] }
 0x7fb   :  { %24001 = vmatmul.mubr.msk.f32.gmra.mrb[98].mxu1 %vm156_vm4, %v11075_v30  ;;  %v11087_v30 = vld [vmem:[#allocation3 + $0x290] sm:$0xff] }
 0x7fc   :  { %24003 = vmatprep.mubr.msk.f32.mxu1 %vm156_vm4, %v11076_v43  ;;  %v11088_v43 = vld [vmem:[#allocation3 + $0x2a0] sm:$0xff] }
 0x7ff   :  { %24004 = vmatmul.mubr.msk.f32.gmra.mrb[100].mxu1 %vm156_vm4, %v11077_v63  ;;  %v11089_v63 = vld [vmem:[#allocation3 + $0x2a8] sm:$0xff] }
 0x800   :  { %24006 = vmatprep.mubr.msk.f32.mxu1 %vm156_vm4, %v11078_v7  ;;  %v11090_v7 = vld [vmem:[#allocation3 + $0x2b8] sm:$0xff] }
 0x803   :  { %24007 = vmatmul.mubr.msk.f32.gmra.mrb[102].mxu1 %vm156_vm4, %v11079_v44  ;;  %v11091_v44 = vld [vmem:[#allocation3 + $0x2c0] sm:$0xff] }
 0x804   :  { %24009 = vmatprep.mubr.msk.f32.mxu1 %vm156_vm4, %v11080_v50  ;;  %v11092_v50 = vld [vmem:[#allocation3 + $0x2d0] sm:$0xff] }
 0x807   :  { %24010 = vmatmul.mubr.msk.f32.gmra.mrb[104].mxu1 %vm156_vm4, %v11081_v1  ;;  %v11093_v1 = vld [vmem:[#allocation3 + $0x2d8] sm:$0xff] }
 0x808   :  { %24012 = vmatprep.mubr.msk.f32.mxu1 %vm156_vm4, %v11082_v28  ;;  %v11094_v28 = vld [vmem:[#allocation3 + $0x2e8] sm:$0xff] }
 0x80b   :  { %24013 = vmatmul.mubr.msk.f32.gmra.mrb[106].mxu1 %vm156_vm4, %v11083_v62  ;;  %v11095_v62 = vld [vmem:[#allocation3 + $0x2f0] sm:$0xff] }
 0x80c   :  { %24015 = vmatprep.mubr.msk.f32.mxu1 %vm156_vm4, %v11084_v42  ;;  %v11096_v42 = vld [vmem:[#allocation3 + $0x300] sm:$0xff] }
 0x80f   :  { %24016 = vmatmul.mubr.msk.f32.gmra.mrb[108].mxu1 %vm156_vm4, %v11085_v33  ;;  %v11097_v33 = vld [vmem:[#allocation3 + $0x308] sm:$0xff] }
 0x810   :  { %24018 = vmatprep.mubr.msk.f32.mxu1 %vm156_vm4, %v11086_v59  ;;  %v11098_v59 = vld [vmem:[#allocation3 + $0x318] sm:$0xff] }
 0x813   :  { %24019 = vmatmul.mubr.msk.f32.gmra.mrb[110].mxu1 %vm156_vm4, %v11087_v30  ;;  %v11099_v30 = vld [vmem:[#allocation3 + $0x320] sm:$0xff] }
 0x814   :  { %24021 = vmatprep.mubr.msk.f32.mxu1 %vm156_vm4, %v11088_v43  ;;  %v11102_v43 = vld [vmem:[#allocation3 + $0x348] sm:$0xff] }
 0x817   :  { %24022 = vmatmul.mubr.msk.f32.gmra.mrb[112].mxu1 %vm156_vm4, %v11089_v63  ;;  %v11103_v63 = vld [vmem:[#allocation3 + $0x350] sm:$0xff] }
 0x818   :  { %24024 = vmatprep.mubr.msk.f32.mxu1 %vm156_vm4, %v11090_v7  ;;  %v20586_v7 = vld [vmem:[%s32708_s2 + $0x210] sm:$0xff] }
 0x81b   :  { %24025 = vmatmul.mubr.msk.f32.gmra.mrb[114].mxu1 %vm156_vm4, %v11091_v44  ;;  %v20587_v44 = vld [vmem:[%s32708_s2 + $0x218] sm:$0xff] }
 0x81c   :  { %24027 = vmatprep.mubr.msk.f32.mxu1 %vm156_vm4, %v11092_v50  ;;  %v20589_v50 = vld [vmem:[%s32708_s2 + $0x228] sm:$0xff] }
 0x81f   :  { %24028 = vmatmul.mubr.msk.f32.gmra.mrb[116].mxu1 %vm156_vm4, %v11093_v1 }
 0x820   :  { %24030 = vmatprep.mubr.msk.f32.mxu1 %vm156_vm4, %v11094_v28  ;;  %v20591_v28 = vld [vmem:[%s32708_s2 + $0x238] sm:$0xff] }
 0x823   :  { %24031 = vmatmul.mubr.msk.f32.gmra.mrb[118].mxu1 %vm156_vm4, %v11095_v62  ;;  %v12498_v62 = vld [vmem:[#allocation3 + $0x19a] sm:$0xff] }
 0x824   :  { %24033 = vmatprep.mubr.msk.f32.mxu1 %vm156_vm4, %v11096_v42  ;;  %v33210_v42 = vld [vmem:[#allocation30_spill] sm:$0xff] }
 0x827   :  { %24034 = vmatmul.mubr.msk.f32.gmra.mrb[120].mxu1 %vm156_vm4, %v11097_v33  ;;  %v12499_v33 = vld [vmem:[#allocation3 + $0x1a2] sm:$0xff] }
 0x828   :  { %24036 = vmatprep.mubr.msk.f32.mxu1 %vm156_vm4, %v11098_v59  ;;  %v12500_v59 = vld [vmem:[#allocation3 + $0x1e2] sm:$0xff] }
 0x82b   :  { %24037 = vmatmul.mubr.msk.f32.gmra.mrb[122].mxu1 %vm156_vm4, %v11099_v30  ;;  %v12501_v30 = vld [vmem:[#allocation3 + $0x1ea] sm:$0xff] }
 0x82c   :  { %24039 = vmatprep.mubr.msk.f32.mxu1 %vm156_vm4, %v29537_v31  ;;  %v24761_v31 = vpack.c.bf16 %v20587_v44, %v20586_v7  ;;  %v12505_v7 = vld [vmem:[#allocation3 + $0x21a] sm:$0xff]  ;;  %v12506_v44 = vld [vmem:[#allocation3 + $0x22a] sm:$0xff] }
 0x82f   :  { %24040 = vmatmul.mubr.msk.f32.gmra.mrb[124].mxu1 %vm156_vm4, %v29541_v26  ;;  %v20588_v26 = vld [vmem:[%s32708_s2 + $0x220] sm:$0xff] }
 0x830   :  { %24042 = vmatprep.mubr.msk.f32.mxu1 %vm156_vm4, %v11102_v43  ;;  %v24765_v1 = vpack.c.bf16 %v20589_v50, %v20588_v26  ;;  %v12502_v43 = vld [vmem:[#allocation3 + $0x1fa] sm:$0xff]  ;;  %v12508_v26 = vld [vmem:[#allocation3 + $0x242] sm:$0xff]  ;;  %v12509_v50 = vld [vmem:[#allocation3 + $0x24a] sm:$0xff] }
 0x833   :  { %24043 = vmatmul.mubr.msk.f32.gmra.mrb[126].mxu1 %vm156_vm4, %v11103_v63  ;;  %v12503_v63 = vld [vmem:[#allocation3 + $0x202] sm:$0xff] }
 0x834   :  { %24061 = vmatprep.mubr.msk.f32.mxu1 %vm156_vm4, %v29559_v17  ;;  %v20590_v17 = vld [vmem:[%s32708_s2 + $0x230] sm:$0xff] }
 0x837   :  { %24062 = vmatmul.mubr.msk.f32.vlgmr.msra.gmra.mrb[64].mxu1 %vm156_vm4, %v29564_v60  ;;  %v24769_v60 = vpack.c.bf16 %v20591_v28, %v20590_v17  ;;  %v12511_v17 = vld [vmem:[#allocation3 + $0x262] sm:$0xff]  ;;  %v12512_v28 = vld [vmem:[#allocation3 + $0x272] sm:$0xff] }
 0x838   :  { %24760 = vmatpush3.bf16.msra.mxu1 %v30013_v40  ;;  %24064 = vmatprep.mubr.msk.f32.mxu1 %vm156_vm4, %v29574_v18  ;;  %v11784_v18 = vld [vmem:[#allocation3 + $0x199] sm:$0xff] }
 0x839   :  { %24762 = vmatprep.subr.bf16.mxu1 %v24761_v31  ;;  %v12495_v40 = vld [vmem:[#allocation3 + $0x172] sm:$0xff] }
 0x83b   :  { %24065 = vmatmul.mubr.msk.f32.gmra.mrb[66].mxu1 %vm156_vm4, %v29578_v34  ;;  %v11785_v34 = vld [vmem:[#allocation3 + $0x1a1] sm:$0xff] }
 0x83c   :  { %24067 = vmatprep.mubr.msk.f32.mxu1 %vm156_vm4, %v29588_v13  ;;  %24764 = vmatpush3.bf16.msra.mxu1 %v24761_v31  ;;  %v33198_v13 = vld [vmem:[#allocation18_spill] sm:$0xff]  ;;  %v12507_v31 = vld [vmem:[#allocation3 + $0x232] sm:$0xff] }
 0x83d   :  { %24766 = vmatprep.subr.bf16.mxu1 %v24765_v1 }
 0x83f   :  { %24068 = vmatmul.mubr.msk.f32.gmra.mrb[68].mxu1 %vm156_vm4, %v29594_v45  ;;  %v33199_v45 = vld [vmem:[#allocation19_spill] sm:$0xff] }
 0x840   :  { %24070 = vmatprep.mubr.msk.f32.mxu1 %vm156_vm4, %v29598_v20  ;;  %24768 = vmatpush3.bf16.msra.mxu1 %v24765_v1  ;;  %v33200_v20 = vld [vmem:[#allocation20_spill] sm:$0xff]  ;;  %v12510_v1 = vld [vmem:[#allocation3 + $0x25a] sm:$0xff] }
 0x841   :  { %24770 = vmatprep.subr.bf16.mxu1 %v24769_v60 }
 0x843   :  { %24071 = vmatmul.mubr.msk.f32.gmra.mrb[70].mxu1 %vm156_vm4, %v29603_v54  ;;  %v33201_v54 = vld [vmem:[#allocation21_spill] sm:$0xff] }
 0x844   :  { %24073 = vmatprep.mubr.msk.f32.mxu1 %vm156_vm4, %v29607_v46  ;;  %24772 = vmatpush3.bf16.msra.mxu1 %v24769_v60  ;;  %v33202_v46 = vld [vmem:[#allocation22_spill] sm:$0xff] }
 0x845   :  { %v12513_v60 = vld [vmem:[#allocation3 + $0x27a] sm:$0xff] }
 0x847   :  { %24074 = vmatmul.mubr.msk.f32.gmra.mrb[72].mxu1 %vm156_vm4, %v29611_v3  ;;  %v33203_v3 = vld [vmem:[#allocation23_spill] sm:$0xff] }
 0x848   :  { %24076 = vmatprep.mubr.msk.f32.mxu1 %vm156_vm4, %v29615_v21  ;;  %v33204_v21 = vld [vmem:[#allocation24_spill] sm:$0xff] }
 0x84b   :  { %24077 = vmatmul.mubr.msk.f32.gmra.mrb[74].mxu1 %vm156_vm4, %v29619_v14  ;;  %v33205_v14 = vld [vmem:[#allocation25_spill] sm:$0xff] }
 0x84c   :  { %24079 = vmatprep.mubr.msk.f32.mxu1 %vm156_vm4, %v29623_v29  ;;  %v33206_v29 = vld [vmem:[#allocation26_spill] sm:$0xff] }
 0x84f   :  { %24080 = vmatmul.mubr.msk.f32.gmra.mrb[76].mxu1 %vm156_vm4, %v29627_v53  ;;  %v33207_v53 = vld [vmem:[#allocation27_spill] sm:$0xff] }
 0x850   :  { %24082 = vmatprep.mubr.msk.f32.mxu1 %vm156_vm4, %v29631_v56  ;;  %v33208_v56 = vld [vmem:[#allocation28_spill] sm:$0xff] }
 0x853   :  { %24083 = vmatmul.mubr.msk.f32.gmra.mrb[78].mxu1 %vm156_vm4, %v29635_v0  ;;  %v11816_v0 = vld [vmem:[#allocation3 + $0x349] sm:$0xff] }
 0x854   :  { %24085 = vmatprep.mubr.msk.f32.mxu1 %vm156_vm4, %v29639_v15  ;;  %v33209_v15 = vld [vmem:[#allocation29_spill] sm:$0xff] }
 0x857   :  { %24086 = vmatmul.mubr.msk.f32.gmra.mrb[80].mxu1 %vm156_vm4, %v29643_v10  ;;  %v11817_v10 = vld [vmem:[#allocation3 + $0x351] sm:$0xff] }
 0x858   :  { %24088 = vmatprep.mubr.msk.f32.mxu1 %vm156_vm4, %v29647_v49  ;;  %v12468_v49 = vld [vmem:[#allocation3 + $0x32] sm:$0xff] }
 0x85b   :  { %24089 = vmatmul.mubr.msk.f32.gmra.mrb[82].mxu1 %vm156_vm4, %v29651_v22  ;;  %v15396_v22 = vld [vmem:[#allocation5 + $0x40] sm:$0xff] }
 0x85c   :  { %24091 = vmatprep.mubr.msk.f32.mxu1 %vm156_vm4, %v29655_v37  ;;  %v15397_v37 = vld [vmem:[#allocation5 + $0x48] sm:$0xff] }
 0x85f   :  { %24092 = vmatmul.mubr.msk.f32.gmra.mrb[84].mxu1 %vm156_vm4, %v29659_v16  ;;  %v24773_v16 = vpack.c.bf16 %v15397_v37, %v15396_v22  ;;  %v12530_v22 = vld [vmem:[#allocation3 + $0x34a] sm:$0xff] }
 0x860   :  { %24094 = vmatprep.mubr.msk.f32.mxu1 %vm156_vm4, %v29663_v19  ;;  %v12469_v19 = vld [vmem:[#allocation3 + $0x3a] sm:$0xff] }
 0x861   :  { %24774 = vmatprep.subr.bf16.mxu0 %v24773_v16 }
 0x862   :  { %24776 = vmatpush3.bf16.msra.mxu0 %v24773_v16  ;;  %v33212_v16 = vld [vmem:[#allocation32_spill] sm:$0xff] }
 0x863   :  { %24095 = vmatmul.mubr.msk.f32.gmra.mrb[86].mxu1 %vm156_vm4, %v29667_v23  ;;  %v12470_v23 = vld [vmem:[#allocation3 + $0x4a] sm:$0xff] }
 0x864   :  { %24097 = vmatprep.mubr.msk.f32.mxu1 %vm156_vm4, %v29671_v2  ;;  %v12471_v2 = vld [vmem:[#allocation3 + $0x52] sm:$0xff] }
 0x867   :  { %24098 = vmatmul.mubr.msk.f32.gmra.mrb[88].mxu1 %vm156_vm4, %v29675_v32  ;;  %v12472_v32 = vld [vmem:[#allocation3 + $0x62] sm:$0xff] }
 0x868   :  { %24100 = vmatprep.mubr.msk.f32.mxu1 %vm156_vm4, %v29679_v57  ;;  %v12473_v57 = vld [vmem:[#allocation3 + $0x6a] sm:$0xff] }
 0x86b   :  { %24101 = vmatmul.mubr.msk.f32.gmra.mrb[90].mxu1 %vm156_vm4, %v29683_v52  ;;  %v12474_v52 = vld [vmem:[#allocation3 + $0x7a] sm:$0xff] }
 0x86c   :  { %24103 = vmatprep.mubr.msk.f32.mxu1 %vm156_vm4, %v29687_v39  ;;  %v12475_v39 = vld [vmem:[#allocation3 + $0x82] sm:$0xff] }
 0x86f   :  { %24104 = vmatmul.mubr.msk.f32.gmra.mrb[92].mxu1 %vm156_vm4, %v29691_v36  ;;  %v12476_v36 = vld [vmem:[#allocation3 + $0x92] sm:$0xff] }
 0x870   :  { %24106 = vmatprep.mubr.msk.f32.mxu1 %vm156_vm4, %v11784_v18  ;;  %v12514_v18 = vld [vmem:[#allocation3 + $0x28a] sm:$0xff] }
 0x873   :  { %24107 = vmatmul.mubr.msk.f32.gmra.mrb[94].mxu1 %vm156_vm4, %v11785_v34  ;;  %v12515_v34 = vld [vmem:[#allocation3 + $0x292] sm:$0xff] }
 0x874   :  { %24109 = vmatprep.mubr.msk.f32.mxu1 %vm156_vm4, %v29697_v47  ;;  %v12477_v47 = vld [vmem:[#allocation3 + $0x9a] sm:$0xff] }
 0x877   :  { %24110 = vmatmul.mubr.msk.f32.gmra.mrb[96].mxu1 %vm156_vm4, %v29701_v55  ;;  %v12478_v55 = vld [vmem:[#allocation3 + $0xaa] sm:$0xff] }
 0x878   :  { %24112 = vmatprep.mubr.msk.f32.mxu1 %vm156_vm4, %v29705_v24  ;;  %v12479_v24 = vld [vmem:[#allocation3 + $0xb2] sm:$0xff] }
 0x87b   :  { %24113 = vmatmul.mubr.msk.f32.gmra.mrb[98].mxu1 %vm156_vm4, %v29709_v58  ;;  %v12480_v58 = vld [vmem:[#allocation3 + $0xc2] sm:$0xff] }
 0x87c   :  { %24115 = vmatprep.mubr.msk.f32.mxu1 %vm156_vm4, %v29713_v5  ;;  %v12481_v5 = vld [vmem:[#allocation3 + $0xca] sm:$0xff] }
 0x87f   :  { %24116 = vmatmul.mubr.msk.f32.gmra.mrb[100].mxu1 %vm156_vm4, %v29717_v61  ;;  %v12482_v61 = vld [vmem:[#allocation3 + $0xda] sm:$0xff] }
 0x880   :  { %24118 = vmatprep.mubr.msk.f32.mxu1 %vm156_vm4, %v29721_v11  ;;  %v12483_v11 = vld [vmem:[#allocation3 + $0xe2] sm:$0xff] }
 0x883   :  { %24119 = vmatmul.mubr.msk.f32.gmra.mrb[102].mxu1 %vm156_vm4, %v29725_v4  ;;  %v12484_v4 = vld [vmem:[#allocation3 + $0xf2] sm:$0xff] }
 0x884   :  { %24121 = vmatprep.mubr.msk.f32.mxu1 %vm156_vm4, %v29729_v25  ;;  %v12485_v25 = vld [vmem:[#allocation3 + $0xfa] sm:$0xff] }
 0x887   :  { %24122 = vmatmul.mubr.msk.f32.gmra.mrb[104].mxu1 %vm156_vm4, %v29733_v12  ;;  %v12486_v12 = vld [vmem:[#allocation3 + $0x10a] sm:$0xff] }
 0x888   :  { %24124 = vmatprep.mubr.msk.f32.mxu1 %vm156_vm4, %v29737_v27  ;;  %v12487_v27 = vld [vmem:[#allocation3 + $0x112] sm:$0xff] }
 0x88b   :  { %24125 = vmatmul.mubr.msk.f32.gmra.mrb[106].mxu1 %vm156_vm4, %v29741_v9  ;;  %v12488_v9 = vld [vmem:[#allocation3 + $0x122] sm:$0xff] }
 0x88c   :  { %24127 = vmatprep.mubr.msk.f32.mxu1 %vm156_vm4, %v29745_v35  ;;  %v12489_v35 = vld [vmem:[#allocation3 + $0x12a] sm:$0xff] }
 0x88f   :  { %24128 = vmatmul.mubr.msk.f32.gmra.mrb[108].mxu1 %vm156_vm4, %v29749_v6  ;;  %v12490_v6 = vld [vmem:[#allocation3 + $0x13a] sm:$0xff] }
 0x890   :  { %24130 = vmatprep.mubr.msk.f32.mxu1 %vm156_vm4, %v29753_v38  ;;  %v12491_v38 = vld [vmem:[#allocation3 + $0x142] sm:$0xff] }
 0x893   :  { %24131 = vmatmul.mubr.msk.f32.gmra.mrb[110].mxu1 %vm156_vm4, %v29757_v41  ;;  %v12492_v41 = vld [vmem:[#allocation3 + $0x152] sm:$0xff] }
 0x894   :  { %24133 = vmatprep.mubr.msk.f32.mxu1 %vm156_vm4, %v29761_v51  ;;  %v12493_v51 = vld [vmem:[#allocation3 + $0x15a] sm:$0xff] }
 0x897   :  { %24134 = vmatmul.mubr.msk.f32.gmra.mrb[112].mxu1 %vm156_vm4, %v29765_v48  ;;  %v12494_v48 = vld [vmem:[#allocation3 + $0x16a] sm:$0xff] }
 0x898   :  { %24136 = vmatprep.mubr.msk.f32.mxu1 %vm156_vm4, %v33198_v13  ;;  %v12516_v13 = vld [vmem:[#allocation3 + $0x2a2] sm:$0xff] }
 0x89b   :  { %24137 = vmatmul.mubr.msk.f32.gmra.mrb[114].mxu1 %vm156_vm4, %v33199_v45  ;;  %v12517_v45 = vld [vmem:[#allocation3 + $0x2aa] sm:$0xff] }
 0x89c   :  { %24139 = vmatprep.mubr.msk.f32.mxu1 %vm156_vm4, %v33200_v20  ;;  %v12518_v20 = vld [vmem:[#allocation3 + $0x2ba] sm:$0xff] }
 0x89f   :  { %24140 = vmatmul.mubr.msk.f32.gmra.mrb[116].mxu1 %vm156_vm4, %v33201_v54  ;;  %v12519_v54 = vld [vmem:[#allocation3 + $0x2c2] sm:$0xff] }
 0x8a0   :  { %24142 = vmatprep.mubr.msk.f32.mxu1 %vm156_vm4, %v33202_v46  ;;  %v12520_v46 = vld [vmem:[#allocation3 + $0x2d2] sm:$0xff] }
 0x8a3   :  { %24143 = vmatmul.mubr.msk.f32.gmra.mrb[118].mxu1 %vm156_vm4, %v33203_v3  ;;  %v12521_v3 = vld [vmem:[#allocation3 + $0x2da] sm:$0xff] }
 0x8a4   :  { %24145 = vmatprep.mubr.msk.f32.mxu1 %vm156_vm4, %v33204_v21  ;;  %v12522_v21 = vld [vmem:[#allocation3 + $0x2ea] sm:$0xff] }
 0x8a7   :  { %24146 = vmatmul.mubr.msk.f32.gmra.mrb[120].mxu1 %vm156_vm4, %v33205_v14  ;;  %v12523_v14 = vld [vmem:[#allocation3 + $0x2f2] sm:$0xff] }
 0x8a8   :  { %24148 = vmatprep.mubr.msk.f32.mxu1 %vm156_vm4, %v33206_v29  ;;  %v12524_v29 = vld [vmem:[#allocation3 + $0x302] sm:$0xff] }
 0x8ab   :  { %24149 = vmatmul.mubr.msk.f32.gmra.mrb[122].mxu1 %vm156_vm4, %v33207_v53  ;;  %v12525_v53 = vld [vmem:[#allocation3 + $0x30a] sm:$0xff] }
 0x8ac   :  { %24151 = vmatprep.mubr.msk.f32.mxu1 %vm156_vm4, %v33208_v56  ;;  %v12526_v56 = vld [vmem:[#allocation3 + $0x31a] sm:$0xff] }
 0x8af   :  { %24152 = vmatmul.mubr.msk.f32.gmra.mrb[124].mxu1 %vm156_vm4, %v33209_v15  ;;  %v33211_v15 = vld [vmem:[#allocation31_spill] sm:$0xff] }
 0x8b0   :  { %24154 = vmatprep.mubr.msk.f32.mxu1 %vm156_vm4, %v11816_v0  ;;  %v12527_v0 = vld [vmem:[#allocation3 + $0x322] sm:$0xff] }
 0x8b3   :  { %24155 = vmatmul.mubr.msk.f32.gmra.mrb[126].mxu1 %vm156_vm4, %v11817_v10  ;;  %v15398_v10 = vld [vmem:[#allocation5 + $0x50] sm:$0xff] }
 0x8b4   :  { %24173 = vmatprep.mubr.msk.f32.mxu1 %vm156_vm4, %v12468_v49  ;;  %v15399_v49 = vld [vmem:[#allocation5 + $0x58] sm:$0xff] }
 0x8b5   :  { %v24777_v37 = vpack.c.bf16 %v15399_v49, %v15398_v10 }
 0x8b7   :  { %24174 = vmatmul.mubr.msk.f32.vlgmr.msra.gmra.mrb[64].mxu1 %vm156_vm4, %v12469_v19  ;;  %24778 = vmatprep.subr.bf16.mxu0 %v24777_v37  ;;  %v12531_v19 = vld [vmem:[#allocation3 + $0x352] sm:$0xff] }
 0x8b8   :  { %24176 = vmatprep.mubr.msk.f32.mxu1 %vm156_vm4, %v12470_v23  ;;  %24780 = vmatpush3.bf16.msra.mxu0 %v24777_v37  ;;  %v15400_v23 = vld [vmem:[#allocation5 + $0x60] sm:$0xff] }
 0x8bb   :  { %24177 = vmatmul.mubr.msk.f32.gmra.mrb[66].mxu1 %vm156_vm4, %v12471_v2  ;;  %v15401_v2 = vld [vmem:[#allocation5 + $0x68] sm:$0xff] }
 0x8bc   :  { %24179 = vmatprep.mubr.msk.f32.mxu1 %vm156_vm4, %v12472_v32  ;;  %v24781_v32 = vpack.c.bf16 %v15401_v2, %v15400_v23 }
 0x8be   :  { %24782 = vmatprep.subr.bf16.mxu0 %v24781_v32 }
 0x8bf   :  { %24180 = vmatmul.mubr.msk.f32.gmra.mrb[68].mxu1 %vm156_vm4, %v12473_v57  ;;  %24784 = vmatpush3.bf16.msra.mxu0 %v24781_v32  ;;  %v15402_v57 = vld [vmem:[#allocation5 + $0x70] sm:$0xff] }
 0x8c0   :  { %24182 = vmatprep.mubr.msk.f32.mxu1 %vm156_vm4, %v12474_v52  ;;  %v15403_v52 = vld [vmem:[#allocation5 + $0x78] sm:$0xff] }
 0x8c3   :  { %24183 = vmatmul.mubr.msk.f32.gmra.mrb[70].mxu1 %vm156_vm4, %v12475_v39  ;;  %v24785_v39 = vpack.c.bf16 %v15403_v52, %v15402_v57 }
 0x8c4   :  { %24185 = vmatprep.mubr.msk.f32.mxu1 %vm156_vm4, %v12476_v36  ;;  %v15379_v36 = vld [vmem:[#allocation4 + $0x1] sm:$0xff] }
 0x8c5   :  { %24786 = vmatprep.subr.bf16.mxu0 %v24785_v39  ;;  %24285 = vmatprep.mubr.msk.f32.mxu0 %vm156_vm4, %v15379_v36 }
 0x8c6   :  { %24788 = vmatpush3.bf16.msra.mxu0 %v24785_v39 }
 0x8c7   :  { %24186 = vmatmul.mubr.msk.f32.gmra.mrb[72].mxu1 %vm156_vm4, %v12477_v47  ;;  %v26204_v47 = vmov 1983009808  }
 0x8c8   :  { %24188 = vmatprep.mubr.msk.f32.mxu1 %vm156_vm4, %v12478_v55  ;;  %v13380_v55 = vunpack.c.l.s4 %v26204_v47 }
 0x8cb   :  { %24189 = vmatmul.mubr.msk.f32.gmra.mrb[74].mxu1 %vm156_vm4, %v12479_v24  ;;  %v13382_v24 = vlaneseq }
 0x8cc   :  { %24191 = vmatprep.mubr.msk.f32.mxu1 %vm156_vm4, %v12480_v58  ;;  %v30292_v58 = vld [vmem:[%s32710_s4 + $0x1] ss:$0 sm:$0xff] }
 0x8cf   :  { %24192 = vmatmul.mubr.msk.f32.gmra.mrb[76].mxu1 %vm156_vm4, %v12481_v5 }
 0x8d0   :  { %24194 = vmatprep.mubr.msk.f32.mxu1 %vm156_vm4, %v12482_v61 }
 0x8d3   :  { %24195 = vmatmul.mubr.msk.f32.gmra.mrb[78].mxu1 %vm156_vm4, %v12483_v11 }
 0x8d4   :  { %24197 = vmatprep.mubr.msk.f32.mxu1 %vm156_vm4, %v12484_v4  ;;  %v13381_v4 = vunpack.c.0.s8 %v13380_v55 }
 0x8d7   :  { %24198 = vmatmul.mubr.msk.f32.gmra.mrb[80].mxu1 %vm156_vm4, %v12485_v25  ;;  %v30296_v25 = vshrl.u32 %v13382_v24, 7 }
 0x8d8   :  { %24200 = vmatprep.mubr.msk.f32.mxu1 %vm156_vm4, %v12486_v12 }
 0x8d9   :  { %33213 = vst [vmem:[#allocation33_spill] sm:$0xff] %v30296_v25 }
 0x8db   :  { %24201 = vmatmul.mubr.msk.f32.gmra.mrb[82].mxu1 %vm156_vm4, %v12487_v27 }
 0x8dc   :  { %24203 = vmatprep.mubr.msk.f32.mxu1 %vm156_vm4, %v12488_v9 }
 0x8df   :  { %24204 = vmatmul.mubr.msk.f32.gmra.mrb[84].mxu1 %vm156_vm4, %v12489_v35 }
 0x8e0   :  { %24206 = vmatprep.mubr.msk.f32.mxu1 %vm156_vm4, %v12490_v6 }
 0x8e3   :  { %24207 = vmatmul.mubr.msk.f32.gmra.mrb[86].mxu1 %vm156_vm4, %v12491_v38 }
 0x8e4   :  { %24209 = vmatprep.mubr.msk.f32.mxu1 %vm156_vm4, %v12492_v41 }
 0x8e7   :  { %24210 = vmatmul.mubr.msk.f32.gmra.mrb[88].mxu1 %vm156_vm4, %v12493_v51  ;;  %v30302_v51 = vsub.s32 %v13381_v4, %v30296_v25 }
 0x8e8   :  { %24212 = vmatprep.mubr.msk.f32.mxu1 %vm156_vm4, %v12494_v48 }
 0x8e9   :  { %33214 = vst [vmem:[#allocation34_spill] sm:$0xff] %v30302_v51 }
 0x8eb   :  { %24213 = vmatmul.mubr.msk.f32.gmra.mrb[90].mxu1 %vm156_vm4, %v12495_v40 }
 0x8ec   :  { %24215 = vmatprep.mubr.msk.f32.mxu1 %vm156_vm4, %v29905_v8  ;;  %v12504_v8 = vld [vmem:[#allocation3 + $0x212] sm:$0xff] }
 0x8ef   :  { %24216 = vmatmul.mubr.msk.f32.gmra.mrb[92].mxu1 %vm156_vm4, %v33210_v42 }
 0x8f0   :  { %24218 = vmatprep.mubr.msk.f32.mxu1 %vm156_vm4, %v12498_v62 }
 0x8f3   :  { %24219 = vmatmul.mubr.msk.f32.gmra.mrb[94].mxu1 %vm156_vm4, %v12499_v33 }
 0x8f4   :  { %24221 = vmatprep.mubr.msk.f32.mxu1 %vm156_vm4, %v12500_v59 }
 0x8f7   :  { %24222 = vmatmul.mubr.msk.f32.gmra.mrb[96].mxu1 %vm156_vm4, %v12501_v30 }
 0x8f8   :  { %24224 = vmatprep.mubr.msk.f32.mxu1 %vm156_vm4, %v12502_v43 }
 0x8fb   :  { %24225 = vmatmul.mubr.msk.f32.gmra.mrb[98].mxu1 %vm156_vm4, %v12503_v63  ;;  %v30306_v63 = vsub.s32 0, %v30296_v25 }
 0x8fc   :  { %24227 = vmatprep.mubr.msk.f32.mxu1 %vm156_vm4, %v12504_v8 }
 0x8fd   :  { %33215 = vst [vmem:[#allocation35_spill] sm:$0xff] %v30306_v63 }
 0x8ff   :  { %24228 = vmatmul.mubr.msk.f32.gmra.mrb[100].mxu1 %vm156_vm4, %v12505_v7 }
 0x900   :  { %24230 = vmatprep.mubr.msk.f32.mxu1 %vm156_vm4, %v12506_v44 }
 0x903   :  { %24231 = vmatmul.mubr.msk.f32.gmra.mrb[102].mxu1 %vm156_vm4, %v12507_v31 }
 0x904   :  { %24233 = vmatprep.mubr.msk.f32.mxu1 %vm156_vm4, %v12508_v26 }
 0x907   :  { %24234 = vmatmul.mubr.msk.f32.gmra.mrb[104].mxu1 %vm156_vm4, %v12509_v50 }
 0x908   :  { %24236 = vmatprep.mubr.msk.f32.mxu1 %vm156_vm4, %v12510_v1 }
 0x90b   :  { %24237 = vmatmul.mubr.msk.f32.gmra.mrb[106].mxu1 %vm156_vm4, %v12511_v17 }
 0x90c   :  { %24239 = vmatprep.mubr.msk.f32.mxu1 %vm156_vm4, %v12512_v28 }
 0x90f   :  { %24240 = vmatmul.mubr.msk.f32.gmra.mrb[108].mxu1 %vm156_vm4, %v12513_v60 }
 0x910   :  { %24242 = vmatprep.mubr.msk.f32.mxu1 %vm156_vm4, %v12514_v18 }
 0x913   :  { %24243 = vmatmul.mubr.msk.f32.gmra.mrb[110].mxu1 %vm156_vm4, %v12515_v34 }
 0x914   :  { %24245 = vmatprep.mubr.msk.f32.mxu1 %vm156_vm4, %v12516_v13 }
 0x917   :  { %24246 = vmatmul.mubr.msk.f32.gmra.mrb[112].mxu1 %vm156_vm4, %v12517_v45 }
 0x918   :  { %24248 = vmatprep.mubr.msk.f32.mxu1 %vm156_vm4, %v12518_v20 }
 0x91b   :  { %24249 = vmatmul.mubr.msk.f32.gmra.mrb[114].mxu1 %vm156_vm4, %v12519_v54 }
 0x91c   :  { %24251 = vmatprep.mubr.msk.f32.mxu1 %vm156_vm4, %v12520_v46 }
 0x91f   :  { %24252 = vmatmul.mubr.msk.f32.gmra.mrb[116].mxu1 %vm156_vm4, %v12521_v3 }
 0x920   :  { %24254 = vmatprep.mubr.msk.f32.mxu1 %vm156_vm4, %v12522_v21 }
 0x923   :  { %24255 = vmatmul.mubr.msk.f32.gmra.mrb[118].mxu1 %vm156_vm4, %v12523_v14 }
 0x924   :  { %24257 = vmatprep.mubr.msk.f32.mxu1 %vm156_vm4, %v12524_v29 }
 0x927   :  { %24258 = vmatmul.mubr.msk.f32.gmra.mrb[120].mxu1 %vm156_vm4, %v12525_v53 }
 0x928   :  { %24260 = vmatprep.mubr.msk.f32.mxu1 %vm156_vm4, %v12526_v56 }
 0x92b   :  { %24261 = vmatmul.mubr.msk.f32.gmra.mrb[122].mxu1 %vm156_vm4, %v12527_v0 }
 0x92c   :  { %24263 = vmatprep.mubr.msk.f32.mxu1 %vm156_vm4, %v33211_v15 }
 0x92f   :  { %24264 = vmatmul.mubr.msk.f32.gmra.mrb[124].mxu1 %vm156_vm4, %v33212_v16 }
 0x930   :  { %24266 = vmatprep.mubr.msk.f32.mxu1 %vm156_vm4, %v12530_v22 }
 0x933   :  { %24267 = vmatmul.mubr.msk.f32.gmra.mrb[126].mxu1 %vm156_vm4, %v12531_v19 }
 0x98a   :  { %v24175_v5 = vpop.f32.mrb[64].mxu1 }
 0x98b   :  { %v12799_v61 = vpop.f32.mrb[65].mxu1  ;;  %v13187_v11 = vadd.f32 %v24175_v5, %v30292_v58 }
 0x98c   :  { %v13186_v12 = vadd.f32 %v30292_v58, %v12799_v61 }
 0x98d   :  { %v13251_v38 = vmax.f32 %v13187_v11, 0.0 }
 0x98e   :  { %v24178_v27 = vpop.f32.mrb[66].mxu1  ;;  %v13250_v48 = vmax.f32 %v13186_v12, 0.0 }
 0x98f   :  { %v13189_v9 = vadd.f32 %v24178_v27, %v30292_v58  ;;  %v12809_v35 = vpop.f32.mrb[67].mxu1 }
 0x990   :  { %v13188_v6 = vadd.f32 %v30292_v58, %v12809_v35 }
 0x991   :  { %v13253_v41 = vmax.f32 %v13189_v9, 0.0 }
 0x992   :  { %v13252_v40 = vmax.f32 %v13188_v6, 0.0  ;;  %v24181_v62 = vpop.f32.mrb[68].mxu1 }
 0x993   :  { %v13315_v42 = vmax.f32 %v13251_v38, %v13253_v41  ;;  %v12819_v33 = vpop.f32.mrb[69].mxu1  ;;  %v13191_v44 = vadd.f32 %v24181_v62, %v30292_v58 }
 0x994   :  { %v13314_v59 = vmax.f32 %v13250_v48, %v13252_v40  ;;  %v13190_v31 = vadd.f32 %v30292_v58, %v12819_v33 }
 0x995   :  { %v13395_v30 = vcombine.high %v13315_v42, %v13315_v42  ;;  %v13402_v43 = vrot.slane %v13315_v42, %v30302_v51  ;;  %v13255_v49 = vmax.f32 %v13191_v44, 0.0 }
 0x996   :  { %v13378_v8 = vcombine.high %v13314_v59, %v13314_v59  ;;  %v13385_v7 = vrot.slane %v13314_v59, %v30302_v51  ;;  %v24184_v26 = vpop.f32.mrb[70].mxu1  ;;  %v13254_v23 = vmax.f32 %v13190_v31, 0.0 }
 0x997   :  { %v13409_v50 = vrot.slane %v13395_v30, %v30302_v51  ;;  %v13410_v1 = vcombine.high %v13402_v43, %v13402_v43  ;;  %v20661_v17 = vrot.slane %v13402_v43, 9  ;;  %v13193_v28 = vadd.f32 %v24184_v26, %v30292_v58  ;;  %v12829_v60 = vpop.f32.mrb[71].mxu1 }
 0x998   :  { %v13392_v18 = vrot.slane %v13378_v8, %v30302_v51  ;;  %v13393_v34 = vcombine.high %v13385_v7, %v13385_v7  ;;  %v20657_v13 = vrot.slane %v13385_v7, 9  ;;  %v13192_v45 = vadd.f32 %v30292_v58, %v12829_v60 }
 0x999   :  { %v13411_v20 = vcombine.high %v13409_v50, %v13409_v50  ;;  %v20662_v54 = vrot.slane %v13410_v1, 9  ;;  %v20663_v46 = vrot.slane %v13409_v50, 9  ;;  %v14438_v3 = vmax.f32 %v13402_v43, %v20661_v17 }
 0x99a   :  { %v13394_v21 = vcombine.high %v13392_v18, %v13392_v18  ;;  %v20658_v14 = vrot.slane %v13393_v34, 9  ;;  %v20659_v29 = vrot.slane %v13392_v18, 9  ;;  %v14434_v53 = vmax.f32 %v13385_v7, %v20657_v13  ;;  %v24187_v56 = vpop.f32.mrb[72].mxu1 }
 0x99b   :  { %v20664_v0 = vrot.slane %v13411_v20, 9  ;;  %v14439_v15 = vmax.f32 %v13410_v1, %v20662_v54  ;;  %v14440_v10 = vmax.f32 %v13409_v50, %v20663_v46  ;;  %v12839_v22 = vpop.f32.mrb[73].mxu1  ;;  %v14709_v32 = vrot.slane %v14438_v3, %v30306_v63 }
 0x99c   :  { %v20660_v37 = vrot.slane %v13394_v21, 9  ;;  %v14435_v16 = vmax.f32 %v13393_v34, %v20658_v14  ;;  %v14436_v19 = vmax.f32 %v13392_v18, %v20659_v29  ;;  %v14693_v57 = vrot.slane %v14434_v53, %v30306_v63 }
 0x99d   :  { %v14441_v2 = vmax.f32 %v13411_v20, %v20664_v0  ;;  %v13257_v52 = vmax.f32 %v13193_v28, 0.0  ;;  %v13256_v55 = vmax.f32 %v13192_v45, 0.0  ;;  %v14713_v61 = vrot.slane %v14439_v15, %v30306_v63 }
 0x99e   :  { %v14437_v39 = vmax.f32 %v13394_v21, %v20660_v37  ;;  %v14697_v36 = vrot.slane %v14435_v16, %v30306_v63  ;;  %v14701_v47 = vrot.slane %v14436_v19, %v30306_v63  ;;  %v24190_v5 = vpop.f32.mrb[74].mxu1  ;;  %v14717_v11 = vrot.slane %v14440_v10, %v30306_v63 }
 0x99f   :  { %v14721_v4 = vrot.slane %v14441_v2, %v30306_v63  ;;  %v13317_v12 = vmax.f32 %v13255_v49, %v13257_v52  ;;  %v12849_v27 = vpop.f32.mrb[75].mxu1  ;;  %v13316_v6 = vmax.f32 %v13254_v23, %v13256_v55  ;;  %v13195_v38 = vadd.f32 %v24187_v56, %v30292_v58 }
 0x9a0   :  { %v14705_v9 = vrot.slane %v14437_v39, %v30306_v63  ;;  %v15203_v35 = vsel %vm15202_vm7, %v14697_v36, %v14693_v57  ;;  %v30328_v62 = vadd.f32 %v30292_v58, %v12839_v22  ;;  %v13197_v30 = vadd.f32 %v24190_v5, %v30292_v58 }
 0x9a1   :  { %v15205_v41 = vsel %vm15204_vm8, %v14701_v47, %v15203_v35  ;;  %v13429_v48 = vcombine.high %v13317_v12, %v13317_v12  ;;  %v13436_v40 = vrot.slane %v13317_v12, %v30302_v51  ;;  %v13412_v33 = vcombine.high %v13316_v6, %v13316_v6 }
 0x9a2   :  { %v15207_v42 = vsel %vm15206_vm9, %v14705_v9, %v15205_v41  ;;  %v13419_v59 = vrot.slane %v13316_v6, %v30302_v51  ;;  %v24193_v43 = vpop.f32.mrb[76].mxu1  ;;  %v13259_v53 = vmax.f32 %v13195_v38, 0.0  ;;  %v13258_v19 = vmax.f32 %v30328_v62, 0.0 }
 0x9a3   :  { %v15209_v8 = vsel %vm15208_vm10, %v14709_v32, %v15207_v42  ;;  %v13443_v7 = vrot.slane %v13429_v48, %v30302_v51  ;;  %v13444_v44 = vcombine.high %v13436_v40, %v13436_v40  ;;  %v20669_v31 = vrot.slane %v13436_v40, 9  ;;  %v12859_v26 = vpop.f32.mrb[77].mxu1 }
 0x9a4   :  { %v15211_v50 = vsel %vm15210_vm11, %v14713_v61, %v15209_v8  ;;  %v13426_v1 = vrot.slane %v13412_v33, %v30302_v51  ;;  %v13427_v17 = vcombine.high %v13419_v59, %v13419_v59  ;;  %v20665_v28 = vrot.slane %v13419_v59, 9 }
 0x9a5   :  { %v15213_v60 = vsel %vm15212_vm12, %v14717_v11, %v15211_v50  ;;  %v13445_v18 = vcombine.high %v13443_v7, %v13443_v7  ;;  %v20670_v34 = vrot.slane %v13444_v44, 9  ;;  %v20671_v13 = vrot.slane %v13443_v7, 9 }
 0x9a6   :  { %v15215_v45 = vsel %vm15214_vm13, %v14721_v4, %v15213_v60  ;;  %v14446_v20 = vmax.f32 %v13436_v40, %v20669_v31  ;;  %v13428_v54 = vcombine.high %v13426_v1, %v13426_v1  ;;  %v20666_v46 = vrot.slane %v13427_v17, 9  ;;  %v24196_v3 = vpop.f32.mrb[78].mxu1 }
 0x9a7   :  { %15338 = vst.msk [vmem:[#allocation4 + $0x11] sm:$0xff] %vm156_vm4, %v15215_v45  ;;  %v20672_v21 = vrot.slane %v13445_v18, 9  ;;  %v14447_v14 = vmax.f32 %v13444_v44, %v20670_v34  ;;  %v20667_v29 = vrot.slane %v13426_v1, 9  ;;  %v12869_v56 = vpop.f32.mrb[79].mxu1  ;;  %v14448_v0 = vmax.f32 %v13443_v7, %v20671_v13 }
 0x9a8   :  { %v20668_v15 = vrot.slane %v13428_v54, 9  ;;  %v14442_v10 = vmax.f32 %v13419_v59, %v20665_v28  ;;  %v14443_v49 = vmax.f32 %v13427_v17, %v20666_v46  ;;  %v14741_v37 = vrot.slane %v14446_v20, %v30306_v63 }
 0x9a9   :  { %v14449_v22 = vmax.f32 %v13445_v18, %v20672_v21  ;;  %v14444_v16 = vmax.f32 %v13426_v1, %v20667_v29  ;;  %v13261_v57 = vmax.f32 %v13197_v30, 0.0  ;;  %v14745_v39 = vrot.slane %v14447_v14, %v30306_v63 }
 0x9aa   :  { %v14445_v23 = vmax.f32 %v13428_v54, %v20668_v15  ;;  %v14725_v2 = vrot.slane %v14442_v10, %v30306_v63  ;;  %v14729_v32 = vrot.slane %v14443_v49, %v30306_v63  ;;  %v30344_v52 = vpop.f32.mrb[80].mxu1  ;;  %v13196_v47 = vadd.f32 %v30292_v58, %v12849_v27 }
 0x9ab   :  { %v14733_v36 = vrot.slane %v14444_v16, %v30306_v63  ;;  %v13199_v55 = vadd.f32 %v24193_v43, %v30292_v58  ;;  %v30350_v5 = vpop.f32.mrb[81].mxu1  ;;  %v14749_v61 = vrot.slane %v14448_v0, %v30306_v63  ;;  %v13319_v12 = vmax.f32 %v13259_v53, %v13261_v57 }
 0x9ac   :  { %v14737_v11 = vrot.slane %v14445_v23, %v30306_v63  ;;  %v15216_v4 = vsel %vm15202_vm7, %v14729_v32, %v14725_v2  ;;  %v14753_v9 = vrot.slane %v14449_v22, %v30306_v63  ;;  %v13260_v6 = vmax.f32 %v13196_v47, 0.0 }
 0x9ad   :  { %v15217_v35 = vsel %vm15204_vm8, %v14733_v36, %v15216_v4  ;;  %v13201_v38 = vadd.f32 %v24196_v3, %v30292_v58  ;;  %v13463_v41 = vcombine.high %v13319_v12, %v13319_v12  ;;  %v13470_v48 = vrot.slane %v13319_v12, %v30302_v51 }
 0x9ae   :  { %v15218_v27 = vsel %vm15206_vm9, %v14737_v11, %v15217_v35  ;;  %v13198_v40 = vadd.f32 %v30292_v58, %v12859_v26  ;;  %v30361_v62 = vpop.f32.mrb[82].mxu1  ;;  %v15380_v42 = vld [vmem:[#allocation4 + $0x11] sm:$0xff]  ;;  %v13318_v59 = vmax.f32 %v13258_v19, %v13260_v6  ;;  %v13263_v30 = vmax.f32 %v13199_v55, 0.0 }
 0x9af   :  { %v15219_v33 = vsel %vm15208_vm10, %v14741_v37, %v15218_v27  ;;  %v13265_v43 = vmax.f32 %v13201_v38, 0.0  ;;  %v30364_v8 = vpop.f32.mrb[83].mxu1  ;;  %24286 = vmatmul.mubr.msk.f32.vlgmr.msra.gmra.mrb[64].mxu0 %vm156_vm4, %v15380_v42  ;;  %v13477_v44 = vrot.slane %v13463_v41, %v30302_v51  ;;  %v13478_v31 = vcombine.high %v13470_v48, %v13470_v48 }
 0x9b0   :  { %v15220_v7 = vsel %vm15210_vm11, %v14745_v39, %v15219_v33  ;;  %v20677_v50 = vrot.slane %v13470_v48, 9  ;;  %v13446_v1 = vcombine.high %v13318_v59, %v13318_v59  ;;  %v13453_v17 = vrot.slane %v13318_v59, %v30302_v51 }
 0x9b1   :  { %v15221_v26 = vsel %vm15212_vm12, %v14749_v61, %v15220_v7  ;;  %v13321_v28 = vmax.f32 %v13263_v30, %v13265_v43  ;;  %v13479_v18 = vcombine.high %v13477_v44, %v13477_v44  ;;  %v20678_v34 = vrot.slane %v13478_v31, 9 }
 0x9b2   :  { %v15222_v60 = vsel %vm15214_vm13, %v14753_v9, %v15221_v26  ;;  %v20679_v13 = vrot.slane %v13477_v44, 9  ;;  %v30372_v45 = vpop.f32.mrb[84].mxu1  ;;  %v14454_v20 = vmax.f32 %v13470_v48, %v20677_v50  ;;  %v13460_v54 = vrot.slane %v13446_v1, %v30302_v51 }
 0x9b3   :  { %15339 = vst.msk [vmem:[#allocation4 + $0x21] sm:$0xff] %vm156_vm4, %v15222_v60  ;;  %v13461_v46 = vcombine.high %v13453_v17, %v13453_v17  ;;  %v20673_v3 = vrot.slane %v13453_v17, 9  ;;  %v30376_v21 = vpop.f32.mrb[85].mxu1  ;;  %v20680_v14 = vrot.slane %v13479_v18, 9  ;;  %v14455_v29 = vmax.f32 %v13478_v31, %v20678_v34 }
 0x9b4   :  { %v13497_v53 = vcombine.high %v13321_v28, %v13321_v28  ;;  %v13200_v0 = vadd.f32 %v30292_v58, %v12869_v56  ;;  %v13462_v15 = vcombine.high %v13460_v54, %v13460_v54  ;;  %v20675_v49 = vrot.slane %v13460_v54, 9 }
 0x9b5   :  { %v20674_v10 = vrot.slane %v13461_v46, 9  ;;  %v13262_v22 = vmax.f32 %v13198_v40, 0.0  ;;  %v14456_v37 = vmax.f32 %v13477_v44, %v20679_v13  ;;  %v14457_v16 = vmax.f32 %v13479_v18, %v20680_v14 }
 0x9b6   :  { %v14773_v19 = vrot.slane %v14454_v20, %v30306_v63  ;;  %v14450_v23 = vmax.f32 %v13453_v17, %v20673_v3  ;;  %v30380_v2 = vpop.f32.mrb[86].mxu1  ;;  %v20676_v32 = vrot.slane %v13462_v15, 9  ;;  %v14452_v39 = vmax.f32 %v13460_v54, %v20675_v49 }
 0x9b7   :  { %v14451_v57 = vmax.f32 %v13461_v46, %v20674_v10  ;;  %v13504_v36 = vrot.slane %v13321_v28, %v30302_v51  ;;  %v30383_v47 = vpop.f32.mrb[87].mxu1  ;;  %v14777_v56 = vrot.slane %v14455_v29, %v30306_v63  ;;  %v13511_v61 = vrot.slane %v13497_v53, %v30302_v51 }
 0x9b8   :  { %v14757_v55 = vrot.slane %v14450_v23, %v30306_v63  ;;  %v13264_v11 = vmax.f32 %v13200_v0, 0.0  ;;  %v14453_v4 = vmax.f32 %v13462_v15, %v20676_v32  ;;  %v14765_v9 = vrot.slane %v14452_v39, %v30306_v63 }
 0x9b9   :  { %v14761_v12 = vrot.slane %v14451_v57, %v30306_v63  ;;  %v13512_v35 = vcombine.high %v13504_v36, %v13504_v36  ;;  %v13513_v6 = vcombine.high %v13511_v61, %v13511_v61  ;;  %v20685_v38 = vrot.slane %v13504_v36, 9 }
 0x9ba   :  { %v20687_v27 = vrot.slane %v13511_v61, 9  ;;  %v13320_v41 = vmax.f32 %v13262_v22, %v13264_v11  ;;  %v15381_v48 = vld [vmem:[#allocation4 + $0x21] sm:$0xff]  ;;  %v30390_v40 = vpop.f32.mrb[88].mxu1  ;;  %v14781_v42 = vrot.slane %v14456_v37, %v30306_v63  ;;  %v14769_v33 = vrot.slane %v14453_v4, %v30306_v63 }
 0x9bb   :  { %v15223_v59 = vsel %vm15202_vm7, %v14761_v12, %v14757_v55  ;;  %v20686_v30 = vrot.slane %v13512_v35, 9  ;;  %24288 = vmatprep.mubr.msk.f32.mxu0 %vm156_vm4, %v15381_v48  ;;  %v30396_v43 = vpop.f32.mrb[89].mxu1  ;;  %v20688_v44 = vrot.slane %v13513_v6, 9  ;;  %v30399_v31 = vmax.f32 %v13504_v36, %v20685_v38 }
 0x9bc   :  { %v15224_v7 = vsel %vm15204_vm8, %v14765_v9, %v15223_v59  ;;  %v30401_v50 = vmax.f32 %v13511_v61, %v20687_v27  ;;  %v13480_v17 = vcombine.high %v13320_v41, %v13320_v41  ;;  %v13487_v28 = vrot.slane %v13320_v41, %v30302_v51 }
 0x9bd   :  { %v15225_v26 = vsel %vm15206_vm9, %v14769_v33, %v15224_v7  ;;  %v30404_v1 = vmax.f32 %v13512_v35, %v20686_v30  ;;  %v14785_v60 = vrot.slane %v14457_v16, %v30306_v63  ;;  %v30409_v34 = vmax.f32 %v13513_v6, %v20688_v44 }
 0x9be   :  { %v15226_v18 = vsel %vm15208_vm10, %v14773_v19, %v15225_v26  ;;  %v13203_v13 = vadd.f32 %v30344_v52, %v30292_v58  ;;  %v30413_v20 = vpop.f32.mrb[90].mxu1  ;;  %v14805_v46 = vrot.slane %v30399_v31, %v30306_v63  ;;  %v13494_v3 = vrot.slane %v13480_v17, %v30302_v51 }
 0x9bf   :  { %v15227_v54 = vsel %vm15210_vm11, %v14777_v56, %v15226_v18  ;;  %v13495_v14 = vcombine.high %v13487_v28, %v13487_v28  ;;  %v30419_v29 = vpop.f32.mrb[91].mxu1  ;;  %v14809_v0 = vrot.slane %v30404_v1, %v30306_v63  ;;  %v14813_v52 = vrot.slane %v30401_v50, %v30306_v63 }
 0x9c0   :  { %v15228_v53 = vsel %vm15212_vm12, %v14781_v42, %v15227_v54  ;;  %v20681_v15 = vrot.slane %v13487_v28, 9  ;;  %v13496_v49 = vcombine.high %v13494_v3, %v13494_v3  ;;  %v20683_v37 = vrot.slane %v13494_v3, 9 }
 0x9c1   :  { %v15229_v10 = vsel %vm15214_vm13, %v14785_v60, %v15228_v53  ;;  %v20682_v22 = vrot.slane %v13495_v14, 9  ;;  %v13202_v19 = vadd.f32 %v30292_v58, %v30350_v5  ;;  %v13205_v23 = vadd.f32 %v30361_v62, %v30292_v58 }
 0x9c2   :  { %15340 = vst.msk [vmem:[#allocation4 + $0x31] sm:$0xff] %vm156_vm4, %v15229_v10  ;;  %v14458_v16 = vmax.f32 %v13487_v28, %v20681_v15  ;;  %v13204_v32 = vadd.f32 %v30292_v58, %v30364_v8  ;;  %v30434_v57 = vpop.f32.mrb[92].mxu1  ;;  %v20684_v39 = vrot.slane %v13496_v49, 9  ;;  %v14460_v56 = vmax.f32 %v13494_v3, %v20683_v37 }
 0x9c3   :  { %v14459_v36 = vmax.f32 %v13495_v14, %v20682_v22  ;;  %v30438_v55 = vadd.f32 %v30372_v45, %v30292_v58  ;;  %v30440_v61 = vpop.f32.mrb[93].mxu1  ;;  %v13267_v11 = vmax.f32 %v13203_v13, 0.0  ;;  %v13266_v4 = vmax.f32 %v13202_v19, 0.0 }
 0x9c4   :  { %v13269_v5 = vmax.f32 %v13205_v23, 0.0  ;;  %v13268_v12 = vmax.f32 %v13204_v32, 0.0  ;;  %v14461_v9 = vmax.f32 %v13496_v49, %v20684_v39  ;;  %v14789_v62 = vrot.slane %v14458_v16, %v30306_v63 }
 0x9c5   :  { %v14793_v8 = vrot.slane %v14459_v36, %v30306_v63  ;;  %v14797_v35 = vrot.slane %v14460_v56, %v30306_v63  ;;  %v14817_v6 = vrot.slane %v30409_v34, %v30306_v63  ;;  %v13209_v45 = vadd.f32 %v30380_v2, %v30292_v58 }
 0x9c6   :  { %v13323_v38 = vmax.f32 %v13267_v11, %v13269_v5  ;;  %v13322_v27 = vmax.f32 %v13266_v4, %v13268_v12  ;;  %v30449_v41 = vpop.f32.mrb[94].mxu1  ;;  %v14801_v48 = vrot.slane %v14461_v9, %v30306_v63  ;;  %v13271_v33 = vmax.f32 %v30438_v55, 0.0 }
 0x9c7   :  { %v15230_v42 = vsel %vm15202_vm7, %v14793_v8, %v14789_v62  ;;  %v13206_v59 = vadd.f32 %v30292_v58, %v30376_v21  ;;  %v30456_v30 = vpop.f32.mrb[95].mxu1  ;;  %v13273_v1 = vmax.f32 %v13209_v45, 0.0  ;;  %v13208_v17 = vadd.f32 %v30292_v58, %v30383_v47 }
 0x9c8   :  { %v15231_v7 = vsel %vm15204_vm8, %v14797_v35, %v15230_v42  ;;  %v13531_v44 = vcombine.high %v13323_v38, %v13323_v38  ;;  %v13538_v31 = vrot.slane %v13323_v38, %v30302_v51  ;;  %v13514_v50 = vcombine.high %v13322_v27, %v13322_v27 }
 0x9c9   :  { %v15232_v2 = vsel %vm15206_vm9, %v14801_v48, %v15231_v7  ;;  %v13521_v26 = vrot.slane %v13322_v27, %v30302_v51  ;;  %v15382_v28 = vld [vmem:[#allocation4 + $0x31] sm:$0xff]  ;;  %v13270_v62 = vmax.f32 %v13206_v59, 0.0  ;;  %v13325_v38 = vmax.f32 %v13271_v33, %v13273_v1 }
 0x9ca   :  { %v15233_v60 = vsel %vm15208_vm10, %v14805_v46, %v15232_v2  ;;  %v13545_v21 = vrot.slane %v13531_v44, %v30302_v51  ;;  %v13546_v18 = vcombine.high %v13538_v31, %v13538_v31  ;;  %v20693_v34 = vrot.slane %v13538_v31, 9  ;;  %24289 = vmatmul.mubr.msk.f32.gmra.mrb[66].mxu0 %vm156_vm4, %v15382_v28  ;;  %v30467_v13 = vpop.f32.mrb[96].mxu1 }
 0x9cb   :  { %v15234_v54 = vsel %vm15210_vm11, %v14809_v0, %v15233_v60  ;;  %v13528_v3 = vrot.slane %v13514_v50, %v30302_v51  ;;  %v13529_v14 = vcombine.high %v13521_v26, %v13521_v26  ;;  %v20689_v53 = vrot.slane %v13521_v26, 9  ;;  %v30471_v15 = vpop.f32.mrb[97].mxu1 }
 0x9cc   :  { %v15235_v47 = vsel %vm15212_vm12, %v14813_v52, %v15234_v54  ;;  %v13547_v10 = vcombine.high %v13545_v21, %v13545_v21  ;;  %v20694_v46 = vrot.slane %v13546_v18, 9  ;;  %v20695_v49 = vrot.slane %v13545_v21, 9 }
 0x9cd   :  { %v15236_v22 = vsel %vm15214_vm13, %v14817_v6, %v15235_v47  ;;  %v14470_v37 = vmax.f32 %v13538_v31, %v20693_v34  ;;  %v13530_v16 = vcombine.high %v13528_v3, %v13528_v3  ;;  %v20690_v19 = vrot.slane %v13529_v14, 9 }
 0x9ce   :  { %15341 = vst.msk [vmem:[#allocation4 + $0x41] sm:$0xff] %vm156_vm4, %v15236_v22  ;;  %v20696_v23 = vrot.slane %v13547_v10, 9  ;;  %v14471_v0 = vmax.f32 %v13546_v18, %v20694_v46  ;;  %v14472_v32 = vmax.f32 %v13545_v21, %v20695_v49  ;;  %v20691_v39 = vrot.slane %v13528_v3, 9  ;;  %v30476_v36 = vpop.f32.mrb[98].mxu1 }
 0x9cf   :  { %v20692_v56 = vrot.slane %v13530_v16, 9  ;;  %v14466_v55 = vmax.f32 %v13521_v26, %v20689_v53  ;;  %v14467_v11 = vmax.f32 %v13529_v14, %v20690_v19  ;;  %v30480_v52 = vadd.f32 %v30390_v40, %v30292_v58  ;;  %v30482_v4 = vpop.f32.mrb[99].mxu1 }
 0x9d0   :  { %v14473_v5 = vmax.f32 %v13547_v10, %v20696_v23  ;;  %v14837_v12 = vrot.slane %v14470_v37, %v30306_v63  ;;  %v14468_v9 = vmax.f32 %v13528_v3, %v20691_v39  ;;  %v14841_v27 = vrot.slane %v14471_v0, %v30306_v63 }
 0x9d1   :  { %v14469_v8 = vmax.f32 %v13530_v16, %v20692_v56  ;;  %v14821_v35 = vrot.slane %v14466_v55, %v30306_v63  ;;  %v14825_v6 = vrot.slane %v14467_v11, %v30306_v63  ;;  %v14845_v45 = vrot.slane %v14472_v32, %v30306_v63 }
 0x9d2   :  { %v14829_v40 = vrot.slane %v14468_v9, %v30306_v63  ;;  %v13272_v48 = vmax.f32 %v13208_v17, 0.0  ;;  %v30490_v42 = vpop.f32.mrb[100].mxu1  ;;  %v13565_v59 = vcombine.high %v13325_v38, %v13325_v38  ;;  %v13572_v31 = vrot.slane %v13325_v38, %v30302_v51 }
 0x9d3   :  { %v14833_v7 = vrot.slane %v14469_v8, %v30306_v63  ;;  %v15237_v44 = vsel %vm15202_vm7, %v14825_v6, %v14821_v35  ;;  %v30495_v50 = vpop.f32.mrb[101].mxu1  ;;  %v14849_v33 = vrot.slane %v14473_v5, %v30306_v63  ;;  %v13210_v1 = vadd.f32 %v30292_v58, %v30396_v43 }
 0x9d4   :  { %v15238_v2 = vsel %vm15204_vm8, %v14829_v40, %v15237_v44  ;;  %v13324_v26 = vmax.f32 %v13270_v62, %v13272_v48  ;;  %v13579_v28 = vrot.slane %v13565_v59, %v30302_v51  ;;  %v13580_v60 = vcombine.high %v13572_v31, %v13572_v31 }
 0x9d5   :  { %v15239_v17 = vsel %vm15206_vm9, %v14833_v7, %v15238_v2  ;;  %v20701_v21 = vrot.slane %v13572_v31, 9  ;;  %v15383_v18 = vld [vmem:[#allocation4 + $0x41] sm:$0xff]  ;;  %v13213_v14 = vadd.f32 %v30413_v20, %v30292_v58  ;;  %v13275_v11 = vmax.f32 %v30480_v52, 0.0 }
 0x9d6   :  { %v15240_v34 = vsel %vm15208_vm10, %v14837_v12, %v15239_v17  ;;  %v13548_v54 = vcombine.high %v13324_v26, %v13324_v26  ;;  %v13555_v3 = vrot.slane %v13324_v26, %v30302_v51  ;;  %24291 = vmatprep.mubr.msk.f32.mxu0 %vm156_vm4, %v15383_v18  ;;  %v30508_v53 = vpop.f32.mrb[102].mxu1  ;;  %v13581_v47 = vcombine.high %v13579_v28, %v13579_v28 }
 0x9d7   :  { %v15241_v43 = vsel %vm15210_vm11, %v14841_v27, %v15240_v34  ;;  %v20702_v10 = vrot.slane %v13580_v60, 9  ;;  %v20703_v46 = vrot.slane %v13579_v28, 9  ;;  %v30511_v49 = vpop.f32.mrb[103].mxu1  ;;  %v14478_v37 = vmax.f32 %v13572_v31, %v20701_v21 }
 0x9d8   :  { %v15242_v22 = vsel %vm15212_vm12, %v14845_v45, %v15241_v43  ;;  %v13562_v16 = vrot.slane %v13548_v54, %v30302_v51  ;;  %v13563_v19 = vcombine.high %v13555_v3, %v13555_v3  ;;  %v20704_v20 = vrot.slane %v13581_v47, 9 }
 0x9d9   :  { %v15243_v23 = vsel %vm15214_vm13, %v14849_v33, %v15242_v22  ;;  %v14479_v0 = vmax.f32 %v13580_v60, %v20702_v10  ;;  %v14480_v32 = vmax.f32 %v13579_v28, %v20703_v46  ;;  %v20697_v56 = vrot.slane %v13555_v3, 9 }
 0x9da   :  { %15342 = vst.msk [vmem:[#allocation4 + $0x51] sm:$0xff] %vm156_vm4, %v15243_v23  ;;  %v13564_v39 = vcombine.high %v13562_v16, %v13562_v16  ;;  %v20698_v55 = vrot.slane %v13563_v19, 9  ;;  %v30518_v5 = vpop.f32.mrb[104].mxu1  ;;  %v14481_v12 = vmax.f32 %v13581_v47, %v20704_v20  ;;  %v14869_v9 = vrot.slane %v14478_v37, %v30306_v63 }
 0x9db   :  { %v20699_v62 = vrot.slane %v13562_v16, 9  ;;  %v13274_v8 = vmax.f32 %v13210_v1, 0.0  ;;  %v30521_v35 = vpop.f32.mrb[105].mxu1  ;;  %v14474_v38 = vmax.f32 %v13555_v3, %v20697_v56  ;;  %v13277_v45 = vmax.f32 %v13213_v14, 0.0 }
 0x9dc   :  { %v20700_v6 = vrot.slane %v13564_v39, 9  ;;  %v14475_v27 = vmax.f32 %v13563_v19, %v20698_v55  ;;  %v14873_v40 = vrot.slane %v14479_v0, %v30306_v63  ;;  %v14877_v48 = vrot.slane %v14480_v32, %v30306_v63 }
 0x9dd   :  { %v14476_v7 = vmax.f32 %v13562_v16, %v20699_v62  ;;  %v13212_v52 = vadd.f32 %v30292_v58, %v30419_v29  ;;  %v14853_v59 = vrot.slane %v14474_v38, %v30306_v63  ;;  %v13327_v33 = vmax.f32 %v13275_v11, %v13277_v45 }
 0x9de   :  { %v14477_v44 = vmax.f32 %v13564_v39, %v20700_v6  ;;  %v14857_v31 = vrot.slane %v14475_v27, %v30306_v63  ;;  %v30529_v2 = vpop.f32.mrb[106].mxu1  ;;  %v14881_v26 = vrot.slane %v14481_v12, %v30306_v63  ;;  %v13215_v28 = vadd.f32 %v30434_v57, %v30292_v58 }
 0x9df   :  { %v14861_v1 = vrot.slane %v14476_v7, %v30306_v63  ;;  %v13276_v17 = vmax.f32 %v13212_v52, 0.0  ;;  %v30535_v60 = vpop.f32.mrb[107].mxu1  ;;  %v13599_v18 = vcombine.high %v13327_v33, %v13327_v33  ;;  %v13606_v34 = vrot.slane %v13327_v33, %v30302_v51 }
 0x9e0   :  { %v14865_v29 = vrot.slane %v14477_v44, %v30306_v63  ;;  %v15244_v21 = vsel %vm15202_vm7, %v14857_v31, %v14853_v59  ;;  %v30543_v14 = vadd.f32 %v30292_v58, %v30440_v61  ;;  %v13217_v43 = vadd.f32 %v30449_v41, %v30292_v58 }
 0x9e1   :  { %v15245_v54 = vsel %vm15204_vm8, %v14861_v1, %v15244_v21  ;;  %v13326_v3 = vmax.f32 %v13274_v8, %v13276_v17  ;;  %v15384_v57 = vld [vmem:[#allocation4 + $0x51] sm:$0xff]  ;;  %v13613_v10 = vrot.slane %v13599_v18, %v30302_v51  ;;  %v13614_v46 = vcombine.high %v13606_v34, %v13606_v34 }
 0x9e2   :  { %v15246_v47 = vsel %vm15206_vm9, %v14865_v29, %v15245_v54  ;;  %v20709_v22 = vrot.slane %v13606_v34, 9  ;;  %24292 = vmatmul.mubr.msk.f32.gmra.mrb[68].mxu0 %vm156_vm4, %v15384_v57  ;;  %v30550_v37 = vpop.f32.mrb[108].mxu1  ;;  %v13281_v23 = vmax.f32 %v13217_v43, 0.0  ;;  %v13279_v7 = vmax.f32 %v13215_v28, 0.0 }
 0x9e3   :  { %v15247_v16 = vsel %vm15208_vm10, %v14869_v9, %v15246_v47  ;;  %v13582_v19 = vcombine.high %v13326_v3, %v13326_v3  ;;  %v13589_v61 = vrot.slane %v13326_v3, %v30302_v51  ;;  %v30554_v20 = vpop.f32.mrb[109].mxu1  ;;  %v13615_v0 = vcombine.high %v13613_v10, %v13613_v10 }
 0x9e4   :  { %v15248_v41 = vsel %vm15210_vm11, %v14873_v40, %v15247_v16  ;;  %v20710_v32 = vrot.slane %v13614_v46, 9  ;;  %v20711_v39 = vrot.slane %v13613_v10, 9  ;;  %v14486_v55 = vmax.f32 %v13606_v34, %v20709_v22 }
 0x9e5   :  { %v15249_v56 = vsel %vm15212_vm12, %v14877_v48, %v15248_v41  ;;  %v13596_v11 = vrot.slane %v13582_v19, %v30302_v51  ;;  %v13597_v12 = vcombine.high %v13589_v61, %v13589_v61  ;;  %v20712_v9 = vrot.slane %v13615_v0, 9 }
 0x9e6   :  { %v15250_v62 = vsel %vm15214_vm13, %v14881_v26, %v15249_v56  ;;  %v14487_v8 = vmax.f32 %v13614_v46, %v20710_v32  ;;  %v14488_v6 = vmax.f32 %v13613_v10, %v20711_v39  ;;  %v30560_v38 = vpop.f32.mrb[110].mxu1  ;;  %v20705_v45 = vrot.slane %v13589_v61, 9 }
 0x9e7   :  { %15343 = vst.msk [vmem:[#allocation4 + $0x61] sm:$0xff] %vm156_vm4, %v15250_v62  ;;  %v13598_v27 = vcombine.high %v13596_v11, %v13596_v11  ;;  %v20706_v40 = vrot.slane %v13597_v12, 9  ;;  %v30563_v52 = vpop.f32.mrb[111].mxu1  ;;  %v14489_v48 = vmax.f32 %v13615_v0, %v20712_v9  ;;  %v14901_v44 = vrot.slane %v14486_v55, %v30306_v63 }
 0x9e8   :  { %v20707_v59 = vrot.slane %v13596_v11, 9  ;;  %v13278_v31 = vmax.f32 %v30543_v14, 0.0  ;;  %v14482_v26 = vmax.f32 %v13589_v61, %v20705_v45  ;;  %v13329_v17 = vmax.f32 %v13279_v7, %v13281_v23 }
 0x9e9   :  { %v20708_v33 = vrot.slane %v13598_v27, 9  ;;  %v14483_v1 = vmax.f32 %v13597_v12, %v20706_v40  ;;  %v14905_v29 = vrot.slane %v14487_v8, %v30306_v63  ;;  %v14909_v21 = vrot.slane %v14488_v6, %v30306_v63 }
 0x9ea   :  { %v14484_v18 = vmax.f32 %v13596_v11, %v20707_v59  ;;  %v13216_v28 = vadd.f32 %v30292_v58, %v30456_v30  ;;  %v30571_v34 = vpop.f32.mrb[112].mxu1  ;;  %v14885_v3 = vrot.slane %v14482_v26, %v30306_v63  ;;  %v13633_v14 = vcombine.high %v13329_v17, %v13329_v17 }
 0x9eb   :  { %v14485_v54 = vmax.f32 %v13598_v27, %v20708_v33  ;;  %v14889_v43 = vrot.slane %v14483_v1, %v30306_v63  ;;  %v30575_v57 = vpop.f32.mrb[113].mxu1  ;;  %v13640_v10 = vrot.slane %v13329_v17, %v30302_v51  ;;  %v13219_v22 = vadd.f32 %v30467_v13, %v30292_v58 }
 0x9ec   :  { %v14893_v47 = vrot.slane %v14484_v18, %v30306_v63  ;;  %v13280_v46 = vmax.f32 %v13216_v28, 0.0  ;;  %v13647_v19 = vrot.slane %v13633_v14, %v30302_v51  ;;  %v13218_v61 = vadd.f32 %v30292_v58, %v30471_v15 }
 0x9ed   :  { %v14897_v30 = vrot.slane %v14485_v54, %v30306_v63  ;;  %v15251_v16 = vsel %vm15202_vm7, %v14889_v43, %v14885_v3  ;;  %v13648_v41 = vcombine.high %v13640_v10, %v13640_v10  ;;  %v20717_v0 = vrot.slane %v13640_v10, 9 }
 0x9ee   :  { %v15252_v23 = vsel %vm15204_vm8, %v14893_v47, %v15251_v16  ;;  %v13328_v32 = vmax.f32 %v13278_v31, %v13280_v46  ;;  %v15385_v39 = vld [vmem:[#allocation4 + $0x61] sm:$0xff]  ;;  %v30587_v56 = vpop.f32.mrb[114].mxu1  ;;  %v14913_v55 = vrot.slane %v14489_v48, %v30306_v63  ;;  %v13649_v11 = vcombine.high %v13647_v19, %v13647_v19 }
 0x9ef   :  { %v15253_v13 = vsel %vm15206_vm9, %v14897_v30, %v15252_v23  ;;  %v20719_v12 = vrot.slane %v13647_v19, 9  ;;  %24294 = vmatprep.mubr.msk.f32.mxu0 %vm156_vm4, %v15385_v39  ;;  %v30592_v62 = vpop.f32.mrb[115].mxu1  ;;  %v20718_v9 = vrot.slane %v13648_v41, 9  ;;  %v30595_v8 = vmax.f32 %v13640_v10, %v20717_v0 }
 0x9f0   :  { %v15254_v15 = vsel %vm15208_vm10, %v14901_v44, %v15253_v13  ;;  %v13616_v6 = vcombine.high %v13328_v32, %v13328_v32  ;;  %v20720_v45 = vrot.slane %v13649_v11, 9  ;;  %v13623_v7 = vrot.slane %v13328_v32, %v30302_v51 }
 0x9f1   :  { %v15255_v27 = vsel %vm15210_vm11, %v14905_v29, %v15254_v15  ;;  %v30598_v40 = vmax.f32 %v13647_v19, %v20719_v12  ;;  %v13283_v31 = vmax.f32 %v13219_v22, 0.0  ;;  %v13282_v33 = vmax.f32 %v13218_v61, 0.0 }
 0x9f2   :  { %v15256_v48 = vsel %vm15212_vm12, %v14909_v21, %v15255_v27  ;;  %v13630_v59 = vrot.slane %v13616_v6, %v30302_v51  ;;  %v30603_v26 = vpop.f32.mrb[116].mxu1  ;;  %v14495_v1 = vmax.f32 %v13648_v41, %v20718_v9  ;;  %v14933_v17 = vrot.slane %v30595_v8, %v30306_v63  ;;  %v15387_v27 = vld [vmem:[#allocation4 + $0xa1] sm:$0xff] }
 0x9f3   :  { %v15257_v44 = vsel %vm15214_vm13, %v14913_v55, %v15256_v48  ;;  %v13631_v29 = vcombine.high %v13623_v7, %v13623_v7  ;;  %v30608_v18 = vpop.f32.mrb[117].mxu1  ;;  %v30611_v28 = vmax.f32 %v13649_v11, %v20720_v45  ;;  %v20713_v54 = vrot.slane %v13623_v7, 9 }
 0x9f4   :  { %15344 = vst.msk [vmem:[#allocation4 + $0x71] sm:$0xff] %vm156_vm4, %v15257_v44  ;;  %v13632_v21 = vcombine.high %v13630_v59, %v13630_v59  ;;  %v20715_v3 = vrot.slane %v13630_v59, 9  ;;  %v14941_v43 = vrot.slane %v30598_v40, %v30306_v63  ;;  %v13221_v47 = vadd.f32 %v30476_v36, %v30292_v58 }
 0x9f5   :  { %v20714_v14 = vrot.slane %v13631_v29, 9  ;;  %v13220_v10 = vadd.f32 %v30292_v58, %v30482_v4  ;;  %v14490_v22 = vmax.f32 %v13623_v7, %v20713_v54  ;;  %v30621_v16 = vadd.f32 %v30490_v42, %v30292_v58 }
 0x9f6   :  { %v20716_v46 = vrot.slane %v13632_v21, 9  ;;  %v14492_v30 = vmax.f32 %v13630_v59, %v20715_v3  ;;  %v30623_v19 = vpop.f32.mrb[118].mxu1  ;;  %v14937_v61 = vrot.slane %v14495_v1, %v30306_v63  ;;  %v13285_v41 = vmax.f32 %v13221_v47, 0.0 }
 0x9f7   :  { %v14491_v23 = vmax.f32 %v13631_v29, %v20714_v14  ;;  %v13284_v0 = vmax.f32 %v13220_v10, 0.0  ;;  %v30626_v32 = vpop.f32.mrb[119].mxu1  ;;  %v14945_v36 = vrot.slane %v30611_v28, %v30306_v63  ;;  %v30633_v55 = vadd.f32 %v30292_v58, %v30495_v50 }
 0x9f8   :  { %v14493_v4 = vmax.f32 %v13632_v21, %v20716_v46  ;;  %v14925_v39 = vrot.slane %v14492_v30, %v30306_v63  ;;  %v14917_v42 = vrot.slane %v14490_v22, %v30306_v63  ;;  %v13331_v11 = vmax.f32 %v13283_v31, %v13285_v41 }
 0x9f9   :  { %v14921_v13 = vrot.slane %v14491_v23, %v30306_v63  ;;  %v13330_v12 = vmax.f32 %v13282_v33, %v13284_v0  ;;  %v13287_v9 = vmax.f32 %v30621_v16, 0.0  ;;  %v13225_v8 = vadd.f32 %v30508_v53, %v30292_v58 }
 0x9fa   :  { %v14929_v15 = vrot.slane %v14493_v4, %v30306_v63  ;;  %v13224_v6 = vadd.f32 %v30292_v58, %v30511_v49  ;;  %v30643_v45 = vpop.f32.mrb[120].mxu1  ;;  %v13667_v40 = vcombine.high %v13331_v11, %v13331_v11  ;;  %v13674_v7 = vrot.slane %v13331_v11, %v30302_v51 }
 0x9fb   :  { %v15258_v50 = vsel %vm15202_vm7, %v14921_v13, %v14917_v42  ;;  %v13650_v48 = vcombine.high %v13330_v12, %v13330_v12  ;;  %v15386_v59 = vld [vmem:[#allocation4 + $0x71] sm:$0xff]  ;;  %v30647_v31 = vpop.f32.mrb[121].mxu1  ;;  %v13657_v44 = vrot.slane %v13330_v12, %v30302_v51  ;;  %v13289_v53 = vmax.f32 %v13225_v8, 0.0 }
 0x9fc   :  { %v15259_v33 = vsel %vm15204_vm8, %v14925_v39, %v15258_v50  ;;  %v13288_v1 = vmax.f32 %v13224_v6, 0.0  ;;  %24295 = vmatmul.mubr.msk.f32.gmra.mrb[70].mxu0 %vm156_vm4, %v15386_v59  ;;  %v13681_v49 = vrot.slane %v13667_v40, %v30302_v51  ;;  %v13682_v29 = vcombine.high %v13674_v7, %v13674_v7 }
 0x9fd   :  { %v15260_v58 = vsel %vm15206_vm9, %v14929_v15, %v15259_v33  ;;  %v20725_v28 = vrot.slane %v13674_v7, 9  ;;  %24297 = vmatprep.mubr.msk.f32.mxu0 %vm156_vm4, %v15387_v27  ;;  %v13664_v54 = vrot.slane %v13650_v48, %v30302_v51  ;;  %v13665_v3 = vcombine.high %v13657_v44, %v13657_v44 }
 0x9fe   :  { %v15261_v21 = vsel %vm15208_vm10, %v14933_v17, %v15260_v58  ;;  %v20721_v14 = vrot.slane %v13657_v44, 9  ;;  %v30657_v47 = vpop.f32.mrb[122].mxu1  ;;  %v13683_v46 = vcombine.high %v13681_v49, %v13681_v49  ;;  %v20726_v22 = vrot.slane %v13682_v29, 9 }
 0x9ff   :  { %v15262_v10 = vsel %vm15210_vm11, %v14937_v61, %v15261_v21  ;;  %v20727_v30 = vrot.slane %v13681_v49, 9  ;;  %v30660_v16 = vpop.f32.mrb[123].mxu1  ;;  %v14502_v41 = vmax.f32 %v13674_v7, %v20725_v28  ;;  %v13666_v0 = vcombine.high %v13664_v54, %v13664_v54 }
 0xa00   :  { %v15263_v23 = vsel %vm15212_vm12, %v14941_v43, %v15262_v10  ;;  %v20722_v4 = vrot.slane %v13665_v3, 9  ;;  %v20728_v39 = vrot.slane %v13683_v46, 9  ;;  %v14503_v42 = vmax.f32 %v13682_v29, %v20726_v22 }
 0xa01   :  { %v15264_v17 = vsel %vm15214_vm13, %v14945_v36, %v15263_v23  ;;  %v14504_v13 = vmax.f32 %v13681_v49, %v20727_v30  ;;  %v20723_v11 = vrot.slane %v13664_v54, 9  ;;  %v20724_v12 = vrot.slane %v13666_v0, 9  ;;  %v30672_v36 = vld [vmem:[%s32710_s4 + $0x1] ss:$0 sm:$0xff] }
 0xa02   :  { %15345 = vst.msk [vmem:[#allocation4 + $0x81] sm:$0xff] %vm156_vm4, %v15264_v17  ;;  %v14498_v61 = vmax.f32 %v13657_v44, %v20721_v14  ;;  %v13286_v15 = vmax.f32 %v30633_v55, 0.0  ;;  %v30666_v8 = vpop.f32.mrb[124].mxu1  ;;  %v14505_v6 = vmax.f32 %v13683_v46, %v20728_v39  ;;  %v14965_v43 = vrot.slane %v14502_v41, %v30306_v63 }
 0xa03   :  { %v14499_v27 = vmax.f32 %v13665_v3, %v20722_v4  ;;  %v30676_v50 = vadd.f32 %v30672_v36, %v30518_v5  ;;  %v30678_v40 = vpop.f32.mrb[125].mxu1  ;;  %v14969_v7 = vrot.slane %v14503_v42, %v30306_v63  ;;  %v14500_v55 = vmax.f32 %v13664_v54, %v20723_v11 }
 0xa04   :  { %v14501_v48 = vmax.f32 %v13666_v0, %v20724_v12  ;;  %v13333_v59 = vmax.f32 %v13287_v9, %v13289_v53  ;;  %v14973_v33 = vrot.slane %v14504_v13, %v30306_v63  ;;  %v14949_v44 = vrot.slane %v14498_v61, %v30306_v63 }
 0xa05   :  { %v14953_v58 = vrot.slane %v14499_v27, %v30306_v63  ;;  %v13332_v49 = vmax.f32 %v13286_v15, %v13288_v1  ;;  %v14957_v29 = vrot.slane %v14500_v55, %v30306_v63  ;;  %v14977_v54 = vrot.slane %v14505_v6, %v30306_v63 }
 0xa06   :  { %v14961_v28 = vrot.slane %v14501_v48, %v30306_v63  ;;  %v13701_v5 = vcombine.high %v13333_v59, %v13333_v59  ;;  %v13708_v21 = vrot.slane %v13333_v59, %v30302_v51  ;;  %v30687_v3 = vpop.f32.mrb[126].mxu1  ;;  %v13226_v48 = vadd.f32 %v30672_v36, %v30521_v35 }
 0xa07   :  { %v15265_v9 = vsel %vm15202_vm7, %v14953_v58, %v14949_v44  ;;  %v13684_v53 = vcombine.high %v13332_v49, %v13332_v49  ;;  %v13691_v14 = vrot.slane %v13332_v49, %v30302_v51  ;;  %v30692_v10 = vpop.f32.mrb[127].mxu1 }
 0xa08   :  { %v15266_v1 = vsel %vm15204_vm8, %v14957_v29, %v15265_v9  ;;  %v13715_v46 = vrot.slane %v13701_v5, %v30302_v51  ;;  %v13716_v22 = vcombine.high %v13708_v21, %v13708_v21  ;;  %v20733_v30 = vrot.slane %v13708_v21, 9 }
 0xa09   :  { %v15267_v23 = vsel %vm15206_vm9, %v14961_v28, %v15266_v1  ;;  %v13698_v41 = vrot.slane %v13684_v53, %v30302_v51  ;;  %v13699_v0 = vcombine.high %v13691_v14, %v13691_v14  ;;  %v20729_v4 = vrot.slane %v13691_v14, 9 }
 0xa0a   :  { %v15268_v17 = vsel %vm15208_vm10, %v14965_v43, %v15267_v23  ;;  %v13717_v39 = vcombine.high %v13715_v46, %v13715_v46  ;;  %v20734_v42 = vrot.slane %v13716_v22, 9  ;;  %v20735_v13 = vrot.slane %v13715_v46, 9 }
 0xa0b   :  { %v15269_v11 = vsel %vm15210_vm11, %v14969_v7, %v15268_v17  ;;  %v14510_v12 = vmax.f32 %v13708_v21, %v20733_v30  ;;  %v13700_v61 = vcombine.high %v13698_v41, %v13698_v41  ;;  %v20730_v15 = vrot.slane %v13699_v0, 9 }
 0xa0c   :  { %v15270_v6 = vsel %vm15212_vm12, %v14973_v33, %v15269_v11  ;;  %v20736_v27 = vrot.slane %v13717_v39, 9  ;;  %v14511_v55 = vmax.f32 %v13716_v22, %v20734_v42  ;;  %v20731_v44 = vrot.slane %v13698_v41, 9 }
 0xa0d   :  { %v15271_v59 = vsel %vm15214_vm13, %v14977_v54, %v15270_v6  ;;  %v20732_v58 = vrot.slane %v13700_v61, 9  ;;  %v13291_v43 = vmax.f32 %v30676_v50, 0.0  ;;  %v14512_v49 = vmax.f32 %v13715_v46, %v20735_v13 }
 0xa0e   :  { %15346 = vst.msk [vmem:[#allocation4 + $0xb1] sm:$0xff] %vm156_vm4, %v15271_v59  ;;  %v14513_v7 = vmax.f32 %v13717_v39, %v20736_v27  ;;  %v14997_v29 = vrot.slane %v14510_v12, %v30306_v63  ;;  %v14506_v28 = vmax.f32 %v13691_v14, %v20729_v4  ;;  %v15001_v33 = vrot.slane %v14511_v55, %v30306_v63 }
 0xa0f   :  { %v14507_v5 = vmax.f32 %v13699_v0, %v20730_v15  ;;  %v14508_v21 = vmax.f32 %v13698_v41, %v20731_v44  ;;  %v14509_v9 = vmax.f32 %v13700_v61, %v20732_v58  ;;  %v13290_v53 = vmax.f32 %v13226_v48, 0.0 }
 0xa10   :  { %v14981_v35 = vrot.slane %v14506_v28, %v30306_v63  ;;  %v13229_v54 = vadd.f32 %v30672_v36, %v30529_v2  ;;  %v13228_v50 = vadd.f32 %v30672_v36, %v30535_v60  ;;  %v13231_v22 = vadd.f32 %v30672_v36, %v30550_v37 }
 0xa11   :  { %v14985_v1 = vrot.slane %v14507_v5, %v30306_v63  ;;  %v14989_v46 = vrot.slane %v14508_v21, %v30306_v63  ;;  %v14993_v14 = vrot.slane %v14509_v9, %v30306_v63  ;;  %v13230_v41 = vadd.f32 %v30672_v36, %v30554_v20 }
 0xa12   :  { %v13293_v30 = vmax.f32 %v13229_v54, 0.0  ;;  %v13292_v23 = vmax.f32 %v13228_v50, 0.0  ;;  %v13233_v2 = vadd.f32 %v30672_v36, %v30560_v38  ;;  %v15005_v0 = vrot.slane %v14512_v49, %v30306_v63 }
 0xa13   :  { %v15009_v60 = vrot.slane %v14513_v7, %v30306_v63  ;;  %v15272_v4 = vsel %vm15202_vm7, %v14985_v1, %v14981_v35  ;;  %v13232_v17 = vadd.f32 %v30672_v36, %v30563_v52  ;;  %v13295_v13 = vmax.f32 %v13231_v22, 0.0 }
 0xa14   :  { %v15273_v39 = vsel %vm15204_vm8, %v14989_v46, %v15272_v4  ;;  %v13335_v37 = vmax.f32 %v13291_v43, %v13293_v30  ;;  %v13334_v42 = vmax.f32 %v13290_v53, %v13292_v23  ;;  %v13294_v20 = vmax.f32 %v13230_v41, 0.0 }
 0xa15   :  { %v15274_v11 = vsel %vm15206_vm9, %v14993_v14, %v15273_v39  ;;  %v13297_v12 = vmax.f32 %v13233_v2, 0.0  ;;  %v13296_v61 = vmax.f32 %v13232_v17, 0.0  ;;  %v15388_v38 = vld [vmem:[#allocation4 + $0xb1] sm:$0xff]  ;;  %v30741_v30 = vadd.f32 %v30672_v36, %v30571_v34 }
 0xa16   :  { %v15275_v15 = vsel %vm15208_vm10, %v14997_v29, %v15274_v11  ;;  %v13735_v6 = vcombine.high %v13335_v37, %v13335_v37  ;;  %v13742_v27 = vrot.slane %v13335_v37, %v30302_v51  ;;  %v13718_v55 = vcombine.high %v13334_v42, %v13334_v42  ;;  %24298 = vmatmul.mubr.msk.f32.gmra.mrb[72].mxu0 %vm156_vm4, %v15388_v38 }
 0xa17   :  { %v15276_v52 = vsel %vm15210_vm11, %v15001_v33, %v15275_v15  ;;  %v13725_v48 = vrot.slane %v13334_v42, %v30302_v51  ;;  %v13337_v59 = vmax.f32 %v13295_v13, %v13297_v12  ;;  %v13336_v44 = vmax.f32 %v13294_v20, %v13296_v61 }
 0xa18   :  { %v15277_v58 = vsel %vm15212_vm12, %v15005_v0, %v15276_v52  ;;  %v13749_v43 = vrot.slane %v13735_v6, %v30302_v51  ;;  %v13750_v49 = vcombine.high %v13742_v27, %v13742_v27  ;;  %v20741_v7 = vrot.slane %v13742_v27, 9 }
 0xa19   :  { %v15278_v29 = vsel %vm15214_vm13, %v15009_v60, %v15277_v58  ;;  %v13732_v28 = vrot.slane %v13718_v55, %v30302_v51  ;;  %v13733_v5 = vcombine.high %v13725_v48, %v13725_v48  ;;  %v20737_v21 = vrot.slane %v13725_v48, 9 }
 0xa1a   :  { %15347 = vst.msk [vmem:[#allocation4 + $0xc1] sm:$0xff] %vm156_vm4, %v15278_v29  ;;  %v13751_v9 = vcombine.high %v13749_v43, %v13749_v43  ;;  %v20742_v33 = vrot.slane %v13750_v49, 9  ;;  %v20743_v35 = vrot.slane %v13749_v43, 9  ;;  %v14518_v53 = vmax.f32 %v13742_v27, %v20741_v7 }
 0xa1b   :  { %v13734_v54 = vcombine.high %v13732_v28, %v13732_v28  ;;  %v20738_v50 = vrot.slane %v13733_v5, 9  ;;  %v20739_v1 = vrot.slane %v13732_v28, 9  ;;  %v14514_v46 = vmax.f32 %v13725_v48, %v20737_v21 }
 0xa1c   :  { %v20744_v14 = vrot.slane %v13751_v9, 9  ;;  %v14519_v22 = vmax.f32 %v13750_v49, %v20742_v33  ;;  %v14520_v23 = vmax.f32 %v13749_v43, %v20743_v35  ;;  %v15029_v4 = vrot.slane %v14518_v53, %v30306_v63 }
 0xa1d   :  { %v20740_v41 = vrot.slane %v13734_v54, 9  ;;  %v14515_v2 = vmax.f32 %v13733_v5, %v20738_v50  ;;  %v14516_v0 = vmax.f32 %v13732_v28, %v20739_v1  ;;  %v15013_v17 = vrot.slane %v14514_v46, %v30306_v63 }
 0xa1e   :  { %v14521_v60 = vmax.f32 %v13751_v9, %v20744_v14  ;;  %v13769_v39 = vcombine.high %v13337_v59, %v13337_v59  ;;  %v13776_v11 = vrot.slane %v13337_v59, %v30302_v51  ;;  %v15033_v34 = vrot.slane %v14519_v22, %v30306_v63 }
 0xa1f   :  { %v14517_v37 = vmax.f32 %v13734_v54, %v20740_v41  ;;  %v15017_v42 = vrot.slane %v14515_v2, %v30306_v63  ;;  %v15021_v13 = vrot.slane %v14516_v0, %v30306_v63  ;;  %v13752_v12 = vcombine.high %v13336_v44, %v13336_v44 }
 0xa20   :  { %v13783_v20 = vrot.slane %v13769_v39, %v30302_v51  ;;  %v13759_v61 = vrot.slane %v13336_v44, %v30302_v51  ;;  %v13784_v6 = vcombine.high %v13776_v11, %v13776_v11  ;;  %v20749_v27 = vrot.slane %v13776_v11, 9 }
 0xa21   :  { %v15025_v38 = vrot.slane %v14517_v37, %v30306_v63  ;;  %v15279_v15 = vsel %vm15202_vm7, %v15017_v42, %v15013_v17  ;;  %v30753_v55 = vld [vmem:[#allocation4 + $0xc1] sm:$0xff]  ;;  %v13766_v59 = vrot.slane %v13752_v12, %v30302_v51  ;;  %v15037_v29 = vrot.slane %v14520_v23, %v30306_v63 }
 0xa22   :  { %v15280_v52 = vsel %vm15204_vm8, %v15021_v13, %v15279_v15  ;;  %v13785_v48 = vcombine.high %v13783_v20, %v13783_v20  ;;  %v20751_v58 = vrot.slane %v13783_v20, 9  ;;  %24300 = vmatprep.mubr.msk.f32.mxu0 %vm156_vm4, %v30753_v55  ;;  %v20750_v44 = vrot.slane %v13784_v6, 9 }
 0xa23   :  { %v15281_v43 = vsel %vm15206_vm9, %v15025_v38, %v15280_v52  ;;  %v14526_v49 = vmax.f32 %v13776_v11, %v20749_v27  ;;  %v13767_v7 = vcombine.high %v13759_v61, %v13759_v61  ;;  %v13768_v21 = vcombine.high %v13766_v59, %v13766_v59 }
 0xa24   :  { %v15282_v28 = vsel %vm15208_vm10, %v15029_v4, %v15281_v43  ;;  %v20752_v5 = vrot.slane %v13785_v48, 9  ;;  %v15041_v9 = vrot.slane %v14521_v60, %v30306_v63  ;;  %v20745_v35 = vrot.slane %v13759_v61, 9 }
 0xa25   :  { %v15283_v33 = vsel %vm15210_vm11, %v15033_v34, %v15282_v28  ;;  %v13299_v53 = vmax.f32 %v30741_v30, 0.0  ;;  %v14527_v50 = vmax.f32 %v13784_v6, %v20750_v44  ;;  %v14528_v1 = vmax.f32 %v13783_v20, %v20751_v58 }
 0xa26   :  { %v15284_v54 = vsel %vm15212_vm12, %v15037_v29, %v15283_v33  ;;  %v20746_v46 = vrot.slane %v13767_v7, 9  ;;  %v15061_v22 = vrot.slane %v14526_v49, %v30306_v63  ;;  %v20747_v23 = vrot.slane %v13766_v59, 9 }
 0xa27   :  { %v15285_v14 = vsel %vm15214_vm13, %v15041_v9, %v15284_v54  ;;  %v20748_v41 = vrot.slane %v13768_v21, 9  ;;  %v14529_v2 = vmax.f32 %v13785_v48, %v20752_v5  ;;  %v14522_v0 = vmax.f32 %v13759_v61, %v20745_v35 }
 0xa28   :  { %15348 = vst.msk [vmem:[#allocation4 + $0xd1] sm:$0xff] %vm156_vm4, %v15285_v14  ;;  %v14523_v60 = vmax.f32 %v13767_v7, %v20746_v46  ;;  %v13234_v4 = vadd.f32 %v30672_v36, %v30575_v57  ;;  %v14524_v30 = vmax.f32 %v13766_v59, %v20747_v23  ;;  %v13237_v39 = vadd.f32 %v30672_v36, %v30587_v56 }
 0xa29   :  { %v14525_v17 = vmax.f32 %v13768_v21, %v20748_v41  ;;  %v13236_v37 = vadd.f32 %v30672_v36, %v30592_v62  ;;  %v15045_v42 = vrot.slane %v14522_v0, %v30306_v63  ;;  %v13239_v34 = vadd.f32 %v30672_v36, %v30603_v26 }
 0xa2a   :  { %v15049_v13 = vrot.slane %v14523_v60, %v30306_v63  ;;  %v13298_v11 = vmax.f32 %v13234_v4, 0.0  ;;  %v15053_v20 = vrot.slane %v14524_v30, %v30306_v63  ;;  %v13301_v12 = vmax.f32 %v13237_v39, 0.0 }
 0xa2b   :  { %v15057_v57 = vrot.slane %v14525_v17, %v30306_v63  ;;  %v13300_v61 = vmax.f32 %v13236_v37, 0.0  ;;  %v15065_v38 = vrot.slane %v14527_v50, %v30306_v63  ;;  %v15069_v56 = vrot.slane %v14528_v1, %v30306_v63 }
 0xa2c   :  { %v15286_v62 = vsel %vm15202_vm7, %v15049_v13, %v15045_v42  ;;  %v13241_v15 = vadd.f32 %v30672_v36, %v30623_v19  ;;  %v15073_v6 = vrot.slane %v14529_v2, %v30306_v63  ;;  %v13339_v26 = vmax.f32 %v13299_v53, %v13301_v12 }
 0xa2d   :  { %v15287_v27 = vsel %vm15204_vm8, %v15053_v20, %v15286_v62  ;;  %v13338_v52 = vmax.f32 %v13298_v11, %v13300_v61  ;;  %v13303_v58 = vmax.f32 %v13239_v34, 0.0  ;;  %v13238_v59 = vadd.f32 %v30672_v36, %v30608_v18 }
 0xa2e   :  { %v15288_v48 = vsel %vm15206_vm9, %v15057_v57, %v15287_v27  ;;  %v13305_v43 = vmax.f32 %v13241_v15, 0.0  ;;  %v13803_v49 = vcombine.high %v13339_v26, %v13339_v26  ;;  %v13810_v7 = vrot.slane %v13339_v26, %v30302_v51 }
 0xa2f   :  { %v15289_v44 = vsel %vm15208_vm10, %v15061_v22, %v15288_v48  ;;  %v13786_v29 = vcombine.high %v13338_v52, %v13338_v52  ;;  %v30793_v19 = vld [vmem:[#allocation4 + $0xd1] sm:$0xff]  ;;  %v13793_v5 = vrot.slane %v13338_v52, %v30302_v51  ;;  %v13240_v9 = vadd.f32 %v30672_v36, %v30626_v32 }
 0xa30   :  { %v15290_v28 = vsel %vm15210_vm11, %v15065_v38, %v15289_v44  ;;  %v13341_v21 = vmax.f32 %v13303_v58, %v13305_v43  ;;  %24301 = vmatmul.mubr.msk.f32.gmra.mrb[74].mxu0 %vm156_vm4, %v30793_v19  ;;  %v13817_v33 = vrot.slane %v13803_v49, %v30302_v51  ;;  %v13818_v35 = vcombine.high %v13810_v7, %v13810_v7 }
 0xa31   :  { %v15291_v18 = vsel %vm15212_vm12, %v15069_v56, %v15290_v28  ;;  %v20757_v53 = vrot.slane %v13810_v7, 9  ;;  %v13800_v50 = vrot.slane %v13786_v29, %v30302_v51  ;;  %v13801_v1 = vcombine.high %v13793_v5, %v13793_v5 }
 0xa32   :  { %v15292_v54 = vsel %vm15214_vm13, %v15073_v6, %v15291_v18  ;;  %v20753_v46 = vrot.slane %v13793_v5, 9  ;;  %v13819_v14 = vcombine.high %v13817_v33, %v13817_v33  ;;  %v20758_v22 = vrot.slane %v13818_v35, 9 }
 0xa33   :  { %15349 = vst.msk [vmem:[#allocation4 + $0xe1] sm:$0xff] %vm156_vm4, %v15292_v54  ;;  %v20759_v32 = vrot.slane %v13817_v33, 9  ;;  %v14534_v23 = vmax.f32 %v13810_v7, %v20757_v53  ;;  %v13802_v41 = vcombine.high %v13800_v50, %v13800_v50  ;;  %v20754_v2 = vrot.slane %v13801_v1, 9 }
 0xa34   :  { %v20755_v0 = vrot.slane %v13800_v50, 9  ;;  %v14530_v60 = vmax.f32 %v13793_v5, %v20753_v46  ;;  %v20760_v4 = vrot.slane %v13819_v14, 9  ;;  %v14535_v30 = vmax.f32 %v13818_v35, %v20758_v22 }
 0xa35   :  { %v13302_v17 = vmax.f32 %v13238_v59, 0.0  ;;  %v13304_v39 = vmax.f32 %v13240_v9, 0.0  ;;  %v20756_v37 = vrot.slane %v13802_v41, 9  ;;  %v14531_v42 = vmax.f32 %v13801_v1, %v20754_v2 }
 0xa36   :  { %v14532_v13 = vmax.f32 %v13800_v50, %v20755_v0  ;;  %v30808_v11 = vadd.f32 %v30672_v36, %v30643_v45  ;;  %v14536_v34 = vmax.f32 %v13817_v33, %v20759_v32  ;;  %v15093_v20 = vrot.slane %v14534_v23, %v30306_v63 }
 0xa37   :  { %v15077_v57 = vrot.slane %v14530_v60, %v30306_v63  ;;  %v13837_v12 = vcombine.high %v13341_v21, %v13341_v21  ;;  %v14533_v61 = vmax.f32 %v13802_v41, %v20756_v37  ;;  %v15081_v38 = vrot.slane %v14531_v42, %v30306_v63 }
 0xa38   :  { %v15085_v56 = vrot.slane %v14532_v13, %v30306_v63  ;;  %v13844_v62 = vrot.slane %v13341_v21, %v30302_v51  ;;  %v14537_v15 = vmax.f32 %v13819_v14, %v20760_v4  ;;  %v15097_v6 = vrot.slane %v14535_v30, %v30306_v63 }
 0xa39   :  { %v13851_v27 = vrot.slane %v13837_v12, %v30302_v51  ;;  %v13340_v45 = vmax.f32 %v13302_v17, %v13304_v39  ;;  %v15089_v26 = vrot.slane %v14533_v61, %v30306_v63  ;;  %v15293_v52 = vsel %vm15202_vm7, %v15081_v38, %v15077_v57 }
 0xa3a   :  { %v13852_v48 = vcombine.high %v13844_v62, %v13844_v62  ;;  %v20765_v58 = vrot.slane %v13844_v62, 9  ;;  %v30819_v59 = vld [vmem:[#allocation4 + $0xe1] sm:$0xff]  ;;  %v15294_v43 = vsel %vm15204_vm8, %v15085_v56, %v15293_v52  ;;  %v15101_v9 = vrot.slane %v14536_v34, %v30306_v63 }
 0xa3b   :  { %v13853_v44 = vcombine.high %v13851_v27, %v13851_v27  ;;  %v20767_v49 = vrot.slane %v13851_v27, 9  ;;  %v13820_v7 = vcombine.high %v13340_v45, %v13340_v45  ;;  %24303 = vmatprep.mubr.msk.f32.mxu0 %vm156_vm4, %v30819_v59  ;;  %v15295_v29 = vsel %vm15206_vm9, %v15089_v26, %v15294_v43  ;;  %v15372_v34 = vld [vmem:[#allocation5 + $0x8] sm:$0xff] }
 0xa3c   :  { %v20766_v28 = vrot.slane %v13852_v48, 9  ;;  %v14542_v5 = vmax.f32 %v13844_v62, %v20765_v58  ;;  %v13827_v21 = vrot.slane %v13340_v45, %v30302_v51  ;;  %v15296_v18 = vsel %vm15208_vm10, %v15093_v20, %v15295_v29 }
 0xa3d   :  { %v20768_v33 = vrot.slane %v13853_v44, 9  ;;  %v13834_v35 = vrot.slane %v13820_v7, %v30302_v51  ;;  %v15105_v53 = vrot.slane %v14537_v15, %v30306_v63  ;;  %v15297_v54 = vsel %vm15210_vm11, %v15097_v6, %v15296_v18  ;;  %v15373_v15 = vld [vmem:[#allocation5 + $0x10] sm:$0xff]  ;;  %v15374_v6 = vld [vmem:[#allocation5 + $0x18] sm:$0xff] }
 0xa3e   :  { %v13835_v50 = vcombine.high %v13827_v21, %v13827_v21  ;;  %v13307_v1 = vmax.f32 %v30808_v11, 0.0  ;;  %v15298_v46 = vsel %vm15212_vm12, %v15101_v9, %v15297_v54  ;;  %v14543_v14 = vmax.f32 %v13852_v48, %v20766_v28  ;;  %v15371_v11 = vld [vmem:[#allocation5] sm:$0xff] }
 0xa3f   :  { %v14544_v22 = vmax.f32 %v13851_v27, %v20767_v49  ;;  %v13836_v32 = vcombine.high %v13834_v35, %v13834_v35  ;;  %v15299_v23 = vsel %vm15214_vm13, %v15105_v53, %v15298_v46  ;;  %v15125_v41 = vrot.slane %v14542_v5, %v30306_v63 }
 0xa40   :  { %v20761_v2 = vrot.slane %v13827_v21, 9  ;;  %v20762_v0 = vrot.slane %v13835_v50, 9  ;;  %15350 = vst.msk [vmem:[#allocation4 + $0xf1] sm:$0xff] %vm156_vm4, %v15299_v23  ;;  %v14545_v60 = vmax.f32 %v13853_v44, %v20768_v33  ;;  %v20763_v4 = vrot.slane %v13834_v35, 9 }
 0xa41   :  { %v20764_v30 = vrot.slane %v13836_v32, 9  ;;  %v13242_v17 = vadd.f32 %v30672_v36, %v30647_v31  ;;  %v13245_v42 = vadd.f32 %v30672_v36, %v30657_v47  ;;  %v13244_v13 = vadd.f32 %v30672_v36, %v30660_v16 }
 0xa42   :  { %v14538_v39 = vmax.f32 %v13827_v21, %v20761_v2  ;;  %v14539_v37 = vmax.f32 %v13835_v50, %v20762_v0  ;;  %v15133_v20 = vrot.slane %v14544_v22, %v30306_v63  ;;  %v14540_v57 = vmax.f32 %v13834_v35, %v20763_v4 }
 0xa43   :  { %v14541_v12 = vmax.f32 %v13836_v32, %v20764_v30  ;;  %v13306_v61 = vmax.f32 %v13242_v17, 0.0  ;;  %v13309_v31 = vmax.f32 %v13245_v42, 0.0  ;;  %v13308_v62 = vmax.f32 %v13244_v13, 0.0  ;;  %v15375_v42 = vld [vmem:[#allocation5 + $0x20] sm:$0xff] }
 0xa44   :  { %v15109_v38 = vrot.slane %v14538_v39, %v30306_v63  ;;  %v15113_v56 = vrot.slane %v14539_v37, %v30306_v63  ;;  %v15129_v47 = vrot.slane %v14543_v14, %v30306_v63  ;;  %v15117_v27 = vrot.slane %v14540_v57, %v30306_v63  ;;  %v15376_v57 = vld [vmem:[#allocation5 + $0x28] sm:$0xff] }
 0xa45   :  { %v15121_v16 = vrot.slane %v14541_v12, %v30306_v63  ;;  %v24789_v45 = vpack.c.bf16 %v15372_v34, %v15371_v11  ;;  %v15137_v26 = vrot.slane %v14545_v60, %v30306_v63  ;;  %v13343_v48 = vmax.f32 %v13307_v1, %v13309_v31  ;;  %v15377_v12 = vld [vmem:[#allocation5 + $0x30] sm:$0xff] }
 0xa46   :  { %v15300_v52 = vsel %vm15202_vm7, %v15113_v56, %v15109_v38  ;;  %v13342_v58 = vmax.f32 %v13306_v61, %v13308_v62  ;;  %v13247_v44 = vadd.f32 %v30672_v36, %v30666_v8  ;;  %v13249_v49 = vadd.f32 %v30672_v36, %v30687_v3  ;;  %v15378_v61 = vld [vmem:[#allocation5 + $0x38] sm:$0xff] }
 0xa47   :  { %v15301_v43 = vsel %vm15204_vm8, %v15117_v27, %v15300_v52  ;;  %24790 = vmatprep.subr.bf16.mxu0 %v24789_v45  ;;  %v24793_v7 = vpack.c.bf16 %v15374_v6, %v15373_v15  ;;  %v13871_v28 = vcombine.high %v13343_v48, %v13343_v48  ;;  %v13878_v5 = vrot.slane %v13343_v48, %v30302_v51  ;;  %v30857_v9 = vld [vmem:[#allocation4 + $0xf1] sm:$0xff]  ;;  %v15808_v52 = vld [vmem:[#allocation5 + $0x88] sm:$0xff] }
 0xa48   :  { %v15302_v29 = vsel %vm15206_vm9, %v15121_v16, %v15301_v43  ;;  %v13854_v21 = vcombine.high %v13342_v58, %v13342_v58  ;;  %24792 = vmatpush3.bf16.msra.mxu0 %v24789_v45  ;;  %v13861_v33 = vrot.slane %v13342_v58, %v30302_v51  ;;  %v13246_v8 = vadd.f32 %v30672_v36, %v30678_v40 }
 0xa49   :  { %v15303_v18 = vsel %vm15208_vm10, %v15125_v41, %v15302_v29  ;;  %v13313_v35 = vmax.f32 %v13249_v49, 0.0  ;;  %24794 = vmatprep.subr.bf16.mxu0 %v24793_v7  ;;  %24304 = vmatmul.mubr.msk.f32.gmra.mrb[76].mxu0 %vm156_vm4, %v30857_v9  ;;  %v13885_v53 = vrot.slane %v13871_v28, %v30302_v51  ;;  %v13886_v54 = vcombine.high %v13878_v5, %v13878_v5 }
 0xa4a   :  { %v15304_v3 = vsel %vm15210_vm11, %v15129_v47, %v15303_v18  ;;  %v20773_v50 = vrot.slane %v13878_v5, 9  ;;  %v13868_v46 = vrot.slane %v13854_v21, %v30302_v51  ;;  %v13869_v14 = vcombine.high %v13861_v33, %v13861_v33 }
 0xa4b   :  { %v15305_v1 = vsel %vm15212_vm12, %v15133_v20, %v15304_v3  ;;  %v20769_v22 = vrot.slane %v13861_v33, 9  ;;  %v13887_v40 = vcombine.high %v13885_v53, %v13885_v53  ;;  %v20774_v23 = vrot.slane %v13886_v54, 9 }
 0xa4c   :  { %v15306_v32 = vsel %vm15214_vm13, %v15137_v26, %v15305_v1  ;;  %v20775_v41 = vrot.slane %v13885_v53, 9  ;;  %24796 = vmatpush3.bf16.msra.mxu0 %v24793_v7  ;;  %v14550_v2 = vmax.f32 %v13878_v5, %v20773_v50  ;;  %v13870_v0 = vcombine.high %v13868_v46, %v13868_v46  ;;  %v15807_v26 = vld [vmem:[#allocation5 + $0x80] sm:$0xff] }
 0xa4d   :  { %15351 = vst.msk [vmem:[#allocation4 + $0x101] sm:$0xff] %vm156_vm4, %v15306_v32  ;;  %v20770_v60 = vrot.slane %v13869_v14, 9  ;;  %v20771_v4 = vrot.slane %v13868_v46, 9  ;;  %v20776_v30 = vrot.slane %v13887_v40, 9  ;;  %v14546_v17 = vmax.f32 %v13861_v33, %v20769_v22 }
 0xa4e   :  { %v13311_v39 = vmax.f32 %v13247_v44, 0.0  ;;  %v13248_v37 = vadd.f32 %v30672_v36, %v30692_v10  ;;  %v20772_v13 = vrot.slane %v13870_v0, 9  ;;  %v13310_v20 = vmax.f32 %v13246_v8, 0.0 }
 0xa4f   :  { %v14547_v11 = vmax.f32 %v13869_v14, %v20770_v60  ;;  %v14548_v34 = vmax.f32 %v13868_v46, %v20771_v4  ;;  %v14551_v38 = vmax.f32 %v13886_v54, %v20774_v23  ;;  %v14552_v56 = vmax.f32 %v13885_v53, %v20775_v41 }
 0xa50   :  { %v15157_v31 = vrot.slane %v14550_v2, %v30306_v63  ;;  %v15141_v62 = vrot.slane %v14546_v17, %v30306_v63  ;;  %v14549_v15 = vmax.f32 %v13870_v0, %v20772_v13  ;;  %v13345_v36 = vmax.f32 %v13311_v39, %v13313_v35 }
 0xa51   :  { %v15145_v6 = vrot.slane %v14547_v11, %v30306_v63  ;;  %v15149_v47 = vrot.slane %v14548_v34, %v30306_v63  ;;  %v14553_v10 = vmax.f32 %v13887_v40, %v20776_v30  ;;  %v13312_v27 = vmax.f32 %v13248_v37, 0.0 }
 0xa52   :  { %v24797_v16 = vpack.c.bf16 %v15376_v57, %v15375_v42  ;;  %v24801_v45 = vpack.c.bf16 %v15378_v61, %v15377_v12  ;;  %v15153_v48 = vrot.slane %v14549_v15, %v30306_v63  ;;  %v13905_v43 = vcombine.high %v13345_v36, %v13345_v36 }
 0xa53   :  { %v15307_v58 = vsel %vm15202_vm7, %v15145_v6, %v15141_v62  ;;  %v13912_v44 = vrot.slane %v13345_v36, %v30302_v51  ;;  %v15161_v49 = vrot.slane %v14551_v38, %v30306_v63  ;;  %v15165_v7 = vrot.slane %v14552_v56, %v30306_v63  ;;  %v15355_v62 = vld [vmem:[#allocation4] sm:$0xff]  ;;  %v15809_v36 = vld [vmem:[#allocation5 + $0x90] sm:$0xff] }
 0xa54   :  { %v15308_v29 = vsel %vm15204_vm8, %v15149_v47, %v15307_v58  ;;  %v13344_v28 = vmax.f32 %v13310_v20, %v13312_v27  ;;  %24798 = vmatprep.subr.bf16.mxu0 %v24797_v16  ;;  %v30883_v5 = vld [vmem:[#allocation4 + $0x101] sm:$0xff]  ;;  %v13919_v18 = vrot.slane %v13905_v43, %v30302_v51  ;;  %v24805_v33 = vpack.c.bf16 %v15808_v52, %v15807_v26 }
 0xa55   :  { %v15309_v21 = vsel %vm15206_vm9, %v15153_v48, %v15308_v29  ;;  %24800 = vmatpush3.bf16.msra.mxu0 %v24797_v16  ;;  %24306 = vmatprep.mubr.msk.f32.mxu0 %vm156_vm4, %v30883_v5  ;;  %v13920_v35 = vcombine.high %v13912_v44, %v13912_v44  ;;  %v15169_v54 = vrot.slane %v14553_v10, %v30306_v63  ;;  %v20781_v40 = vrot.slane %v13912_v44, 9  ;;  %v15810_v10 = vld [vmem:[#allocation5 + $0x98] sm:$0xff] }
 0xa56   :  { %v15310_v8 = vsel %vm15208_vm10, %v15157_v31, %v15309_v21  ;;  %v13888_v3 = vcombine.high %v13344_v28, %v13344_v28  ;;  %v13895_v53 = vrot.slane %v13344_v28, %v30302_v51  ;;  %24802 = vmatprep.subr.bf16.mxu0 %v24801_v45  ;;  %v13921_v46 = vcombine.high %v13919_v18, %v13919_v18  ;;  %v30921_v28 = vld [vmem:[#allocation4 + $0x20] sm:$0xff] }
 0xa57   :  { %v15311_v50 = vsel %vm15210_vm11, %v15161_v49, %v15310_v8  ;;  %v20782_v23 = vrot.slane %v13920_v35, 9  ;;  %v20783_v60 = vrot.slane %v13919_v18, 9  ;;  %v14558_v42 = vmax.f32 %v13912_v44, %v20781_v40  ;;  %v30916_v44 = vld [vmem:[#allocation4 + $0x10] sm:$0xff]  ;;  %v15811_v49 = vld [vmem:[#allocation5 + $0xa0] sm:$0xff] }
 0xa58   :  { %v15312_v1 = vsel %vm15212_vm12, %v15165_v7, %v15311_v50  ;;  %v13902_v14 = vrot.slane %v13888_v3, %v30302_v51  ;;  %v13903_v22 = vcombine.high %v13895_v53, %v13895_v53  ;;  %v20777_v2 = vrot.slane %v13895_v53, 9  ;;  %v15812_v7 = vld [vmem:[#allocation5 + $0xa8] sm:$0xff]  ;;  %v15813_v8 = vld [vmem:[#allocation5 + $0xb0] sm:$0xff]  ;;  %v30930_v3 = vld [vmem:[#allocation4 + $0x40] sm:$0xff] }
 0xa59   :  { %v15313_v32 = vsel %vm15214_vm13, %v15169_v54, %v15312_v1  ;;  %24804 = vmatpush3.bf16.msra.mxu0 %v24801_v45  ;;  %v20784_v30 = vrot.slane %v13921_v46, 9  ;;  %v14559_v11 = vmax.f32 %v13920_v35, %v20782_v23  ;;  %v14560_v12 = vmax.f32 %v13919_v18, %v20783_v60  ;;  %v30926_v18 = vld [vmem:[#allocation4 + $0x30] sm:$0xff]  ;;  %v15814_v35 = vld [vmem:[#allocation5 + $0xb8] sm:$0xff]  ;;  %v16041_v54 = vld [vmem:[#allocation5 + $0xc0] sm:$0xff] }
 0xa5a   :  { %15352 = vst.msk [vmem:[#allocation4 + $0x111] sm:$0xff] %vm156_vm4, %v15313_v32  ;;  %v13904_v41 = vcombine.high %v13902_v14, %v13902_v14  ;;  %v20778_v0 = vrot.slane %v13903_v22, 9  ;;  %24806 = vmatprep.subr.bf16.mxu0 %v24805_v33  ;;  %v20779_v4 = vrot.slane %v13902_v14, 9  ;;  %v14554_v39 = vmax.f32 %v13895_v53, %v20777_v2  ;;  %v30934_v53 = vld [vmem:[#allocation4 + $0x50] sm:$0xff]  ;;  %v16042_v50 = vld [vmem:[#allocation5 + $0xc8] sm:$0xff]  ;;  %v30938_v1 = vld [vmem:[#allocation4 + $0x60] sm:$0xff] }
 0xa5b   :  { %v14561_v38 = vmax.f32 %v13921_v46, %v20784_v30  ;;  %v15189_v15 = vrot.slane %v14558_v42, %v30306_v63  ;;  %v15193_v27 = vrot.slane %v14559_v11, %v30306_v63  ;;  %v15197_v45 = vrot.slane %v14560_v12, %v30306_v63  ;;  %v15363_v46 = vld [vmem:[#allocation4 + $0xa0] sm:$0xff]  ;;  %v30947_v32 = vld [vmem:[#allocation4 + $0xb0] sm:$0xff]  ;;  %v16048_v12 = vld [vmem:[#allocation5 + $0xf8] sm:$0xff] }
 0xa5c   :  { %v20780_v17 = vrot.slane %v13904_v41, 9  ;;  %v14555_v37 = vmax.f32 %v13903_v22, %v20778_v0  ;;  %v14556_v13 = vmax.f32 %v13902_v14, %v20779_v4  ;;  %v15173_v20 = vrot.slane %v14554_v39, %v30306_v63  ;;  %v30942_v22 = vld [vmem:[#allocation4 + $0x70] sm:$0xff]  ;;  %v30951_v40 = vld [vmem:[#allocation4 + $0xc0] sm:$0xff] }
 0xa5d   :  { %v15201_v52 = vrot.slane %v14561_v38, %v30306_v63  ;;  %v24809_v58 = vpack.c.bf16 %v15810_v10, %v15809_v36  ;;  %v24813_v21 = vpack.c.bf16 %v15812_v7, %v15811_v49  ;;  %v24821_v14 = vpack.c.bf16 %v16042_v50, %v16041_v54  ;;  %v30955_v23 = vld [vmem:[#allocation4 + $0xd0] sm:$0xff]  ;;  %v30967_v0 = vld [vmem:[#allocation4 + $0x100] sm:$0xff]  ;;  %v16278_v49 = vld [vmem:[#allocation5 + $0x118] sm:$0xff] }
 0xa5e   :  { %v14557_v34 = vmax.f32 %v13904_v41, %v20780_v17  ;;  %v15177_v57 = vrot.slane %v14555_v37, %v30306_v63  ;;  %v15181_v61 = vrot.slane %v14556_v13, %v30306_v63  ;;  %v30959_v41 = vld [vmem:[#allocation4 + $0xe0] sm:$0xff]  ;;  %v30963_v2 = vld [vmem:[#allocation4 + $0xf0] sm:$0xff]  ;;  %v16044_v17 = vld [vmem:[#allocation5 + $0xd8] sm:$0xff] }
 0xa5f   :  { %v15790_v60 = vld [vmem:[#allocation4 + $0x2] sm:$0xff]  ;;  %v16043_v30 = vld [vmem:[#allocation5 + $0xd0] sm:$0xff] }
 0xa60   :  { %v15185_v56 = vrot.slane %v14557_v34, %v30306_v63  ;;  %v15314_v31 = vsel %vm15202_vm7, %v15177_v57, %v15173_v20  ;;  %v24825_v39 = vpack.c.bf16 %v16044_v17, %v16043_v30  ;;  %v30976_v37 = vld [vmem:[#allocation4 + $0x12] sm:$0xff]  ;;  %v16045_v42 = vld [vmem:[#allocation5 + $0xe0] sm:$0xff]  ;;  %v16046_v13 = vld [vmem:[#allocation5 + $0xe8] sm:$0xff] }
 0xa61   :  { %v15315_v6 = vsel %vm15204_vm8, %v15181_v61, %v15314_v31  ;;  %v30904_v47 = vld [vmem:[#allocation4 + $0x111] sm:$0xff]  ;;  %v30980_v11 = vld [vmem:[#allocation4 + $0x22] sm:$0xff]  ;;  %v24829_v34 = vpack.c.bf16 %v16046_v13, %v16045_v42 }
 0xa62   :  { %v15316_v16 = vsel %vm15206_vm9, %v15185_v56, %v15315_v6  ;;  %24307 = vmatmul.mubr.msk.f32.gmra.mrb[78].mxu0 %vm156_vm4, %v30904_v47  ;;  %v30971_v4 = vld [vmem:[#allocation4 + $0x110] sm:$0xff]  ;;  %v30988_v61 = vld [vmem:[#allocation4 + $0x42] sm:$0xff]  ;;  %v16512_v30 = vld [vmem:[#allocation5 + $0x158] sm:$0xff] }
 0xa63   :  { %v15317_v26 = vsel %vm15208_vm10, %v15189_v15, %v15316_v16  ;;  %24325 = vmatprep.mubr.msk.f32.mxu0 %vm156_vm4, %v15355_v62  ;;  %v30984_v20 = vld [vmem:[#allocation4 + $0x32] sm:$0xff]  ;;  %v16275_v31 = vld [vmem:[#allocation5 + $0x100] sm:$0xff]  ;;  %v16276_v62 = vld [vmem:[#allocation5 + $0x108] sm:$0xff] }
 0xa64   :  { %v15318_v48 = vsel %vm15210_vm11, %v15193_v27, %v15317_v26  ;;  %v16047_v57 = vld [vmem:[#allocation5 + $0xf0] sm:$0xff]  ;;  %v30996_v15 = vld [vmem:[#allocation4 + $0x62] sm:$0xff]  ;;  %v24837_v36 = vpack.c.bf16 %v16276_v62, %v16275_v31  ;;  %v16516_v62 = vld [vmem:[#allocation5 + $0x178] sm:$0xff] }
 0xa65   :  { %v15319_v43 = vsel %vm15212_vm12, %v15197_v45, %v15318_v48  ;;  %v24833_v38 = vpack.c.bf16 %v16048_v12, %v16047_v57  ;;  %v30992_v56 = vld [vmem:[#allocation4 + $0x52] sm:$0xff]  ;;  %v15798_v6 = vld [vmem:[#allocation4 + $0xa2] sm:$0xff] }
 0xa66   :  { %v15320_v29 = vsel %vm15214_vm13, %v15201_v52, %v15319_v43  ;;  %24326 = vmatmul.mubr.msk.f32.vlgmr.msra.gmra.mrb[64].mxu0 %vm156_vm4, %v30916_v44  ;;  %v31000_v10 = vld [vmem:[#allocation4 + $0x72] sm:$0xff]  ;;  %v31009_v16 = vld [vmem:[#allocation4 + $0xc2] sm:$0xff] }
 0xa67   :  { %15353 = vst.msk [vmem:[#allocation4 + $0x121] sm:$0xff] %vm156_vm4, %v15320_v29  ;;  %24808 = vmatpush3.bf16.msra.mxu0 %v24805_v33  ;;  %24328 = vmatprep.mubr.msk.f32.mxu0 %vm156_vm4, %v30921_v28  ;;  %v24817_v33 = vpack.c.bf16 %v15814_v35, %v15813_v8  ;;  %v31005_v27 = vld [vmem:[#allocation4 + $0xb2] sm:$0xff]  ;;  %v31017_v26 = vld [vmem:[#allocation4 + $0xe2] sm:$0xff] }
 0xa68   :  { %24810 = vmatprep.subr.bf16.mxu0 %v24809_v58  ;;  %v31013_v45 = vld [vmem:[#allocation4 + $0xd2] sm:$0xff]  ;;  %v31025_v48 = vld [vmem:[#allocation4 + $0x102] sm:$0xff] }
 0xa69   :  { %v31021_v52 = vld [vmem:[#allocation4 + $0xf2] sm:$0xff]  ;;  %v16279_v29 = vld [vmem:[#allocation5 + $0x120] sm:$0xff]  ;;  %v16510_v50 = vld [vmem:[#allocation5 + $0x148] sm:$0xff] }
 0xa6a   :  { %24329 = vmatmul.mubr.msk.f32.gmra.mrb[66].mxu0 %vm156_vm4, %v30926_v18  ;;  %v16277_v43 = vld [vmem:[#allocation5 + $0x110] sm:$0xff]  ;;  %v16509_v54 = vld [vmem:[#allocation5 + $0x140] sm:$0xff] }
 0xa6b   :  { %24331 = vmatprep.mubr.msk.f32.mxu0 %vm156_vm4, %v30930_v3  ;;  %24812 = vmatpush3.bf16.msra.mxu0 %v24809_v58  ;;  %v31029_v58 = vld [vmem:[#allocation4 + $0x112] sm:$0xff]  ;;  %v24841_v7 = vpack.c.bf16 %v16278_v49, %v16277_v43  ;;  %v31070_v42 = vld [vmem:[#allocation4 + $0x21] sm:$0xff] }
 0xa6c   :  { %24814 = vmatprep.subr.bf16.mxu0 %v24813_v21  ;;  %v16281_v35 = vld [vmem:[#allocation5 + $0x130] sm:$0xff]  ;;  %v16513_v13 = vld [vmem:[#allocation5 + $0x160] sm:$0xff] }
 0xa6d   :  { %v16258_v17 = vld [vmem:[#allocation4 + $0x11] sm:$0xff]  ;;  %v31086_v43 = vld [vmem:[#allocation4 + $0x61] sm:$0xff] }
 0xa6e   :  { %24332 = vmatmul.mubr.msk.f32.gmra.mrb[68].mxu0 %vm156_vm4, %v30934_v53  ;;  %v31074_v57 = vld [vmem:[#allocation4 + $0x31] sm:$0xff]  ;;  %v16744_v49 = vld [vmem:[#allocation5 + $0x180] sm:$0xff] }
 0xa6f   :  { %24334 = vmatprep.mubr.msk.f32.mxu0 %vm156_vm4, %v30938_v1  ;;  %24816 = vmatpush3.bf16.msra.mxu0 %v24813_v21  ;;  %v16280_v21 = vld [vmem:[#allocation5 + $0x128] sm:$0xff]  ;;  %v16515_v31 = vld [vmem:[#allocation5 + $0x170] sm:$0xff] }
 0xa70   :  { %24818 = vmatprep.subr.bf16.mxu0 %v24817_v33  ;;  %v24845_v8 = vpack.c.bf16 %v16280_v21, %v16279_v29  ;;  %v26089_v29 = vld [vmem:[#allocation4 + $0x71] sm:$0xff] }
 0xa72   :  { %24335 = vmatmul.mubr.msk.f32.gmra.mrb[70].mxu0 %vm156_vm4, %v30942_v22 }
 0xa73   :  { %24337 = vmatprep.mubr.msk.f32.mxu0 %vm156_vm4, %v15363_v46  ;;  %24820 = vmatpush3.bf16.msra.mxu0 %v24817_v33  ;;  %v16282_v33 = vld [vmem:[#allocation5 + $0x138] sm:$0xff]  ;;  %v24853_v46 = vpack.c.bf16 %v16510_v50, %v16509_v54  ;;  %v16749_v50 = vld [vmem:[#allocation5 + $0x1a8] sm:$0xff] }
 0xa74   :  { %24822 = vmatprep.subr.bf16.mxu0 %v24821_v14  ;;  %v16747_v54 = vld [vmem:[#allocation5 + $0x198] sm:$0xff] }
 0xa76   :  { %24338 = vmatmul.mubr.msk.f32.gmra.mrb[72].mxu0 %vm156_vm4, %v30947_v32 }
 0xa77   :  { %24340 = vmatprep.mubr.msk.f32.mxu0 %vm156_vm4, %v30951_v40 }
 0xa7a   :  { %24341 = vmatmul.mubr.msk.f32.gmra.mrb[74].mxu0 %vm156_vm4, %v30955_v23 }
 0xa7b   :  { %24343 = vmatprep.mubr.msk.f32.mxu0 %vm156_vm4, %v30959_v41 }
 0xa7e   :  { %24344 = vmatmul.mubr.msk.f32.gmra.mrb[76].mxu0 %vm156_vm4, %v30963_v2 }
 0xa7f   :  { %24346 = vmatprep.mubr.msk.f32.mxu0 %vm156_vm4, %v30967_v0 }
 0xa82   :  { %24347 = vmatmul.mubr.msk.f32.gmra.mrb[78].mxu0 %vm156_vm4, %v30971_v4 }
 0xa83   :  { %24365 = vmatprep.mubr.msk.f32.mxu0 %vm156_vm4, %v15790_v60  ;;  %v16511_v60 = vld [vmem:[#allocation5 + $0x150] sm:$0xff] }
 0xa86   :  { %24366 = vmatmul.mubr.msk.f32.vlgmr.msra.gmra.mrb[64].mxu0 %vm156_vm4, %v30976_v37 }
 0xa87   :  { %24824 = vmatpush3.bf16.msra.mxu0 %v24821_v14  ;;  %24368 = vmatprep.mubr.msk.f32.mxu0 %vm156_vm4, %v30980_v11  ;;  %v31047_v14 = vld [vmem:[#allocation4 + $0x80] sm:$0xff] }
 0xa88   :  { %24826 = vmatprep.subr.bf16.mxu0 %v24825_v39 }
 0xa8a   :  { %24369 = vmatmul.mubr.msk.f32.gmra.mrb[66].mxu0 %vm156_vm4, %v30984_v20 }
 0xa8b   :  { %24371 = vmatprep.mubr.msk.f32.mxu0 %vm156_vm4, %v30988_v61  ;;  %24828 = vmatpush3.bf16.msra.mxu0 %v24825_v39  ;;  %v24857_v39 = vpack.c.bf16 %v16512_v30, %v16511_v60  ;;  %v16750_v60 = vld [vmem:[#allocation5 + $0x1b0] sm:$0xff]  ;;  %v16751_v30 = vld [vmem:[#allocation5 + $0x1b8] sm:$0xff] }
 0xa8c   :  { %24830 = vmatprep.subr.bf16.mxu0 %v24829_v34 }
 0xa8e   :  { %24372 = vmatmul.mubr.msk.f32.gmra.mrb[68].mxu0 %vm156_vm4, %v30992_v56 }
 0xa8f   :  { %24374 = vmatprep.mubr.msk.f32.mxu0 %vm156_vm4, %v30996_v15  ;;  %24832 = vmatpush3.bf16.msra.mxu0 %v24829_v34  ;;  %v16514_v34 = vld [vmem:[#allocation5 + $0x168] sm:$0xff] }
 0xa90   :  { %24834 = vmatprep.subr.bf16.mxu0 %v24833_v38  ;;  %v24861_v12 = vpack.c.bf16 %v16514_v34, %v16513_v13  ;;  %v31126_v34 = vld [vmem:[#allocation4 + $0x82] sm:$0xff] }
 0xa92   :  { %24375 = vmatmul.mubr.msk.f32.gmra.mrb[70].mxu0 %vm156_vm4, %v31000_v10 }
 0xa93   :  { %24377 = vmatprep.mubr.msk.f32.mxu0 %vm156_vm4, %v15798_v6  ;;  %24836 = vmatpush3.bf16.msra.mxu0 %v24833_v38  ;;  %v31078_v38 = vld [vmem:[#allocation4 + $0x41] sm:$0xff]  ;;  %v31082_v6 = vld [vmem:[#allocation4 + $0x51] sm:$0xff] }
 0xa94   :  { %24838 = vmatprep.subr.bf16.mxu0 %v24837_v36 }
 0xa96   :  { %24378 = vmatmul.mubr.msk.f32.gmra.mrb[72].mxu0 %vm156_vm4, %v31005_v27 }
 0xa97   :  { %24380 = vmatprep.mubr.msk.f32.mxu0 %vm156_vm4, %v31009_v16 }
 0xa9a   :  { %24381 = vmatmul.mubr.msk.f32.gmra.mrb[74].mxu0 %vm156_vm4, %v31013_v45 }
 0xa9b   :  { %24383 = vmatprep.mubr.msk.f32.mxu0 %vm156_vm4, %v31017_v26 }
 0xa9e   :  { %24384 = vmatmul.mubr.msk.f32.gmra.mrb[76].mxu0 %vm156_vm4, %v31021_v52 }
 0xa9f   :  { %24386 = vmatprep.mubr.msk.f32.mxu0 %vm156_vm4, %v31025_v48 }
 0xaa2   :  { %24387 = vmatmul.mubr.msk.f32.gmra.mrb[78].mxu0 %vm156_vm4, %v31029_v58 }
 0xaa3   :  { %24405 = vmatprep.mubr.msk.f32.mxu0 %vm156_vm4, %v30916_v44  ;;  %v24849_v44 = vpack.c.bf16 %v16282_v33, %v16281_v35  ;;  %v26090_v35 = vld [vmem:[#allocation4 + $0xb1] sm:$0xff]  ;;  %v31108_v33 = vld [vmem:[#allocation4 + $0x121] sm:$0xff] }
 0xaa6   :  { %24406 = vmatmul.mubr.msk.f32.vlgmr.msra.gmra.mrb[64].mxu0 %vm156_vm4, %v30921_v28 }
 0xaa7   :  { %24840 = vmatpush3.bf16.msra.mxu0 %v24837_v36  ;;  %24408 = vmatprep.mubr.msk.f32.mxu0 %vm156_vm4, %v30926_v18  ;;  %v24865_v36 = vpack.c.bf16 %v16516_v62, %v16515_v31  ;;  %v16981_v31 = vld [vmem:[#allocation5 + $0x1d8] sm:$0xff] }
 0xaa8   :  { %24842 = vmatprep.subr.bf16.mxu0 %v24841_v7 }
 0xaaa   :  { %24409 = vmatmul.mubr.msk.f32.gmra.mrb[66].mxu0 %vm156_vm4, %v30930_v3 }
 0xaab   :  { %24411 = vmatprep.mubr.msk.f32.mxu0 %vm156_vm4, %v30934_v53  ;;  %24844 = vmatpush3.bf16.msra.mxu0 %v24841_v7  ;;  %v16745_v7 = vld [vmem:[#allocation5 + $0x188] sm:$0xff] }
 0xaac   :  { %24846 = vmatprep.subr.bf16.mxu0 %v24845_v8  ;;  %v24869_v21 = vpack.c.bf16 %v16745_v7, %v16744_v49  ;;  %v16983_v49 = vld [vmem:[#allocation5 + $0x1e8] sm:$0xff] }
 0xaae   :  { %24412 = vmatmul.mubr.msk.f32.gmra.mrb[68].mxu0 %vm156_vm4, %v30938_v1 }
 0xaaf   :  { %24414 = vmatprep.mubr.msk.f32.mxu0 %vm156_vm4, %v30942_v22  ;;  %24848 = vmatpush3.bf16.msra.mxu0 %v24845_v8  ;;  %v31091_v8 = vld [vmem:[#allocation4 + $0x81] sm:$0xff] }
 0xab0   :  { %24850 = vmatprep.subr.bf16.mxu0 %v24849_v44 }
 0xab2   :  { %24415 = vmatmul.mubr.msk.f32.gmra.mrb[70].mxu0 %vm156_vm4, %v31047_v14 }
 0xab3   :  { %24417 = vmatprep.mubr.msk.f32.mxu0 %vm156_vm4, %v30947_v32  ;;  %24852 = vmatpush3.bf16.msra.mxu0 %v24849_v44  ;;  %v31065_v32 = vld [vmem:[#allocation4 + $0x120] sm:$0xff]  ;;  %v16746_v44 = vld [vmem:[#allocation5 + $0x190] sm:$0xff] }
 0xab4   :  { %24854 = vmatprep.subr.bf16.mxu0 %v24853_v46 }
 0xab6   :  { %24418 = vmatmul.mubr.msk.f32.gmra.mrb[72].mxu0 %vm156_vm4, %v30951_v40 }
 0xab7   :  { %24420 = vmatprep.mubr.msk.f32.mxu0 %vm156_vm4, %v30955_v23 }
 0xaba   :  { %24421 = vmatmul.mubr.msk.f32.gmra.mrb[74].mxu0 %vm156_vm4, %v30959_v41 }
 0xabb   :  { %24423 = vmatprep.mubr.msk.f32.mxu0 %vm156_vm4, %v30963_v2 }
 0xabe   :  { %24424 = vmatmul.mubr.msk.f32.gmra.mrb[76].mxu0 %vm156_vm4, %v30967_v0 }
 0xabf   :  { %24426 = vmatprep.mubr.msk.f32.mxu0 %vm156_vm4, %v30971_v4 }
 0xac2   :  { %24427 = vmatmul.mubr.msk.f32.gmra.mrb[78].mxu0 %vm156_vm4, %v31065_v32 }
 0xac3   :  { %24445 = vmatprep.mubr.msk.f32.mxu0 %vm156_vm4, %v16258_v17  ;;  %v16978_v17 = vld [vmem:[#allocation5 + $0x1c0] sm:$0xff] }
 0xac6   :  { %24446 = vmatmul.mubr.msk.f32.vlgmr.msra.gmra.mrb[64].mxu0 %vm156_vm4, %v31070_v42 }
 0xac7   :  { %24856 = vmatpush3.bf16.msra.mxu0 %v24853_v46  ;;  %24448 = vmatprep.mubr.msk.f32.mxu0 %vm156_vm4, %v31074_v57 }
 0xac8   :  { %24858 = vmatprep.subr.bf16.mxu0 %v24857_v39 }
 0xaca   :  { %24449 = vmatmul.mubr.msk.f32.gmra.mrb[66].mxu0 %vm156_vm4, %v31078_v38 }
 0xacb   :  { %24451 = vmatprep.mubr.msk.f32.mxu0 %vm156_vm4, %v31082_v6  ;;  %24860 = vmatpush3.bf16.msra.mxu0 %v24857_v39  ;;  %v16979_v39 = vld [vmem:[#allocation5 + $0x1c8] sm:$0xff] }
 0xacc   :  { %24862 = vmatprep.subr.bf16.mxu0 %v24861_v12  ;;  %v24885_v13 = vpack.c.bf16 %v16979_v39, %v16978_v17 }
 0xace   :  { %24452 = vmatmul.mubr.msk.f32.gmra.mrb[68].mxu0 %vm156_vm4, %v31086_v43 }
 0xacf   :  { %24454 = vmatprep.mubr.msk.f32.mxu0 %vm156_vm4, %v26089_v29  ;;  %24864 = vmatpush3.bf16.msra.mxu0 %v24861_v12  ;;  %v16980_v12 = vld [vmem:[#allocation5 + $0x1d0] sm:$0xff] }
 0xad0   :  { %24866 = vmatprep.subr.bf16.mxu0 %v24865_v36  ;;  %v24889_v62 = vpack.c.bf16 %v16981_v31, %v16980_v12  ;;  %v16984_v29 = vld [vmem:[#allocation5 + $0x1f0] sm:$0xff]  ;;  %v31282_v31 = vld [vmem:[#allocation8 + $0x108] sm:$0xff] }
 0xad2   :  { %24455 = vmatmul.mubr.msk.f32.gmra.mrb[70].mxu0 %vm156_vm4, %v31091_v8 }
 0xad3   :  { %24457 = vmatprep.mubr.msk.f32.mxu0 %vm156_vm4, %v26090_v35  ;;  %24868 = vmatpush3.bf16.msra.mxu0 %v24865_v36  ;;  %v16982_v36 = vld [vmem:[#allocation5 + $0x1e0] sm:$0xff] }
 0xad4   :  { %24870 = vmatprep.subr.bf16.mxu0 %v24869_v21  ;;  %v24893_v7 = vpack.c.bf16 %v16983_v49, %v16982_v36  ;;  %v17212_v35 = vld [vmem:[#allocation5 + $0x200] sm:$0xff] }
 0xad6   :  { %24458 = vmatmul.mubr.msk.f32.gmra.mrb[72].mxu0 %vm156_vm4, %v30753_v55  ;;  %v24873_v55 = vpack.c.bf16 %v16747_v54, %v16746_v44  ;;  %v17213_v44 = vld [vmem:[#allocation5 + $0x208] sm:$0xff] }
 0xad7   :  { %24460 = vmatprep.mubr.msk.f32.mxu0 %vm156_vm4, %v30793_v19  ;;  %v16748_v19 = vld [vmem:[#allocation5 + $0x1a0] sm:$0xff] }
 0xad8   :  { %v24877_v46 = vpack.c.bf16 %v16749_v50, %v16748_v19 }
 0xada   :  { %24461 = vmatmul.mubr.msk.f32.gmra.mrb[74].mxu0 %vm156_vm4, %v30819_v59 }
 0xadb   :  { %24463 = vmatprep.mubr.msk.f32.mxu0 %vm156_vm4, %v30857_v9 }
 0xade   :  { %24464 = vmatmul.mubr.msk.f32.gmra.mrb[76].mxu0 %vm156_vm4, %v30883_v5 }
 0xadf   :  { %24466 = vmatprep.mubr.msk.f32.mxu0 %vm156_vm4, %v30904_v47 }
 0xae2   :  { %24467 = vmatmul.mubr.msk.f32.gmra.mrb[78].mxu0 %vm156_vm4, %v31108_v33 }
 0xae3   :  { %24485 = vmatprep.mubr.msk.f32.mxu0 %vm156_vm4, %v30976_v37  ;;  %v24881_v37 = vpack.c.bf16 %v16751_v30, %v16750_v60  ;;  %v17669_v60 = vld [vmem:[#allocation8 + $0x40] sm:$0xff] }
 0xae6   :  { %24486 = vmatmul.mubr.msk.f32.vlgmr.msra.gmra.mrb[64].mxu0 %vm156_vm4, %v30980_v11 }
 0xae7   :  { %24872 = vmatpush3.bf16.msra.mxu0 %v24869_v21  ;;  %24488 = vmatprep.mubr.msk.f32.mxu0 %vm156_vm4, %v30984_v20  ;;  %v16985_v21 = vld [vmem:[#allocation5 + $0x1f8] sm:$0xff] }
 0xae8   :  { %24874 = vmatprep.subr.bf16.mxu0 %v24873_v55 }
 0xaea   :  { %24489 = vmatmul.mubr.msk.f32.gmra.mrb[66].mxu0 %vm156_vm4, %v30988_v61 }
 0xaeb   :  { %24491 = vmatprep.mubr.msk.f32.mxu0 %vm156_vm4, %v30992_v56  ;;  %24876 = vmatpush3.bf16.msra.mxu0 %v24873_v55 }
 0xaec   :  { %24878 = vmatprep.subr.bf16.mxu0 %v24877_v46 }
 0xaee   :  { %24492 = vmatmul.mubr.msk.f32.gmra.mrb[68].mxu0 %vm156_vm4, %v30996_v15 }
 0xaef   :  { %24494 = vmatprep.mubr.msk.f32.mxu0 %vm156_vm4, %v31000_v10  ;;  %24880 = vmatpush3.bf16.msra.mxu0 %v24877_v46  ;;  %v31269_v46 = vld [vmem:[#allocation8 + $0xc8] sm:$0xff] }
 0xaf0   :  { %24882 = vmatprep.subr.bf16.mxu0 %v24881_v37 }
 0xaf2   :  { %24495 = vmatmul.mubr.msk.f32.gmra.mrb[70].mxu0 %vm156_vm4, %v31126_v34 }
 0xaf3   :  { %24497 = vmatprep.mubr.msk.f32.mxu0 %vm156_vm4, %v31005_v27  ;;  %24884 = vmatpush3.bf16.msra.mxu0 %v24881_v37  ;;  %v31144_v27 = vld [vmem:[#allocation4 + $0x122] sm:$0xff] }
 0xaf4   :  { %24886 = vmatprep.subr.bf16.mxu0 %v24885_v13 }
 0xaf6   :  { %24498 = vmatmul.mubr.msk.f32.gmra.mrb[72].mxu0 %vm156_vm4, %v31009_v16 }
 0xaf7   :  { %24500 = vmatprep.mubr.msk.f32.mxu0 %vm156_vm4, %v31013_v45 }
 0xafa   :  { %24501 = vmatmul.mubr.msk.f32.gmra.mrb[74].mxu0 %vm156_vm4, %v31017_v26 }
 0xafb   :  { %24503 = vmatprep.mubr.msk.f32.mxu0 %vm156_vm4, %v31021_v52 }
 0xafe   :  { %24504 = vmatmul.mubr.msk.f32.gmra.mrb[76].mxu0 %vm156_vm4, %v31025_v48 }
 0xaff   :  { %24506 = vmatprep.mubr.msk.f32.mxu0 %vm156_vm4, %v31029_v58 }
 0xb02   :  { %24507 = vmatmul.mubr.msk.f32.gmra.mrb[78].mxu0 %vm156_vm4, %v31144_v27 }
 0xb03   :  { %24525 = vmatprep.mubr.msk.f32.mxu0 %vm156_vm4, %v30921_v28  ;;  %v24897_v28 = vpack.c.bf16 %v16985_v21, %v16984_v29 }
 0xb06   :  { %24526 = vmatmul.mubr.msk.f32.vlgmr.msra.gmra.mrb[64].mxu0 %vm156_vm4, %v30926_v18  ;;  %v16734_v18 = vld [vmem:[#allocation4 + $0x90] sm:$0xff] }
 0xb07   :  { %24888 = vmatpush3.bf16.msra.mxu0 %v24885_v13  ;;  %24528 = vmatprep.mubr.msk.f32.mxu0 %vm156_vm4, %v30930_v3  ;;  %v24901_v3 = vpack.c.bf16 %v17213_v44, %v17212_v35 }
 0xb08   :  { %24890 = vmatprep.subr.bf16.mxu0 %v24889_v62 }
 0xb0a   :  { %24529 = vmatmul.mubr.msk.f32.gmra.mrb[66].mxu0 %vm156_vm4, %v30934_v53  ;;  %v16742_v53 = vld [vmem:[#allocation4 + $0x130] sm:$0xff] }
 0xb0b   :  { %24531 = vmatprep.mubr.msk.f32.mxu0 %vm156_vm4, %v30938_v1  ;;  %24892 = vmatpush3.bf16.msra.mxu0 %v24889_v62  ;;  %v17214_v1 = vld [vmem:[#allocation5 + $0x210] sm:$0xff]  ;;  %v17858_v62 = vld [vmem:[#allocation8 + $0x80] sm:$0xff] }
 0xb0c   :  { %24894 = vmatprep.subr.bf16.mxu0 %v24893_v7 }
 0xb0e   :  { %24532 = vmatmul.mubr.msk.f32.gmra.mrb[68].mxu0 %vm156_vm4, %v30942_v22  ;;  %v17215_v22 = vld [vmem:[#allocation5 + $0x218] sm:$0xff] }
 0xb0f   :  { %24534 = vmatprep.mubr.msk.f32.mxu0 %vm156_vm4, %v31047_v14  ;;  %24896 = vmatpush3.bf16.msra.mxu0 %v24893_v7 }
 0xb10   :  { %24898 = vmatprep.subr.bf16.mxu0 %v24897_v28 }
 0xb12   :  { %24535 = vmatmul.mubr.msk.f32.gmra.mrb[70].mxu0 %vm156_vm4, %v16734_v18  ;;  %v31295_v18 = vld [vmem:[#allocation8 + $0x148] sm:$0xff] }
 0xb13   :  { %24537 = vmatprep.mubr.msk.f32.mxu0 %vm156_vm4, %v30951_v40  ;;  %24900 = vmatpush3.bf16.msra.mxu0 %v24897_v28  ;;  %v24905_v40 = vpack.c.bf16 %v17215_v22, %v17214_v1 }
 0xb14   :  { %24902 = vmatprep.subr.bf16.mxu0 %v24901_v3 }
 0xb16   :  { %24538 = vmatmul.mubr.msk.f32.gmra.mrb[72].mxu0 %vm156_vm4, %v30955_v23  ;;  %v17216_v23 = vld [vmem:[#allocation5 + $0x220] sm:$0xff] }
 0xb17   :  { %24540 = vmatprep.mubr.msk.f32.mxu0 %vm156_vm4, %v30959_v41  ;;  %v17217_v41 = vld [vmem:[#allocation5 + $0x228] sm:$0xff] }
 0xb1a   :  { %24541 = vmatmul.mubr.msk.f32.gmra.mrb[74].mxu0 %vm156_vm4, %v30963_v2  ;;  %v24909_v2 = vpack.c.bf16 %v17217_v41, %v17216_v23 }
 0xb1b   :  { %24543 = vmatprep.mubr.msk.f32.mxu0 %vm156_vm4, %v30967_v0  ;;  %v17218_v0 = vld [vmem:[#allocation5 + $0x230] sm:$0xff] }
 0xb1e   :  { %24544 = vmatmul.mubr.msk.f32.gmra.mrb[76].mxu0 %vm156_vm4, %v30971_v4  ;;  %v17219_v4 = vld [vmem:[#allocation5 + $0x238] sm:$0xff] }
 0xb1f   :  { %24546 = vmatprep.mubr.msk.f32.mxu0 %vm156_vm4, %v31065_v32  ;;  %v24913_v14 = vpack.c.bf16 %v17219_v4, %v17218_v0  ;;  %v16966_v32 = vld [vmem:[#allocation4 + $0x71] sm:$0xff]  ;;  %v31303_v0 = vld [vmem:[#allocation8 + $0x188] sm:$0xff]  ;;  %v18236_v4 = vld [vmem:[#allocation8 + $0x100] sm:$0xff] }
 0xb22   :  { %24547 = vmatmul.mubr.msk.f32.gmra.mrb[78].mxu0 %vm156_vm4, %v16742_v53 }
 0xb23   :  { %24565 = vmatprep.mubr.msk.f32.mxu0 %vm156_vm4, %v31070_v42  ;;  %v16968_v42 = vld [vmem:[#allocation4 + $0x91] sm:$0xff] }
 0xb26   :  { %24566 = vmatmul.mubr.msk.f32.vlgmr.msra.gmra.mrb[64].mxu0 %vm156_vm4, %v31074_v57  ;;  %v26091_v57 = vld [vmem:[#allocation4 + $0xc1] sm:$0xff] }
 0xb27   :  { %24904 = vmatpush3.bf16.msra.mxu0 %v24901_v3  ;;  %24568 = vmatprep.mubr.msk.f32.mxu0 %vm156_vm4, %v31078_v38  ;;  %v26092_v38 = vld [vmem:[#allocation4 + $0xd1] sm:$0xff]  ;;  %v18047_v3 = vld [vmem:[#allocation8 + $0xc0] sm:$0xff] }
 0xb28   :  { %24906 = vmatprep.subr.bf16.mxu0 %v24905_v40 }
 0xb2a   :  { %24569 = vmatmul.mubr.msk.f32.gmra.mrb[66].mxu0 %vm156_vm4, %v31082_v6  ;;  %v16976_v6 = vld [vmem:[#allocation4 + $0x131] sm:$0xff] }
 0xb2b   :  { %24571 = vmatprep.mubr.msk.f32.mxu0 %vm156_vm4, %v31086_v43  ;;  %24908 = vmatpush3.bf16.msra.mxu0 %v24905_v40 }
 0xb2c   :  { %24910 = vmatprep.subr.bf16.mxu0 %v24909_v2 }
 0xb2e   :  { %24572 = vmatmul.mubr.msk.f32.gmra.mrb[68].mxu0 %vm156_vm4, %v16966_v32 }
 0xb2f   :  { %24574 = vmatprep.mubr.msk.f32.mxu0 %vm156_vm4, %v31091_v8  ;;  %24912 = vmatpush3.bf16.msra.mxu0 %v24909_v2 }
 0xb30   :  { %24914 = vmatprep.subr.bf16.mxu0 %v24913_v14 }
 0xb32   :  { %24575 = vmatmul.mubr.msk.f32.gmra.mrb[70].mxu0 %vm156_vm4, %v16968_v42 }
 0xb33   :  { %24577 = vmatprep.mubr.msk.f32.mxu0 %vm156_vm4, %v26091_v57  ;;  %24916 = vmatpush3.bf16.msra.mxu0 %v24913_v14 }
 0xb36   :  { %24578 = vmatmul.mubr.msk.f32.gmra.mrb[72].mxu0 %vm156_vm4, %v26092_v38 }
 0xb37   :  { %24580 = vmatprep.mubr.msk.f32.mxu0 %vm156_vm4, %v30819_v59  ;;  %v17202_v59 = vld [vmem:[#allocation4 + $0x92] sm:$0xff] }
 0xb3a   :  { %24581 = vmatmul.mubr.msk.f32.gmra.mrb[74].mxu0 %vm156_vm4, %v30857_v9  ;;  %v17210_v9 = vld [vmem:[#allocation4 + $0x132] sm:$0xff] }
 0xb3b   :  { %24583 = vmatprep.mubr.msk.f32.mxu0 %vm156_vm4, %v30883_v5  ;;  %v31238_v5 = vld [vmem:[%s32710_s4 + $0x2] ss:$0 sm:$0xff]  ;;  %s26205_s4 = smov [#allocation11]  }
 0xb3c   :  { %s19412_s16 = sshll.u32 %s26205_s4, 4  ;;  %s19413_s16 = int_to_ptr.vmem [resolvable:$true] %s19412_s16 }
 0xb3d   :  { %s26168_s17 = scalar_lea.vmem %s19413_s16, 64  ;;  %p26173_p11 = scmp.lt.s32.totalorder %s19413_s16, %s19413_s16 }
 0xb3e   :  { %24584 = vmatmul.mubr.msk.f32.gmra.mrb[76].mxu0 %vm156_vm4, %v30904_v47  ;;  %p26169_p10 = scmp.ne.s32.totalorder %s19413_s16, %s26168_s17  ;;  %p26174_p12 = scmp.lt.s32.totalorder %s26168_s17, %s26168_s17 }
 0xb3f   :  { %24586 = vmatprep.mubr.msk.f32.mxu0 %vm156_vm4, %v31108_v33 }
 0xb40   :  { %p26175_p13 = por %p26174_p12, %p26173_p11 }
 0xb42   :  { %24587 = vmatmul.mubr.msk.f32.gmra.mrb[78].mxu0 %vm156_vm4, %v16976_v6  ;;  %p26176_p0 = pnand %p26175_p13, %p26169_p10 }
 0xb43   :  { %24605 = vmatprep.mubr.msk.f32.mxu0 %vm156_vm4, %v30980_v11 }
 0xb46   :  { %24606 = vmatmul.mubr.msk.f32.vlgmr.msra.gmra.mrb[64].mxu0 %vm156_vm4, %v30984_v20 }
 0xb47   :  { %24608 = vmatprep.mubr.msk.f32.mxu0 %vm156_vm4, %v30988_v61 }
 0xb4a   :  { %24609 = vmatmul.mubr.msk.f32.gmra.mrb[66].mxu0 %vm156_vm4, %v30992_v56  ;;  %v31242_v56 = vld [vmem:[#allocation8 + $0x48] sm:$0xff] }
 0xb4b   :  { %24611 = vmatprep.mubr.msk.f32.mxu0 %vm156_vm4, %v30996_v15  ;;  %v31244_v15 = vld [vmem:[#allocation8 + $0x8] sm:$0xff] }
 0xb4e   :  { %24612 = vmatmul.mubr.msk.f32.gmra.mrb[68].mxu0 %vm156_vm4, %v31000_v10 }
 0xb4f   :  { %24614 = vmatprep.mubr.msk.f32.mxu0 %vm156_vm4, %v31126_v34 }
 0xb52   :  { %24615 = vmatmul.mubr.msk.f32.gmra.mrb[70].mxu0 %vm156_vm4, %v17202_v59 }
 0xb53   :  { %24617 = vmatprep.mubr.msk.f32.mxu0 %vm156_vm4, %v31009_v16 }
 0xb56   :  { %24618 = vmatmul.mubr.msk.f32.gmra.mrb[72].mxu0 %vm156_vm4, %v31013_v45 }
 0xb57   :  { %24620 = vmatprep.mubr.msk.f32.mxu0 %vm156_vm4, %v31017_v26  ;;  %v31252_v26 = vld [vmem:[#allocation8 + $0x88] sm:$0xff] }
 0xb5a   :  { %24621 = vmatmul.mubr.msk.f32.gmra.mrb[74].mxu0 %vm156_vm4, %v31021_v52  ;;  %v31254_v52 = vld [vmem:[#allocation8] sm:$0xff] }
 0xb5b   :  { %24623 = vmatprep.mubr.msk.f32.mxu0 %vm156_vm4, %v31025_v48 }
 0xb5e   :  { %24624 = vmatmul.mubr.msk.f32.gmra.mrb[76].mxu0 %vm156_vm4, %v31029_v58 }
 0xb5f   :  { %24626 = vmatprep.mubr.msk.f32.mxu0 %vm156_vm4, %v31144_v27 }
 0xb62   :  { %24627 = vmatmul.mubr.msk.f32.gmra.mrb[78].mxu0 %vm156_vm4, %v17210_v9 }
 0xc19   :  { %v24607_v47 = vpop.f32.mrb[64].mxu0 }
 0xc1a   :  { %v17434_v11 = vadd.f32 %v24607_v47, %v31238_v5  ;;  %v17334_v20 = vpop.f32.mrb[65].mxu0  ;;  %v31316_v47 = vld [vmem:[#allocation8 + $0x1c8] sm:$0xff] }
 0xc1b   :  { %v17433_v61 = vadd.f32 %v31238_v5, %v17334_v20 }
 0xc1c   :  { %v31246_v10 = vmax.f32 %v17434_v11, 0.0  ;;  %v18425_v11 = vld [vmem:[#allocation8 + $0x140] sm:$0xff] }
 0xc1d   :  { %v31248_v16 = vmax.f32 %v17433_v61, 0.0  ;;  %v31250_v45 = vpop.f32.mrb[66].mxu0 }
 0xc1e   :  { %v17344_v48 = vpop.f32.mrb[67].mxu0  ;;  %v17678_v58 = vmul.f32 %v31242_v56, %v31246_v10  ;;  %v17474_v43 = vmul.f32 %v31244_v15, %v31246_v10  ;;  %v17867_v55 = vmul.f32 %v31252_v26, %v31246_v10  ;;  %v18056_v34 = vmul.f32 %v31269_v46, %v31246_v10 }
 0xc1f   :  { %v31261_v8 = vadd.f32 %v31238_v5, %v17344_v48  ;;  %v17473_v19 = vmul.f32 %v31254_v52, %v31248_v16  ;;  %v17677_v27 = vmul.f32 %v17669_v60, %v31248_v16  ;;  %v18245_v28 = vmul.f32 %v31282_v31, %v31246_v10  ;;  %v18614_v60 = vld [vmem:[#allocation8 + $0x180] sm:$0xff] }
 0xc20   :  { %v17696_v33 = vsel %vm156_vm4, %v17678_v58, 0.0  ;;  %v17492_v54 = vsel %vm156_vm4, %v17474_v43, 0.0  ;;  %v17885_v39 = vsel %vm156_vm4, %v17867_v55, 0.0  ;;  %v18074_v29 = vsel %vm156_vm4, %v18056_v34, 0.0 }
 0xc21   :  { %17697 = vadd.xlane.f32.xlu1 %v17696_v33  ;;  %17493 = vadd.xlane.f32.xlu0 %v17492_v54  ;;  %v24613_v50 = vpop.f32.mrb[68].mxu0  ;;  %v17489_v13 = vsel %vm156_vm4, %v17473_v19, 0.0  ;;  %v17693_v21 = vsel %vm156_vm4, %v17677_v27, 0.0  ;;  %v17866_v35 = vmul.f32 %v17858_v62, %v31248_v16  ;;  %v18263_v22 = vsel %vm156_vm4, %v18245_v28, 0.0  ;;  %v31331_v19 = vld [vmem:[#allocation8 + $0x208] sm:$0xff]  ;;  %v18803_v28 = vld [vmem:[#allocation8 + $0x1c0] sm:$0xff] }
 0xc22   :  { %v31272_v30 = vadd.f32 %v24613_v50, %v31238_v5  ;;  %v17354_v37 = vpop.f32.mrb[69].mxu0  ;;  %v18434_v23 = vmul.f32 %v31295_v18, %v31246_v10  ;;  %v18055_v41 = vmul.f32 %v18047_v3, %v31248_v16  ;;  %v18623_v6 = vmul.f32 %v31303_v0, %v31246_v10 }
 0xc23   :  { %v31275_v17 = vadd.f32 %v31238_v5, %v17354_v37  ;;  %v17882_v40 = vsel %vm156_vm4, %v17866_v35, 0.0  ;;  %v18244_v59 = vmul.f32 %v18236_v4, %v31248_v16  ;;  %v18812_v54 = vmul.f32 %v31316_v47, %v31246_v10 }
 0xc24   :  { %v18452_v57 = vsel %vm156_vm4, %v18434_v23, 0.0  ;;  %v18071_v38 = vsel %vm156_vm4, %v18055_v41, 0.0  ;;  %v18641_v43 = vsel %vm156_vm4, %v18623_v6, 0.0  ;;  %v18433_v55 = vmul.f32 %v18425_v11, %v31248_v16 }
 0xc25   :  { %17886 = vadd.xlane.f32.xlu1 %v17885_v39  ;;  %17490 = vadd.xlane.f32.xlu0 %v17489_v13  ;;  %v24616_v12 = vpop.f32.mrb[70].mxu0  ;;  %v18260_v33 = vsel %vm156_vm4, %v18244_v59, 0.0  ;;  %v19001_v34 = vmul.f32 %v31331_v19, %v31246_v10  ;;  %v18830_v62 = vsel %vm156_vm4, %v18812_v54, 0.0 }
 0xc26   :  { %v31285_v36 = vadd.f32 %v24616_v12, %v31238_v5  ;;  %v17364_v49 = vpop.f32.mrb[71].mxu0 }
 0xc27   :  { %v31288_v7 = vadd.f32 %v31238_v5, %v17364_v49  ;;  %v18449_v49 = vsel %vm156_vm4, %v18433_v55, 0.0 }
 0xc29   :  { %18075 = vadd.xlane.f32.xlu1 %v18074_v29  ;;  %17694 = vadd.xlane.f32.xlu0 %v17693_v21  ;;  %v24619_v44 = vpop.f32.mrb[72].mxu0  ;;  %v18622_v29 = vmul.f32 %v18614_v60, %v31248_v16  ;;  %v31349_v21 = vld [vmem:[#allocation8 + $0x248] sm:$0xff]  ;;  %v31396_v60 = vld [vmem:[#allocation8 + $0xd8] sm:$0xff] }
 0xc2a   :  { %v17374_v53 = vpop.f32.mrb[73].mxu0  ;;  %v17442_v12 = vadd.f32 %v24619_v44, %v31238_v5  ;;  %v19190_v35 = vmul.f32 %v31349_v21, %v31246_v10 }
 0xc2b   :  { %v17441_v1 = vadd.f32 %v31238_v5, %v17374_v53  ;;  %v18638_v44 = vsel %vm156_vm4, %v18622_v29, 0.0  ;;  %v18811_v53 = vmul.f32 %v18803_v28, %v31248_v16 }
 0xc2c   :  { %v31353_v3 = vmax.f32 %v17442_v12, 0.0 }
 0xc2d   :  { %18264 = vadd.xlane.f32.xlu1 %v18263_v22  ;;  %17883 = vadd.xlane.f32.xlu0 %v17882_v40  ;;  %v24622_v2 = vpop.f32.mrb[74].mxu0  ;;  %v31321_v48 = vmax.f32 %v17441_v1, 0.0  ;;  %v18992_v1 = vld [vmem:[#allocation8 + $0x200] sm:$0xff]  ;;  %v17436_v22 = vadd.f32 %v31250_v45, %v31238_v5  ;;  %v19208_v40 = vsel %vm156_vm4, %v19190_v35, 0.0  ;;  %v18827_v23 = vsel %vm156_vm4, %v18811_v53, 0.0  ;;  %v31412_v35 = vld [vmem:[#allocation8 + $0x158] sm:$0xff] }
 0xc2e   :  { %v31306_v14 = vadd.f32 %v24622_v2, %v31238_v5  ;;  %v17384_v32 = vpop.f32.mrb[75].mxu0  ;;  %v19000_v10 = vmul.f32 %v18992_v1, %v31248_v16  ;;  %v17482_v41 = vmul.f32 %v31244_v15, %v31353_v3  ;;  %v19181_v2 = vld [vmem:[#allocation8 + $0x240] sm:$0xff]  ;;  %v17686_v45 = vmul.f32 %v31242_v56, %v31353_v3  ;;  %v31420_v1 = vld [vmem:[#allocation8 + $0x198] sm:$0xff] }
 0xc2f   :  { %v31309_v42 = vadd.f32 %v31238_v5, %v17384_v32  ;;  %v31343_v27 = vmul.f32 %v31254_v52, %v31321_v48  ;;  %v19019_v52 = vsel %vm156_vm4, %v19001_v34, 0.0  ;;  %v31365_v4 = vmax.f32 %v17436_v22, 0.0 }
 0xc30   :  { %v19016_v32 = vsel %vm156_vm4, %v19000_v10, 0.0  ;;  %v17720_v6 = vsel %vm156_vm4, %v17686_v45, 0.0  ;;  %v18442_v12 = vmul.f32 %v31295_v18, %v31353_v3  ;;  %v18631_v28 = vmul.f32 %v31303_v0, %v31353_v3  ;;  %v31428_v10 = vld [vmem:[#allocation8 + $0x1d8] sm:$0xff] }
 0xc31   :  { %18453 = vadd.xlane.f32.xlu1 %v18452_v57  ;;  %18072 = vadd.xlane.f32.xlu0 %v18071_v38  ;;  %v24625_v9 = vpop.f32.mrb[76].mxu0  ;;  %v17516_v57 = vsel %vm156_vm4, %v17482_v41, 0.0  ;;  %v31372_v38 = vld [vmem:[#allocation8 + $0x18] sm:$0xff]  ;;  %v18058_v34 = vmul.f32 %v31396_v60, %v31365_v4  ;;  %v18820_v53 = vmul.f32 %v31316_v47, %v31353_v3 }
 0xc32   :  { %v31319_v20 = vadd.f32 %v24625_v9, %v31238_v5  ;;  %v17394_v61 = vpop.f32.mrb[77].mxu0  ;;  %v17476_v59 = vmul.f32 %v31372_v38, %v31365_v4  ;;  %v17875_v9 = vmul.f32 %v31252_v26, %v31353_v3 }
 0xc33   :  { %v31324_v58 = vadd.f32 %v31238_v5, %v17394_v61  ;;  %v18854_v22 = vsel %vm156_vm4, %v18820_v53, 0.0 }
 0xc34   :  { %v17498_v56 = vsel %vm156_vm4, %v17476_v59, 0.0  ;;  %v17909_v11 = vsel %vm156_vm4, %v17875_v9, 0.0 }
 0xc35   :  { %18642 = vadd.xlane.f32.xlu1 %v18641_v43  ;;  %18261 = vadd.xlane.f32.xlu0 %v18260_v33  ;;  %v24628_v50 = vpop.f32.mrb[78].mxu0  ;;  %v18064_v43 = vmul.f32 %v31269_v46, %v31353_v3  ;;  %v31388_v33 = vld [vmem:[#allocation8 + $0x98] sm:$0xff] }
 0xc36   :  { %v31334_v37 = vadd.f32 %v24628_v50, %v31238_v5  ;;  %v17404_v39 = vpop.f32.mrb[79].mxu0  ;;  %v17869_v55 = vmul.f32 %v31388_v33, %v31365_v4  ;;  %v18253_v50 = vmul.f32 %v31282_v31, %v31353_v3  ;;  %v18080_v31 = vsel %vm156_vm4, %v18058_v34, 0.0  ;;  %v31481_v34 = vld [vmem:[#allocation8 + $0xd0] sm:$0xff] }
 0xc37   :  { %v31337_v13 = vadd.f32 %v31238_v5, %v17404_v39  ;;  %v19189_v5 = vmul.f32 %v19181_v2, %v31248_v16  ;;  %v31380_v16 = vld [vmem:[#allocation8 + $0x58] sm:$0xff]  ;;  %v18098_v54 = vsel %vm156_vm4, %v18064_v43, 0.0  ;;  %v18814_v2 = vmul.f32 %v31428_v10, %v31365_v4 }
 0xc38   :  { %v17680_v61 = vmul.f32 %v31380_v16, %v31365_v4  ;;  %v17891_v46 = vsel %vm156_vm4, %v17869_v55, 0.0  ;;  %v18287_v39 = vsel %vm156_vm4, %v18253_v50, 0.0  ;;  %v31473_v55 = vld [vmem:[#allocation8 + $0x90] sm:$0xff] }
 0xc39   :  { %18831 = vadd.xlane.f32.xlu1 %v18830_v62  ;;  %18450 = vadd.xlane.f32.xlu0 %v18449_v49  ;;  %v19205_v15 = vsel %vm156_vm4, %v19189_v5, 0.0  ;;  %v31404_v62 = vld [vmem:[#allocation8 + $0x118] sm:$0xff]  ;;  %v18476_v49 = vsel %vm156_vm4, %v18442_v12, 0.0  ;;  %v18836_v5 = vsel %vm156_vm4, %v18814_v2, 0.0  ;;  %v31513_v2 = vld [vmem:[#allocation8 + $0x1d0] sm:$0xff] }
 0xc3a   :  { %v17702_v26 = vsel %vm156_vm4, %v17680_v61, 0.0  ;;  %v18247_v29 = vmul.f32 %v31404_v62, %v31365_v4 }
 0xc3c   :  { %v18269_v18 = vsel %vm156_vm4, %v18247_v29, 0.0  ;;  %v31489_v29 = vld [vmem:[#allocation8 + $0x110] sm:$0xff] }
 0xc3d   :  { %19020 = vadd.xlane.f32.xlu1 %v19019_v52  ;;  %18639 = vadd.xlane.f32.xlu0 %v18638_v44  ;;  %v18665_v52 = vsel %vm156_vm4, %v18631_v28, 0.0  ;;  %v18436_v44 = vmul.f32 %v31412_v35, %v31365_v4 }
 0xc3f   :  { %v18458_v0 = vsel %vm156_vm4, %v18436_v44, 0.0  ;;  %v31497_v44 = vld [vmem:[#allocation8 + $0x150] sm:$0xff] }
 0xc41   :  { %19209 = vadd.xlane.f32.xlu1 %v19208_v40  ;;  %18828 = vadd.xlane.f32.xlu0 %v18827_v23  ;;  %v18625_v40 = vmul.f32 %v31420_v1, %v31365_v4  ;;  %v19009_v23 = vmul.f32 %v31331_v19, %v31353_v3  ;;  %v31439_v19 = vmax.f32 %v31306_v14, 0.0  ;;  %v17513_v14 = vsel %vm156_vm4, %v31343_v27, 0.0 }
 0xc43   :  { %v18647_v47 = vsel %vm156_vm4, %v18625_v40, 0.0  ;;  %v19043_v41 = vsel %vm156_vm4, %v19009_v23, 0.0  ;;  %v17484_v9 = vmul.f32 %v31372_v38, %v31439_v19  ;;  %v17688_v27 = vmul.f32 %v31380_v16, %v31439_v19  ;;  %v31505_v40 = vld [vmem:[#allocation8 + $0x190] sm:$0xff] }
 0xc45   :  { %19017 = vadd.xlane.f32.xlu0 %v19016_v32  ;;  %17517 = vadd.xlane.f32.xlu1 %v17516_v57  ;;  %v19198_v32 = vmul.f32 %v31349_v21, %v31353_v3  ;;  %v31436_v57 = vld [vmem:[#allocation8 + $0x218] sm:$0xff]  ;;  %v31448_v21 = vmax.f32 %v31261_v8, 0.0  ;;  %v17522_v8 = vsel %vm156_vm4, %v17484_v9, 0.0  ;;  %v17726_v43 = vsel %vm156_vm4, %v17688_v27, 0.0 }
 0xc47   :  { %v19232_v45 = vsel %vm156_vm4, %v19198_v32, 0.0 }
 0xc49   :  { %19206 = vadd.xlane.f32.xlu0 %v19205_v15  ;;  %17721 = vadd.xlane.f32.xlu1 %v17720_v6  ;;  %v19003_v15 = vmul.f32 %v31436_v57, %v31365_v4  ;;  %v31445_v6 = vld [vmem:[#allocation8 + $0x258] sm:$0xff] }
 0xc4a   :  { %v19192_v59 = vmul.f32 %v31445_v6, %v31365_v4  ;;  %v31465_v4 = vld [vmem:[#allocation8 + $0x50] sm:$0xff]  ;;  %v19200_v9 = vmul.f32 %v31445_v6, %v31439_v19 }
 0xc4b   :  { %v19025_v3 = vsel %vm156_vm4, %v19003_v15, 0.0  ;;  %v31521_v15 = vld [vmem:[#allocation8 + $0x210] sm:$0xff] }
 0xc4d   :  { %17499 = vadd.xlane.f32.xlu0 %v17498_v56  ;;  %17910 = vadd.xlane.f32.xlu1 %v17909_v11  ;;  %v31457_v56 = vld [vmem:[#allocation8 + $0x10] sm:$0xff]  ;;  %v19214_v11 = vsel %vm156_vm4, %v19192_v59, 0.0  ;;  %v19002_v59 = vmul.f32 %v31521_v15, %v31448_v21 }
 0xc4e   :  { %v17475_v61 = vmul.f32 %v31457_v56, %v31448_v21 }
 0xc50   :  { %v17495_v38 = vsel %vm156_vm4, %v17475_v61, 0.0 }
 0xc51   :  { %17703 = vadd.xlane.f32.xlu0 %v17702_v26  ;;  %18099 = vadd.xlane.f32.xlu1 %v18098_v54  ;;  %v17679_v26 = vmul.f32 %v31465_v4, %v31448_v21  ;;  %v17877_v54 = vmul.f32 %v31388_v33, %v31439_v19 }
 0xc53   :  { %v17699_v16 = vsel %vm156_vm4, %v17679_v26, 0.0  ;;  %v17915_v50 = vsel %vm156_vm4, %v17877_v54, 0.0 }
 0xc55   :  { %17892 = vadd.xlane.f32.xlu0 %v17891_v46  ;;  %18288 = vadd.xlane.f32.xlu1 %v18287_v39  ;;  %v17868_v46 = vmul.f32 %v31473_v55, %v31448_v21  ;;  %v18066_v39 = vmul.f32 %v31396_v60, %v31439_v19 }
 0xc57   :  { %v17888_v33 = vsel %vm156_vm4, %v17868_v46, 0.0  ;;  %v18104_v12 = vsel %vm156_vm4, %v18066_v39, 0.0 }
 0xc59   :  { %18081 = vadd.xlane.f32.xlu0 %v18080_v31  ;;  %18477 = vadd.xlane.f32.xlu1 %v18476_v49  ;;  %v18057_v31 = vmul.f32 %v31481_v34, %v31448_v21  ;;  %v18255_v49 = vmul.f32 %v31404_v62, %v31439_v19 }
 0xc5b   :  { %v18077_v60 = vsel %vm156_vm4, %v18057_v31, 0.0  ;;  %v18293_v28 = vsel %vm156_vm4, %v18255_v49, 0.0 }
 0xc5d   :  { %18270 = vadd.xlane.f32.xlu0 %v18269_v18  ;;  %18666 = vadd.xlane.f32.xlu1 %v18665_v52  ;;  %v18246_v18 = vmul.f32 %v31489_v29, %v31448_v21  ;;  %v18444_v52 = vmul.f32 %v31412_v35, %v31439_v19 }
 0xc5f   :  { %v18266_v62 = vsel %vm156_vm4, %v18246_v18, 0.0  ;;  %v18482_v53 = vsel %vm156_vm4, %v18444_v52, 0.0 }
 0xc61   :  { %18459 = vadd.xlane.f32.xlu0 %v18458_v0  ;;  %18855 = vadd.xlane.f32.xlu1 %v18854_v22  ;;  %v18435_v0 = vmul.f32 %v31497_v44, %v31448_v21  ;;  %v18633_v22 = vmul.f32 %v31420_v1, %v31439_v19 }
 0xc63   :  { %v18455_v35 = vsel %vm156_vm4, %v18435_v0, 0.0  ;;  %v18671_v23 = vsel %vm156_vm4, %v18633_v22, 0.0 }
 0xc65   :  { %18648 = vadd.xlane.f32.xlu0 %v18647_v47  ;;  %19044 = vadd.xlane.f32.xlu1 %v19043_v41  ;;  %v18624_v47 = vmul.f32 %v31505_v40, %v31448_v21  ;;  %v18822_v41 = vmul.f32 %v31428_v10, %v31439_v19  ;;  %v31524_v10 = vmax.f32 %v31309_v42, 0.0  ;;  %v19022_v42 = vsel %vm156_vm4, %v19002_v59, 0.0 }
 0xc67   :  { %v18644_v1 = vsel %vm156_vm4, %v18624_v47, 0.0  ;;  %v18860_v32 = vsel %vm156_vm4, %v18822_v41, 0.0  ;;  %v17483_v27 = vmul.f32 %v31457_v56, %v31524_v10  ;;  %v31595_v47 = vld [vmem:[#allocation8 + $0x1a8] sm:$0xff] }
 0xc69   :  { %18837 = vadd.xlane.f32.xlu0 %v18836_v5  ;;  %19233 = vadd.xlane.f32.xlu1 %v19232_v45  ;;  %v18813_v5 = vmul.f32 %v31513_v2, %v31448_v21  ;;  %v19011_v45 = vmul.f32 %v31436_v57, %v31439_v19  ;;  %v31532_v57 = vld [vmem:[#allocation8 + $0x250] sm:$0xff]  ;;  %v31543_v19 = vld [vmem:[#allocation8 + $0x28] sm:$0xff] }
 0xc6a   :  { %v19191_v61 = vmul.f32 %v31532_v57, %v31448_v21  ;;  %v31551_v21 = vld [vmem:[#allocation8 + $0x68] sm:$0xff] }
 0xc6c   :  { %v19211_v6 = vsel %vm156_vm4, %v19191_v61, 0.0 }
 0xc6d   :  { %19026 = vadd.xlane.f32.xlu0 %v19025_v3  ;;  %17514 = vadd.xlane.f32.xlu1 %v17513_v14  ;;  %v18833_v3 = vsel %vm156_vm4, %v18813_v5, 0.0  ;;  %v19049_v14 = vsel %vm156_vm4, %v19011_v45, 0.0 }
 0xc71   :  { %19215 = vadd.xlane.f32.xlu0 %v19214_v11  ;;  %17523 = vadd.xlane.f32.xlu1 %v17522_v8  ;;  %v31535_v11 = vmax.f32 %v31272_v30, 0.0  ;;  %v19238_v8 = vsel %vm156_vm4, %v19200_v9, 0.0 }
 0xc73   :  { %v17478_v30 = vmul.f32 %v31543_v19, %v31535_v11  ;;  %v17682_v54 = vmul.f32 %v31551_v21, %v31535_v11 }
 0xc75   :  { %17496 = vadd.xlane.f32.xlu0 %v17495_v38  ;;  %17727 = vadd.xlane.f32.xlu1 %v17726_v43  ;;  %v17519_v38 = vsel %vm156_vm4, %v17483_v27, 0.0  ;;  %v17687_v43 = vmul.f32 %v31465_v4, %v31524_v10  ;;  %v17504_v56 = vsel %vm156_vm4, %v17478_v30, 0.0  ;;  %v17708_v4 = vsel %vm156_vm4, %v17682_v54, 0.0  ;;  %v31623_v30 = vld [vmem:[#allocation8 + $0x228] sm:$0xff] }
 0xc77   :  { %v17723_v26 = vsel %vm156_vm4, %v17687_v43, 0.0 }
 0xc79   :  { %17700 = vadd.xlane.f32.xlu0 %v17699_v16  ;;  %17916 = vadd.xlane.f32.xlu1 %v17915_v50  ;;  %v17876_v16 = vmul.f32 %v31473_v55, %v31524_v10  ;;  %v31559_v50 = vld [vmem:[#allocation8 + $0xa8] sm:$0xff] }
 0xc7a   :  { %v17871_v39 = vmul.f32 %v31559_v50, %v31535_v11 }
 0xc7b   :  { %v17912_v46 = vsel %vm156_vm4, %v17876_v16, 0.0 }
 0xc7c   :  { %v17897_v55 = vsel %vm156_vm4, %v17871_v39, 0.0  ;;  %v19199_v39 = vmul.f32 %v31532_v57, %v31524_v10 }
 0xc7d   :  { %17889 = vadd.xlane.f32.xlu0 %v17888_v33  ;;  %18105 = vadd.xlane.f32.xlu1 %v18104_v12  ;;  %v18065_v33 = vmul.f32 %v31481_v34, %v31524_v10  ;;  %v31567_v12 = vld [vmem:[#allocation8 + $0xe8] sm:$0xff]  ;;  %v31578_v34 = vand.u32 127, %v13382_v24 }
 0xc7e   :  { %v18060_v49 = vmul.f32 %v31567_v12, %v31535_v11 }
 0xc7f   :  { %v18101_v31 = vsel %vm156_vm4, %v18065_v33, 0.0  ;;  %v17559_v0 = vadd.s32 4294967288, %v31578_v34 }
 0xc80   :  { %v18086_v18 = vsel %vm156_vm4, %v18060_v49, 0.0  ;;  %v31642_v49 = vmax.f32 %v31275_v17, 0.0  ;;  %v31655_v17 = vld [vmem:[#allocation8 + $0x20] sm:$0xff] }
 0xc81   :  { %18078 = vadd.xlane.f32.xlu0 %v18077_v60  ;;  %18294 = vadd.xlane.f32.xlu1 %v18293_v28  ;;  %v18254_v60 = vmul.f32 %v31489_v29, %v31524_v10  ;;  %v31575_v28 = vld [vmem:[#allocation8 + $0x128] sm:$0xff] }
 0xc82   :  { %v31586_v29 = vld [vmem:[#allocation8 + $0x168] sm:$0xff] }
 0xc83   :  { %v18290_v52 = vsel %vm156_vm4, %v18254_v60, 0.0 }
 0xc85   :  { %18267 = vadd.xlane.f32.xlu0 %v18266_v62  ;;  %18483 = vadd.xlane.f32.xlu1 %v18482_v53  ;;  %v18249_v62 = vmul.f32 %v31575_v28, %v31535_v11  ;;  %v18443_v53 = vmul.f32 %v31497_v44, %v31524_v10 }
 0xc87   :  { %v18275_v22 = vsel %vm156_vm4, %v18249_v62, 0.0  ;;  %v18479_v24 = vsel %vm156_vm4, %v18443_v53, 0.0 }
 0xc89   :  { %18456 = vadd.xlane.f32.xlu0 %v18455_v35  ;;  %18672 = vadd.xlane.f32.xlu1 %v18671_v23  ;;  %v18438_v35 = vmul.f32 %v31586_v29, %v31535_v11  ;;  %v18632_v23 = vmul.f32 %v31505_v40, %v31524_v10  ;;  %v18627_v40 = vmul.f32 %v31595_v47, %v31535_v11 }
 0xc8b   :  { %v18464_v5 = vsel %vm156_vm4, %v18438_v35, 0.0  ;;  %v18668_v45 = vsel %vm156_vm4, %v18632_v23, 0.0  ;;  %v18653_v61 = vsel %vm156_vm4, %v18627_v40, 0.0 }
 0xc8d   :  { %18645 = vadd.xlane.f32.xlu0 %v18644_v1  ;;  %18861 = vadd.xlane.f32.xlu1 %v18860_v32  ;;  %v31598_v1 = vsub.s32 %v17559_v0, %v30296_v25  ;;  %v31602_v32 = vsub.s32 %v31578_v34, %v30296_v25 }
 0xc91   :  { %18834 = vadd.xlane.f32.xlu0 %v18833_v3  ;;  %19050 = vadd.xlane.f32.xlu1 %v19049_v14  ;;  %v18821_v3 = vmul.f32 %v31513_v2, %v31524_v10  ;;  %v31610_v14 = vld [vmem:[#allocation8 + $0x1e8] sm:$0xff]  ;;  %v19010_v2 = vmul.f32 %v31521_v15, %v31524_v10  ;;  %v19235_v10 = vsel %vm156_vm4, %v19199_v39, 0.0 }
 0xc93   :  { %v18857_v27 = vsel %vm156_vm4, %v18821_v3, 0.0  ;;  %v19046_v15 = vsel %vm156_vm4, %v19010_v2, 0.0 }
 0xc95   :  { %19023 = vadd.xlane.f32.xlu0 %v19022_v42  ;;  %19239 = vadd.xlane.f32.xlu1 %v19238_v8 }
 0xc99   :  { %19212 = vadd.xlane.f32.xlu0 %v19211_v6  ;;  %17520 = vadd.xlane.f32.xlu1 %v17519_v38  ;;  %v18816_v6 = vmul.f32 %v31610_v14, %v31535_v11 }
 0xc9d   :  { %17505 = vadd.xlane.f32.xlu0 %v17504_v56  ;;  %17724 = vadd.xlane.f32.xlu1 %v17723_v26  ;;  %v31626_v26 = vmax.f32 %v31319_v20, 0.0  ;;  %v31639_v20 = vld [vmem:[#allocation8 + $0x268] sm:$0xff] }
 0xc9e   :  { %v19194_v57 = vmul.f32 %v31639_v20, %v31535_v11 }
 0xc9f   :  { %v17486_v62 = vmul.f32 %v31543_v19, %v31626_v26  ;;  %v17477_v19 = vmul.f32 %v31655_v17, %v31642_v49 }
 0xca0   :  { %v19220_v23 = vsel %vm156_vm4, %v19194_v57, 0.0 }
 0xca1   :  { %17709 = vadd.xlane.f32.xlu0 %v17708_v4  ;;  %17913 = vadd.xlane.f32.xlu1 %v17912_v46  ;;  %v18842_v4 = vsel %vm156_vm4, %v18816_v6, 0.0  ;;  %v19005_v46 = vmul.f32 %v31623_v30, %v31535_v11  ;;  %v17528_v11 = vsel %vm156_vm4, %v17486_v62, 0.0  ;;  %v31707_v62 = vld [vmem:[#allocation8 + $0x120] sm:$0xff] }
 0xca5   :  { %17898 = vadd.xlane.f32.xlu0 %v17897_v55  ;;  %18102 = vadd.xlane.f32.xlu1 %v18101_v31 }
 0xca9   :  { %18087 = vadd.xlane.f32.xlu0 %v18086_v18  ;;  %18291 = vadd.xlane.f32.xlu1 %v18290_v52  ;;  %v19031_v52 = vsel %vm156_vm4, %v19005_v46, 0.0  ;;  %v31694_v46 = vld [vmem:[#allocation8 + $0xe0] sm:$0xff] }
 0xcad   :  { %18276 = vadd.xlane.f32.xlu0 %v18275_v22  ;;  %18480 = vadd.xlane.f32.xlu1 %v18479_v24 }
 0xcae   :  { %v17698_v44 = vpop.xlane.xlu1 %17697  ;;  %v17494_v41 = vpop.xlane.xlu0 %17493 }
 0xcaf   :  { %v17563_v42 = vrot.slane %v17494_v41, %v31598_v1  ;;  %v17764_v54 = vrot.slane %v17698_v44, %v31598_v1  ;;  %v17690_v44 = vmul.f32 %v31551_v21, %v31626_v26 }
 0xcb1   :  { %18465 = vadd.xlane.f32.xlu0 %v18464_v5  ;;  %18669 = vadd.xlane.f32.xlu1 %v18668_v45  ;;  %v31668_v5 = vld [vmem:[#allocation8 + $0x60] sm:$0xff] }
 0xcb2   :  { %v17887_v59 = vpop.xlane.xlu1 %17886  ;;  %v17491_v9 = vpop.xlane.xlu0 %17490  ;;  %v17681_v21 = vmul.f32 %v31668_v5, %v31642_v49 }
 0xcb3   :  { %v17558_v8 = vrot.slane %v17491_v9, %v31602_v32  ;;  %v17953_v60 = vrot.slane %v17887_v59, %v31598_v1  ;;  %v17501_v9 = vsel %vm156_vm4, %v17477_v19, 0.0  ;;  %v18446_v19 = vmul.f32 %v31586_v29, %v31626_v26 }
 0xcb5   :  { %v31621_v38 = vsel %vm17564_vm14, %v17563_v42, %v17558_v8  ;;  %18654 = vadd.xlane.f32.xlu0 %v18653_v61  ;;  %18858 = vadd.xlane.f32.xlu1 %v18857_v27  ;;  %v17732_v42 = vsel %vm156_vm4, %v17690_v44, 0.0  ;;  %v17879_v8 = vmul.f32 %v31559_v50, %v31626_v26  ;;  %v31681_v27 = vld [vmem:[#allocation8 + $0xa0] sm:$0xff] }
 0xcb6   :  { %v18076_v43 = vpop.xlane.xlu1 %18075  ;;  %v17695_v56 = vpop.xlane.xlu0 %17694  ;;  %v17870_v50 = vmul.f32 %v31681_v27, %v31642_v49 }
 0xcb7   :  { %v17760_v16 = vrot.slane %v17695_v56, %v31602_v32  ;;  %v18142_v24 = vrot.slane %v18076_v43, %v31598_v1 }
 0xcb9   :  { %v31637_v33 = vsel %vm17564_vm14, %v17764_v54, %v17760_v16  ;;  %18843 = vadd.xlane.f32.xlu0 %v18842_v4  ;;  %19047 = vadd.xlane.f32.xlu1 %v19046_v15  ;;  %v17705_v54 = vsel %vm156_vm4, %v17681_v21, 0.0  ;;  %v17921_v16 = vsel %vm156_vm4, %v17879_v8, 0.0  ;;  %v18068_v4 = vmul.f32 %v31567_v12, %v31626_v26 }
 0xcba   :  { %v18265_v55 = vpop.xlane.xlu1 %18264  ;;  %v17884_v31 = vpop.xlane.xlu0 %17883  ;;  %v18059_v12 = vmul.f32 %v31694_v46, %v31642_v49  ;;  %v18488_v21 = vsel %vm156_vm4, %v18446_v19, 0.0  ;;  %v18635_v8 = vmul.f32 %v31595_v47, %v31626_v26  ;;  %v31777_v19 = vld [vmem:[#allocation8 + $0x260] sm:$0xff] }
 0xcbb   :  { %v17949_v18 = vrot.slane %v17884_v31, %v31602_v32  ;;  %v18331_v3 = vrot.slane %v18265_v55, %v31598_v1 }
 0xcbd   :  { %v31653_v53 = vsel %vm17564_vm14, %v17953_v60, %v17949_v18  ;;  %19032 = vadd.xlane.f32.xlu0 %v19031_v52  ;;  %19236 = vadd.xlane.f32.xlu1 %v19235_v10  ;;  %v17894_v18 = vsel %vm156_vm4, %v17870_v50, 0.0  ;;  %v18110_v52 = vsel %vm156_vm4, %v18068_v4, 0.0  ;;  %v18257_v10 = vmul.f32 %v31575_v28, %v31626_v26 }
 0xcbe   :  { %v18454_v0 = vpop.xlane.xlu1 %18453  ;;  %v18073_v22 = vpop.xlane.xlu0 %18072  ;;  %v18248_v28 = vmul.f32 %v31707_v62, %v31642_v49  ;;  %v18677_v4 = vsel %vm156_vm4, %v18635_v8, 0.0 }
 0xcbf   :  { %v18138_v35 = vrot.slane %v18073_v22, %v31602_v32  ;;  %v18520_v43 = vrot.slane %v18454_v0, %v31598_v1 }
 0xcc1   :  { %v31666_v41 = vsel %vm17564_vm14, %v18142_v24, %v18138_v35  ;;  %19221 = vadd.xlane.f32.xlu0 %v19220_v23  ;;  %17529 = vadd.xlane.f32.xlu1 %v17528_v11  ;;  %v18083_v23 = vsel %vm156_vm4, %v18059_v12, 0.0  ;;  %v18299_v11 = vsel %vm156_vm4, %v18257_v10, 0.0 }
 0xcc2   :  { %v18643_v45 = vpop.xlane.xlu1 %18642  ;;  %v18262_v40 = vpop.xlane.xlu0 %18261 }
 0xcc3   :  { %v18327_v59 = vrot.slane %v18262_v40, %v31602_v32  ;;  %v18709_v31 = vrot.slane %v18643_v45, %v31598_v1  ;;  %v31720_v45 = vld [vmem:[#allocation8 + $0x160] sm:$0xff] }
 0xcc4   :  { %v18437_v29 = vmul.f32 %v31720_v45, %v31642_v49 }
 0xcc5   :  { %v31679_v61 = vsel %vm17564_vm14, %v18331_v3, %v18327_v59  ;;  %17502 = vadd.xlane.f32.xlu0 %v17501_v9  ;;  %17733 = vadd.xlane.f32.xlu1 %v17732_v42  ;;  %v18272_v42 = vsel %vm156_vm4, %v18248_v28, 0.0 }
 0xcc6   :  { %v18832_v6 = vpop.xlane.xlu1 %18831  ;;  %v18451_v2 = vpop.xlane.xlu0 %18450  ;;  %v18461_v50 = vsel %vm156_vm4, %v18437_v29, 0.0 }
 0xcc7   :  { %v18516_v56 = vrot.slane %v18451_v2, %v31602_v32  ;;  %v18898_v24 = vrot.slane %v18832_v6, %v31598_v1  ;;  %v31735_v2 = vld [vmem:[#allocation8 + $0x1a0] sm:$0xff] }
 0xcc8   :  { %v18626_v47 = vmul.f32 %v31735_v2, %v31642_v49 }
 0xcc9   :  { %v31692_v15 = vsel %vm17564_vm14, %v18520_v43, %v18516_v56  ;;  %17706 = vadd.xlane.f32.xlu0 %v17705_v54  ;;  %17922 = vadd.xlane.f32.xlu1 %v17921_v16 }
 0xcca   :  { %v19021_v39 = vpop.xlane.xlu1 %19020  ;;  %v18640_v55 = vpop.xlane.xlu0 %18639 }
 0xccb   :  { %v18705_v60 = vrot.slane %v18640_v55, %v31602_v32  ;;  %v19087_v59 = vrot.slane %v19021_v39, %v31598_v1  ;;  %v18824_v39 = vmul.f32 %v31610_v14, %v31626_v26  ;;  %v19013_v14 = vmul.f32 %v31623_v30, %v31626_v26 }
 0xccc   :  { %v19202_v30 = vmul.f32 %v31639_v20, %v31626_v26  ;;  %v31792_v20 = vld [vmem:[#allocation8 + $0x38] sm:$0xff] }
 0xccd   :  { %v31705_v57 = vsel %vm17564_vm14, %v18709_v31, %v18705_v60  ;;  %17895 = vadd.xlane.f32.xlu0 %v17894_v18  ;;  %18111 = vadd.xlane.f32.xlu1 %v18110_v52  ;;  %v31750_v31 = vld [vmem:[#allocation8 + $0x1e0] sm:$0xff]  ;;  %v18650_v52 = vsel %vm156_vm4, %v18626_v47, 0.0  ;;  %v18866_v12 = vsel %vm156_vm4, %v18824_v39, 0.0 }
 0xcce   :  { %v19210_v0 = vpop.xlane.xlu1 %19209  ;;  %v18829_v22 = vpop.xlane.xlu0 %18828  ;;  %v18815_v10 = vmul.f32 %v31750_v31, %v31642_v49 }
 0xccf   :  { %v18894_v35 = vrot.slane %v18829_v22, %v31602_v32  ;;  %v19276_v54 = vrot.slane %v19210_v0, %v31598_v1  ;;  %v31762_v0 = vld [vmem:[#allocation8 + $0x220] sm:$0xff] }
 0xcd0   :  { %v19004_v28 = vmul.f32 %v31762_v0, %v31642_v49 }
 0xcd1   :  { %v31718_v44 = vsel %vm17564_vm14, %v18898_v24, %v18894_v35  ;;  %18084 = vadd.xlane.f32.xlu0 %v18083_v23  ;;  %18300 = vadd.xlane.f32.xlu1 %v18299_v11  ;;  %v31769_v35 = vmax.f32 %v31324_v58, 0.0  ;;  %v18839_v23 = vsel %vm156_vm4, %v18815_v10, 0.0  ;;  %v19055_v11 = vsel %vm156_vm4, %v19013_v14, 0.0 }
 0xcd2   :  { %v19018_v40 = vpop.xlane.xlu0 %19017  ;;  %v31722_v3 = vpop.xlane.xlu1 %17517  ;;  %v31784_v58 = vmax.f32 %v31285_v36, 0.0 }
 0xcd3   :  { %v19083_v9 = vrot.slane %v19018_v40, %v31602_v32  ;;  %v17485_v26 = vmul.f32 %v31655_v17, %v31769_v35  ;;  %v31804_v17 = vld [vmem:[#allocation8 + $0x78] sm:$0xff] }
 0xcd4   :  { %v17684_v39 = vmul.f32 %v31804_v17, %v31784_v58 }
 0xcd5   :  { %v31733_v6 = vsel %vm17564_vm14, %v19087_v59, %v19083_v9  ;;  %18273 = vadd.xlane.f32.xlu0 %v18272_v42  ;;  %18489 = vadd.xlane.f32.xlu1 %v18488_v21  ;;  %v19028_v9 = vsel %vm156_vm4, %v19004_v28, 0.0  ;;  %v19244_v42 = vsel %vm156_vm4, %v19202_v30, 0.0  ;;  %v19193_v21 = vmul.f32 %v31777_v19, %v31642_v49 }
 0xcd6   :  { %v19207_v43 = vpop.xlane.xlu0 %19206  ;;  %v31737_v56 = vpop.xlane.xlu1 %17721  ;;  %v17689_v49 = vmul.f32 %v31668_v5, %v31769_v35  ;;  %v31816_v5 = vld [vmem:[#allocation8 + $0xb8] sm:$0xff]  ;;  %v17714_v14 = vsel %vm156_vm4, %v17684_v39, 0.0  ;;  %v18067_v28 = vmul.f32 %v31694_v46, %v31769_v35  ;;  %v18445_v39 = vmul.f32 %v31720_v45, %v31769_v35 }
 0xcd7   :  { %v19272_v16 = vrot.slane %v19207_v43, %v31602_v32  ;;  %v19217_v36 = vsel %vm156_vm4, %v19193_v21, 0.0  ;;  %v17525_v43 = vsel %vm156_vm4, %v17485_v26, 0.0  ;;  %v31840_v46 = vld [vmem:[#allocation8 + $0x138] sm:$0xff] }
 0xcd8   :  { %v17729_v47 = vsel %vm156_vm4, %v17689_v49, 0.0  ;;  %v18107_v21 = vsel %vm156_vm4, %v18067_v28, 0.0  ;;  %v18485_v45 = vsel %vm156_vm4, %v18445_v39, 0.0 }
 0xcd9   :  { %v31748_v55 = vsel %vm17564_vm14, %v19276_v54, %v19272_v16  ;;  %18462 = vadd.xlane.f32.xlu0 %v18461_v50  ;;  %18678 = vadd.xlane.f32.xlu1 %v18677_v4  ;;  %v17480_v54 = vmul.f32 %v31792_v20, %v31784_v58 }
 0xcda   :  { %v31752_v60 = vpop.xlane.xlu0 %17499  ;;  %v31754_v18 = vpop.xlane.xlu1 %17910 }
 0xcdb   :  { %v17510_v4 = vsel %vm156_vm4, %v17480_v54, 0.0 }
 0xcdd   :  { %18651 = vadd.xlane.f32.xlu0 %v18650_v52  ;;  %18867 = vadd.xlane.f32.xlu1 %v18866_v12  ;;  %v17878_v52 = vmul.f32 %v31681_v27, %v31769_v35  ;;  %v31828_v27 = vld [vmem:[#allocation8 + $0xf8] sm:$0xff] }
 0xcde   :  { %v31764_v22 = vpop.xlane.xlu0 %17703  ;;  %v31766_v24 = vpop.xlane.xlu1 %18099  ;;  %v18062_v26 = vmul.f32 %v31828_v27, %v31784_v58 }
 0xce0   :  { %v18092_v49 = vsel %vm156_vm4, %v18062_v26, 0.0 }
 0xce1   :  { %18840 = vadd.xlane.f32.xlu0 %v18839_v23  ;;  %19056 = vadd.xlane.f32.xlu1 %v19055_v11  ;;  %v17918_v23 = vsel %vm156_vm4, %v17878_v52, 0.0  ;;  %v17873_v11 = vmul.f32 %v31816_v5, %v31784_v58 }
 0xce2   :  { %v31779_v40 = vpop.xlane.xlu0 %17892  ;;  %v31781_v59 = vpop.xlane.xlu1 %18288 }
 0xce5   :  { %19029 = vadd.xlane.f32.xlu0 %v19028_v9  ;;  %19245 = vadd.xlane.f32.xlu1 %v19244_v42  ;;  %v17903_v42 = vsel %vm156_vm4, %v17873_v11, 0.0  ;;  %v17573_v11 = vadd.s32 4294967272, %v31578_v34 }
 0xce6   :  { %v31794_v29 = vpop.xlane.xlu0 %18081  ;;  %v31796_v8 = vpop.xlane.xlu1 %18477 }
 0xce9   :  { %19218 = vadd.xlane.f32.xlu0 %v19217_v36  ;;  %17526 = vadd.xlane.f32.xlu1 %v17525_v43  ;;  %v18256_v36 = vmul.f32 %v31707_v62, %v31769_v35  ;;  %v31852_v62 = vld [vmem:[#allocation8 + $0x178] sm:$0xff] }
 0xcea   :  { %v31806_v16 = vpop.xlane.xlu0 %18270  ;;  %v31808_v50 = vpop.xlane.xlu1 %18666  ;;  %v18440_v26 = vmul.f32 %v31852_v62, %v31784_v58 }
 0xcec   :  { %v18470_v51 = vsel %vm156_vm4, %v18440_v26, 0.0 }
 0xced   :  { %17511 = vadd.xlane.f32.xlu0 %v17510_v4  ;;  %17730 = vadd.xlane.f32.xlu1 %v17729_v47  ;;  %v18296_v4 = vsel %vm156_vm4, %v18256_v36, 0.0  ;;  %v18251_v47 = vmul.f32 %v31840_v46, %v31784_v58  ;;  %v18634_v36 = vmul.f32 %v31735_v2, %v31769_v35 }
 0xcee   :  { %v31818_v12 = vpop.xlane.xlu0 %18459  ;;  %v31820_v10 = vpop.xlane.xlu1 %18855 }
 0xcef   :  { %v18674_v2 = vsel %vm156_vm4, %v18634_v36, 0.0 }
 0xcf1   :  { %17715 = vadd.xlane.f32.xlu0 %v17714_v14  ;;  %17919 = vadd.xlane.f32.xlu1 %v17918_v23  ;;  %v17615_v23 = vrot.slane %v31722_v3, %v31598_v1  ;;  %v31870_v3 = vld [vmem:[#allocation8 + $0x1b8] sm:$0xff] }
 0xcf2   :  { %v31830_v30 = vpop.xlane.xlu0 %18648  ;;  %v31832_v9 = vpop.xlane.xlu1 %19044 }
 0xcf3   :  { %33216 = vst [vmem:[#allocation36_spill] sm:$0xff] %v31832_v9 }
 0xcf5   :  { %17904 = vadd.xlane.f32.xlu0 %v17903_v42  ;;  %18108 = vadd.xlane.f32.xlu1 %v18107_v21  ;;  %v17566_v42 = vadd.s32 4294967280, %v31578_v34  ;;  %v18281_v21 = vsel %vm156_vm4, %v18251_v47, 0.0  ;;  %v31877_v47 = vsub.s32 %v17573_v11, %v30296_v25 }
 0xcf6   :  { %v31842_v43 = vpop.xlane.xlu0 %18837  ;;  %v31844_v54 = vpop.xlane.xlu1 %19233 }
 0xcf7   :  { %33217 = vst [vmem:[#allocation37_spill] sm:$0xff] %v31844_v54  ;;  %v31880_v39 = vsub.s32 %v17566_v42, %v30296_v25  ;;  %v17577_v36 = vrot.slane %v31752_v60, %v31877_v47  ;;  %v31911_v60 = vmax.f32 %v31288_v7, 0.0 }
 0xcf9   :  { %18093 = vadd.xlane.f32.xlu0 %v18092_v49  ;;  %18297 = vadd.xlane.f32.xlu1 %v18296_v4 }
 0xcfa   :  { %v31854_v52 = vpop.xlane.xlu0 %19026  ;;  %v17515_v14 = vpop.xlane.xlu1 %17514 }
 0xcfb   :  { %v17611_v28 = vrot.slane %v17515_v14, %v31602_v32 }
 0xcfd   :  { %v31868_v49 = vsel %vm17564_vm14, %v17615_v23, %v17611_v28  ;;  %18282 = vadd.xlane.f32.xlu0 %v18281_v21  ;;  %18486 = vadd.xlane.f32.xlu1 %v18485_v45  ;;  %v18629_v23 = vmul.f32 %v31870_v3, %v31784_v58  ;;  %v18823_v28 = vmul.f32 %v31750_v31, %v31769_v35  ;;  %v31888_v21 = vld [vmem:[#allocation8 + $0x1f8] sm:$0xff] }
 0xcfe   :  { %v31872_v4 = vpop.xlane.xlu0 %19215  ;;  %v31874_v14 = vpop.xlane.xlu1 %17523  ;;  %v18818_v26 = vmul.f32 %v31888_v21, %v31784_v58 }
 0xcff   :  { %v18659_v63 = vsel %vm156_vm4, %v18629_v23, 0.0  ;;  %v18863_v31 = vsel %vm156_vm4, %v18823_v28, 0.0  ;;  %v31914_v23 = vmax.f32 %v31334_v37, 0.0  ;;  %v31927_v37 = vld [vmem:[#allocation8 + $0x30] sm:$0xff] }
 0xd01   :  { %18471 = vadd.xlane.f32.xlu0 %v18470_v51  ;;  %18675 = vadd.xlane.f32.xlu1 %v18674_v2  ;;  %v19012_v51 = vmul.f32 %v31762_v0, %v31769_v35  ;;  %v31901_v2 = vld [vmem:[#allocation8 + $0x238] sm:$0xff] }
 0xd02   :  { %v17497_v11 = vpop.xlane.xlu0 %17496  ;;  %v31890_v45 = vpop.xlane.xlu1 %17727  ;;  %v19007_v28 = vmul.f32 %v31901_v2, %v31784_v58 }
 0xd03   :  { %33218 = vst [vmem:[#allocation38_spill] sm:$0xff] %v31890_v45  ;;  %v17570_v42 = vrot.slane %v17497_v11, %v31880_v39 }
 0xd05   :  { %v17572_v54 = vsel %vm17571_vm15, %v17570_v42, %v31621_v38  ;;  %18660 = vadd.xlane.f32.xlu0 %v18659_v63  ;;  %18864 = vadd.xlane.f32.xlu1 %v18863_v31  ;;  %v17774_v63 = vrot.slane %v31764_v22, %v31877_v47  ;;  %v18848_v38 = vsel %vm156_vm4, %v18818_v26, 0.0  ;;  %v19052_v42 = vsel %vm156_vm4, %v19012_v51, 0.0 }
 0xd06   :  { %v17701_v11 = vpop.xlane.xlu0 %17700  ;;  %v31905_v45 = vpop.xlane.xlu1 %17916  ;;  %v31908_v9 = vsel %vm17578_vm0, %v17577_v36, %v17572_v54  ;;  %v19201_v54 = vmul.f32 %v31777_v19, %v31769_v35  ;;  %v19037_v26 = vsel %vm156_vm4, %v19007_v28, 0.0  ;;  %v17963_v35 = vrot.slane %v31779_v40, %v31877_v47 }
 0xd07   :  { %v17769_v0 = vrot.slane %v17701_v11, %v31880_v39  ;;  %v17488_v51 = vmul.f32 %v31792_v20, %v31914_v23  ;;  %v18152_v20 = vrot.slane %v31794_v29, %v31877_v47 }
 0xd08   :  { %v19241_v19 = vsel %vm156_vm4, %v19201_v54, 0.0 }
 0xd09   :  { %v17770_v7 = vsel %vm17571_vm15, %v17769_v0, %v31637_v33  ;;  %18849 = vadd.xlane.f32.xlu0 %v18848_v38  ;;  %19053 = vadd.xlane.f32.xlu1 %v19052_v42  ;;  %v17479_v33 = vmul.f32 %v31927_v37, %v31911_v60  ;;  %v31943_v0 = vld [vmem:[#allocation8 + $0x70] sm:$0xff] }
 0xd0a   :  { %v17890_v36 = vpop.xlane.xlu0 %17889  ;;  %v31929_v31 = vpop.xlane.xlu1 %18105  ;;  %v31932_v11 = vsel %vm17578_vm0, %v17774_v63, %v17770_v7  ;;  %v17683_v54 = vmul.f32 %v31943_v0, %v31911_v60 }
 0xd0b   :  { %v17958_v22 = vrot.slane %v17890_v36, %v31880_v39  ;;  %v17507_v7 = vsel %vm156_vm4, %v17479_v33, 0.0  ;;  %v17692_v36 = vmul.f32 %v31804_v17, %v31914_v23  ;;  %v18341_v17 = vrot.slane %v31806_v16, %v31877_v47 }
 0xd0d   :  { %v17959_v63 = vsel %vm17571_vm15, %v17958_v22, %v31653_v53  ;;  %19038 = vadd.xlane.f32.xlu0 %v19037_v26  ;;  %19242 = vadd.xlane.f32.xlu1 %v19241_v19  ;;  %v17534_v53 = vsel %vm156_vm4, %v17488_v51, 0.0  ;;  %v31961_v22 = vld [vmem:[#allocation8 + $0xb0] sm:$0xff]  ;;  %v17711_v51 = vsel %vm156_vm4, %v17683_v54, 0.0 }
 0xd0e   :  { %v18079_v38 = vpop.xlane.xlu0 %18078  ;;  %v31947_v28 = vpop.xlane.xlu1 %18294  ;;  %v31950_v40 = vsel %vm17578_vm0, %v17963_v35, %v17959_v63  ;;  %v17872_v33 = vmul.f32 %v31961_v22, %v31911_v60 }
 0xd0f   :  { %v18147_v42 = vrot.slane %v18079_v38, %v31880_v39  ;;  %v17881_v38 = vmul.f32 %v31816_v5, %v31914_v23  ;;  %v18530_v5 = vrot.slane %v31818_v12, %v31877_v47 }
 0xd11   :  { %v18148_v26 = vsel %vm17571_vm15, %v18147_v42, %v31666_v41  ;;  %17508 = vadd.xlane.f32.xlu0 %v17507_v7  ;;  %17535 = vadd.xlane.f32.xlu1 %v17534_v53  ;;  %v17738_v41 = vsel %vm156_vm4, %v17692_v36, 0.0  ;;  %v31979_v42 = vld [vmem:[#allocation8 + $0xf0] sm:$0xff]  ;;  %v17900_v36 = vsel %vm156_vm4, %v17872_v33, 0.0 }
 0xd12   :  { %v18268_v35 = vpop.xlane.xlu0 %18267  ;;  %v31965_v19 = vpop.xlane.xlu1 %18483  ;;  %v31968_v63 = vsel %vm17578_vm0, %v18152_v20, %v18148_v26  ;;  %v18061_v54 = vmul.f32 %v31979_v42, %v31911_v60 }
 0xd13   :  { %33219 = vst [vmem:[#allocation39_spill] sm:$0xff] %v31965_v19  ;;  %v18336_v29 = vrot.slane %v18268_v35, %v31880_v39  ;;  %v18070_v35 = vmul.f32 %v31828_v27, %v31914_v23  ;;  %v18719_v27 = vrot.slane %v31830_v30, %v31877_v47 }
 0xd14   :  { %v18089_v33 = vsel %vm156_vm4, %v18061_v54, 0.0 }
 0xd15   :  { %v18337_v20 = vsel %vm17571_vm15, %v18336_v29, %v31679_v61  ;;  %17712 = vadd.xlane.f32.xlu0 %v17711_v51  ;;  %17739 = vadd.xlane.f32.xlu1 %v17738_v41  ;;  %v17927_v61 = vsel %vm156_vm4, %v17881_v38, 0.0  ;;  %v18116_v38 = vsel %vm156_vm4, %v18070_v35, 0.0 }
 0xd16   :  { %v18457_v7 = vpop.xlane.xlu0 %18456  ;;  %v31983_v53 = vpop.xlane.xlu1 %18672  ;;  %v31986_v26 = vsel %vm17578_vm0, %v18341_v17, %v18337_v20  ;;  %v31999_v17 = vld [vmem:[#allocation8 + $0x130] sm:$0xff] }
 0xd17   :  { %33220 = vst [vmem:[#allocation40_spill] sm:$0xff] %v31983_v53  ;;  %v18525_v16 = vrot.slane %v18457_v7, %v31880_v39  ;;  %v18259_v7 = vmul.f32 %v31840_v46, %v31914_v23  ;;  %v18908_v46 = vrot.slane %v31842_v43, %v31877_v47 }
 0xd19   :  { %v18526_v29 = vsel %vm17571_vm15, %v18525_v16, %v31692_v15  ;;  %17901 = vadd.xlane.f32.xlu0 %v17900_v36  ;;  %17928 = vadd.xlane.f32.xlu1 %v17927_v61  ;;  %v18250_v15 = vmul.f32 %v31999_v17, %v31911_v60  ;;  %v32015_v16 = vld [vmem:[#allocation8 + $0x170] sm:$0xff] }
 0xd1a   :  { %v18646_v51 = vpop.xlane.xlu0 %18645  ;;  %v32001_v41 = vpop.xlane.xlu1 %18861  ;;  %v32004_v20 = vsel %vm17578_vm0, %v18530_v5, %v18526_v29  ;;  %v18439_v35 = vmul.f32 %v32015_v16, %v31911_v60 }
 0xd1b   :  { %33221 = vst [vmem:[#allocation41_spill] sm:$0xff] %v32001_v41  ;;  %v18714_v12 = vrot.slane %v18646_v51, %v31880_v39  ;;  %v18278_v29 = vsel %vm156_vm4, %v18250_v15, 0.0  ;;  %v18448_v51 = vmul.f32 %v31852_v62, %v31914_v23  ;;  %v19097_v62 = vrot.slane %v31854_v52, %v31877_v47 }
 0xd1d   :  { %v18715_v5 = vsel %vm17571_vm15, %v18714_v12, %v31705_v57  ;;  %18090 = vadd.xlane.f32.xlu0 %v18089_v33  ;;  %18117 = vadd.xlane.f32.xlu1 %v18116_v38  ;;  %v18305_v57 = vsel %vm156_vm4, %v18259_v7, 0.0  ;;  %v32033_v12 = vld [vmem:[#allocation8 + $0x1b0] sm:$0xff]  ;;  %v18467_v7 = vsel %vm156_vm4, %v18439_v35, 0.0 }
 0xd1e   :  { %v18835_v36 = vpop.xlane.xlu0 %18834  ;;  %v32019_v54 = vpop.xlane.xlu1 %19050  ;;  %v32022_v30 = vsel %vm17578_vm0, %v18719_v27, %v18715_v5  ;;  %v18628_v15 = vmul.f32 %v32033_v12, %v31911_v60 }
 0xd1f   :  { %33222 = vst [vmem:[#allocation42_spill] sm:$0xff] %v32019_v54  ;;  %v18903_v61 = vrot.slane %v18835_v36, %v31880_v39  ;;  %v18637_v36 = vmul.f32 %v31870_v3, %v31914_v23  ;;  %v26098_v54 = vld [vmem:[#allocation8 + $0x180] sm:$0xff] }
 0xd21   :  { %v18904_v33 = vsel %vm17571_vm15, %v18903_v61, %v31718_v44  ;;  %18279 = vadd.xlane.f32.xlu0 %v18278_v29  ;;  %18306 = vadd.xlane.f32.xlu1 %v18305_v57  ;;  %v18494_v44 = vsel %vm156_vm4, %v18448_v51, 0.0  ;;  %v32051_v61 = vld [vmem:[#allocation8 + $0x1f0] sm:$0xff]  ;;  %v18656_v51 = vsel %vm156_vm4, %v18628_v15, 0.0 }
 0xd22   :  { %v19024_v27 = vpop.xlane.xlu0 %19023  ;;  %v32037_v38 = vpop.xlane.xlu1 %19239  ;;  %v32040_v5 = vsel %vm17578_vm0, %v18908_v46, %v18904_v33  ;;  %v18817_v3 = vmul.f32 %v32051_v61, %v31911_v60 }
 0xd23   :  { %33223 = vst [vmem:[#allocation43_spill] sm:$0xff] %v32037_v38  ;;  %v19092_v43 = vrot.slane %v19024_v27, %v31880_v39  ;;  %v19286_v27 = vrot.slane %v31872_v4, %v31877_v47  ;;  %v26097_v38 = vld [vmem:[#allocation8 + $0x140] sm:$0xff] }
 0xd25   :  { %v19093_v46 = vsel %vm17571_vm15, %v19092_v43, %v31733_v6  ;;  %18468 = vadd.xlane.f32.xlu0 %v18467_v7  ;;  %18495 = vadd.xlane.f32.xlu1 %v18494_v44  ;;  %v17625_v6 = vrot.slane %v31874_v14, %v31877_v47  ;;  %v18683_v43 = vsel %vm156_vm4, %v18637_v36, 0.0  ;;  %v32074_v44 = vld [vmem:[#allocation8 + $0x230] sm:$0xff] }
 0xd26   :  { %v19213_v29 = vpop.xlane.xlu0 %19212  ;;  %v17521_v57 = vpop.xlane.xlu1 %17520  ;;  %v32056_v33 = vsel %vm17578_vm0, %v19097_v62, %v19093_v46  ;;  %v18826_v62 = vmul.f32 %v31888_v21, %v31914_v23  ;;  %v32087_v21 = vmax.f32 %v31337_v13, 0.0 }
 0xd27   :  { %v19281_v52 = vrot.slane %v19213_v29, %v31880_v39  ;;  %v17620_v35 = vrot.slane %v17521_v57, %v31880_v39  ;;  %v19006_v29 = vmul.f32 %v32074_v44, %v31911_v60  ;;  %v19015_v57 = vmul.f32 %v31901_v2, %v31914_v23 }
 0xd29   :  { %v19282_v7 = vsel %vm17571_vm15, %v19281_v52, %v31748_v55  ;;  %v17621_v15 = vsel %vm17571_vm15, %v17620_v35, %v31868_v49  ;;  %18657 = vadd.xlane.f32.xlu0 %v18656_v51  ;;  %18684 = vadd.xlane.f32.xlu1 %v18683_v43  ;;  %v18845_v55 = vsel %vm156_vm4, %v18817_v3, 0.0  ;;  %v18872_v49 = vsel %vm156_vm4, %v18826_v62, 0.0 }
 0xd2a   :  { %v32076_v46 = vpop.xlane.xlu0 %17505  ;;  %v32078_v4 = vpop.xlane.xlu1 %17724  ;;  %v32081_v14 = vsel %vm17578_vm0, %v19286_v27, %v19282_v7  ;;  %v32084_v36 = vsel %vm17578_vm0, %v17625_v6, %v17621_v15  ;;  %v19034_v51 = vsel %vm156_vm4, %v19006_v29, 0.0  ;;  %v19061_v13 = vsel %vm156_vm4, %v19015_v57, 0.0  ;;  %v26093_v27 = vld [vmem:[#allocation8 + $0x40] sm:$0xff] }
 0xd2b   :  { %v17685_v3 = vmul.f32 %v26093_v27, %v31321_v48  ;;  %v17487_v6 = vmul.f32 %v31927_v37, %v32087_v21  ;;  %v26094_v15 = vld [vmem:[#allocation8 + $0x80] sm:$0xff] }
 0xd2d   :  { %18846 = vadd.xlane.f32.xlu0 %v18845_v55  ;;  %18873 = vadd.xlane.f32.xlu1 %v18872_v49  ;;  %v17717_v62 = vsel %vm156_vm4, %v17685_v3, 0.0  ;;  %v17531_v7 = vsel %vm156_vm4, %v17487_v6, 0.0  ;;  %v17874_v55 = vmul.f32 %v26094_v15, %v31321_v48  ;;  %v17691_v49 = vmul.f32 %v31943_v0, %v32087_v21  ;;  %v26096_v15 = vld [vmem:[#allocation8 + $0x100] sm:$0xff] }
 0xd2e   :  { %v32095_v52 = vpop.xlane.xlu0 %17709  ;;  %v32097_v35 = vpop.xlane.xlu1 %17913  ;;  %v17880_v3 = vmul.f32 %v31961_v22, %v32087_v21 }
 0xd2f   :  { %v17906_v57 = vsel %vm156_vm4, %v17874_v55, 0.0  ;;  %v18252_v55 = vmul.f32 %v26096_v15, %v31321_v48 }
 0xd31   :  { %19035 = vadd.xlane.f32.xlu0 %v19034_v51  ;;  %19062 = vadd.xlane.f32.xlu1 %v19061_v13  ;;  %v17735_v51 = vsel %vm156_vm4, %v17691_v49, 0.0  ;;  %v26095_v13 = vld [vmem:[#allocation8 + $0xc0] sm:$0xff]  ;;  %v18069_v49 = vmul.f32 %v31979_v42, %v32087_v21 }
 0xd32   :  { %v32104_v43 = vpop.xlane.xlu0 %17898  ;;  %v32106_v2 = vpop.xlane.xlu1 %18102  ;;  %v18063_v27 = vmul.f32 %v26095_v13, %v31321_v48 }
 0xd35   :  { %17718 = vadd.xlane.f32.xlu0 %v17717_v62  ;;  %17532 = vadd.xlane.f32.xlu1 %v17531_v7  ;;  %v18095_v62 = vsel %vm156_vm4, %v18063_v27, 0.0  ;;  %v17924_v7 = vsel %vm156_vm4, %v17880_v3, 0.0  ;;  %v18441_v27 = vmul.f32 %v26097_v38, %v31321_v48  ;;  %v18258_v3 = vmul.f32 %v31999_v17, %v32087_v21 }
 0xd36   :  { %v32113_v29 = vpop.xlane.xlu0 %18087  ;;  %v32115_v37 = vpop.xlane.xlu1 %18291 }
 0xd39   :  { %17907 = vadd.xlane.f32.xlu0 %v17906_v57  ;;  %17736 = vadd.xlane.f32.xlu1 %v17735_v51  ;;  %v18284_v57 = vsel %vm156_vm4, %v18252_v55, 0.0  ;;  %v18113_v51 = vsel %vm156_vm4, %v18069_v49, 0.0  ;;  %v18630_v55 = vmul.f32 %v26098_v54, %v31321_v48  ;;  %v18447_v49 = vmul.f32 %v32015_v16, %v32087_v21 }
 0xd3a   :  { %v32122_v6 = vpop.xlane.xlu0 %18276  ;;  %v32124_v0 = vpop.xlane.xlu1 %18480 }
 0xd3b   :  { %33224 = vst [vmem:[#allocation44_spill] sm:$0xff] %v32124_v0 }
 0xd3d   :  { %18096 = vadd.xlane.f32.xlu0 %v18095_v62  ;;  %17925 = vadd.xlane.f32.xlu1 %v17924_v7  ;;  %v18473_v62 = vsel %vm156_vm4, %v18441_v27, 0.0  ;;  %v18302_v7 = vsel %vm156_vm4, %v18258_v3, 0.0  ;;  %v18636_v3 = vmul.f32 %v32033_v12, %v32087_v21 }
 0xd3e   :  { %v32131_v13 = vpop.xlane.xlu0 %18465  ;;  %v32133_v22 = vpop.xlane.xlu1 %18669 }
 0xd3f   :  { %33225 = vst [vmem:[#allocation45_spill] sm:$0xff] %v32133_v22 }
 0xd41   :  { %18285 = vadd.xlane.f32.xlu0 %v18284_v57  ;;  %18114 = vadd.xlane.f32.xlu1 %v18113_v51  ;;  %v18662_v57 = vsel %vm156_vm4, %v18630_v55, 0.0  ;;  %v18491_v51 = vsel %vm156_vm4, %v18447_v49, 0.0  ;;  %v18680_v55 = vsel %vm156_vm4, %v18636_v3, 0.0  ;;  %v26101_v3 = vld [vmem:[#allocation8 + $0x240] sm:$0xff] }
 0xd42   :  { %v32140_v15 = vpop.xlane.xlu0 %18654  ;;  %v32142_v42 = vpop.xlane.xlu1 %18858  ;;  %v19197_v41 = vmul.f32 %v26101_v3, %v31321_v48 }
 0xd43   :  { %33226 = vst [vmem:[#allocation46_spill] sm:$0xff] %v32142_v42  ;;  %v26099_v42 = vld [vmem:[#allocation8 + $0x1c0] sm:$0xff] }
 0xd44   :  { %v18819_v27 = vmul.f32 %v26099_v42, %v31321_v48  ;;  %v18825_v42 = vmul.f32 %v32051_v61, %v32087_v21  ;;  %v19187_v61 = vld [vmem:[#allocation8 + $0x270] sm:$0xff]  ;;  %v19229_v22 = vsel %vm156_vm4, %v19197_v41, 0.0 }
 0xd45   :  { %18474 = vadd.xlane.f32.xlu0 %v18473_v62  ;;  %18303 = vadd.xlane.f32.xlu1 %v18302_v7  ;;  %v17580_v62 = vadd.s32 4294967264, %v31578_v34 }
 0xd46   :  { %v32149_v38 = vpop.xlane.xlu0 %18843  ;;  %v32151_v17 = vpop.xlane.xlu1 %19047  ;;  %v18851_v7 = vsel %vm156_vm4, %v18819_v27, 0.0  ;;  %v18869_v27 = vsel %vm156_vm4, %v18825_v42, 0.0  ;;  %v19195_v42 = vmul.f32 %v19187_v61, %v31911_v60 }
 0xd47   :  { %33227 = vst [vmem:[#allocation47_spill] sm:$0xff] %v32151_v17  ;;  %v26100_v17 = vld [vmem:[#allocation8 + $0x200] sm:$0xff] }
 0xd48   :  { %v19008_v49 = vmul.f32 %v26100_v17, %v31321_v48  ;;  %v19014_v17 = vmul.f32 %v32074_v44, %v32087_v21  ;;  %v19203_v48 = vmul.f32 %v19187_v61, %v32087_v21  ;;  %v19223_v41 = vsel %vm156_vm4, %v19195_v42, 0.0 }
 0xd49   :  { %18663 = vadd.xlane.f32.xlu0 %v18662_v57  ;;  %18492 = vadd.xlane.f32.xlu1 %v18491_v51  ;;  %v32173_v51 = vsub.s32 %v17580_v62, %v30296_v25 }
 0xd4a   :  { %v32158_v54 = vpop.xlane.xlu0 %19032  ;;  %v32160_v16 = vpop.xlane.xlu1 %19236 }
 0xd4b   :  { %33228 = vst [vmem:[#allocation48_spill] sm:$0xff] %v32160_v16  ;;  %v19040_v16 = vsel %vm156_vm4, %v19008_v49, 0.0  ;;  %v19058_v49 = vsel %vm156_vm4, %v19014_v17, 0.0  ;;  %v19247_v17 = vsel %vm156_vm4, %v19203_v48, 0.0 }
 0xd4d   :  { %18852 = vadd.xlane.f32.xlu0 %v18851_v7  ;;  %18681 = vadd.xlane.f32.xlu1 %v18680_v55 }
 0xd4e   :  { %v32168_v12 = vpop.xlane.xlu0 %19221  ;;  %v32170_v57 = vpop.xlane.xlu1 %17529 }
 0xd51   :  { %19041 = vadd.xlane.f32.xlu0 %v19040_v16  ;;  %18870 = vadd.xlane.f32.xlu1 %v18869_v27  ;;  %v19188_v16 = vld [vmem:[#allocation8 + $0x278] sm:$0xff] }
 0xd52   :  { %v17503_v7 = vpop.xlane.xlu0 %17502  ;;  %v32180_v55 = vpop.xlane.xlu1 %17733  ;;  %v19196_v60 = vmul.f32 %v19188_v16, %v31784_v58  ;;  %v19204_v21 = vmul.f32 %v19188_v16, %v31914_v23 }
 0xd53   :  { %v17584_v62 = vrot.slane %v17503_v7, %v32173_v51 }
 0xd54   :  { %v19250_v42 = vsel %vm156_vm4, %v19204_v21, 0.0 }
 0xd55   :  { %v32189_v44 = vsel %vm17585_vm1, %v17584_v62, %v31908_v9  ;;  %19230 = vadd.xlane.f32.xlu0 %v19229_v22  ;;  %19059 = vadd.xlane.f32.xlu1 %v19058_v49  ;;  %v19226_v49 = vsel %vm156_vm4, %v19196_v60, 0.0  ;;  %vm17606_vm4 = vcmask 523712  }
 0xd56   :  { %v17707_v27 = vpop.xlane.xlu0 %17706  ;;  %v32191_v3 = vpop.xlane.xlu1 %17922 }
 0xd57   :  { %v17779_v7 = vrot.slane %v17707_v27, %v32173_v51 }
 0xd59   :  { %v32200_v9 = vsel %vm17585_vm1, %v17779_v7, %v31932_v11  ;;  %19224 = vadd.xlane.f32.xlu0 %v19223_v41  ;;  %19248 = vadd.xlane.f32.xlu1 %v19247_v17  ;;  %v17587_v17 = vadd.s32 4294967256, %v31578_v34 }
 0xd5a   :  { %v17896_v22 = vpop.xlane.xlu0 %17895  ;;  %v32202_v61 = vpop.xlane.xlu1 %18111 }
 0xd5b   :  { %v17968_v62 = vrot.slane %v17896_v22, %v32173_v51 }
 0xd5d   :  { %v32209_v58 = vsel %vm17585_vm1, %v17968_v62, %v31950_v40  ;;  %19227 = vadd.xlane.f32.xlu0 %v19226_v49  ;;  %19251 = vadd.xlane.f32.xlu1 %v19250_v42  ;;  %v32234_v62 = vsub.s32 %v17587_v17, %v30296_v25 }
 0xd5e   :  { %v18085_v23 = vpop.xlane.xlu0 %18084  ;;  %v32211_v11 = vpop.xlane.xlu1 %18300 }
 0xd5f   :  { %33229 = vst [vmem:[#allocation49_spill] sm:$0xff] %v32211_v11  ;;  %v18157_v48 = vrot.slane %v18085_v23, %v32173_v51  ;;  %v18729_v23 = vrot.slane %v32140_v15, %v32234_v62 }
 0xd61   :  { %v32216_v16 = vsel %vm17585_vm1, %v18157_v48, %v31968_v63 }
 0xd62   :  { %v18274_v27 = vpop.xlane.xlu0 %18273  ;;  %v32218_v7 = vpop.xlane.xlu1 %18489 }
 0xd63   :  { %33230 = vst [vmem:[#allocation50_spill] sm:$0xff] %v32218_v7  ;;  %v18346_v41 = vrot.slane %v18274_v27, %v32173_v51 }
 0xd65   :  { %v32223_v40 = vsel %vm17585_vm1, %v18346_v41, %v31986_v26 }
 0xd66   :  { %v18463_v60 = vpop.xlane.xlu0 %18462  ;;  %v32226_v21 = vpop.xlane.xlu1 %18678 }
 0xd67   :  { %33231 = vst [vmem:[#allocation51_spill] sm:$0xff] %v32226_v21  ;;  %v18535_v22 = vrot.slane %v18463_v60, %v32173_v51  ;;  %v18918_v60 = vrot.slane %v32149_v38, %v32234_v62  ;;  %v17601_v21 = vadd.s32 4294967240, %v31578_v34 }
 0xd69   :  { %v32231_v63 = vsel %vm17585_vm1, %v18535_v22, %v32004_v20 }
 0xd6a   :  { %v18652_v49 = vpop.xlane.xlu0 %18651  ;;  %v32236_v42 = vpop.xlane.xlu1 %18867 }
 0xd6b   :  { %33232 = vst [vmem:[#allocation52_spill] sm:$0xff] %v32236_v42  ;;  %v18724_v26 = vrot.slane %v18652_v49, %v32173_v51 }
 0xd6d   :  { %v18725_v48 = vsel %vm17585_vm1, %v18724_v26, %v32022_v30 }
 0xd6e   :  { %v18841_v27 = vpop.xlane.xlu0 %18840  ;;  %v32243_v41 = vpop.xlane.xlu1 %19056  ;;  %v32246_v20 = vsel %vm17592_vm2, %v18729_v23, %v18725_v48  ;;  %v19107_v23 = vrot.slane %v32158_v54, %v32234_v62 }
 0xd6f   :  { %33233 = vst [vmem:[#allocation53_spill] sm:$0xff] %v32243_v41  ;;  %v18913_v17 = vrot.slane %v18841_v27, %v32173_v51 }
 0xd71   :  { %v18914_v22 = vsel %vm17585_vm1, %v18913_v17, %v32040_v5 }
 0xd72   :  { %v19030_v49 = vpop.xlane.xlu0 %19029  ;;  %v32253_v15 = vpop.xlane.xlu1 %19245  ;;  %v32256_v30 = vsel %vm17592_vm2, %v18918_v60, %v18914_v22  ;;  %v19296_v60 = vrot.slane %v32168_v12, %v32234_v62  ;;  %v17635_v22 = vrot.slane %v32170_v57, %v32234_v62 }
 0xd73   :  { %33234 = vst [vmem:[#allocation54_spill] sm:$0xff] %v32253_v15  ;;  %v19102_v26 = vrot.slane %v19030_v49, %v32173_v51 }
 0xd75   :  { %v19103_v48 = vsel %vm17585_vm1, %v19102_v26, %v32056_v33 }
 0xd76   :  { %v19219_v27 = vpop.xlane.xlu0 %19218  ;;  %v17527_v41 = vpop.xlane.xlu1 %17526  ;;  %v32264_v38 = vsel %vm17592_vm2, %v19107_v23, %v19103_v48 }
 0xd77   :  { %v19291_v5 = vrot.slane %v19219_v27, %v32173_v51  ;;  %v17630_v17 = vrot.slane %v17527_v41, %v32173_v51 }
 0xd79   :  { %v19292_v54 = vsel %vm17585_vm1, %v19291_v5, %v32081_v14  ;;  %v17631_v33 = vsel %vm17585_vm1, %v17630_v17, %v32084_v36 }
 0xd7a   :  { %v17512_v49 = vpop.xlane.xlu0 %17511  ;;  %v32276_v26 = vpop.xlane.xlu1 %17730  ;;  %v32279_v23 = vsel %vm17592_vm2, %v17635_v22, %v17631_v33  ;;  %v32282_v41 = vsel %vm17592_vm2, %v19296_v60, %v19292_v54 }
 0xd7b   :  { %33235 = vst [vmem:[#allocation55_spill] sm:$0xff] %v32282_v41  ;;  %v17594_v41 = vadd.s32 4294967248, %v31578_v34 }
 0xd7e   :  { %v17716_v48 = vpop.xlane.xlu0 %17715  ;;  %v32284_v12 = vpop.xlane.xlu1 %17919 }
 0xd82   :  { %v17905_v27 = vpop.xlane.xlu0 %17904  ;;  %v32286_v57 = vpop.xlane.xlu1 %18108 }
 0xd86   :  { %v18094_v15 = vpop.xlane.xlu0 %18093  ;;  %v32288_v14 = vpop.xlane.xlu1 %18297 }
 0xd87   :  { %33236 = vst [vmem:[#allocation56_spill] sm:$0xff] %v32288_v14 }
 0xd8a   :  { %v18283_v5 = vpop.xlane.xlu0 %18282  ;;  %v32290_v36 = vpop.xlane.xlu1 %18486 }
 0xd8b   :  { %33237 = vst [vmem:[#allocation57_spill] sm:$0xff] %v32290_v36  ;;  %v32311_v36 = vsub.s32 %v17594_v41, %v30296_v25 }
 0xd8e   :  { %v32292_v17 = vpop.xlane.xlu0 %18471  ;;  %v32294_v42 = vpop.xlane.xlu1 %18675 }
 0xd8f   :  { %33238 = vst [vmem:[#allocation58_spill] sm:$0xff] %v32294_v42  ;;  %v32314_v42 = vsub.s32 %v17601_v21, %v30296_v25  ;;  %v17784_v21 = vrot.slane %v32095_v52, %v32234_v62 }
 0xd91   :  { %v17605_v34 = vrot.slane %v17512_v49, %v32314_v42  ;;  %v17785_v49 = vsel %vm17592_vm2, %v17784_v21, %v32200_v9 }
 0xd92   :  { %v32296_v22 = vpop.xlane.xlu0 %18660  ;;  %v32298_v60 = vpop.xlane.xlu1 %18864 }
 0xd93   :  { %33239 = vst [vmem:[#allocation59_spill] sm:$0xff] %v32298_v60  ;;  %v17591_v60 = vrot.slane %v32076_v46, %v32234_v62 }
 0xd96   :  { %v32300_v54 = vpop.xlane.xlu0 %18849  ;;  %v32302_v33 = vpop.xlane.xlu1 %19053 }
 0xd97   :  { %33240 = vst [vmem:[#allocation60_spill] sm:$0xff] %v32302_v33 }
 0xd9a   :  { %v32306_v53 = vpop.xlane.xlu0 %19038  ;;  %v32308_v7 = vpop.xlane.xlu1 %19242 }
 0xd9b   :  { %33241 = vst [vmem:[#allocation61_spill] sm:$0xff] %v32308_v7  ;;  %v17593_v7 = vsel %vm17592_vm2, %v17591_v60, %v32189_v44 }
 0xd9e   :  { %v17509_v0 = vpop.xlane.xlu0 %17508  ;;  %v32318_v33 = vpop.xlane.xlu1 %17535 }
 0xd9f   :  { %v17598_v19 = vrot.slane %v17509_v0, %v32311_v36  ;;  %v17794_v0 = vrot.slane %v17716_v48, %v32314_v42 }
 0xda1   :  { %v17600_v41 = vsel %vm17599_vm3, %v17598_v19, %v17593_v7  ;;  %v17973_v19 = vrot.slane %v32104_v43, %v32234_v62 }
 0xda2   :  { %v17713_v25 = vpop.xlane.xlu0 %17712  ;;  %v32327_v14 = vpop.xlane.xlu1 %17739  ;;  %v32330_v46 = vsel %vm17606_vm4, %v17605_v34, %v17600_v41 }
 0xda3   :  { %v17789_v11 = vrot.slane %v17713_v25, %v32311_v36  ;;  %v17983_v25 = vrot.slane %v17905_v27, %v32314_v42  ;;  %v17974_v48 = vsel %vm17592_vm2, %v17973_v19, %v32209_v58 }
 0xda5   :  { %v17790_v44 = vsel %vm17599_vm3, %v17789_v11, %v17785_v49  ;;  %v18162_v11 = vrot.slane %v32113_v29, %v32234_v62  ;;  %v18172_v49 = vrot.slane %v18094_v15, %v32314_v42 }
 0xda6   :  { %v17902_v7 = vpop.xlane.xlu0 %17901  ;;  %v32339_v52 = vpop.xlane.xlu1 %17928  ;;  %v32342_v60 = vsel %vm17606_vm4, %v17794_v0, %v17790_v44  ;;  %v18351_v44 = vrot.slane %v32122_v6, %v32234_v62 }
 0xda7   :  { %v17978_v34 = vrot.slane %v17902_v7, %v32311_v36  ;;  %v18163_v27 = vsel %vm17592_vm2, %v18162_v11, %v32216_v16 }
 0xda8   :  { %v18352_v15 = vsel %vm17592_vm2, %v18351_v44, %v32223_v40  ;;  %v18739_v44 = vrot.slane %v32296_v22, %v32314_v42 }
 0xda9   :  { %v17979_v9 = vsel %vm17599_vm3, %v17978_v34, %v17974_v48  ;;  %v18540_v48 = vrot.slane %v32131_v13, %v32234_v62 }
 0xdaa   :  { %v18091_v41 = vpop.xlane.xlu0 %18090  ;;  %v32351_v43 = vpop.xlane.xlu1 %18117  ;;  %v32354_v21 = vsel %vm17606_vm4, %v17983_v25, %v17979_v9  ;;  %v18361_v25 = vrot.slane %v18283_v5, %v32314_v42 }
 0xdab   :  { %v18167_v0 = vrot.slane %v18091_v41, %v32311_v36  ;;  %v18541_v5 = vsel %vm17592_vm2, %v18540_v48, %v32231_v63 }
 0xdad   :  { %v18168_v58 = vsel %vm17599_vm3, %v18167_v0, %v18163_v27  ;;  %v18550_v0 = vrot.slane %v32292_v17, %v32314_v42 }
 0xdae   :  { %v18280_v19 = vpop.xlane.xlu0 %18279  ;;  %v32363_v29 = vpop.xlane.xlu1 %18306  ;;  %v32366_v7 = vsel %vm17606_vm4, %v18172_v49, %v18168_v58 }
 0xdaf   :  { %v18356_v34 = vrot.slane %v18280_v19, %v32311_v36 }
 0xdb1   :  { %v18357_v16 = vsel %vm17599_vm3, %v18356_v34, %v18352_v15  ;;  %v18928_v15 = vrot.slane %v32300_v54, %v32314_v42  ;;  %v17803_v54 = vrot.slane %v31737_v56, %v31598_v1 }
 0xdb2   :  { %v18469_v9 = vpop.xlane.xlu0 %18468  ;;  %v32375_v6 = vpop.xlane.xlu1 %18495  ;;  %v32378_v11 = vsel %vm17606_vm4, %v18361_v25, %v18357_v16 }
 0xdb3   :  { %v18545_v41 = vrot.slane %v18469_v9, %v32311_v36 }
 0xdb5   :  { %v18546_v40 = vsel %vm17599_vm3, %v18545_v41, %v18541_v5  ;;  %v19117_v41 = vrot.slane %v32306_v53, %v32314_v42  ;;  %v18181_v5 = vrot.slane %v31766_v24, %v31598_v1  ;;  %v18370_v53 = vrot.slane %v31781_v59, %v31598_v1 }
 0xdb6   :  { %v18658_v49 = vpop.xlane.xlu0 %18657  ;;  %v32386_v27 = vpop.xlane.xlu1 %18684  ;;  %v32389_v13 = vsel %vm17606_vm4, %v18550_v0, %v18546_v40 }
 0xdb7   :  { %v18734_v58 = vrot.slane %v18658_v49, %v32311_v36 }
 0xdb9   :  { %v18735_v19 = vsel %vm17599_vm3, %v18734_v58, %v32246_v20 }
 0xdba   :  { %v18847_v17 = vpop.xlane.xlu0 %18846  ;;  %v32396_v34 = vpop.xlane.xlu1 %18873  ;;  %v32399_v63 = vsel %vm17606_vm4, %v18739_v44, %v18735_v19  ;;  %v17808_v19 = vrot.slane %v32078_v4, %v31880_v39  ;;  %v17818_v4 = vrot.slane %v32276_v26, %v32173_v51  ;;  %v17997_v26 = vrot.slane %v32097_v35, %v31880_v39 }
 0xdbb   :  { %v18923_v25 = vrot.slane %v18847_v17, %v32311_v36  ;;  %v17645_v17 = vrot.slane %v32318_v33, %v32314_v42  ;;  %v18007_v35 = vrot.slane %v32284_v12, %v32173_v51  ;;  %v18186_v12 = vrot.slane %v32106_v2, %v31880_v39 }
 0xdbc   :  { %v18196_v2 = vrot.slane %v32286_v57, %v32173_v51  ;;  %v18375_v57 = vrot.slane %v32115_v37, %v31880_v39 }
 0xdbd   :  { %v18924_v16 = vsel %vm17599_vm3, %v18923_v25, %v32256_v30  ;;  %v17992_v30 = vrot.slane %v31754_v18, %v31598_v1  ;;  %v18748_v18 = vrot.slane %v31808_v50, %v31598_v1  ;;  %v33242_v25 = vld [vmem:[#allocation36_spill] sm:$0xff] }
 0xdbe   :  { %v19036_v48 = vpop.xlane.xlu0 %19035  ;;  %v32406_v9 = vpop.xlane.xlu1 %19062  ;;  %v32409_v22 = vsel %vm17606_vm4, %v18928_v15, %v18924_v16  ;;  %v33243_v16 = vld [vmem:[#allocation38_spill] sm:$0xff] }
 0xdbf   :  { %v19112_v20 = vrot.slane %v19036_v48, %v32311_v36  ;;  %v17813_v48 = vrot.slane %v33243_v16, %v31877_v47 }
 0xdc1   :  { %v19113_v0 = vsel %vm17599_vm3, %v19112_v20, %v32264_v38  ;;  %v18559_v38 = vrot.slane %v31796_v8, %v31598_v1 }
 0xdc2   :  { %v17719_v40 = vpop.xlane.xlu0 %17718  ;;  %v17533_v49 = vpop.xlane.xlu1 %17532  ;;  %v32423_v58 = vsel %vm17606_vm4, %v19117_v41, %v19113_v0  ;;  %v17823_v0 = vrot.slane %v32180_v55, %v32234_v62  ;;  %v33244_v55 = vld [vmem:[#allocation37_spill] sm:$0xff] }
 0xdc3   :  { %v17799_v44 = vrot.slane %v17719_v40, %v31602_v32  ;;  %v17640_v56 = vrot.slane %v17533_v49, %v32311_v36 }
 0xdc5   :  { %v17804_v20 = vsel %vm17564_vm14, %v17803_v54, %v17799_v44  ;;  %v17641_v41 = vsel %vm17599_vm3, %v17640_v56, %v32279_v23  ;;  %v19315_v44 = vrot.slane %v33244_v55, %v31598_v1 }
 0xdc6   :  { %v17809_v40 = vsel %vm17571_vm15, %v17808_v19, %v17804_v20  ;;  %v17908_v33 = vpop.xlane.xlu0 %17907  ;;  %v17737_v49 = vpop.xlane.xlu1 %17736  ;;  %v17646_v15 = vsel %vm17606_vm4, %v17645_v17, %v17641_v41  ;;  %v18002_v17 = vrot.slane %v31905_v45, %v31877_v47 }
 0xdc7   :  { %v17814_v24 = vsel %vm17578_vm0, %v17813_v48, %v17809_v40  ;;  %v17988_v16 = vrot.slane %v17908_v33, %v31602_v32  ;;  %v17828_v54 = vrot.slane %v17737_v49, %v32311_v36  ;;  %v17647_v23 = vsel %vm15202_vm7, %v17646_v15, %v32330_v46 }
 0xdc8   :  { %v17819_v56 = vsel %vm17585_vm1, %v17818_v4, %v17814_v24  ;;  %v17649_v19 = vsel %vm159_vm5, %v17647_v23, 0.0  ;;  %v17833_v48 = vrot.slane %v32327_v14, %v32314_v42  ;;  %v18012_v15 = vrot.slane %v32191_v3, %v32234_v62 }
 0xdc9   :  { %v17993_v20 = vsel %vm17564_vm14, %v17992_v30, %v17988_v16  ;;  %v17824_v46 = vsel %vm17592_vm2, %v17823_v0, %v17819_v56  ;;  %17650 = vadd.xlane.f32.xlu0 %v17649_v19  ;;  %v18191_v3 = vrot.slane %v31929_v31, %v31877_v47  ;;  %v18022_v16 = vrot.slane %v32339_v52, %v32314_v42 }
 0xdca   :  { %v17998_v24 = vsel %vm17571_vm15, %v17997_v26, %v17993_v20  ;;  %v17829_v41 = vsel %vm17599_vm3, %v17828_v54, %v17824_v46  ;;  %v18097_v4 = vpop.xlane.xlu0 %18096  ;;  %v17926_v45 = vpop.xlane.xlu1 %17925  ;;  %v18201_v31 = vrot.slane %v32202_v61, %v32234_v62  ;;  %v18380_v61 = vrot.slane %v31947_v28, %v31877_v47 }
 0xdcb   :  { %v18003_v40 = vsel %vm17578_vm0, %v18002_v17, %v17998_v24  ;;  %v18177_v14 = vrot.slane %v18097_v4, %v31602_v32  ;;  %v18017_v30 = vrot.slane %v17926_v45, %v32311_v36  ;;  %v17834_v0 = vsel %vm17606_vm4, %v17833_v48, %v17829_v41  ;;  %v33245_v4 = vld [vmem:[#allocation49_spill] sm:$0xff]  ;;  %v33246_v45 = vld [vmem:[#allocation56_spill] sm:$0xff] }
 0xdcc   :  { %v18008_v33 = vsel %vm17585_vm1, %v18007_v35, %v18003_v40  ;;  %v17835_v49 = vsel %vm15202_vm7, %v17834_v0, %v32342_v60  ;;  %v18211_v35 = vrot.slane %v32351_v43, %v32314_v42  ;;  %v18390_v37 = vrot.slane %v33245_v4, %v32234_v62 }
 0xdcd   :  { %v18182_v54 = vsel %vm17564_vm14, %v18181_v5, %v18177_v14  ;;  %v18013_v23 = vsel %vm17592_vm2, %v18012_v15, %v18008_v33  ;;  %v17837_v26 = vsel %vm159_vm5, %v17835_v49, 0.0  ;;  %v18385_v40 = vrot.slane %v33246_v45, %v32173_v51  ;;  %v33248_v49 = vld [vmem:[#allocation44_spill] sm:$0xff] }
 0xdce   :  { %v18187_v56 = vsel %vm17571_vm15, %v18186_v12, %v18182_v54  ;;  %v18018_v19 = vsel %vm17599_vm3, %v18017_v30, %v18013_v23  ;;  %v18286_v60 = vpop.xlane.xlu0 %18285  ;;  %17838 = vadd.xlane.f32.xlu1 %v17837_v26  ;;  %v18115_v17 = vpop.xlane.xlu1 %18114  ;;  %v33247_v12 = vld [vmem:[#allocation39_spill] sm:$0xff]  ;;  %v18400_v26 = vrot.slane %v32363_v29, %v32314_v42 }
 0xdcf   :  { %v18192_v52 = vsel %vm17578_vm0, %v18191_v3, %v18187_v56  ;;  %v18366_v5 = vrot.slane %v18286_v60, %v31602_v32  ;;  %v18206_v48 = vrot.slane %v18115_v17, %v32311_v36  ;;  %v18023_v20 = vsel %vm17606_vm4, %v18022_v16, %v18018_v19  ;;  %v33249_v19 = vld [vmem:[#allocation50_spill] sm:$0xff]  ;;  %v33250_v17 = vld [vmem:[#allocation57_spill] sm:$0xff] }
 0xdd0   :  { %v18197_v46 = vsel %vm17585_vm1, %v18196_v2, %v18192_v52  ;;  %v18024_v15 = vsel %vm15202_vm7, %v18023_v20, %v32354_v21  ;;  %v18569_v33 = vrot.slane %v33247_v12, %v31877_v47  ;;  %v18564_v16 = vrot.slane %v33248_v49, %v31880_v39 }
 0xdd1   :  { %v18371_v24 = vsel %vm17564_vm14, %v18370_v53, %v18366_v5  ;;  %v18202_v41 = vsel %vm17592_vm2, %v18201_v31, %v18197_v46  ;;  %v18026_v28 = vsel %vm159_vm5, %v18024_v15, 0.0  ;;  %v18579_v60 = vrot.slane %v33249_v19, %v32234_v62  ;;  %v33252_v15 = vld [vmem:[#allocation45_spill] sm:$0xff]  ;;  %v33258_v19 = vld [vmem:[#allocation52_spill] sm:$0xff] }
 0xdd2   :  { %v18376_v21 = vsel %vm17571_vm15, %v18375_v57, %v18371_v24  ;;  %v18207_v14 = vsel %vm17599_vm3, %v18206_v48, %v18202_v41  ;;  %v18475_v43 = vpop.xlane.xlu0 %18474  ;;  %18027 = vadd.xlane.f32.xlu0 %v18026_v28  ;;  %v18304_v30 = vpop.xlane.xlu1 %18303  ;;  %v18574_v52 = vrot.slane %v33250_v17, %v32173_v51  ;;  %v33251_v57 = vld [vmem:[#allocation40_spill] sm:$0xff]  ;;  %v18589_v28 = vrot.slane %v32375_v6, %v32314_v42  ;;  %v33259_v17 = vld [vmem:[#allocation59_spill] sm:$0xff] }
 0xdd3   :  { %v18381_v59 = vsel %vm17578_vm0, %v18380_v61, %v18376_v21  ;;  %v18555_v53 = vrot.slane %v18475_v43, %v31602_v32  ;;  %v18395_v0 = vrot.slane %v18304_v30, %v32311_v36  ;;  %v18212_v3 = vsel %vm17606_vm4, %v18211_v35, %v18207_v14  ;;  %v33254_v14 = vld [vmem:[#allocation58_spill] sm:$0xff] }
 0xdd4   :  { %v18386_v54 = vsel %vm17585_vm1, %v18385_v40, %v18381_v59  ;;  %v18213_v23 = vsel %vm15202_vm7, %v18212_v3, %v32366_v7  ;;  %v18758_v46 = vrot.slane %v33251_v57, %v31877_v47  ;;  %v18753_v35 = vrot.slane %v33252_v15, %v31880_v39  ;;  %v33253_v40 = vld [vmem:[#allocation51_spill] sm:$0xff]  ;;  %v33255_v3 = vld [vmem:[#allocation41_spill] sm:$0xff] }
 0xdd5   :  { %v18560_v31 = vsel %vm17564_vm14, %v18559_v38, %v18555_v53  ;;  %v18391_v2 = vsel %vm17592_vm2, %v18390_v37, %v18386_v54  ;;  %v18215_v56 = vsel %vm159_vm5, %v18213_v23, 0.0  ;;  %v18768_v21 = vrot.slane %v33253_v40, %v32234_v62  ;;  %v33264_v40 = vld [vmem:[#allocation60_spill] sm:$0xff] }
 0xdd6   :  { %v18565_v7 = vsel %vm17571_vm15, %v18564_v16, %v18560_v31  ;;  %v18396_v5 = vsel %vm17599_vm3, %v18395_v0, %v18391_v2  ;;  %v18664_v29 = vpop.xlane.xlu0 %18663  ;;  %18216 = vadd.xlane.f32.xlu1 %v18215_v56  ;;  %v18493_v48 = vpop.xlane.xlu1 %18492  ;;  %v18763_v43 = vrot.slane %v33254_v14, %v32173_v51  ;;  %v18947_v12 = vrot.slane %v33255_v3, %v31877_v47 }
 0xdd7   :  { %v18570_v8 = vsel %vm17578_vm0, %v18569_v33, %v18565_v7  ;;  %v18744_v38 = vrot.slane %v18664_v29, %v31602_v32  ;;  %v18584_v20 = vrot.slane %v18493_v48, %v32311_v36  ;;  %v18401_v61 = vsel %vm17606_vm4, %v18400_v26, %v18396_v5  ;;  %v33256_v33 = vld [vmem:[#allocation46_spill] sm:$0xff] }
 0xdd8   :  { %v18575_v24 = vsel %vm17585_vm1, %v18574_v52, %v18570_v8  ;;  %v18402_v41 = vsel %vm15202_vm7, %v18401_v61, %v32378_v11  ;;  %v18942_v49 = vrot.slane %v33256_v33, %v31880_v39  ;;  %v18778_v23 = vrot.slane %v32386_v27, %v32314_v42  ;;  %v33261_v61 = vld [vmem:[#allocation47_spill] sm:$0xff] }
 0xdd9   :  { %v18749_v4 = vsel %vm17564_vm14, %v18748_v18, %v18744_v38  ;;  %v18580_v37 = vsel %vm17592_vm2, %v18579_v60, %v18575_v24  ;;  %v18404_v45 = vsel %vm159_vm5, %v18402_v41, 0.0  ;;  %v33257_v26 = vrot.slane %v31820_v10, %v31598_v1  ;;  %v33260_v38 = vld [vmem:[#allocation42_spill] sm:$0xff] }
 0xdda   :  { %v18754_v11 = vsel %vm17571_vm15, %v18753_v35, %v18749_v4  ;;  %v18585_v30 = vsel %vm17599_vm3, %v18584_v20, %v18580_v37  ;;  %v18853_v6 = vpop.xlane.xlu0 %18852  ;;  %18405 = vadd.xlane.f32.xlu0 %v18404_v45  ;;  %v18682_v59 = vpop.xlane.xlu1 %18681  ;;  %v18957_v60 = vrot.slane %v33258_v19, %v32234_v62  ;;  %v18952_v52 = vrot.slane %v33259_v17, %v32173_v51  ;;  %v33263_v37 = vld [vmem:[#allocation53_spill] sm:$0xff] }
 0xddb   :  { %v18759_v50 = vsel %vm17578_vm0, %v18758_v46, %v18754_v11  ;;  %v18933_v18 = vrot.slane %v18853_v6, %v31602_v32  ;;  %v18773_v53 = vrot.slane %v18682_v59, %v32311_v36  ;;  %v18590_v0 = vsel %vm17606_vm4, %v18589_v28, %v18585_v30  ;;  %v33265_v59 = vld [vmem:[#allocation43_spill] sm:$0xff] }
 0xddc   :  { %v18764_v16 = vsel %vm17585_vm1, %v18763_v43, %v18759_v50  ;;  %v18591_v54 = vsel %vm15202_vm7, %v18590_v0, %v32389_v13  ;;  %v19136_v20 = vrot.slane %v33260_v38, %v31877_v47  ;;  %v19131_v57 = vrot.slane %v33261_v61, %v31880_v39  ;;  %v17652_v38 = vld [vmem:[#allocation10] ss:$8 sm:$0x3] }
 0xddd   :  { %v18938_v31 = vsel %vm17564_vm14, %v33257_v26, %v18933_v18  ;;  %v18769_v2 = vsel %vm17592_vm2, %v18768_v21, %v18764_v16  ;;  %v18593_v56 = vsel %vm159_vm5, %v18591_v54, 0.0  ;;  %v18967_v35 = vrot.slane %v32396_v34, %v32314_v42  ;;  %v33266_v18 = vld [vmem:[#allocation48_spill] sm:$0xff]  ;;  %v33271_v61 = vld [vmem:[#allocation35_spill] sm:$0xff] }
 0xdde   :  { %v18943_v13 = vsel %vm17571_vm15, %v18942_v49, %v18938_v31  ;;  %v18774_v7 = vsel %vm17599_vm3, %v18773_v53, %v18769_v2  ;;  %v19042_v27 = vpop.xlane.xlu0 %19041  ;;  %18594 = vadd.xlane.f32.xlu1 %v18593_v56  ;;  %v18871_v5 = vpop.xlane.xlu1 %18870  ;;  %v33262_v24 = vrot.slane %v33242_v25, %v31598_v1  ;;  %v19146_v45 = vrot.slane %v33263_v37, %v32234_v62  ;;  %v33267_v49 = vld [vmem:[#allocation61_spill] sm:$0xff]  ;;  %v18408_v37 = vld [vmem:[#allocation10 + $0x4] ss:$8 sm:$0x3] }
 0xddf   :  { %v18948_v10 = vsel %vm17578_vm0, %v18947_v12, %v18943_v13  ;;  %v19122_v29 = vrot.slane %v19042_v27, %v31602_v32  ;;  %v18962_v48 = vrot.slane %v18871_v5, %v32311_v36  ;;  %v18779_v8 = vsel %vm17606_vm4, %v18778_v23, %v18774_v7  ;;  %v33269_v13 = vld [vmem:[#allocation55_spill] sm:$0xff] }
 0xde0   :  { %v18953_v46 = vsel %vm17585_vm1, %v18952_v52, %v18948_v10  ;;  %v18780_v15 = vsel %vm15202_vm7, %v18779_v8, %v32399_v63  ;;  %v19141_v21 = vrot.slane %v33264_v40, %v32173_v51  ;;  %v19325_v50 = vrot.slane %v33265_v59, %v31877_v47 }
 0xde1   :  { %v19127_v41 = vsel %vm17564_vm14, %v33262_v24, %v19122_v29  ;;  %v18958_v28 = vsel %vm17592_vm2, %v18957_v60, %v18953_v46  ;;  %v18782_v4 = vsel %vm159_vm5, %v18780_v15, 0.0  ;;  %v19320_v53 = vrot.slane %v33266_v18, %v31880_v39  ;;  %v17841_v29 = vld [vmem:[#allocation10 + $0x1] ss:$8 sm:$0x3] }
 0xde2   :  { %v19132_v63 = vsel %vm17571_vm15, %v19131_v57, %v19127_v41  ;;  %v18963_v14 = vsel %vm17599_vm3, %v18962_v48, %v18958_v28  ;;  %v19231_v34 = vpop.xlane.xlu0 %19230  ;;  %18783 = vadd.xlane.f32.xlu0 %v18782_v4  ;;  %v19060_v43 = vpop.xlane.xlu1 %19059  ;;  %v19156_v12 = vrot.slane %v32406_v9, %v32314_v42  ;;  %v19330_v39 = vrot.slane %v33267_v49, %v32173_v51  ;;  %v33268_v9 = vld [vmem:[#allocation54_spill] sm:$0xff]  ;;  %v33270_v48 = vld [vmem:[#allocation33_spill] sm:$0xff]  ;;  %v18786_v18 = vld [vmem:[#allocation10 + $0x6] ss:$8 sm:$0x3] }
 0xde3   :  { %v19137_v25 = vsel %vm17578_vm0, %v19136_v20, %v19132_v63  ;;  %v19311_v11 = vrot.slane %v19231_v34, %v31602_v32  ;;  %v19151_v30 = vrot.slane %v19060_v43, %v32311_v36  ;;  %v18968_v6 = vsel %vm17606_vm4, %v18967_v35, %v18963_v14  ;;  %v18030_v20 = vld [vmem:[#allocation10 + $0x2] ss:$8 sm:$0x3]  ;;  %v18219_v35 = vld [vmem:[#allocation10 + $0x3] ss:$8 sm:$0x3] }
 0xde4   :  { %v19142_v0 = vsel %vm17585_vm1, %v19141_v21, %v19137_v25  ;;  %v18969_v3 = vsel %vm15202_vm7, %v18968_v6, %v32409_v22  ;;  %v19335_v26 = vrot.slane %v33268_v9, %v32234_v62  ;;  %v32666_v8 = vsub.s32 1, %v33270_v48  ;;  %v18597_v34 = vld [vmem:[#allocation10 + $0x5] ss:$8 sm:$0x3] }
 0xde5   :  { %v19316_v32 = vsel %vm17564_vm14, %v19315_v44, %v19311_v11  ;;  %v19147_v33 = vsel %vm17592_vm2, %v19146_v45, %v19142_v0  ;;  %v18971_v47 = vsel %vm159_vm5, %v18969_v3, 0.0  ;;  %v17846_v57 = vrot.slane %v17841_v29, %v33271_v61  ;;  %v18975_v49 = vld [vmem:[#allocation10 + $0x7] ss:$8 sm:$0x3] }
 0xde6   :  { %v19321_v16 = vsel %vm17571_vm15, %v19320_v53, %v19316_v32  ;;  %v19152_v54 = vsel %vm17599_vm3, %v19151_v30, %v19147_v33  ;;  %v19225_v22 = vpop.xlane.xlu0 %19224  ;;  %18972 = vadd.xlane.f32.xlu1 %v18971_v47  ;;  %v19249_v23 = vpop.xlane.xlu1 %19248  ;;  %v17850_v46 = vrot.slane %v17841_v29, %v32666_v8  ;;  %v17657_v24 = vrot.slane %v17652_v38, %v33271_v61 }
 0xde7   :  { %v19326_v1 = vsel %vm17578_vm0, %v19325_v50, %v19321_v16  ;;  %v19157_v55 = vsel %vm17606_vm4, %v19156_v12, %v19152_v54  ;;  %v19301_v44 = vrot.slane %v19225_v22, %v32311_v36  ;;  %v19340_v51 = vrot.slane %v19249_v23, %v32311_v36 }
 0xde8   :  { %v19331_v31 = vsel %vm17585_vm1, %v19330_v39, %v19326_v1  ;;  %v19158_v2 = vsel %vm15202_vm7, %v19157_v55, %v32423_v58  ;;  %v17661_v41 = vrot.slane %v17652_v38, %v32666_v8  ;;  %v18035_v28 = vrot.slane %v18030_v20, %v33271_v61  ;;  %v19164_v1 = vld [vmem:[#allocation10 + $0x10] ss:$8 sm:$0x3] }
 0xde9   :  { %v19336_v56 = vsel %vm17592_vm2, %v19335_v26, %v19331_v31  ;;  %v19160_v19 = vsel %vm159_vm5, %v19158_v2, 0.0  ;;  %v19302_v7 = vsel %vm17599_vm3, %v19301_v44, %v33269_v13  ;;  %v18039_v4 = vrot.slane %v18030_v20, %v32666_v8 }
 0xdea   :  { %v19228_v60 = vpop.xlane.xlu0 %19227  ;;  %19161 = vadd.xlane.f32.xlu0 %v19160_v19  ;;  %v19252_v62 = vpop.xlane.xlu1 %19251  ;;  %v19341_v27 = vsel %vm17599_vm3, %v19340_v51, %v19336_v56  ;;  %v18224_v63 = vrot.slane %v18219_v35, %v33271_v61  ;;  %v18228_v14 = vrot.slane %v18219_v35, %v32666_v8  ;;  %v18413_v25 = vrot.slane %v18408_v37, %v33271_v61 }
 0xdeb   :  { %v19306_v17 = vrot.slane %v19228_v60, %v32314_v42  ;;  %v19345_v52 = vrot.slane %v19252_v62, %v32314_v42  ;;  %v18417_v11 = vrot.slane %v18408_v37, %v32666_v8  ;;  %v18602_v0 = vrot.slane %v18597_v34, %v33271_v61 }
 0xdec   :  { %v18606_v3 = vrot.slane %v18597_v34, %v32666_v8  ;;  %v18791_v16 = vrot.slane %v18786_v18, %v33271_v61  ;;  %v18795_v54 = vrot.slane %v18786_v18, %v32666_v8  ;;  %v18980_v44 = vrot.slane %v18975_v49, %v33271_v61 }
 0xded   :  { %v19307_v36 = vsel %vm17606_vm4, %v19306_v17, %v19302_v7  ;;  %v19346_v58 = vsel %vm17606_vm4, %v19345_v52, %v19341_v27  ;;  %v18984_v31 = vrot.slane %v18975_v49, %v32666_v8  ;;  %v19169_v62 = vrot.slane %v19164_v1, %v33271_v61  ;;  %v33272_v49 = vld [vmem:[#allocation34_spill] sm:$0xff] }
 0xdee   :  { %v19347_v5 = vsel %vm15202_vm7, %v19346_v58, %v19307_v36  ;;  %v19173_v17 = vrot.slane %v19164_v1, %v32666_v8  ;;  %v19353_v36 = vld [vmem:[#allocation10 + $0x11] ss:$8 sm:$0x3]  ;;  %vm19403_vm7 = vcmask 11266  }
 0xdef   :  { %v19349_v10 = vsel %vm159_vm5, %v19347_v5, 0.0  ;;  %v19358_v38 = vrot.slane %v19353_v36, %v33271_v61  ;;  %vm19369_vm5 = vcmask 1041408  }
 0xdf0   :  { %19350 = vadd.xlane.f32.xlu1 %v19349_v10  ;;  %vm19404_vm8 = vmor %vm19403_vm7, %vm19369_vm5 }
 0xe56   :  { %v17651_v42 = vpop.xlane.xlu0 %17650 }
 0xe57   :  { %v17664_v30 = vmul.f32 %v17657_v24, %v17651_v42  ;;  %v17665_v6 = vmul.f32 %v17661_v41, %v17651_v42  ;;  %v19362_v42 = vrot.slane %v19353_v36, %v32666_v8 }
 0xe5b   :  { %v17839_v15 = vpop.xlane.xlu1 %17838 }
 0xe5c   :  { %v17853_v40 = vmul.f32 %v17846_v57, %v17839_v15  ;;  %v17854_v21 = vmul.f32 %v17850_v46, %v17839_v15 }
 0xe5e   :  { %v17855_v12 = vadd.f32 %v17853_v40, %v17664_v30  ;;  %v17856_v32 = vadd.f32 %v17854_v21, %v17665_v6 }
 0xe5f   :  { %v18028_v45 = vpop.xlane.xlu0 %18027 }
 0xe60   :  { %v18042_v59 = vmul.f32 %v18035_v28, %v18028_v45  ;;  %v18043_v50 = vmul.f32 %v18039_v4, %v18028_v45 }
 0xe62   :  { %v18044_v22 = vadd.f32 %v18042_v59, %v17855_v12  ;;  %v18045_v23 = vadd.f32 %v18043_v50, %v17856_v32 }
 0xe63   :  { %v18217_v43 = vpop.xlane.xlu1 %18216 }
 0xe64   :  { %v18231_v33 = vmul.f32 %v18224_v63, %v18217_v43  ;;  %v18232_v47 = vmul.f32 %v18228_v14, %v18217_v43 }
 0xe66   :  { %v18233_v51 = vadd.f32 %v18231_v33, %v18044_v22  ;;  %v18234_v2 = vadd.f32 %v18232_v47, %v18045_v23 }
 0xe67   :  { %v18406_v53 = vpop.xlane.xlu0 %18405 }
 0xe68   :  { %v18420_v9 = vmul.f32 %v18413_v25, %v18406_v53  ;;  %v18421_v26 = vmul.f32 %v18417_v11, %v18406_v53 }
 0xe6a   :  { %v18422_v52 = vadd.f32 %v18420_v9, %v18233_v51  ;;  %v18423_v13 = vadd.f32 %v18421_v26, %v18234_v2 }
 0xe6b   :  { %v18595_v39 = vpop.xlane.xlu1 %18594 }
 0xe6c   :  { %v18609_v56 = vmul.f32 %v18602_v0, %v18595_v39  ;;  %v18610_v19 = vmul.f32 %v18606_v3, %v18595_v39 }
 0xe6e   :  { %v18611_v5 = vadd.f32 %v18609_v56, %v18422_v52  ;;  %v18612_v10 = vadd.f32 %v18610_v19, %v18423_v13 }
 0xe6f   :  { %v18784_v55 = vpop.xlane.xlu0 %18783 }
 0xe70   :  { %v18798_v7 = vmul.f32 %v18791_v16, %v18784_v55  ;;  %v18799_v27 = vmul.f32 %v18795_v54, %v18784_v55 }
 0xe72   :  { %v18800_v20 = vadd.f32 %v18798_v7, %v18611_v5  ;;  %v18801_v57 = vadd.f32 %v18799_v27, %v18612_v10 }
 0xe73   :  { %v18973_v60 = vpop.xlane.xlu1 %18972 }
 0xe74   :  { %v18987_v29 = vmul.f32 %v18980_v44, %v18973_v60  ;;  %v18988_v48 = vmul.f32 %v18984_v31, %v18973_v60 }
 0xe76   :  { %v18989_v35 = vadd.f32 %v18987_v29, %v18800_v20  ;;  %v18990_v24 = vadd.f32 %v18988_v48, %v18801_v57 }
 0xe77   :  { %v19162_v58 = vpop.xlane.xlu0 %19161 }
 0xe78   :  { %v19176_v46 = vmul.f32 %v19169_v62, %v19162_v58  ;;  %v19177_v15 = vmul.f32 %v19173_v17, %v19162_v58 }
 0xe7a   :  { %v19178_v28 = vadd.f32 %v19176_v46, %v18989_v35  ;;  %v19179_v4 = vadd.f32 %v19177_v15, %v18990_v24 }
 0xe7d   :  { %v19351_v41 = vpop.xlane.xlu1 %19350 }
 0xe7e   :  { %v19365_v37 = vmul.f32 %v19358_v38, %v19351_v41  ;;  %v19366_v45 = vmul.f32 %v19362_v42, %v19351_v41 }
 0xe80   :  { %v19367_v40 = vadd.f32 %v19365_v37, %v19178_v28  ;;  %v19368_v21 = vadd.f32 %v19366_v45, %v19179_v4 }
 0xe82   :  { %v19370_v63 = vsel %vm19369_vm5, %v19367_v40, -inf  ;;  %v19372_v61 = vsel %vm19371_vm6, %v19368_v21, -inf }
 0xe83   :  { %v19373_v8 = vmax.f32 %v19370_v63, %v19372_v61 }
 0xe85   :  { %19374 = vmax.xlane.f32.xlu0 %v19373_v8 }
 0xf12   :  { %v19375_v14 = vpop.xlane.xlu0 %19374 }
 0xf13   :  { %v19376_v34 = vsub.f32 %v19367_v40, %v19375_v14  ;;  %v19377_v43 = vsub.f32 %v19368_v21, %v19375_v14 }
 0xf15   :  { %v19378_v25 = vmul.f32 1.442695, %v19376_v34  ;;  %v19380_v11 = vmul.f32 1.442695, %v19377_v43 }
 0xf17   :  { %26081 = vpow2.f32 %v19378_v25 }
 0xf18   :  { %26083 = vpow2.f32 %v19380_v11 }
 0xf21   :  { %v26082_v30 = vpop.eup %26081 }
 0xf22   :  { %v26084_v6 = vpop.eup %26083  ;;  %v19382_v59 = vsel %vm19369_vm5, %v26082_v30, 0.0 }
 0xf23   :  { %v19383_v50 = vsel %vm19371_vm6, %v26084_v6, 0.0 }
 0xf24   :  { %v19384_v18 = vadd.f32 %v19383_v50, %v19382_v59 }
 0xf26   :  { %19385 = vadd.xlane.f32.xlu1 %v19384_v18 }
 0xfb3   :  { %v19386_v53 = vpop.xlane.xlu1 %19385 }
 0xfb4   :  { %26085 = vlog2.f32 %v19386_v53 }
 0xfbe   :  { %v26086_v0 = vpop.eup %26085 }
 0xfbf   :  { %v19388_v3 = vmul.f32 0.6931472, %v26086_v0 }
 0xfc1   :  { %v19389_v12 = vadd.f32 %v19388_v3, %v19375_v14 }
 0xfc3   :  { %v19390_v32 = vsub.f32 %v19367_v40, %v19389_v12  ;;  %v19391_v33 = vsub.f32 %v19368_v21, %v19389_v12 }
 0xfc5   :  { %v19394_v47 = vcombine.low %v19390_v32, %v19391_v33 }
 0xfc7   :  { %v19401_v39 = vrot.slane %v19394_v47, %v33272_v49 }
 0xfc9   :  { %19405 = vst.msk [vmem:[#allocation11] sm:$0xf] %vm19404_vm8, %v19401_v39 }
 0xfca   :  { %26179 = shalt.err (!%p26176_p0)
}
 0xfcb   :  { %s26180_s20 = scalar_lea.hbm %s32713_s7, 64 }
 0xfcc   :  { %p26181_p1 = scmp.ne.s32.totalorder %s32713_s7, %s26180_s20  ;;  %p26184_p2 = scmp.lt.u32.totalorder %s26180_s20, %s32713_s7 }
 0xfce   :  { %p26186_p3 = pnand %p26184_p2, %p26181_p1 }
 0xfd0   :  { %26189 = shalt.err (!%p26186_p3)
}
 0xfd1   :  { %19415 = dma.vmem_to_hbm [thread:$0]  %s19413_s16, 64, %s32713_s7, [#allocation7]  }
 0xfd2   :  { %26194 = dma.done.wait [#allocation7], 64  }
 0xfd3   :  { %26195 = vsyncadd [#allocation7], 4294967232 }
 0xfd4   :  { %19419 = vsyncpa [#allocation6], 1 }
 0xfd5   :  { %19420 = vsyncpa [#allocation9], 1 }
 0xfd6   :  { %19421 = vsyncpa [#allocation7], 1 }

</bundles_post_ra>
